<compile_context>
chip_gen: v6e
topology: v6e:2x2x1
jax: 0.10.0
libtpu: 0.0.40
codegen_flags: <defaults>
</compile_context>

<pallas_src>
import functools

import jax
import jax.numpy as jnp
from jax import lax
from jax.experimental import pallas as pl
from jax.experimental.pallas import tpu as pltpu

_EPS = 1e-12   # clamp for the weight-norm denominator (documented divergence from
               # the reference only when ||v|| -> 0, where torch would emit inf/nan)
_IPAD = 12     # padded i' extent of the pooled conv1 grid (valid 0..6); padding lets
               # conv2 read i' in [qi, qi+8) with aligned 8*B-row slabs.


# ----------------------------------------------------------------------------
# The single fused Pallas kernel
# ----------------------------------------------------------------------------
def _wn_scale(v, g_row):
    """Weight-norm scale g/||v|| per output column (f32, EUP rsqrt)."""
    ssq = jnp.sum(v * v, axis=0, keepdims=True)
    return g_row * lax.rsqrt(jnp.maximum(ssq, _EPS))


def _fused_kernel(p1_ref, w1_ref, w2_ref, wf1_ref, wf2_ref, wf3_ref, gb_ref,
                  o_ref, *, batch):
    """conv1+pool -> conv2+pool -> fc1 -> fc2 -> fc3, all weight-normed, in VMEM.

    p1_ref : (4*7*4*_IPAD*B, 75) bf16  conv1 im2col, rows (q, j', pi, pj, i', b)
    w1_ref : (75, 6)   f32  conv1 v (feature order ci*25+dy*5+dx)
    w2_ref : (750, 80) f32  conv2 v, block-diagonal over the oj pool column
    wf1_ref: (400,120) f32  fc1 v, rows permuted to (oi*80 + oj*16 + c)
    wf2_ref: (120, 84) f32  fc2 v (transposed)
    wf3_ref: (84, 10)  f32  fc3 v (transposed)
    gb_ref : (10, 128) f32  packed gains/biases (g1,b1,g2t,b2t,g3,b3,g4,b4,g5,b5)
    o_ref  : (B, 10)   f32  logits
    """
    B = batch

    # ---- conv1 + bias + ReLU + 2x2 maxpool (4 pool phases batched in rows) ---
    v1 = w1_ref[...]                                                  # (75, 6)
    w1n = (v1 * _wn_scale(v1, gb_ref[0:1, 0:6])).astype(jnp.bfloat16)
    y1 = jnp.dot(p1_ref[...], w1n, preferred_element_type=jnp.float32)
    rows_q = y1.shape[0] // 4
    m1 = jnp.max(y1.reshape(4, rows_q, 6), axis=0)                    # pool max
    a1 = jnp.maximum(m1 + gb_ref[1:2, 0:6], 0.0)                      # bias + ReLU

    # repack rows (j', pi, pj, i'*B+b) -> a1ps[pi, pj, i'*B+b, j'*6+c]
    blk = rows_q // 7                                                 # 4*_IPAD*B
    a1ps = jnp.concatenate([a1[j * blk:(j + 1) * blk, :] for j in range(7)],
                           axis=1)                                    # (blk, 42)
    a1ps = a1ps.reshape(2, 2, blk // 4, 42)

    # ---- conv2: in-kernel patch slabs (contiguous static slices) ------------
    phase_rows = []
    for p0 in range(2):
        for p1 in range(2):
            slabs = []
            for dy in range(5):
                ri, qi = (p0 + dy) & 1, (p0 + dy) >> 1
                for dx in range(5):
                    rj, qj = (p1 + dx) & 1, (p1 + dx) >> 1
                    slabs.append(a1ps[ri, rj,
                                      B * qi:B * qi + 8 * B,
                                      6 * qj:6 * qj + 30])            # (8B, 30)
            phase_rows.append(jnp.concatenate(slabs, axis=1))         # (8B, 750)
    lhs2 = jnp.concatenate(phase_rows, axis=0).astype(jnp.bfloat16)   # (32B, 750)

    v2 = w2_ref[...]                                                  # (750, 80)
    w2n = (v2 * _wn_scale(v2, gb_ref[2:3, 0:80])).astype(jnp.bfloat16)
    y2 = jnp.dot(lhs2, w2n, preferred_element_type=jnp.float32)       # (32B, 80)
    m2 = jnp.max(y2.reshape(4, 8 * B, 80), axis=0)                    # pool max
    a2 = jnp.maximum(m2 + gb_ref[3:4, 0:80], 0.0)                     # (8B, 80)

    # ---- flatten to (B, 400) in torch NCHW order (order folded into fc1 v) --
    flat = jnp.concatenate([a2[B * oi:B * (oi + 1), :] for oi in range(5)],
                           axis=1)                                    # (B, 400)

    # ---- fc1 / fc2 / fc3 (weight-normed, f32 matmuls) ------------------------
    v3 = wf1_ref[...]
    h1 = jnp.maximum(
        jnp.dot(flat, v3 * _wn_scale(v3, gb_ref[4:5, 0:120]),
                preferred_element_type=jnp.float32) + gb_ref[5:6, 0:120], 0.0)
    v4 = wf2_ref[...]
    h2 = jnp.maximum(
        jnp.dot(h1, v4 * _wn_scale(v4, gb_ref[6:7, 0:84]),
                preferred_element_type=jnp.float32) + gb_ref[7:8, 0:84], 0.0)
    v5 = wf3_ref[...]
    o_ref[...] = (jnp.dot(h2, v5 * _wn_scale(v5, gb_ref[8:9, 0:10]),
                          preferred_element_type=jnp.float32)
                  + gb_ref[9:10, 0:10])


# ----------------------------------------------------------------------------
# XLA glue on the kernel INPUT: conv1 im2col in parity-split row order
# ----------------------------------------------------------------------------
def _build_conv1_lhs(x_nhwc):
    """Rows ordered (q0, q1, j', pi, pj, i'[pad to _IPAD], b); lanes (ci,dy,dx)."""
    B = x_nhwc.shape[0]
    taps = [x_nhwc[:, dy:dy + 28, dx:dx + 28, :]
            for dy in range(5) for dx in range(5)]                    # 25x (B,28,28,3)
    t = jnp.stack(taps, axis=0)                                       # (25,B,28,28,3)
    t = t.reshape(5, 5, B, 7, 2, 2, 7, 2, 2, 3)     # [dy,dx,b,i',pi,q0,j',pj,q1,ci]
    t = t.transpose(5, 8, 6, 4, 7, 3, 2, 9, 0, 1)   # [q0,q1,j',pi,pj,i',b,ci,dy,dx]
    t = jnp.pad(t, [(0, 0)] * 5 + [(0, _IPAD - 7)] + [(0, 0)] * 4)
    return t.reshape(4 * 7 * 4 * _IPAD * B, 75).astype(jnp.bfloat16)


# ----------------------------------------------------------------------------
# One-time weight prepacking (pure layout transforms, semantics-preserving)
# ----------------------------------------------------------------------------
def prepare_params(p):
    f32 = jnp.float32
    w1 = p["c1v"].reshape(6, 75).T.astype(f32)                        # (75, 6)

    # conv2 block-diagonal weight: row = tap*30 + jloc*6 + ci, col = oj*16 + co
    w2m = p["c2v"].transpose(2, 3, 1, 0).reshape(25, 6, 16)           # [t, ci, co]
    w2bd = jnp.einsum("tic,jo->tjioc", w2m,
                      jnp.eye(5, dtype=f32)).reshape(750, 80).astype(f32)

    # fc1 weight with torch's c*25 + oi*5 + oj column order permuted to
    # row = oi*80 + oj*16 + c (matches the kernel's lane-concat flatten)
    wf1 = (p["f1v"].reshape(120, 16, 5, 5).transpose(2, 3, 1, 0)
           .reshape(400, 120).astype(f32))
    wf2 = p["f2v"].T.astype(f32)                                      # (120, 84)
    wf3 = p["f3v"].T.astype(f32)                                      # (84, 10)

    def row(v):
        v = jnp.asarray(v, f32).reshape(-1)
        return jnp.pad(v, (0, 128 - v.shape[0]))

    gb = jnp.stack([
        row(p["c1g"]), row(p["c1b"]),
        row(jnp.tile(p["c2g"], 5)), row(jnp.tile(p["c2b"], 5)),
        row(p["f1g"]), row(p["f1b"]),
        row(p["f2g"]), row(p["f2b"]),
        row(p["f3g"]), row(p["f3b"]),
    ])                                                                # (10, 128)

    return {"w1": w1, "w2": w2bd, "wf1": wf1, "wf2": wf2, "wf3": wf3, "gb": gb}


# ----------------------------------------------------------------------------
# Full forward pass (mirrors WeightNormNet.forward)
# ----------------------------------------------------------------------------
def forward(x_nchw, pp):
    x = jnp.transpose(x_nchw, (0, 2, 3, 1)).astype(jnp.float32)       # NCHW -> NHWC
    B = x.shape[0]
    p1 = _build_conv1_lhs(x)
    rows = p1.shape[0]
    kern = functools.partial(_fused_kernel, batch=B)
    return pl.pallas_call(
        kern,
        out_shape=jax.ShapeDtypeStruct((B, 10), jnp.float32),
        grid=(1,),
        in_specs=[
            pl.BlockSpec((rows, 75), lambda i: (0, 0)),
            pl.BlockSpec((75, 6), lambda i: (0, 0)),
            pl.BlockSpec((750, 80), lambda i: (0, 0)),
            pl.BlockSpec((400, 120), lambda i: (0, 0)),
            pl.BlockSpec((120, 84), lambda i: (0, 0)),
            pl.BlockSpec((84, 10), lambda i: (0, 0)),
            pl.BlockSpec((10, 128), lambda i: (0, 0)),
        ],
        out_specs=pl.BlockSpec((B, 10), lambda i: (0, 0)),
        compiler_params=pltpu.CompilerParams(
            dimension_semantics=("arbitrary",)),
    )(p1, pp["w1"], pp["w2"], pp["wf1"], pp["wf2"], pp["wf3"], pp["gb"])


# ----------------------------------------------------------------------------
# Pure-JAX reference (for correctness check only)
# ----------------------------------------------------------------------------
def ref_forward(x, p):
    def wn(v, g, axes):
        n = jnp.sqrt(jnp.sum(v * v, axis=axes, keepdims=True))
        shape = (v.shape[0],) + (1,) * (v.ndim - 1)
        return v * (g.reshape(shape) / n)

    dn = ("NCHW", "OIHW", "NCHW")
    y = lax.conv_general_dilated(x, wn(p["c1v"], p["c1g"], (1, 2, 3)), (1, 1),
                                 "VALID", dimension_numbers=dn)
    y = jax.nn.relu(y + p["c1b"].reshape(1, -1, 1, 1))
    y = lax.reduce_window(y, -jnp.inf, lax.max, (1, 1, 2, 2), (1, 1, 2, 2), "VALID")
    y = lax.conv_general_dilated(y, wn(p["c2v"], p["c2g"], (1, 2, 3)), (1, 1),
                                 "VALID", dimension_numbers=dn)
    y = jax.nn.relu(y + p["c2b"].reshape(1, -1, 1, 1))
    y = lax.reduce_window(y, -jnp.inf, lax.max, (1, 1, 2, 2), (1, 1, 2, 2), "VALID")
    y = y.reshape(y.shape[0], -1)
    y = jax.nn.relu(y @ wn(p["f1v"], p["f1g"], (1,)).T + p["f1b"])
    y = jax.nn.relu(y @ wn(p["f2v"], p["f2g"], (1,)).T + p["f2b"])
    y = y @ wn(p["f3v"], p["f3g"], (1,)).T + p["f3b"]
    return y


# ----------------------------------------------------------------------------
# Deterministic parameter init (shapes from WeightNormNet.__init__)
# ----------------------------------------------------------------------------
def init_params(key):
    shapes = {
        "c1v": (6, 3, 5, 5), "c2v": (16, 6, 5, 5),
        "f1v": (120, 16 * 5 * 5), "f2v": (84, 120), "f3v": (10, 84),
    }
    outs = {"c1": 6, "c2": 16, "f1": 120, "f2": 84, "f3": 10}
    params = {}
    keys = jax.random.split(key, 3 * len(outs))
    i = 0
    for name in ["c1", "c2", "f1", "f2", "f3"]:
        params[name + "v"] = 0.1 * jax.random.normal(keys[i], shapes[name + "v"],
                                                     dtype=jnp.float32)
        params[name + "g"] = jax.random.uniform(keys[i + 1], (outs[name],),
                                                minval=0.5, maxval=1.5,
                                                dtype=jnp.float32)
        params[name + "b"] = 0.1 * jax.random.normal(keys[i + 2], (outs[name],),
                                                     dtype=jnp.float32)
        i += 3
    return params


if __name__ == "__main__":
    key = jax.random.PRNGKey(0)
    k_param, k_x = jax.random.split(key)
    params = init_params(k_param)
    packed = prepare_params(params)      # one-time layout prepack, not per call

    # Input: NCHW [2, 3, 32, 32]  (32x32 is forced by the 16*5*5 flatten)
    x = jax.random.normal(k_x, (2, 3, 32, 32), dtype=jnp.float32)

    fwd = jax.jit(forward)
    out = jax.block_until_ready(fwd(x, packed))
    assert out.shape == (2, 10), out.shape

    ref = jax.block_until_ready(ref_forward(x, params))
    # bf16 conv operands (f32 accumulation) -> slightly looser tolerance than pure f32.
    assert jnp.allclose(out, ref, atol=5e-2, rtol=5e-2), (
        f"max abs diff {jnp.max(jnp.abs(out - ref))}")

    print("KERNEL_OK")
</pallas_src>

<mosaic_0001>
module attributes {stable_mosaic.version = 11 : i64} {
  func.func @_fused_kernel(%arg0: i32, %arg1: memref<2688x75xbf16, #tpu.memory_space<vmem>>, %arg2: memref<75x6xf32, #tpu.memory_space<vmem>>, %arg3: memref<750x80xf32, #tpu.memory_space<vmem>>, %arg4: memref<400x120xf32, #tpu.memory_space<vmem>>, %arg5: memref<120x84xf32, #tpu.memory_space<vmem>>, %arg6: memref<84x10xf32, #tpu.memory_space<vmem>>, %arg7: memref<10x128xf32, #tpu.memory_space<vmem>>, %arg8: memref<2x10xf32, #tpu.memory_space<vmem>>) attributes {dimension_semantics = [#tpu.dimension_semantics<arbitrary>], iteration_bounds = array<i64: 1>, scalar_prefetch = 0 : i64, scratch_operands = 0 : i64, tpu.core_type = #tpu.core_type<tc>, window_params = [{pipeline_mode = #tpu.pipeline_mode<synchronous>, transform_indices = @transform_0, window_bounds = array<i64: 2688, 75>}, {pipeline_mode = #tpu.pipeline_mode<synchronous>, transform_indices = @transform_1, window_bounds = array<i64: 75, 6>}, {pipeline_mode = #tpu.pipeline_mode<synchronous>, transform_indices = @transform_2, window_bounds = array<i64: 750, 80>}, {pipeline_mode = #tpu.pipeline_mode<synchronous>, transform_indices = @transform_3, window_bounds = array<i64: 400, 120>}, {pipeline_mode = #tpu.pipeline_mode<synchronous>, transform_indices = @transform_4, window_bounds = array<i64: 120, 84>}, {pipeline_mode = #tpu.pipeline_mode<synchronous>, transform_indices = @transform_5, window_bounds = array<i64: 84, 10>}, {pipeline_mode = #tpu.pipeline_mode<synchronous>, transform_indices = @transform_6, window_bounds = array<i64: 10, 128>}, {pipeline_mode = #tpu.pipeline_mode<synchronous>, transform_indices = @transform_7, window_bounds = array<i64: 2, 10>}]} {
    %c0 = arith.constant 0 : index
    %c0_0 = arith.constant 0 : index
    %0 = vector.load %arg2[%c0, %c0_0] : memref<75x6xf32, #tpu.memory_space<vmem>>, vector<75x6xf32>
    %c0_1 = arith.constant 0 : index
    %c0_2 = arith.constant 0 : index
    %1 = vector.load %arg7[%c0_1, %c0_2] : memref<10x128xf32, #tpu.memory_space<vmem>>, vector<1x6xf32>
    %2 = arith.mulf %0, %0 : vector<75x6xf32>
    %cst = arith.constant dense<0.000000e+00> : vector<6xf32>
    %3 = vector.multi_reduction <add>, %2, %cst [0] : vector<75x6xf32> to vector<6xf32>
    %4 = vector.shape_cast %3 : vector<6xf32> to vector<1x6xf32>
    %cst_3 = arith.constant 9.99999996E-13 : f32
    %5 = vector.broadcast %cst_3 : f32 to vector<1x6xf32>
    %6 = arith.maximumf %4, %5 : vector<1x6xf32>
    %7 = math.rsqrt %6 : vector<1x6xf32>
    %8 = arith.mulf %1, %7 : vector<1x6xf32>
    %9 = vector.broadcast %8 : vector<1x6xf32> to vector<75x6xf32>
    %10 = arith.mulf %0, %9 : vector<75x6xf32>
    %11 = arith.truncf %10 : vector<75x6xf32> to vector<75x6xbf16>
    %c0_4 = arith.constant 0 : index
    %c0_5 = arith.constant 0 : index
    %12 = vector.load %arg1[%c0_4, %c0_5] : memref<2688x75xbf16, #tpu.memory_space<vmem>>, vector<2688x75xbf16>
    %cst_6 = arith.constant dense<0.000000e+00> : vector<2688x6xf32>
    %13 = tpu.matmul %12, %11, %cst_6 {dimension_numbers = #tpu.dot_dimension_numbers<[1], [0], [0], [1], [0, 0, 1, 1], [], []>} : vector<2688x75xbf16>, vector<75x6xbf16>, vector<2688x6xf32> -> vector<2688x6xf32>
    %14 = vector.shape_cast %13 : vector<2688x6xf32> to vector<4x672x6xf32>
    %cst_7 = arith.constant dense<0xFF800000> : vector<672x6xf32>
    %15 = vector.multi_reduction <maximumf>, %14, %cst_7 [0] : vector<4x672x6xf32> to vector<672x6xf32>
    %c1 = arith.constant 1 : index
    %c0_8 = arith.constant 0 : index
    %16 = vector.load %arg7[%c1, %c0_8] : memref<10x128xf32, #tpu.memory_space<vmem>>, vector<1x6xf32>
    %17 = vector.broadcast %16 : vector<1x6xf32> to vector<672x6xf32>
    %18 = arith.addf %15, %17 : vector<672x6xf32>
    %cst_9 = arith.constant 0.000000e+00 : f32
    %19 = vector.broadcast %cst_9 : f32 to vector<672x6xf32>
    %20 = arith.maximumf %18, %19 : vector<672x6xf32>
    %21 = vector.extract_strided_slice %20 {offsets = [0, 0], sizes = [96, 6], strides = [1, 1]} : vector<672x6xf32> to vector<96x6xf32>
    %22 = vector.extract_strided_slice %20 {offsets = [96, 0], sizes = [96, 6], strides = [1, 1]} : vector<672x6xf32> to vector<96x6xf32>
    %23 = vector.extract_strided_slice %20 {offsets = [192, 0], sizes = [96, 6], strides = [1, 1]} : vector<672x6xf32> to vector<96x6xf32>
    %24 = vector.extract_strided_slice %20 {offsets = [288, 0], sizes = [96, 6], strides = [1, 1]} : vector<672x6xf32> to vector<96x6xf32>
    %25 = vector.extract_strided_slice %20 {offsets = [384, 0], sizes = [96, 6], strides = [1, 1]} : vector<672x6xf32> to vector<96x6xf32>
    %26 = vector.extract_strided_slice %20 {offsets = [480, 0], sizes = [96, 6], strides = [1, 1]} : vector<672x6xf32> to vector<96x6xf32>
    %27 = vector.extract_strided_slice %20 {offsets = [576, 0], sizes = [96, 6], strides = [1, 1]} : vector<672x6xf32> to vector<96x6xf32>
    %28 = tpu.concatenate %21, %22, %23, %24, %25, %26, %27 in 1 : vector<96x6xf32>, vector<96x6xf32>, vector<96x6xf32>, vector<96x6xf32>, vector<96x6xf32>, vector<96x6xf32>, vector<96x6xf32> -> vector<96x42xf32>
    %29 = vector.shape_cast %28 : vector<96x42xf32> to vector<2x2x24x42xf32>
    %30 = vector.extract_strided_slice %29 {offsets = [0, 0, 0, 0], sizes = [1, 1, 16, 30], strides = [1, 1, 1, 1]} : vector<2x2x24x42xf32> to vector<1x1x16x30xf32>
    %31 = vector.shape_cast %30 : vector<1x1x16x30xf32> to vector<16x30xf32>
    %32 = vector.extract_strided_slice %29 {offsets = [0, 1, 0, 0], sizes = [1, 1, 16, 30], strides = [1, 1, 1, 1]} : vector<2x2x24x42xf32> to vector<1x1x16x30xf32>
    %33 = vector.shape_cast %32 : vector<1x1x16x30xf32> to vector<16x30xf32>
    %34 = vector.extract_strided_slice %29 {offsets = [0, 0, 0, 6], sizes = [1, 1, 16, 30], strides = [1, 1, 1, 1]} : vector<2x2x24x42xf32> to vector<1x1x16x30xf32>
    %35 = vector.shape_cast %34 : vector<1x1x16x30xf32> to vector<16x30xf32>
    %36 = vector.extract_strided_slice %29 {offsets = [0, 1, 0, 6], sizes = [1, 1, 16, 30], strides = [1, 1, 1, 1]} : vector<2x2x24x42xf32> to vector<1x1x16x30xf32>
    %37 = vector.shape_cast %36 : vector<1x1x16x30xf32> to vector<16x30xf32>
    %38 = vector.extract_strided_slice %29 {offsets = [0, 0, 0, 12], sizes = [1, 1, 16, 30], strides = [1, 1, 1, 1]} : vector<2x2x24x42xf32> to vector<1x1x16x30xf32>
    %39 = vector.shape_cast %38 : vector<1x1x16x30xf32> to vector<16x30xf32>
    %40 = vector.extract_strided_slice %29 {offsets = [1, 0, 0, 0], sizes = [1, 1, 16, 30], strides = [1, 1, 1, 1]} : vector<2x2x24x42xf32> to vector<1x1x16x30xf32>
    %41 = vector.shape_cast %40 : vector<1x1x16x30xf32> to vector<16x30xf32>
    %42 = vector.extract_strided_slice %29 {offsets = [1, 1, 0, 0], sizes = [1, 1, 16, 30], strides = [1, 1, 1, 1]} : vector<2x2x24x42xf32> to vector<1x1x16x30xf32>
    %43 = vector.shape_cast %42 : vector<1x1x16x30xf32> to vector<16x30xf32>
    %44 = vector.extract_strided_slice %29 {offsets = [1, 0, 0, 6], sizes = [1, 1, 16, 30], strides = [1, 1, 1, 1]} : vector<2x2x24x42xf32> to vector<1x1x16x30xf32>
    %45 = vector.shape_cast %44 : vector<1x1x16x30xf32> to vector<16x30xf32>
    %46 = vector.extract_strided_slice %29 {offsets = [1, 1, 0, 6], sizes = [1, 1, 16, 30], strides = [1, 1, 1, 1]} : vector<2x2x24x42xf32> to vector<1x1x16x30xf32>
    %47 = vector.shape_cast %46 : vector<1x1x16x30xf32> to vector<16x30xf32>
    %48 = vector.extract_strided_slice %29 {offsets = [1, 0, 0, 12], sizes = [1, 1, 16, 30], strides = [1, 1, 1, 1]} : vector<2x2x24x42xf32> to vector<1x1x16x30xf32>
    %49 = vector.shape_cast %48 : vector<1x1x16x30xf32> to vector<16x30xf32>
    %50 = vector.extract_strided_slice %29 {offsets = [0, 0, 2, 0], sizes = [1, 1, 16, 30], strides = [1, 1, 1, 1]} : vector<2x2x24x42xf32> to vector<1x1x16x30xf32>
    %51 = vector.shape_cast %50 : vector<1x1x16x30xf32> to vector<16x30xf32>
    %52 = vector.extract_strided_slice %29 {offsets = [0, 1, 2, 0], sizes = [1, 1, 16, 30], strides = [1, 1, 1, 1]} : vector<2x2x24x42xf32> to vector<1x1x16x30xf32>
    %53 = vector.shape_cast %52 : vector<1x1x16x30xf32> to vector<16x30xf32>
    %54 = vector.extract_strided_slice %29 {offsets = [0, 0, 2, 6], sizes = [1, 1, 16, 30], strides = [1, 1, 1, 1]} : vector<2x2x24x42xf32> to vector<1x1x16x30xf32>
    %55 = vector.shape_cast %54 : vector<1x1x16x30xf32> to vector<16x30xf32>
    %56 = vector.extract_strided_slice %29 {offsets = [0, 1, 2, 6], sizes = [1, 1, 16, 30], strides = [1, 1, 1, 1]} : vector<2x2x24x42xf32> to vector<1x1x16x30xf32>
    %57 = vector.shape_cast %56 : vector<1x1x16x30xf32> to vector<16x30xf32>
    %58 = vector.extract_strided_slice %29 {offsets = [0, 0, 2, 12], sizes = [1, 1, 16, 30], strides = [1, 1, 1, 1]} : vector<2x2x24x42xf32> to vector<1x1x16x30xf32>
    %59 = vector.shape_cast %58 : vector<1x1x16x30xf32> to vector<16x30xf32>
    %60 = vector.extract_strided_slice %29 {offsets = [1, 0, 2, 0], sizes = [1, 1, 16, 30], strides = [1, 1, 1, 1]} : vector<2x2x24x42xf32> to vector<1x1x16x30xf32>
    %61 = vector.shape_cast %60 : vector<1x1x16x30xf32> to vector<16x30xf32>
    %62 = vector.extract_strided_slice %29 {offsets = [1, 1, 2, 0], sizes = [1, 1, 16, 30], strides = [1, 1, 1, 1]} : vector<2x2x24x42xf32> to vector<1x1x16x30xf32>
    %63 = vector.shape_cast %62 : vector<1x1x16x30xf32> to vector<16x30xf32>
    %64 = vector.extract_strided_slice %29 {offsets = [1, 0, 2, 6], sizes = [1, 1, 16, 30], strides = [1, 1, 1, 1]} : vector<2x2x24x42xf32> to vector<1x1x16x30xf32>
    %65 = vector.shape_cast %64 : vector<1x1x16x30xf32> to vector<16x30xf32>
    %66 = vector.extract_strided_slice %29 {offsets = [1, 1, 2, 6], sizes = [1, 1, 16, 30], strides = [1, 1, 1, 1]} : vector<2x2x24x42xf32> to vector<1x1x16x30xf32>
    %67 = vector.shape_cast %66 : vector<1x1x16x30xf32> to vector<16x30xf32>
    %68 = vector.extract_strided_slice %29 {offsets = [1, 0, 2, 12], sizes = [1, 1, 16, 30], strides = [1, 1, 1, 1]} : vector<2x2x24x42xf32> to vector<1x1x16x30xf32>
    %69 = vector.shape_cast %68 : vector<1x1x16x30xf32> to vector<16x30xf32>
    %70 = vector.extract_strided_slice %29 {offsets = [0, 0, 4, 0], sizes = [1, 1, 16, 30], strides = [1, 1, 1, 1]} : vector<2x2x24x42xf32> to vector<1x1x16x30xf32>
    %71 = vector.shape_cast %70 : vector<1x1x16x30xf32> to vector<16x30xf32>
    %72 = vector.extract_strided_slice %29 {offsets = [0, 1, 4, 0], sizes = [1, 1, 16, 30], strides = [1, 1, 1, 1]} : vector<2x2x24x42xf32> to vector<1x1x16x30xf32>
    %73 = vector.shape_cast %72 : vector<1x1x16x30xf32> to vector<16x30xf32>
    %74 = vector.extract_strided_slice %29 {offsets = [0, 0, 4, 6], sizes = [1, 1, 16, 30], strides = [1, 1, 1, 1]} : vector<2x2x24x42xf32> to vector<1x1x16x30xf32>
    %75 = vector.shape_cast %74 : vector<1x1x16x30xf32> to vector<16x30xf32>
    %76 = vector.extract_strided_slice %29 {offsets = [0, 1, 4, 6], sizes = [1, 1, 16, 30], strides = [1, 1, 1, 1]} : vector<2x2x24x42xf32> to vector<1x1x16x30xf32>
    %77 = vector.shape_cast %76 : vector<1x1x16x30xf32> to vector<16x30xf32>
    %78 = vector.extract_strided_slice %29 {offsets = [0, 0, 4, 12], sizes = [1, 1, 16, 30], strides = [1, 1, 1, 1]} : vector<2x2x24x42xf32> to vector<1x1x16x30xf32>
    %79 = vector.shape_cast %78 : vector<1x1x16x30xf32> to vector<16x30xf32>
    %80 = tpu.concatenate %31, %33, %35, %37, %39, %41, %43, %45, %47, %49, %51, %53, %55, %57, %59, %61 in 1 : vector<16x30xf32>, vector<16x30xf32>, vector<16x30xf32>, vector<16x30xf32>, vector<16x30xf32>, vector<16x30xf32>, vector<16x30xf32>, vector<16x30xf32>, vector<16x30xf32>, vector<16x30xf32>, vector<16x30xf32>, vector<16x30xf32>, vector<16x30xf32>, vector<16x30xf32>, vector<16x30xf32>, vector<16x30xf32> -> vector<16x480xf32>
    %81 = tpu.concatenate %63, %65, %67, %69, %71, %73, %75, %77, %79 in 1 : vector<16x30xf32>, vector<16x30xf32>, vector<16x30xf32>, vector<16x30xf32>, vector<16x30xf32>, vector<16x30xf32>, vector<16x30xf32>, vector<16x30xf32>, vector<16x30xf32> -> vector<16x270xf32>
    %82 = tpu.concatenate %80, %81 in 1 : vector<16x480xf32>, vector<16x270xf32> -> vector<16x750xf32>
    %83 = vector.extract_strided_slice %29 {offsets = [0, 1, 0, 0], sizes = [1, 1, 16, 30], strides = [1, 1, 1, 1]} : vector<2x2x24x42xf32> to vector<1x1x16x30xf32>
    %84 = vector.shape_cast %83 : vector<1x1x16x30xf32> to vector<16x30xf32>
    %85 = vector.extract_strided_slice %29 {offsets = [0, 0, 0, 6], sizes = [1, 1, 16, 30], strides = [1, 1, 1, 1]} : vector<2x2x24x42xf32> to vector<1x1x16x30xf32>
    %86 = vector.shape_cast %85 : vector<1x1x16x30xf32> to vector<16x30xf32>
    %87 = vector.extract_strided_slice %29 {offsets = [0, 1, 0, 6], sizes = [1, 1, 16, 30], strides = [1, 1, 1, 1]} : vector<2x2x24x42xf32> to vector<1x1x16x30xf32>
    %88 = vector.shape_cast %87 : vector<1x1x16x30xf32> to vector<16x30xf32>
    %89 = vector.extract_strided_slice %29 {offsets = [0, 0, 0, 12], sizes = [1, 1, 16, 30], strides = [1, 1, 1, 1]} : vector<2x2x24x42xf32> to vector<1x1x16x30xf32>
    %90 = vector.shape_cast %89 : vector<1x1x16x30xf32> to vector<16x30xf32>
    %91 = vector.extract_strided_slice %29 {offsets = [0, 1, 0, 12], sizes = [1, 1, 16, 30], strides = [1, 1, 1, 1]} : vector<2x2x24x42xf32> to vector<1x1x16x30xf32>
    %92 = vector.shape_cast %91 : vector<1x1x16x30xf32> to vector<16x30xf32>
    %93 = vector.extract_strided_slice %29 {offsets = [1, 1, 0, 0], sizes = [1, 1, 16, 30], strides = [1, 1, 1, 1]} : vector<2x2x24x42xf32> to vector<1x1x16x30xf32>
    %94 = vector.shape_cast %93 : vector<1x1x16x30xf32> to vector<16x30xf32>
    %95 = vector.extract_strided_slice %29 {offsets = [1, 0, 0, 6], sizes = [1, 1, 16, 30], strides = [1, 1, 1, 1]} : vector<2x2x24x42xf32> to vector<1x1x16x30xf32>
    %96 = vector.shape_cast %95 : vector<1x1x16x30xf32> to vector<16x30xf32>
    %97 = vector.extract_strided_slice %29 {offsets = [1, 1, 0, 6], sizes = [1, 1, 16, 30], strides = [1, 1, 1, 1]} : vector<2x2x24x42xf32> to vector<1x1x16x30xf32>
    %98 = vector.shape_cast %97 : vector<1x1x16x30xf32> to vector<16x30xf32>
    %99 = vector.extract_strided_slice %29 {offsets = [1, 0, 0, 12], sizes = [1, 1, 16, 30], strides = [1, 1, 1, 1]} : vector<2x2x24x42xf32> to vector<1x1x16x30xf32>
    %100 = vector.shape_cast %99 : vector<1x1x16x30xf32> to vector<16x30xf32>
    %101 = vector.extract_strided_slice %29 {offsets = [1, 1, 0, 12], sizes = [1, 1, 16, 30], strides = [1, 1, 1, 1]} : vector<2x2x24x42xf32> to vector<1x1x16x30xf32>
    %102 = vector.shape_cast %101 : vector<1x1x16x30xf32> to vector<16x30xf32>
    %103 = vector.extract_strided_slice %29 {offsets = [0, 1, 2, 0], sizes = [1, 1, 16, 30], strides = [1, 1, 1, 1]} : vector<2x2x24x42xf32> to vector<1x1x16x30xf32>
    %104 = vector.shape_cast %103 : vector<1x1x16x30xf32> to vector<16x30xf32>
    %105 = vector.extract_strided_slice %29 {offsets = [0, 0, 2, 6], sizes = [1, 1, 16, 30], strides = [1, 1, 1, 1]} : vector<2x2x24x42xf32> to vector<1x1x16x30xf32>
    %106 = vector.shape_cast %105 : vector<1x1x16x30xf32> to vector<16x30xf32>
    %107 = vector.extract_strided_slice %29 {offsets = [0, 1, 2, 6], sizes = [1, 1, 16, 30], strides = [1, 1, 1, 1]} : vector<2x2x24x42xf32> to vector<1x1x16x30xf32>
    %108 = vector.shape_cast %107 : vector<1x1x16x30xf32> to vector<16x30xf32>
    %109 = vector.extract_strided_slice %29 {offsets = [0, 0, 2, 12], sizes = [1, 1, 16, 30], strides = [1, 1, 1, 1]} : vector<2x2x24x42xf32> to vector<1x1x16x30xf32>
    %110 = vector.shape_cast %109 : vector<1x1x16x30xf32> to vector<16x30xf32>
    %111 = vector.extract_strided_slice %29 {offsets = [0, 1, 2, 12], sizes = [1, 1, 16, 30], strides = [1, 1, 1, 1]} : vector<2x2x24x42xf32> to vector<1x1x16x30xf32>
    %112 = vector.shape_cast %111 : vector<1x1x16x30xf32> to vector<16x30xf32>
    %113 = vector.extract_strided_slice %29 {offsets = [1, 1, 2, 0], sizes = [1, 1, 16, 30], strides = [1, 1, 1, 1]} : vector<2x2x24x42xf32> to vector<1x1x16x30xf32>
    %114 = vector.shape_cast %113 : vector<1x1x16x30xf32> to vector<16x30xf32>
    %115 = vector.extract_strided_slice %29 {offsets = [1, 0, 2, 6], sizes = [1, 1, 16, 30], strides = [1, 1, 1, 1]} : vector<2x2x24x42xf32> to vector<1x1x16x30xf32>
    %116 = vector.shape_cast %115 : vector<1x1x16x30xf32> to vector<16x30xf32>
    %117 = vector.extract_strided_slice %29 {offsets = [1, 1, 2, 6], sizes = [1, 1, 16, 30], strides = [1, 1, 1, 1]} : vector<2x2x24x42xf32> to vector<1x1x16x30xf32>
    %118 = vector.shape_cast %117 : vector<1x1x16x30xf32> to vector<16x30xf32>
    %119 = vector.extract_strided_slice %29 {offsets = [1, 0, 2, 12], sizes = [1, 1, 16, 30], strides = [1, 1, 1, 1]} : vector<2x2x24x42xf32> to vector<1x1x16x30xf32>
    %120 = vector.shape_cast %119 : vector<1x1x16x30xf32> to vector<16x30xf32>
    %121 = vector.extract_strided_slice %29 {offsets = [1, 1, 2, 12], sizes = [1, 1, 16, 30], strides = [1, 1, 1, 1]} : vector<2x2x24x42xf32> to vector<1x1x16x30xf32>
    %122 = vector.shape_cast %121 : vector<1x1x16x30xf32> to vector<16x30xf32>
    %123 = vector.extract_strided_slice %29 {offsets = [0, 1, 4, 0], sizes = [1, 1, 16, 30], strides = [1, 1, 1, 1]} : vector<2x2x24x42xf32> to vector<1x1x16x30xf32>
    %124 = vector.shape_cast %123 : vector<1x1x16x30xf32> to vector<16x30xf32>
    %125 = vector.extract_strided_slice %29 {offsets = [0, 0, 4, 6], sizes = [1, 1, 16, 30], strides = [1, 1, 1, 1]} : vector<2x2x24x42xf32> to vector<1x1x16x30xf32>
    %126 = vector.shape_cast %125 : vector<1x1x16x30xf32> to vector<16x30xf32>
    %127 = vector.extract_strided_slice %29 {offsets = [0, 1, 4, 6], sizes = [1, 1, 16, 30], strides = [1, 1, 1, 1]} : vector<2x2x24x42xf32> to vector<1x1x16x30xf32>
    %128 = vector.shape_cast %127 : vector<1x1x16x30xf32> to vector<16x30xf32>
    %129 = vector.extract_strided_slice %29 {offsets = [0, 0, 4, 12], sizes = [1, 1, 16, 30], strides = [1, 1, 1, 1]} : vector<2x2x24x42xf32> to vector<1x1x16x30xf32>
    %130 = vector.shape_cast %129 : vector<1x1x16x30xf32> to vector<16x30xf32>
    %131 = vector.extract_strided_slice %29 {offsets = [0, 1, 4, 12], sizes = [1, 1, 16, 30], strides = [1, 1, 1, 1]} : vector<2x2x24x42xf32> to vector<1x1x16x30xf32>
    %132 = vector.shape_cast %131 : vector<1x1x16x30xf32> to vector<16x30xf32>
    %133 = tpu.concatenate %84, %86, %88, %90, %92, %94, %96, %98, %100, %102, %104, %106, %108, %110, %112, %114 in 1 : vector<16x30xf32>, vector<16x30xf32>, vector<16x30xf32>, vector<16x30xf32>, vector<16x30xf32>, vector<16x30xf32>, vector<16x30xf32>, vector<16x30xf32>, vector<16x30xf32>, vector<16x30xf32>, vector<16x30xf32>, vector<16x30xf32>, vector<16x30xf32>, vector<16x30xf32>, vector<16x30xf32>, vector<16x30xf32> -> vector<16x480xf32>
    %134 = tpu.concatenate %116, %118, %120, %122, %124, %126, %128, %130, %132 in 1 : vector<16x30xf32>, vector<16x30xf32>, vector<16x30xf32>, vector<16x30xf32>, vector<16x30xf32>, vector<16x30xf32>, vector<16x30xf32>, vector<16x30xf32>, vector<16x30xf32> -> vector<16x270xf32>
    %135 = tpu.concatenate %133, %134 in 1 : vector<16x480xf32>, vector<16x270xf32> -> vector<16x750xf32>
    %136 = vector.extract_strided_slice %29 {offsets = [1, 0, 0, 0], sizes = [1, 1, 16, 30], strides = [1, 1, 1, 1]} : vector<2x2x24x42xf32> to vector<1x1x16x30xf32>
    %137 = vector.shape_cast %136 : vector<1x1x16x30xf32> to vector<16x30xf32>
    %138 = vector.extract_strided_slice %29 {offsets = [1, 1, 0, 0], sizes = [1, 1, 16, 30], strides = [1, 1, 1, 1]} : vector<2x2x24x42xf32> to vector<1x1x16x30xf32>
    %139 = vector.shape_cast %138 : vector<1x1x16x30xf32> to vector<16x30xf32>
    %140 = vector.extract_strided_slice %29 {offsets = [1, 0, 0, 6], sizes = [1, 1, 16, 30], strides = [1, 1, 1, 1]} : vector<2x2x24x42xf32> to vector<1x1x16x30xf32>
    %141 = vector.shape_cast %140 : vector<1x1x16x30xf32> to vector<16x30xf32>
    %142 = vector.extract_strided_slice %29 {offsets = [1, 1, 0, 6], sizes = [1, 1, 16, 30], strides = [1, 1, 1, 1]} : vector<2x2x24x42xf32> to vector<1x1x16x30xf32>
    %143 = vector.shape_cast %142 : vector<1x1x16x30xf32> to vector<16x30xf32>
    %144 = vector.extract_strided_slice %29 {offsets = [1, 0, 0, 12], sizes = [1, 1, 16, 30], strides = [1, 1, 1, 1]} : vector<2x2x24x42xf32> to vector<1x1x16x30xf32>
    %145 = vector.shape_cast %144 : vector<1x1x16x30xf32> to vector<16x30xf32>
    %146 = vector.extract_strided_slice %29 {offsets = [0, 0, 2, 0], sizes = [1, 1, 16, 30], strides = [1, 1, 1, 1]} : vector<2x2x24x42xf32> to vector<1x1x16x30xf32>
    %147 = vector.shape_cast %146 : vector<1x1x16x30xf32> to vector<16x30xf32>
    %148 = vector.extract_strided_slice %29 {offsets = [0, 1, 2, 0], sizes = [1, 1, 16, 30], strides = [1, 1, 1, 1]} : vector<2x2x24x42xf32> to vector<1x1x16x30xf32>
    %149 = vector.shape_cast %148 : vector<1x1x16x30xf32> to vector<16x30xf32>
    %150 = vector.extract_strided_slice %29 {offsets = [0, 0, 2, 6], sizes = [1, 1, 16, 30], strides = [1, 1, 1, 1]} : vector<2x2x24x42xf32> to vector<1x1x16x30xf32>
    %151 = vector.shape_cast %150 : vector<1x1x16x30xf32> to vector<16x30xf32>
    %152 = vector.extract_strided_slice %29 {offsets = [0, 1, 2, 6], sizes = [1, 1, 16, 30], strides = [1, 1, 1, 1]} : vector<2x2x24x42xf32> to vector<1x1x16x30xf32>
    %153 = vector.shape_cast %152 : vector<1x1x16x30xf32> to vector<16x30xf32>
    %154 = vector.extract_strided_slice %29 {offsets = [0, 0, 2, 12], sizes = [1, 1, 16, 30], strides = [1, 1, 1, 1]} : vector<2x2x24x42xf32> to vector<1x1x16x30xf32>
    %155 = vector.shape_cast %154 : vector<1x1x16x30xf32> to vector<16x30xf32>
    %156 = vector.extract_strided_slice %29 {offsets = [1, 0, 2, 0], sizes = [1, 1, 16, 30], strides = [1, 1, 1, 1]} : vector<2x2x24x42xf32> to vector<1x1x16x30xf32>
    %157 = vector.shape_cast %156 : vector<1x1x16x30xf32> to vector<16x30xf32>
    %158 = vector.extract_strided_slice %29 {offsets = [1, 1, 2, 0], sizes = [1, 1, 16, 30], strides = [1, 1, 1, 1]} : vector<2x2x24x42xf32> to vector<1x1x16x30xf32>
    %159 = vector.shape_cast %158 : vector<1x1x16x30xf32> to vector<16x30xf32>
    %160 = vector.extract_strided_slice %29 {offsets = [1, 0, 2, 6], sizes = [1, 1, 16, 30], strides = [1, 1, 1, 1]} : vector<2x2x24x42xf32> to vector<1x1x16x30xf32>
    %161 = vector.shape_cast %160 : vector<1x1x16x30xf32> to vector<16x30xf32>
    %162 = vector.extract_strided_slice %29 {offsets = [1, 1, 2, 6], sizes = [1, 1, 16, 30], strides = [1, 1, 1, 1]} : vector<2x2x24x42xf32> to vector<1x1x16x30xf32>
    %163 = vector.shape_cast %162 : vector<1x1x16x30xf32> to vector<16x30xf32>
    %164 = vector.extract_strided_slice %29 {offsets = [1, 0, 2, 12], sizes = [1, 1, 16, 30], strides = [1, 1, 1, 1]} : vector<2x2x24x42xf32> to vector<1x1x16x30xf32>
    %165 = vector.shape_cast %164 : vector<1x1x16x30xf32> to vector<16x30xf32>
    %166 = vector.extract_strided_slice %29 {offsets = [0, 0, 4, 0], sizes = [1, 1, 16, 30], strides = [1, 1, 1, 1]} : vector<2x2x24x42xf32> to vector<1x1x16x30xf32>
    %167 = vector.shape_cast %166 : vector<1x1x16x30xf32> to vector<16x30xf32>
    %168 = vector.extract_strided_slice %29 {offsets = [0, 1, 4, 0], sizes = [1, 1, 16, 30], strides = [1, 1, 1, 1]} : vector<2x2x24x42xf32> to vector<1x1x16x30xf32>
    %169 = vector.shape_cast %168 : vector<1x1x16x30xf32> to vector<16x30xf32>
    %170 = vector.extract_strided_slice %29 {offsets = [0, 0, 4, 6], sizes = [1, 1, 16, 30], strides = [1, 1, 1, 1]} : vector<2x2x24x42xf32> to vector<1x1x16x30xf32>
    %171 = vector.shape_cast %170 : vector<1x1x16x30xf32> to vector<16x30xf32>
    %172 = vector.extract_strided_slice %29 {offsets = [0, 1, 4, 6], sizes = [1, 1, 16, 30], strides = [1, 1, 1, 1]} : vector<2x2x24x42xf32> to vector<1x1x16x30xf32>
    %173 = vector.shape_cast %172 : vector<1x1x16x30xf32> to vector<16x30xf32>
    %174 = vector.extract_strided_slice %29 {offsets = [0, 0, 4, 12], sizes = [1, 1, 16, 30], strides = [1, 1, 1, 1]} : vector<2x2x24x42xf32> to vector<1x1x16x30xf32>
    %175 = vector.shape_cast %174 : vector<1x1x16x30xf32> to vector<16x30xf32>
    %176 = vector.extract_strided_slice %29 {offsets = [1, 0, 4, 0], sizes = [1, 1, 16, 30], strides = [1, 1, 1, 1]} : vector<2x2x24x42xf32> to vector<1x1x16x30xf32>
    %177 = vector.shape_cast %176 : vector<1x1x16x30xf32> to vector<16x30xf32>
    %178 = vector.extract_strided_slice %29 {offsets = [1, 1, 4, 0], sizes = [1, 1, 16, 30], strides = [1, 1, 1, 1]} : vector<2x2x24x42xf32> to vector<1x1x16x30xf32>
    %179 = vector.shape_cast %178 : vector<1x1x16x30xf32> to vector<16x30xf32>
    %180 = vector.extract_strided_slice %29 {offsets = [1, 0, 4, 6], sizes = [1, 1, 16, 30], strides = [1, 1, 1, 1]} : vector<2x2x24x42xf32> to vector<1x1x16x30xf32>
    %181 = vector.shape_cast %180 : vector<1x1x16x30xf32> to vector<16x30xf32>
    %182 = vector.extract_strided_slice %29 {offsets = [1, 1, 4, 6], sizes = [1, 1, 16, 30], strides = [1, 1, 1, 1]} : vector<2x2x24x42xf32> to vector<1x1x16x30xf32>
    %183 = vector.shape_cast %182 : vector<1x1x16x30xf32> to vector<16x30xf32>
    %184 = vector.extract_strided_slice %29 {offsets = [1, 0, 4, 12], sizes = [1, 1, 16, 30], strides = [1, 1, 1, 1]} : vector<2x2x24x42xf32> to vector<1x1x16x30xf32>
    %185 = vector.shape_cast %184 : vector<1x1x16x30xf32> to vector<16x30xf32>
    %186 = tpu.concatenate %137, %139, %141, %143, %145, %147, %149, %151, %153, %155, %157, %159, %161, %163, %165, %167 in 1 : vector<16x30xf32>, vector<16x30xf32>, vector<16x30xf32>, vector<16x30xf32>, vector<16x30xf32>, vector<16x30xf32>, vector<16x30xf32>, vector<16x30xf32>, vector<16x30xf32>, vector<16x30xf32>, vector<16x30xf32>, vector<16x30xf32>, vector<16x30xf32>, vector<16x30xf32>, vector<16x30xf32>, vector<16x30xf32> -> vector<16x480xf32>
    %187 = tpu.concatenate %169, %171, %173, %175, %177, %179, %181, %183, %185 in 1 : vector<16x30xf32>, vector<16x30xf32>, vector<16x30xf32>, vector<16x30xf32>, vector<16x30xf32>, vector<16x30xf32>, vector<16x30xf32>, vector<16x30xf32>, vector<16x30xf32> -> vector<16x270xf32>
    %188 = tpu.concatenate %186, %187 in 1 : vector<16x480xf32>, vector<16x270xf32> -> vector<16x750xf32>
    %189 = vector.extract_strided_slice %29 {offsets = [1, 1, 0, 0], sizes = [1, 1, 16, 30], strides = [1, 1, 1, 1]} : vector<2x2x24x42xf32> to vector<1x1x16x30xf32>
    %190 = vector.shape_cast %189 : vector<1x1x16x30xf32> to vector<16x30xf32>
    %191 = vector.extract_strided_slice %29 {offsets = [1, 0, 0, 6], sizes = [1, 1, 16, 30], strides = [1, 1, 1, 1]} : vector<2x2x24x42xf32> to vector<1x1x16x30xf32>
    %192 = vector.shape_cast %191 : vector<1x1x16x30xf32> to vector<16x30xf32>
    %193 = vector.extract_strided_slice %29 {offsets = [1, 1, 0, 6], sizes = [1, 1, 16, 30], strides = [1, 1, 1, 1]} : vector<2x2x24x42xf32> to vector<1x1x16x30xf32>
    %194 = vector.shape_cast %193 : vector<1x1x16x30xf32> to vector<16x30xf32>
    %195 = vector.extract_strided_slice %29 {offsets = [1, 0, 0, 12], sizes = [1, 1, 16, 30], strides = [1, 1, 1, 1]} : vector<2x2x24x42xf32> to vector<1x1x16x30xf32>
    %196 = vector.shape_cast %195 : vector<1x1x16x30xf32> to vector<16x30xf32>
    %197 = vector.extract_strided_slice %29 {offsets = [1, 1, 0, 12], sizes = [1, 1, 16, 30], strides = [1, 1, 1, 1]} : vector<2x2x24x42xf32> to vector<1x1x16x30xf32>
    %198 = vector.shape_cast %197 : vector<1x1x16x30xf32> to vector<16x30xf32>
    %199 = vector.extract_strided_slice %29 {offsets = [0, 1, 2, 0], sizes = [1, 1, 16, 30], strides = [1, 1, 1, 1]} : vector<2x2x24x42xf32> to vector<1x1x16x30xf32>
    %200 = vector.shape_cast %199 : vector<1x1x16x30xf32> to vector<16x30xf32>
    %201 = vector.extract_strided_slice %29 {offsets = [0, 0, 2, 6], sizes = [1, 1, 16, 30], strides = [1, 1, 1, 1]} : vector<2x2x24x42xf32> to vector<1x1x16x30xf32>
    %202 = vector.shape_cast %201 : vector<1x1x16x30xf32> to vector<16x30xf32>
    %203 = vector.extract_strided_slice %29 {offsets = [0, 1, 2, 6], sizes = [1, 1, 16, 30], strides = [1, 1, 1, 1]} : vector<2x2x24x42xf32> to vector<1x1x16x30xf32>
    %204 = vector.shape_cast %203 : vector<1x1x16x30xf32> to vector<16x30xf32>
    %205 = vector.extract_strided_slice %29 {offsets = [0, 0, 2, 12], sizes = [1, 1, 16, 30], strides = [1, 1, 1, 1]} : vector<2x2x24x42xf32> to vector<1x1x16x30xf32>
    %206 = vector.shape_cast %205 : vector<1x1x16x30xf32> to vector<16x30xf32>
    %207 = vector.extract_strided_slice %29 {offsets = [0, 1, 2, 12], sizes = [1, 1, 16, 30], strides = [1, 1, 1, 1]} : vector<2x2x24x42xf32> to vector<1x1x16x30xf32>
    %208 = vector.shape_cast %207 : vector<1x1x16x30xf32> to vector<16x30xf32>
    %209 = vector.extract_strided_slice %29 {offsets = [1, 1, 2, 0], sizes = [1, 1, 16, 30], strides = [1, 1, 1, 1]} : vector<2x2x24x42xf32> to vector<1x1x16x30xf32>
    %210 = vector.shape_cast %209 : vector<1x1x16x30xf32> to vector<16x30xf32>
    %211 = vector.extract_strided_slice %29 {offsets = [1, 0, 2, 6], sizes = [1, 1, 16, 30], strides = [1, 1, 1, 1]} : vector<2x2x24x42xf32> to vector<1x1x16x30xf32>
    %212 = vector.shape_cast %211 : vector<1x1x16x30xf32> to vector<16x30xf32>
    %213 = vector.extract_strided_slice %29 {offsets = [1, 1, 2, 6], sizes = [1, 1, 16, 30], strides = [1, 1, 1, 1]} : vector<2x2x24x42xf32> to vector<1x1x16x30xf32>
    %214 = vector.shape_cast %213 : vector<1x1x16x30xf32> to vector<16x30xf32>
    %215 = vector.extract_strided_slice %29 {offsets = [1, 0, 2, 12], sizes = [1, 1, 16, 30], strides = [1, 1, 1, 1]} : vector<2x2x24x42xf32> to vector<1x1x16x30xf32>
    %216 = vector.shape_cast %215 : vector<1x1x16x30xf32> to vector<16x30xf32>
    %217 = vector.extract_strided_slice %29 {offsets = [1, 1, 2, 12], sizes = [1, 1, 16, 30], strides = [1, 1, 1, 1]} : vector<2x2x24x42xf32> to vector<1x1x16x30xf32>
    %218 = vector.shape_cast %217 : vector<1x1x16x30xf32> to vector<16x30xf32>
    %219 = vector.extract_strided_slice %29 {offsets = [0, 1, 4, 0], sizes = [1, 1, 16, 30], strides = [1, 1, 1, 1]} : vector<2x2x24x42xf32> to vector<1x1x16x30xf32>
    %220 = vector.shape_cast %219 : vector<1x1x16x30xf32> to vector<16x30xf32>
    %221 = vector.extract_strided_slice %29 {offsets = [0, 0, 4, 6], sizes = [1, 1, 16, 30], strides = [1, 1, 1, 1]} : vector<2x2x24x42xf32> to vector<1x1x16x30xf32>
    %222 = vector.shape_cast %221 : vector<1x1x16x30xf32> to vector<16x30xf32>
    %223 = vector.extract_strided_slice %29 {offsets = [0, 1, 4, 6], sizes = [1, 1, 16, 30], strides = [1, 1, 1, 1]} : vector<2x2x24x42xf32> to vector<1x1x16x30xf32>
    %224 = vector.shape_cast %223 : vector<1x1x16x30xf32> to vector<16x30xf32>
    %225 = vector.extract_strided_slice %29 {offsets = [0, 0, 4, 12], sizes = [1, 1, 16, 30], strides = [1, 1, 1, 1]} : vector<2x2x24x42xf32> to vector<1x1x16x30xf32>
    %226 = vector.shape_cast %225 : vector<1x1x16x30xf32> to vector<16x30xf32>
    %227 = vector.extract_strided_slice %29 {offsets = [0, 1, 4, 12], sizes = [1, 1, 16, 30], strides = [1, 1, 1, 1]} : vector<2x2x24x42xf32> to vector<1x1x16x30xf32>
    %228 = vector.shape_cast %227 : vector<1x1x16x30xf32> to vector<16x30xf32>
    %229 = vector.extract_strided_slice %29 {offsets = [1, 1, 4, 0], sizes = [1, 1, 16, 30], strides = [1, 1, 1, 1]} : vector<2x2x24x42xf32> to vector<1x1x16x30xf32>
    %230 = vector.shape_cast %229 : vector<1x1x16x30xf32> to vector<16x30xf32>
    %231 = vector.extract_strided_slice %29 {offsets = [1, 0, 4, 6], sizes = [1, 1, 16, 30], strides = [1, 1, 1, 1]} : vector<2x2x24x42xf32> to vector<1x1x16x30xf32>
    %232 = vector.shape_cast %231 : vector<1x1x16x30xf32> to vector<16x30xf32>
    %233 = vector.extract_strided_slice %29 {offsets = [1, 1, 4, 6], sizes = [1, 1, 16, 30], strides = [1, 1, 1, 1]} : vector<2x2x24x42xf32> to vector<1x1x16x30xf32>
    %234 = vector.shape_cast %233 : vector<1x1x16x30xf32> to vector<16x30xf32>
    %235 = vector.extract_strided_slice %29 {offsets = [1, 0, 4, 12], sizes = [1, 1, 16, 30], strides = [1, 1, 1, 1]} : vector<2x2x24x42xf32> to vector<1x1x16x30xf32>
    %236 = vector.shape_cast %235 : vector<1x1x16x30xf32> to vector<16x30xf32>
    %237 = vector.extract_strided_slice %29 {offsets = [1, 1, 4, 12], sizes = [1, 1, 16, 30], strides = [1, 1, 1, 1]} : vector<2x2x24x42xf32> to vector<1x1x16x30xf32>
    %238 = vector.shape_cast %237 : vector<1x1x16x30xf32> to vector<16x30xf32>
    %239 = tpu.concatenate %190, %192, %194, %196, %198, %200, %202, %204, %206, %208, %210, %212, %214, %216, %218, %220 in 1 : vector<16x30xf32>, vector<16x30xf32>, vector<16x30xf32>, vector<16x30xf32>, vector<16x30xf32>, vector<16x30xf32>, vector<16x30xf32>, vector<16x30xf32>, vector<16x30xf32>, vector<16x30xf32>, vector<16x30xf32>, vector<16x30xf32>, vector<16x30xf32>, vector<16x30xf32>, vector<16x30xf32>, vector<16x30xf32> -> vector<16x480xf32>
    %240 = tpu.concatenate %222, %224, %226, %228, %230, %232, %234, %236, %238 in 1 : vector<16x30xf32>, vector<16x30xf32>, vector<16x30xf32>, vector<16x30xf32>, vector<16x30xf32>, vector<16x30xf32>, vector<16x30xf32>, vector<16x30xf32>, vector<16x30xf32> -> vector<16x270xf32>
    %241 = tpu.concatenate %239, %240 in 1 : vector<16x480xf32>, vector<16x270xf32> -> vector<16x750xf32>
    %242 = tpu.concatenate %82, %135, %188, %241 in 0 : vector<16x750xf32>, vector<16x750xf32>, vector<16x750xf32>, vector<16x750xf32> -> vector<64x750xf32>
    %243 = arith.truncf %242 : vector<64x750xf32> to vector<64x750xbf16>
    %c0_10 = arith.constant 0 : index
    %c0_11 = arith.constant 0 : index
    %244 = vector.load %arg3[%c0_10, %c0_11] : memref<750x80xf32, #tpu.memory_space<vmem>>, vector<750x80xf32>
    %c2 = arith.constant 2 : index
    %c0_12 = arith.constant 0 : index
    %245 = vector.load %arg7[%c2, %c0_12] : memref<10x128xf32, #tpu.memory_space<vmem>>, vector<1x80xf32>
    %246 = arith.mulf %244, %244 : vector<750x80xf32>
    %cst_13 = arith.constant dense<0.000000e+00> : vector<80xf32>
    %247 = vector.multi_reduction <add>, %246, %cst_13 [0] : vector<750x80xf32> to vector<80xf32>
    %248 = vector.shape_cast %247 : vector<80xf32> to vector<1x80xf32>
    %cst_14 = arith.constant 9.99999996E-13 : f32
    %249 = vector.broadcast %cst_14 : f32 to vector<1x80xf32>
    %250 = arith.maximumf %248, %249 : vector<1x80xf32>
    %251 = math.rsqrt %250 : vector<1x80xf32>
    %252 = arith.mulf %245, %251 : vector<1x80xf32>
    %253 = vector.broadcast %252 : vector<1x80xf32> to vector<750x80xf32>
    %254 = arith.mulf %244, %253 : vector<750x80xf32>
    %255 = arith.truncf %254 : vector<750x80xf32> to vector<750x80xbf16>
    %cst_15 = arith.constant dense<0.000000e+00> : vector<64x80xf32>
    %256 = tpu.matmul %243, %255, %cst_15 {dimension_numbers = #tpu.dot_dimension_numbers<[1], [0], [0], [1], [0, 0, 1, 1], [], []>} : vector<64x750xbf16>, vector<750x80xbf16>, vector<64x80xf32> -> vector<64x80xf32>
    %257 = vector.shape_cast %256 : vector<64x80xf32> to vector<4x16x80xf32>
    %cst_16 = arith.constant dense<0xFF800000> : vector<16x80xf32>
    %258 = vector.multi_reduction <maximumf>, %257, %cst_16 [0] : vector<4x16x80xf32> to vector<16x80xf32>
    %c3 = arith.constant 3 : index
    %c0_17 = arith.constant 0 : index
    %259 = vector.load %arg7[%c3, %c0_17] : memref<10x128xf32, #tpu.memory_space<vmem>>, vector<1x80xf32>
    %260 = vector.broadcast %259 : vector<1x80xf32> to vector<16x80xf32>
    %261 = arith.addf %258, %260 : vector<16x80xf32>
    %cst_18 = arith.constant 0.000000e+00 : f32
    %262 = vector.broadcast %cst_18 : f32 to vector<16x80xf32>
    %263 = arith.maximumf %261, %262 : vector<16x80xf32>
    %264 = vector.extract_strided_slice %263 {offsets = [0, 0], sizes = [2, 80], strides = [1, 1]} : vector<16x80xf32> to vector<2x80xf32>
    %265 = vector.extract_strided_slice %263 {offsets = [2, 0], sizes = [2, 80], strides = [1, 1]} : vector<16x80xf32> to vector<2x80xf32>
    %266 = vector.extract_strided_slice %263 {offsets = [4, 0], sizes = [2, 80], strides = [1, 1]} : vector<16x80xf32> to vector<2x80xf32>
    %267 = vector.extract_strided_slice %263 {offsets = [6, 0], sizes = [2, 80], strides = [1, 1]} : vector<16x80xf32> to vector<2x80xf32>
    %268 = vector.extract_strided_slice %263 {offsets = [8, 0], sizes = [2, 80], strides = [1, 1]} : vector<16x80xf32> to vector<2x80xf32>
    %269 = tpu.concatenate %264, %265, %266, %267, %268 in 1 : vector<2x80xf32>, vector<2x80xf32>, vector<2x80xf32>, vector<2x80xf32>, vector<2x80xf32> -> vector<2x400xf32>
    %c0_19 = arith.constant 0 : index
    %c0_20 = arith.constant 0 : index
    %270 = vector.load %arg4[%c0_19, %c0_20] : memref<400x120xf32, #tpu.memory_space<vmem>>, vector<400x120xf32>
    %c4 = arith.constant 4 : index
    %c0_21 = arith.constant 0 : index
    %271 = vector.load %arg7[%c4, %c0_21] : memref<10x128xf32, #tpu.memory_space<vmem>>, vector<1x120xf32>
    %272 = arith.mulf %270, %270 : vector<400x120xf32>
    %cst_22 = arith.constant dense<0.000000e+00> : vector<120xf32>
    %273 = vector.multi_reduction <add>, %272, %cst_22 [0] : vector<400x120xf32> to vector<120xf32>
    %274 = vector.shape_cast %273 : vector<120xf32> to vector<1x120xf32>
    %cst_23 = arith.constant 9.99999996E-13 : f32
    %275 = vector.broadcast %cst_23 : f32 to vector<1x120xf32>
    %276 = arith.maximumf %274, %275 : vector<1x120xf32>
    %277 = math.rsqrt %276 : vector<1x120xf32>
    %278 = arith.mulf %271, %277 : vector<1x120xf32>
    %279 = vector.broadcast %278 : vector<1x120xf32> to vector<400x120xf32>
    %280 = arith.mulf %270, %279 : vector<400x120xf32>
    %cst_24 = arith.constant dense<0.000000e+00> : vector<2x120xf32>
    %281 = tpu.matmul %269, %280, %cst_24 {dimension_numbers = #tpu.dot_dimension_numbers<[1], [0], [0], [1], [0, 0, 1, 1], [], []>} : vector<2x400xf32>, vector<400x120xf32>, vector<2x120xf32> -> vector<2x120xf32>
    %c5 = arith.constant 5 : index
    %c0_25 = arith.constant 0 : index
    %282 = vector.load %arg7[%c5, %c0_25] : memref<10x128xf32, #tpu.memory_space<vmem>>, vector<1x120xf32>
    %283 = vector.broadcast %282 : vector<1x120xf32> to vector<2x120xf32>
    %284 = arith.addf %281, %283 : vector<2x120xf32>
    %cst_26 = arith.constant 0.000000e+00 : f32
    %285 = vector.broadcast %cst_26 : f32 to vector<2x120xf32>
    %286 = arith.maximumf %284, %285 : vector<2x120xf32>
    %c0_27 = arith.constant 0 : index
    %c0_28 = arith.constant 0 : index
    %287 = vector.load %arg5[%c0_27, %c0_28] : memref<120x84xf32, #tpu.memory_space<vmem>>, vector<120x84xf32>
    %c6 = arith.constant 6 : index
    %c0_29 = arith.constant 0 : index
    %288 = vector.load %arg7[%c6, %c0_29] : memref<10x128xf32, #tpu.memory_space<vmem>>, vector<1x84xf32>
    %289 = arith.mulf %287, %287 : vector<120x84xf32>
    %cst_30 = arith.constant dense<0.000000e+00> : vector<84xf32>
    %290 = vector.multi_reduction <add>, %289, %cst_30 [0] : vector<120x84xf32> to vector<84xf32>
    %291 = vector.shape_cast %290 : vector<84xf32> to vector<1x84xf32>
    %cst_31 = arith.constant 9.99999996E-13 : f32
    %292 = vector.broadcast %cst_31 : f32 to vector<1x84xf32>
    %293 = arith.maximumf %291, %292 : vector<1x84xf32>
    %294 = math.rsqrt %293 : vector<1x84xf32>
    %295 = arith.mulf %288, %294 : vector<1x84xf32>
    %296 = vector.broadcast %295 : vector<1x84xf32> to vector<120x84xf32>
    %297 = arith.mulf %287, %296 : vector<120x84xf32>
    %cst_32 = arith.constant dense<0.000000e+00> : vector<2x84xf32>
    %298 = tpu.matmul %286, %297, %cst_32 {dimension_numbers = #tpu.dot_dimension_numbers<[1], [0], [0], [1], [0, 0, 1, 1], [], []>} : vector<2x120xf32>, vector<120x84xf32>, vector<2x84xf32> -> vector<2x84xf32>
    %c7 = arith.constant 7 : index
    %c0_33 = arith.constant 0 : index
    %299 = vector.load %arg7[%c7, %c0_33] : memref<10x128xf32, #tpu.memory_space<vmem>>, vector<1x84xf32>
    %300 = vector.broadcast %299 : vector<1x84xf32> to vector<2x84xf32>
    %301 = arith.addf %298, %300 : vector<2x84xf32>
    %cst_34 = arith.constant 0.000000e+00 : f32
    %302 = vector.broadcast %cst_34 : f32 to vector<2x84xf32>
    %303 = arith.maximumf %301, %302 : vector<2x84xf32>
    %c0_35 = arith.constant 0 : index
    %c0_36 = arith.constant 0 : index
    %304 = vector.load %arg6[%c0_35, %c0_36] : memref<84x10xf32, #tpu.memory_space<vmem>>, vector<84x10xf32>
    %c8 = arith.constant 8 : index
    %c0_37 = arith.constant 0 : index
    %305 = vector.load %arg7[%c8, %c0_37] : memref<10x128xf32, #tpu.memory_space<vmem>>, vector<1x10xf32>
    %306 = arith.mulf %304, %304 : vector<84x10xf32>
    %cst_38 = arith.constant dense<0.000000e+00> : vector<10xf32>
    %307 = vector.multi_reduction <add>, %306, %cst_38 [0] : vector<84x10xf32> to vector<10xf32>
    %308 = vector.shape_cast %307 : vector<10xf32> to vector<1x10xf32>
    %cst_39 = arith.constant 9.99999996E-13 : f32
    %309 = vector.broadcast %cst_39 : f32 to vector<1x10xf32>
    %310 = arith.maximumf %308, %309 : vector<1x10xf32>
    %311 = math.rsqrt %310 : vector<1x10xf32>
    %312 = arith.mulf %305, %311 : vector<1x10xf32>
    %313 = vector.broadcast %312 : vector<1x10xf32> to vector<84x10xf32>
    %314 = arith.mulf %304, %313 : vector<84x10xf32>
    %cst_40 = arith.constant dense<0.000000e+00> : vector<2x10xf32>
    %315 = tpu.matmul %303, %314, %cst_40 {dimension_numbers = #tpu.dot_dimension_numbers<[1], [0], [0], [1], [0, 0, 1, 1], [], []>} : vector<2x84xf32>, vector<84x10xf32>, vector<2x10xf32> -> vector<2x10xf32>
    %c9 = arith.constant 9 : index
    %c0_41 = arith.constant 0 : index
    %316 = vector.load %arg7[%c9, %c0_41] : memref<10x128xf32, #tpu.memory_space<vmem>>, vector<1x10xf32>
    %317 = vector.broadcast %316 : vector<1x10xf32> to vector<2x10xf32>
    %318 = arith.addf %315, %317 : vector<2x10xf32>
    %c0_42 = arith.constant 0 : index
    %c0_43 = arith.constant 0 : index
    %319 = vector.load %arg8[%c0_42, %c0_43] : memref<2x10xf32, #tpu.memory_space<vmem>>, vector<2x10xf32>
    tpu.vector_store %arg8[%c0_42, %c0_43], %318 {strides = array<i32>} : memref<2x10xf32, #tpu.memory_space<vmem>>, vector<2x10xf32>,
    return
  }
  func.func @transform_0(%arg0: i32) -> (i32, i32) {
    %c0_i32 = arith.constant 0 : i32
    %c0_i32_0 = arith.constant 0 : i32
    %c0_i32_1 = arith.constant 0 : i32
    return %c0_i32, %c0_i32_0 : i32, i32
  }
  func.func @transform_1(%arg0: i32) -> (i32, i32) {
    %c0_i32 = arith.constant 0 : i32
    %c0_i32_0 = arith.constant 0 : i32
    %c0_i32_1 = arith.constant 0 : i32
    return %c0_i32, %c0_i32_0 : i32, i32
  }
  func.func @transform_2(%arg0: i32) -> (i32, i32) {
    %c0_i32 = arith.constant 0 : i32
    %c0_i32_0 = arith.constant 0 : i32
    %c0_i32_1 = arith.constant 0 : i32
    return %c0_i32, %c0_i32_0 : i32, i32
  }
  func.func @transform_3(%arg0: i32) -> (i32, i32) {
    %c0_i32 = arith.constant 0 : i32
    %c0_i32_0 = arith.constant 0 : i32
    %c0_i32_1 = arith.constant 0 : i32
    return %c0_i32, %c0_i32_0 : i32, i32
  }
  func.func @transform_4(%arg0: i32) -> (i32, i32) {
    %c0_i32 = arith.constant 0 : i32
    %c0_i32_0 = arith.constant 0 : i32
    %c0_i32_1 = arith.constant 0 : i32
    return %c0_i32, %c0_i32_0 : i32, i32
  }
  func.func @transform_5(%arg0: i32) -> (i32, i32) {
    %c0_i32 = arith.constant 0 : i32
    %c0_i32_0 = arith.constant 0 : i32
    %c0_i32_1 = arith.constant 0 : i32
    return %c0_i32, %c0_i32_0 : i32, i32
  }
  func.func @transform_6(%arg0: i32) -> (i32, i32) {
    %c0_i32 = arith.constant 0 : i32
    %c0_i32_0 = arith.constant 0 : i32
    %c0_i32_1 = arith.constant 0 : i32
    return %c0_i32, %c0_i32_0 : i32, i32
  }
  func.func @transform_7(%arg0: i32) -> (i32, i32) {
    %c0_i32 = arith.constant 0 : i32
    %c0_i32_0 = arith.constant 0 : i32
    %c0_i32_1 = arith.constant 0 : i32
    return %c0_i32, %c0_i32_0 : i32, i32
  }
}

</mosaic_0001>

<bundles_post_ra>
// kernel: forward.1
= control target key start
LH: loop header
LB: loop body
LE: loop exit
PB: predicated region body
PF: predicated region fallthrough
CT: control target
= control target key end

     0   :  { %vm49_vm0 = vcmask 48128   ;;  %vm1274_vm1 = vcmask 613376   ;;  %vm67_vm2 = vcmask 43008   ;;  %vm1779_vm3 = vcmask 1044480   ;;  %s14836_s0 = inlined_call_operand.vmem [shape: bf16[2688,75], index: 0, kind: input, shape index: {}]   ;;  %s14837_s1 = inlined_call_operand.vmem [shape: f32[75,6], index: 1, kind: input, shape index: {}]   ;;  %s14838_s2 = inlined_call_operand.vmem [shape: f32[750,80], index: 2, kind: input, shape index: {}]   ;;  %s14839_s3 = inlined_call_operand.vmem [shape: f32[400,120], index: 3, kind: input, shape index: {}]   ;;  %s14840_s4 = inlined_call_operand.vmem [shape: f32[120,84], index: 4, kind: input, shape index: {}]   ;;  %s14841_s5 = inlined_call_operand.vmem [shape: f32[84,10], index: 5, kind: input, shape index: {}]   ;;  %s14842_s6 = inlined_call_operand.vmem [shape: f32[10,128], index: 6, kind: input, shape index: {}]   ;;  %s14843_s7 = inlined_call_operand.hbm [shape: f32[2,10], index: 7, kind: output, shape index: {}]  }
   0x1   :  { %v9070_v0 = vld [vmem:[%s14837_s1] sm:$0xff]  ;;  %v9075_v1 = vld [vmem:[%s14837_s1 + $0x8] sm:$0xff]  ;;  %v9080_v2 = vld [vmem:[%s14837_s1 + $0x10] sm:$0xff]  ;;  %v79_v47 = vlaneseq  ;;  %vm1780_vm4 = vcmask 1045504   ;;  %v8990_v49 = vmov 65535  }
   0x2   :  { %v9085_v3 = vld [vmem:[%s14837_s1 + $0x18] sm:$0xff]  ;;  %v9090_v4 = vld [vmem:[%s14837_s1 + $0x20] sm:$0xff]  ;;  %v39_v5 = vmul.f32 %v9070_v0, %v9070_v0  ;;  %v40_v6 = vmul.f32 %v9075_v1, %v9075_v1  ;;  %v41_v7 = vmul.f32 %v9080_v2, %v9080_v2  ;;  %v9101_v8 = vld [vmem:[%s14837_s1 + $0x28] sm:$0xff]  ;;  %v1781_v50 = vsel %vm1779_vm3, 4294967295, %v8990_v49 }
   0x3   :  { %v42_v9 = vmul.f32 %v9085_v3, %v9085_v3  ;;  %v43_v11 = vmul.f32 %v9090_v4, %v9090_v4  ;;  %v8695_v14 = vld [vmem:[%s14836_s0] sm:$0xff]   ;;  %v34_v15 = vld [vmem:[%s14837_s1 + $0x30] sm:$0xff]  ;;  %v44_v16 = vmul.f32 %v9101_v8, %v9101_v8  ;;  %v35_v19 = vld [vmem:[%s14837_s1 + $0x38] sm:$0xff]  ;;  %v80_v48 = vshrl.u32 %v79_v47, 7 }
   0x4   :  { %v50_v10 = vsel %vm49_vm0, %v39_v5, 0.0  ;;  %v51_v12 = vsel %vm49_vm0, %v40_v6, 0.0  ;;  %v53_v13 = vsel %vm49_vm0, %v41_v7, 0.0  ;;  %v45_v21 = vmul.f32 %v34_v15, %v34_v15  ;;  %7539 = vmatprep.mubr.msk.bf16.mxu0 %vm1274_vm1, %v8695_v14  ;;  %v36_v23 = vld [vmem:[%s14837_s1 + $0x40] sm:$0xff]  ;;  %v37_v27 = vld [vmem:[%s14837_s1 + $0x48] sm:$0x7] }
   0x5   :  { %v52_v17 = vadd.f32 %v51_v12, %v50_v10  ;;  %v55_v18 = vsel %vm49_vm0, %v42_v9, 0.0  ;;  %v57_v22 = vsel %vm49_vm0, %v43_v11, 0.0  ;;  %v59_v25 = vsel %vm49_vm0, %v44_v16, 0.0  ;;  %v38_v51 = vld [vmem:[%s14842_s6] sm:$0x1]  ;;  %v8698_v14 = vld [vmem:[%s14836_s0 + $0x18] sm:$0xff]  }
   0x6   :  { %v46_v26 = vmul.f32 %v35_v19, %v35_v19  ;;  %v47_v29 = vmul.f32 %v36_v23, %v36_v23  ;;  %v61_v30 = vsel %vm49_vm0, %v45_v21, 0.0  ;;  %v48_v32 = vmul.f32 %v37_v27, %v37_v27  ;;  %v8699_v16 = vld [vmem:[%s14836_s0 + $0x20] sm:$0xff]   ;;  %v8737_v21 = vld [vmem:[%s14836_s0 + $0x3b0] sm:$0xff]  }
   0x7   :  { %v54_v20 = vadd.f32 %v53_v13, %v52_v17  ;;  %v9137_v52 = vsub.s32 0, %v80_v48  ;;  %v1782_v54 = vsel %vm1780_vm4, %v1781_v50, 0  ;;  %v8733_v17 = vld [vmem:[%s14836_s0 + $0x3a0] sm:$0xff]  }
   0x8   :  { %v63_v33 = vsel %vm49_vm0, %v46_v26, 0.0  ;;  %v65_v35 = vsel %vm49_vm0, %v47_v29, 0.0  ;;  %v68_v37 = vsel %vm67_vm2, %v48_v32, 0.0  ;;  %v8704_v26 = vld [vmem:[%s14836_s0 + $0x48] sm:$0xff]   ;;  %v8745_v29 = vld [vmem:[%s14836_s0 + $0x3d0] sm:$0xff]   ;;  %v8707_v32 = vld [vmem:[%s14836_s0 + $0x60] sm:$0xff]  }
   0x9   :  { %v56_v24 = vadd.f32 %v55_v18, %v54_v20  ;;  %15015 = vst [vmem:[#allocation5_spill] sm:$0xff] %v9137_v52  ;;  %v8700_v18 = vld [vmem:[%s14836_s0 + $0x28] sm:$0xff]   ;;  %v8701_v20 = vld [vmem:[%s14836_s0 + $0x30] sm:$0xff]  }
   0xb   :  { %v58_v28 = vadd.f32 %v57_v22, %v56_v24  ;;  %v8702_v22 = vld [vmem:[%s14836_s0 + $0x38] sm:$0xff]   ;;  %v8703_v24 = vld [vmem:[%s14836_s0 + $0x40] sm:$0xff]  }
   0xd   :  { %v60_v31 = vadd.f32 %v59_v25, %v58_v28  ;;  %v8741_v25 = vld [vmem:[%s14836_s0 + $0x3c0] sm:$0xff]   ;;  %v8705_v28 = vld [vmem:[%s14836_s0 + $0x50] sm:$0xff]  }
   0xf   :  { %v62_v34 = vadd.f32 %v61_v30, %v60_v31  ;;  %v8706_v30 = vld [vmem:[%s14836_s0 + $0x58] sm:$0xff]  }
  0x10   :  { %v8746_v31 = vld [vmem:[%s14836_s0 + $0x3d8] sm:$0xff]  }
  0x11   :  { %v64_v36 = vadd.f32 %v63_v33, %v62_v34  ;;  %v8749_v33 = vld [vmem:[%s14836_s0 + $0x3e0] sm:$0xff]   ;;  %v8708_v34 = vld [vmem:[%s14836_s0 + $0x68] sm:$0xff]  }
  0x13   :  { %v66_v38 = vadd.f32 %v65_v35, %v64_v36  ;;  %v8750_v35 = vld [vmem:[%s14836_s0 + $0x3e8] sm:$0xff]   ;;  %v8709_v36 = vld [vmem:[%s14836_s0 + $0x70] sm:$0xff]  }
  0x15   :  { %v69_v39 = vadd.f32 %v68_v37, %v66_v38  ;;  %v8753_v37 = vld [vmem:[%s14836_s0 + $0x3f0] sm:$0xff]   ;;  %v8710_v38 = vld [vmem:[%s14836_s0 + $0x78] sm:$0xff]  }
  0x17   :  { %v70_v40 = vrot.slane %v69_v39, 4 }
  0x19   :  { %v71_v41 = vadd.f32 %v70_v40, %v69_v39  ;;  %v8754_v39 = vld [vmem:[%s14836_s0 + $0x3f8] sm:$0xff]   ;;  %v8711_v40 = vld [vmem:[%s14836_s0 + $0x80] sm:$0xff]  }
  0x1b   :  { %v72_v42 = vrot.slane %v71_v41, 2 }
  0x1d   :  { %v73_v43 = vadd.f32 %v72_v42, %v71_v41  ;;  %v8757_v41 = vld [vmem:[%s14836_s0 + $0x400] sm:$0xff]   ;;  %v8712_v42 = vld [vmem:[%s14836_s0 + $0x88] sm:$0xff]  }
  0x1f   :  { %v74_v44 = vrot.slane %v73_v43, 1 }
  0x21   :  { %v75_v45 = vadd.f32 %v74_v44, %v73_v43  ;;  %v8758_v43 = vld [vmem:[%s14836_s0 + $0x408] sm:$0xff]  }
  0x23   :  { %v76_v46 = vmax.f32 %v75_v45, 1e-12 }
  0x25   :  { %8863 = vrsqrt.f32 %v76_v46 }
  0x32   :  { %v8864_v53 = vpop.eup %8863 }
  0x33   :  { %v78_v55 = vmul.f32 %v8864_v53, %v38_v51 }
  0x35   :  { %v82_v56 = vrot.slane %v78_v55, %v9137_v52 }
  0x37   :  { %v91_v57 = vmul.f32 %v82_v56, %v36_v23  ;;  %v92_v58 = vmul.f32 %v82_v56, %v37_v27  ;;  %v89_v59 = vmul.f32 %v82_v56, %v34_v15  ;;  %v90_v60 = vmul.f32 %v82_v56, %v35_v19  ;;  %v8730_v15 = vld [vmem:[%s14836_s0 + $0x398] sm:$0xff]   ;;  %v8734_v19 = vld [vmem:[%s14836_s0 + $0x3a8] sm:$0xff]  }
  0x38   :  { %v83_v62 = vmul.f32 %v82_v56, %v9070_v0  ;;  %v84_v63 = vmul.f32 %v82_v56, %v9075_v1  ;;  %v87_v5 = vmul.f32 %v82_v56, %v9090_v4  ;;  %v88_v9 = vmul.f32 %v82_v56, %v9101_v8  ;;  %v8725_v0 = vld [vmem:[%s14836_s0 + $0x380] sm:$0xff]   ;;  %v8697_v4 = vld [vmem:[%s14836_s0 + $0x10] sm:$0xff]   ;;  %v8738_v23 = vld [vmem:[%s14836_s0 + $0x3b8] sm:$0xff]  }
  0x39   :  { %v97_v61 = vpack.c.bf16 %v92_v58, %v91_v57  ;;  %v96_v7 = vpack.c.bf16 %v90_v60, %v89_v59  ;;  %v85_v12 = vmul.f32 %v82_v56, %v9080_v2  ;;  %v86_v13 = vmul.f32 %v82_v56, %v9085_v3  ;;  %7763 = vmatprep.mubr.msk.bf16.mxu1 %vm1274_vm1, %v8725_v0  ;;  %v8696_v2 = vld [vmem:[%s14836_s0 + $0x8] sm:$0xff]   ;;  %v8729_v8 = vld [vmem:[%s14836_s0 + $0x390] sm:$0xff]  }
  0x3a   :  { %v93_v10 = vpack.c.bf16 %v84_v63, %v83_v62  ;;  %v95_v11 = vpack.c.bf16 %v88_v9, %v87_v5  ;;  %v8726_v3 = vld [vmem:[%s14836_s0 + $0x388] sm:$0xff]  }
  0x3b   :  { %v1784_v6 = vand.u32 %v1782_v54, %v97_v61  ;;  %v94_v1 = vpack.c.bf16 %v86_v13, %v85_v12  ;;  %v8742_v27 = vld [vmem:[%s14836_s0 + $0x3c8] sm:$0xff]  }
  0x3d   :  { %7529 = vmatprep.subr.bf16.mxu0 %v1784_v6  ;;  %7933 = vmatprep.subr.bf16.mxu1 %v1784_v6 }
  0x3e   :  { %7530 = vmatpush3.bf16.msra.mxu0 %v1784_v6  ;;  %7938 = vmatpush3.bf16.msra.mxu1 %v1784_v6 }
  0x3f   :  { %7531 = vmatprep.subr.bf16.mxu0 %v96_v7  ;;  %7934 = vmatprep.subr.bf16.mxu1 %v96_v7 }
  0x42   :  { %7532 = vmatpush3.bf16.msra.mxu0 %v96_v7  ;;  %7939 = vmatpush3.bf16.msra.mxu1 %v96_v7 }
  0x43   :  { %7533 = vmatprep.subr.bf16.mxu0 %v95_v11  ;;  %7935 = vmatprep.subr.bf16.mxu1 %v95_v11 }
  0x46   :  { %7534 = vmatpush3.bf16.msra.mxu0 %v95_v11  ;;  %7940 = vmatpush3.bf16.msra.mxu1 %v95_v11 }
  0x47   :  { %7535 = vmatprep.subr.bf16.mxu0 %v94_v1  ;;  %7936 = vmatprep.subr.bf16.mxu1 %v94_v1 }
  0x4a   :  { %7536 = vmatpush3.bf16.msra.mxu0 %v94_v1  ;;  %7941 = vmatpush3.bf16.msra.mxu1 %v94_v1 }
  0x4b   :  { %7537 = vmatprep.subr.bf16.mxu0 %v93_v10  ;;  %7937 = vmatprep.subr.bf16.mxu1 %v93_v10 }
  0x4e   :  { %7538 = vmatpush3.bf16.msra.mxu0 %v93_v10  ;;  %7942 = vmatpush3.bf16.msra.mxu1 %v93_v10 }
  0x51   :  { %7540 = vmatmul.mubr.msk.bf16.vlgmr.msra.gmra.mxu0 %vm1274_vm1, %v8696_v2  ;;  %7764 = vmatmul.mubr.msk.bf16.vlgmr.msra.gmra.mxu1 %vm1274_vm1, %v8726_v3 }
  0x52   :  { %7543 = vmatprep.mubr.msk.bf16.mxu0 %vm1274_vm1, %v8697_v4  ;;  %7767 = vmatprep.mubr.msk.bf16.mxu1 %vm1274_vm1, %v8729_v8 }
  0x59   :  { %7544 = vmatmul.mubr.msk.bf16.gmra.mxu0 %vm1274_vm1, %v8698_v14  ;;  %7768 = vmatmul.mubr.msk.bf16.gmra.mxu1 %vm1274_vm1, %v8730_v15 }
  0x5a   :  { %7547 = vmatprep.mubr.msk.bf16.mxu0 %vm1274_vm1, %v8699_v16  ;;  %7771 = vmatprep.mubr.msk.bf16.mxu1 %vm1274_vm1, %v8733_v17 }
  0x61   :  { %7548 = vmatmul.mubr.msk.bf16.gmra.mxu0 %vm1274_vm1, %v8700_v18  ;;  %7772 = vmatmul.mubr.msk.bf16.gmra.mxu1 %vm1274_vm1, %v8734_v19 }
  0x62   :  { %7551 = vmatprep.mubr.msk.bf16.mxu0 %vm1274_vm1, %v8701_v20  ;;  %7775 = vmatprep.mubr.msk.bf16.mxu1 %vm1274_vm1, %v8737_v21 }
  0x69   :  { %7552 = vmatmul.mubr.msk.bf16.gmra.mxu0 %vm1274_vm1, %v8702_v22  ;;  %7776 = vmatmul.mubr.msk.bf16.gmra.mxu1 %vm1274_vm1, %v8738_v23 }
  0x6a   :  { %7555 = vmatprep.mubr.msk.bf16.mxu0 %vm1274_vm1, %v8703_v24  ;;  %7779 = vmatprep.mubr.msk.bf16.mxu1 %vm1274_vm1, %v8741_v25 }
  0x71   :  { %7556 = vmatmul.mubr.msk.bf16.gmra.mxu0 %vm1274_vm1, %v8704_v26  ;;  %7780 = vmatmul.mubr.msk.bf16.gmra.mxu1 %vm1274_vm1, %v8742_v27 }
  0x72   :  { %7559 = vmatprep.mubr.msk.bf16.mxu0 %vm1274_vm1, %v8705_v28  ;;  %7783 = vmatprep.mubr.msk.bf16.mxu1 %vm1274_vm1, %v8745_v29 }
  0x79   :  { %7560 = vmatmul.mubr.msk.bf16.gmra.mxu0 %vm1274_vm1, %v8706_v30  ;;  %7784 = vmatmul.mubr.msk.bf16.gmra.mxu1 %vm1274_vm1, %v8746_v31 }
  0x7a   :  { %7563 = vmatprep.mubr.msk.bf16.mxu0 %vm1274_vm1, %v8707_v32  ;;  %7787 = vmatprep.mubr.msk.bf16.mxu1 %vm1274_vm1, %v8749_v33 }
  0x81   :  { %7564 = vmatmul.mubr.msk.bf16.gmra.mxu0 %vm1274_vm1, %v8708_v34  ;;  %7788 = vmatmul.mubr.msk.bf16.gmra.mxu1 %vm1274_vm1, %v8750_v35 }
  0x82   :  { %7567 = vmatprep.mubr.msk.bf16.mxu0 %vm1274_vm1, %v8709_v36  ;;  %7791 = vmatprep.mubr.msk.bf16.mxu1 %vm1274_vm1, %v8753_v37 }
  0x89   :  { %7568 = vmatmul.mubr.msk.bf16.gmra.mxu0 %vm1274_vm1, %v8710_v38  ;;  %7792 = vmatmul.mubr.msk.bf16.gmra.mxu1 %vm1274_vm1, %v8754_v39 }
  0x8a   :  { %7571 = vmatprep.mubr.msk.bf16.mxu0 %vm1274_vm1, %v8711_v40  ;;  %7795 = vmatprep.mubr.msk.bf16.mxu1 %vm1274_vm1, %v8757_v41 }
  0x8b   :  { %12 = vsyncpa [#allocation3], 0  ;;  %v8713_v44 = vld [vmem:[%s14836_s0 + $0x90] sm:$0xff]   ;;  %v8714_v46 = vld [vmem:[%s14836_s0 + $0x98] sm:$0xff]   ;;  %s8991_s23 = smov 24   ;;  %s8992_s24 = smov 30  }
  0x8c   :  { %v8761_v45 = vld [vmem:[%s14836_s0 + $0x410] sm:$0xff]   ;;  %v8762_v47 = vld [vmem:[%s14836_s0 + $0x418] sm:$0xff]   ;;  %v8715_v48 = vld [vmem:[%s14836_s0 + $0xa0] sm:$0xff]   ;;  %s8993_s25 = smov 36   ;;  %s8994_s26 = smov 6   ;;  %vm5516_vm5 = vcmask 654336  }
  0x8d   :  { %v8765_v49 = vld [vmem:[%s14836_s0 + $0x420] sm:$0xff]   ;;  %v8716_v50 = vld [vmem:[%s14836_s0 + $0xa8] sm:$0xff]   ;;  %v8717_v53 = vld [vmem:[%s14836_s0 + $0xb0] sm:$0xff]   ;;  %s8995_s8 = smov 12   ;;  %vm4224_vm6 = vcmask 97280   ;;  %vm4237_vm7 = vcmask 146432  }
  0x8e   :  { %v8766_v51 = vld [vmem:[%s14836_s0 + $0x428] sm:$0xff]   ;;  %v8769_v54 = vld [vmem:[%s14836_s0 + $0x430] sm:$0xff]   ;;  %v8718_v55 = vld [vmem:[%s14836_s0 + $0xb8] sm:$0xff]   ;;  %vm4250_vm8 = vcmask 195584   ;;  %vm4263_vm9 = vcmask 244736   ;;  %vm4276_vm10 = vcmask 293888  }
  0x8f   :  { %v8770_v56 = vld [vmem:[%s14836_s0 + $0x438] sm:$0xff]   ;;  %v8719_v57 = vld [vmem:[%s14836_s0 + $0xc0] sm:$0xff]   ;;  %v8720_v59 = vld [vmem:[%s14836_s0 + $0xc8] sm:$0xff]   ;;  %s8998_s1 = smov 54   ;;  %s8999_s27 = smov 76   ;;  %vm5702_vm11 = vcmask 652288  }
  0x90   :  { %v8773_v58 = vld [vmem:[%s14836_s0 + $0x440] sm:$0xff]   ;;  %v8774_v60 = vld [vmem:[%s14836_s0 + $0x448] sm:$0xff]   ;;  %v8721_v61 = vld [vmem:[%s14836_s0 + $0xd0] sm:$0xff]   ;;  %s9000_s30 = smov 120   ;;  %s9001_s12 = smov 48   ;;  %vm4941_vm12 = vcmask 1043456  }
  0x91   :  { %7572 = vmatmul.mubr.msk.bf16.gmra.mxu0 %vm1274_vm1, %v8712_v42  ;;  %7796 = vmatmul.mubr.msk.bf16.gmra.mxu1 %vm1274_vm1, %v8758_v43  ;;  %v8777_v62 = vld [vmem:[%s14836_s0 + $0x450] sm:$0xff]   ;;  %v8722_v63 = vld [vmem:[%s14836_s0 + $0xd8] sm:$0xff]   ;;  %v8723_v6 = vld [vmem:[%s14836_s0 + $0xe0] sm:$0xff]   ;;  %s9002_s15 = smov 52   ;;  %s9003_s20 = smov 106   ;;  %vm4403_vm13 = vcmask 490496  }
  0x92   :  { %7575 = vmatprep.mubr.msk.bf16.mxu0 %vm1274_vm1, %v8713_v44  ;;  %7799 = vmatprep.mubr.msk.bf16.mxu1 %vm1274_vm1, %v8761_v45  ;;  %v8778_v5 = vld [vmem:[%s14836_s0 + $0x458] sm:$0xff]   ;;  %v8781_v7 = vld [vmem:[%s14836_s0 + $0x460] sm:$0xff]   ;;  %v8724_v9 = vld [vmem:[%s14836_s0 + $0xe8] sm:$0xff]   ;;  %s9005_s29 = smov 22   ;;  %s9006_s18 = smov 84   ;;  %vm4406_vm14 = vcmask 736256  }
  0x93   :  { %v8782_v10 = vld [vmem:[%s14836_s0 + $0x468] sm:$0xff]   ;;  %v8727_v11 = vld [vmem:[%s14836_s0 + $0xf0] sm:$0xff]   ;;  %v8728_v13 = vld [vmem:[%s14836_s0 + $0xf8] sm:$0xff]   ;;  %s9007_s11 = smov 122   ;;  %s9011_s9 = smov 2   ;;  %vm4409_vm15 = vcmask 982016  }
  0x94   :  { %v8785_v12 = vld [vmem:[%s14836_s0 + $0x470] sm:$0xff]   ;;  %v8786_v0 = vld [vmem:[%s14836_s0 + $0x478] sm:$0xff]   ;;  %v8731_v1 = vld [vmem:[%s14836_s0 + $0x100] sm:$0xff]   ;;  %s9012_s10 = smov 44   ;;  %s9014_s16 = smov 70   ;;  %vm4415_vm2 = vcmask 424960  }
  0x95   :  { %v8789_v2 = vld [vmem:[%s14836_s0 + $0x480] sm:$0xff]   ;;  %v8732_v3 = vld [vmem:[%s14836_s0 + $0x108] sm:$0xff]   ;;  %v8735_v8 = vld [vmem:[%s14836_s0 + $0x110] sm:$0xff]   ;;  %s9015_s14 = smov 66   ;;  %vm4418_vm3 = vcmask 670720   ;;  %s9018_s19 = smov 96  }
  0x96   :  { %v8790_v4 = vld [vmem:[%s14836_s0 + $0x488] sm:$0xff]   ;;  %v8793_v14 = vld [vmem:[%s14836_s0 + $0x490] sm:$0xff]   ;;  %v8736_v15 = vld [vmem:[%s14836_s0 + $0x118] sm:$0xff]   ;;  %s9026_s28 = smov [#allocation2]  }
  0x97   :  { %v8794_v16 = vld [vmem:[%s14836_s0 + $0x498] sm:$0xff]   ;;  %v8739_v17 = vld [vmem:[%s14836_s0 + $0x120] sm:$0xff]   ;;  %v8740_v19 = vld [vmem:[%s14836_s0 + $0x128] sm:$0xff]   ;;  %s6856_s13 = sshll.u32 %s9026_s28, 4  ;;  %s6857_s13 = int_to_ptr.vmem [resolvable:$true] %s6856_s13 }
  0x98   :  { %v8797_v18 = vld [vmem:[%s14836_s0 + $0x4a0] sm:$0xff]   ;;  %v8798_v20 = vld [vmem:[%s14836_s0 + $0x4a8] sm:$0xff]   ;;  %v8743_v21 = vld [vmem:[%s14836_s0 + $0x130] sm:$0xff]   ;;  %p8973_p1 = scmp.lt.s32.totalorder %s6857_s13, %s6857_s13 }
  0x99   :  { %7576 = vmatmul.mubr.msk.bf16.gmra.mxu0 %vm1274_vm1, %v8714_v46  ;;  %7800 = vmatmul.mubr.msk.bf16.gmra.mxu1 %vm1274_vm1, %v8762_v47  ;;  %v8801_v22 = vld [vmem:[%s14836_s0 + $0x4b0] sm:$0xff]   ;;  %v8744_v23 = vld [vmem:[%s14836_s0 + $0x138] sm:$0xff]   ;;  %v8747_v25 = vld [vmem:[%s14836_s0 + $0x140] sm:$0xff]  }
  0x9a   :  { %7579 = vmatprep.mubr.msk.bf16.mxu0 %vm1274_vm1, %v8715_v48  ;;  %7803 = vmatprep.mubr.msk.bf16.mxu1 %vm1274_vm1, %v8765_v49  ;;  %v8802_v24 = vld [vmem:[%s14836_s0 + $0x4b8] sm:$0xff]   ;;  %v8805_v26 = vld [vmem:[%s14836_s0 + $0x4c0] sm:$0xff]   ;;  %v8748_v27 = vld [vmem:[%s14836_s0 + $0x148] sm:$0xff]  }
  0x9b   :  { %v8806_v28 = vld [vmem:[%s14836_s0 + $0x4c8] sm:$0xff]   ;;  %v8751_v29 = vld [vmem:[%s14836_s0 + $0x150] sm:$0xff]   ;;  %v8752_v31 = vld [vmem:[%s14836_s0 + $0x158] sm:$0xff]  }
  0x9c   :  { %v8809_v30 = vld [vmem:[%s14836_s0 + $0x4d0] sm:$0xff]   ;;  %v8810_v32 = vld [vmem:[%s14836_s0 + $0x4d8] sm:$0xff]   ;;  %v8755_v33 = vld [vmem:[%s14836_s0 + $0x160] sm:$0xff]  }
  0x9d   :  { %v8813_v34 = vld [vmem:[%s14836_s0 + $0x4e0] sm:$0xff]   ;;  %v8756_v35 = vld [vmem:[%s14836_s0 + $0x168] sm:$0xff]   ;;  %v8759_v37 = vld [vmem:[%s14836_s0 + $0x170] sm:$0xff]  }
  0x9e   :  { %v8814_v36 = vld [vmem:[%s14836_s0 + $0x4e8] sm:$0xff]   ;;  %v8817_v38 = vld [vmem:[%s14836_s0 + $0x4f0] sm:$0xff]   ;;  %v8760_v39 = vld [vmem:[%s14836_s0 + $0x178] sm:$0xff]  }
  0x9f   :  { %v8818_v40 = vld [vmem:[%s14836_s0 + $0x4f8] sm:$0xff]   ;;  %v8763_v41 = vld [vmem:[%s14836_s0 + $0x180] sm:$0xff]   ;;  %v8764_v43 = vld [vmem:[%s14836_s0 + $0x188] sm:$0xff]  }
  0xa0   :  { %v8821_v42 = vld [vmem:[%s14836_s0 + $0x500] sm:$0xff]   ;;  %v8822_v44 = vld [vmem:[%s14836_s0 + $0x508] sm:$0xff]   ;;  %v8767_v45 = vld [vmem:[%s14836_s0 + $0x190] sm:$0xff]  }
  0xa1   :  { %7580 = vmatmul.mubr.msk.bf16.gmra.mxu0 %vm1274_vm1, %v8716_v50  ;;  %7804 = vmatmul.mubr.msk.bf16.gmra.mxu1 %vm1274_vm1, %v8766_v51  ;;  %v8825_v46 = vld [vmem:[%s14836_s0 + $0x510] sm:$0xff]   ;;  %v8796_v52 = vld [vmem:[%s14836_s0 + $0x208] sm:$0xff]  }
  0xa2   :  { %7583 = vmatprep.mubr.msk.bf16.mxu0 %vm1274_vm1, %v8717_v53  ;;  %7807 = vmatprep.mubr.msk.bf16.mxu1 %vm1274_vm1, %v8769_v54  ;;  %v8768_v53 = vld [vmem:[%s14836_s0 + $0x198] sm:$0xff]  }
  0xa9   :  { %7584 = vmatmul.mubr.msk.bf16.gmra.mxu0 %vm1274_vm1, %v8718_v55  ;;  %7808 = vmatmul.mubr.msk.bf16.gmra.mxu1 %vm1274_vm1, %v8770_v56  ;;  %v8826_v55 = vld [vmem:[%s14836_s0 + $0x518] sm:$0xff]   ;;  %v8771_v56 = vld [vmem:[%s14836_s0 + $0x1a0] sm:$0xff]  }
  0xaa   :  { %7587 = vmatprep.mubr.msk.bf16.mxu0 %vm1274_vm1, %v8719_v57  ;;  %7811 = vmatprep.mubr.msk.bf16.mxu1 %vm1274_vm1, %v8773_v58  ;;  %v8829_v57 = vld [vmem:[%s14836_s0 + $0x520] sm:$0xff]  }
  0xb1   :  { %7588 = vmatmul.mubr.msk.bf16.gmra.mxu0 %vm1274_vm1, %v8720_v59  ;;  %7812 = vmatmul.mubr.msk.bf16.gmra.mxu1 %vm1274_vm1, %v8774_v60 }
  0xb2   :  { %7591 = vmatprep.mubr.msk.bf16.mxu0 %vm1274_vm1, %v8721_v61  ;;  %7815 = vmatprep.mubr.msk.bf16.mxu1 %vm1274_vm1, %v8777_v62 }
  0xb9   :  { %7592 = vmatmul.mubr.msk.bf16.gmra.mxu0 %vm1274_vm1, %v8722_v63  ;;  %7816 = vmatmul.mubr.msk.bf16.gmra.mxu1 %vm1274_vm1, %v8778_v5 }
  0xba   :  { %7595 = vmatprep.mubr.msk.bf16.mxu0 %vm1274_vm1, %v8723_v6  ;;  %7819 = vmatprep.mubr.msk.bf16.mxu1 %vm1274_vm1, %v8781_v7  ;;  %v8772_v6 = vld [vmem:[%s14836_s0 + $0x1a8] sm:$0xff]  }
  0xc1   :  { %7596 = vmatmul.mubr.msk.bf16.gmra.mxu0 %vm1274_vm1, %v8724_v9  ;;  %7820 = vmatmul.mubr.msk.bf16.gmra.mxu1 %vm1274_vm1, %v8782_v10  ;;  %v8830_v9 = vld [vmem:[%s14836_s0 + $0x528] sm:$0xff]   ;;  %v8775_v10 = vld [vmem:[%s14836_s0 + $0x1b0] sm:$0xff]  }
  0xc2   :  { %7599 = vmatprep.mubr.msk.bf16.mxu0 %vm1274_vm1, %v8727_v11  ;;  %7823 = vmatprep.mubr.msk.bf16.mxu1 %vm1274_vm1, %v8785_v12  ;;  %v8833_v11 = vld [vmem:[%s14836_s0 + $0x530] sm:$0xff]  }
  0xc9   :  { %7600 = vmatmul.mubr.msk.bf16.gmra.mxu0 %vm1274_vm1, %v8728_v13  ;;  %7824 = vmatmul.mubr.msk.bf16.gmra.mxu1 %vm1274_vm1, %v8786_v0 }
  0xca   :  { %7603 = vmatprep.mubr.msk.bf16.mxu0 %vm1274_vm1, %v8731_v1  ;;  %7827 = vmatprep.mubr.msk.bf16.mxu1 %vm1274_vm1, %v8789_v2 }
  0xd1   :  { %7604 = vmatmul.mubr.msk.bf16.gmra.mxu0 %vm1274_vm1, %v8732_v3  ;;  %7828 = vmatmul.mubr.msk.bf16.gmra.mxu1 %vm1274_vm1, %v8790_v4 }
  0xd2   :  { %7607 = vmatprep.mubr.msk.bf16.mxu0 %vm1274_vm1, %v8735_v8  ;;  %7831 = vmatprep.mubr.msk.bf16.mxu1 %vm1274_vm1, %v8793_v14  ;;  %v8776_v8 = vld [vmem:[%s14836_s0 + $0x1b8] sm:$0xff]  }
  0xd9   :  { %7608 = vmatmul.mubr.msk.bf16.gmra.mxu0 %vm1274_vm1, %v8736_v15  ;;  %7832 = vmatmul.mubr.msk.bf16.gmra.mxu1 %vm1274_vm1, %v8794_v16  ;;  %v8834_v15 = vld [vmem:[%s14836_s0 + $0x538] sm:$0xff]   ;;  %v8779_v16 = vld [vmem:[%s14836_s0 + $0x1c0] sm:$0xff]  }
  0xda   :  { %7611 = vmatprep.mubr.msk.bf16.mxu0 %vm1274_vm1, %v8739_v17  ;;  %7835 = vmatprep.mubr.msk.bf16.mxu1 %vm1274_vm1, %v8797_v18 }
  0xe1   :  { %7612 = vmatmul.mubr.msk.bf16.gmra.mxu0 %vm1274_vm1, %v8740_v19  ;;  %7836 = vmatmul.mubr.msk.bf16.gmra.mxu1 %vm1274_vm1, %v8798_v20 }
  0xe2   :  { %7615 = vmatprep.mubr.msk.bf16.mxu0 %vm1274_vm1, %v8743_v21  ;;  %7839 = vmatprep.mubr.msk.bf16.mxu1 %vm1274_vm1, %v8801_v22 }
  0xe9   :  { %7616 = vmatmul.mubr.msk.bf16.gmra.mxu0 %vm1274_vm1, %v8744_v23  ;;  %7840 = vmatmul.mubr.msk.bf16.gmra.mxu1 %vm1274_vm1, %v8802_v24  ;;  %v8780_v24 = vld [vmem:[%s14836_s0 + $0x1c8] sm:$0xff]  }
  0xea   :  { %7619 = vmatprep.mubr.msk.bf16.mxu0 %vm1274_vm1, %v8747_v25  ;;  %7843 = vmatprep.mubr.msk.bf16.mxu1 %vm1274_vm1, %v8805_v26  ;;  %v8783_v26 = vld [vmem:[%s14836_s0 + $0x1d0] sm:$0xff]  }
  0xf1   :  { %7620 = vmatmul.mubr.msk.bf16.gmra.mxu0 %vm1274_vm1, %v8748_v27  ;;  %7844 = vmatmul.mubr.msk.bf16.gmra.mxu1 %vm1274_vm1, %v8806_v28 }
  0xf2   :  { %7623 = vmatprep.mubr.msk.bf16.mxu0 %vm1274_vm1, %v8751_v29  ;;  %7847 = vmatprep.mubr.msk.bf16.mxu1 %vm1274_vm1, %v8809_v30 }
  0xf9   :  { %7624 = vmatmul.mubr.msk.bf16.gmra.mxu0 %vm1274_vm1, %v8752_v31  ;;  %7848 = vmatmul.mubr.msk.bf16.gmra.mxu1 %vm1274_vm1, %v8810_v32 }
  0xfa   :  { %7627 = vmatprep.mubr.msk.bf16.mxu0 %vm1274_vm1, %v8755_v33  ;;  %7851 = vmatprep.mubr.msk.bf16.mxu1 %vm1274_vm1, %v8813_v34  ;;  %v8784_v34 = vld [vmem:[%s14836_s0 + $0x1d8] sm:$0xff]  }
 0x101   :  { %7628 = vmatmul.mubr.msk.bf16.gmra.mxu0 %vm1274_vm1, %v8756_v35  ;;  %7852 = vmatmul.mubr.msk.bf16.gmra.mxu1 %vm1274_vm1, %v8814_v36  ;;  %v8787_v36 = vld [vmem:[%s14836_s0 + $0x1e0] sm:$0xff]  }
 0x102   :  { %7631 = vmatprep.mubr.msk.bf16.mxu0 %vm1274_vm1, %v8759_v37  ;;  %7855 = vmatprep.mubr.msk.bf16.mxu1 %vm1274_vm1, %v8817_v38 }
 0x109   :  { %7632 = vmatmul.mubr.msk.bf16.gmra.mxu0 %vm1274_vm1, %v8760_v39  ;;  %7856 = vmatmul.mubr.msk.bf16.gmra.mxu1 %vm1274_vm1, %v8818_v40 }
 0x10a   :  { %7635 = vmatprep.mubr.msk.bf16.mxu0 %vm1274_vm1, %v8763_v41  ;;  %7859 = vmatprep.mubr.msk.bf16.mxu1 %vm1274_vm1, %v8821_v42 }
 0x111   :  { %v9547_v47 = vpop.f32.mrf.mxu0  ;;  %7636 = vmatmul.mubr.msk.bf16.gmra.mxu0 %vm1274_vm1, %v8764_v43  ;;  %v9550_v48 = vpop.f32.mrf.mxu1  ;;  %7860 = vmatmul.mubr.msk.bf16.gmra.mxu1 %vm1274_vm1, %v8822_v44  ;;  %v8788_v44 = vld [vmem:[%s14836_s0 + $0x1e8] sm:$0xff]  }
 0x112   :  { %7639 = vmatprep.mubr.msk.bf16.mxu0 %vm1274_vm1, %v8767_v45  ;;  %7863 = vmatprep.mubr.msk.bf16.mxu1 %vm1274_vm1, %v8825_v46  ;;  %v8791_v46 = vld [vmem:[%s14836_s0 + $0x1f0] sm:$0xff]  }
 0x113   :  { %v9555_v49 = vpop.f32.mrf.mxu0  ;;  %v9557_v50 = vpop.f32.mrf.mxu1 }
 0x114   :  { %15016 = vst [vmem:[#allocation6_spill] sm:$0xff] %v9557_v50 }
 0x115   :  { %v9559_v51 = vpop.f32.mrf.mxu0  ;;  %v9564_v54 = vpop.f32.mrf.mxu1 }
 0x116   :  { %15017 = vst [vmem:[#allocation7_spill] sm:$0xff] %v9564_v54 }
 0x117   :  { %v9575_v58 = vpop.f32.mrf.mxu0  ;;  %v9577_v59 = vpop.f32.mrf.mxu1 }
 0x118   :  { %15018 = vst [vmem:[#allocation8_spill] sm:$0xff] %v9577_v59  ;;  %v8820_v59 = vld [vmem:[%s14836_s0 + $0x268] sm:$0xff]  }
 0x119   :  { %v9579_v60 = vpop.f32.mrf.mxu0  ;;  %7640 = vmatmul.mubr.msk.bf16.gmra.mxu0 %vm1274_vm1, %v8768_v53  ;;  %v9582_v61 = vpop.f32.mrf.mxu1  ;;  %7864 = vmatmul.mubr.msk.bf16.gmra.mxu1 %vm1274_vm1, %v8826_v55 }
 0x11a   :  { %15019 = vst [vmem:[#allocation9_spill] sm:$0xff] %v9582_v61  ;;  %7643 = vmatprep.mubr.msk.bf16.mxu0 %vm1274_vm1, %v8771_v56  ;;  %7867 = vmatprep.mubr.msk.bf16.mxu1 %vm1274_vm1, %v8829_v57 }
 0x11b   :  { %v9587_v62 = vpop.f32.mrf.mxu0  ;;  %v9589_v63 = vpop.f32.mrf.mxu1 }
 0x11c   :  { %15020 = vst [vmem:[#allocation10_spill] sm:$0xff] %v9589_v63 }
 0x11d   :  { %v9591_v5 = vpop.f32.mrf.mxu0  ;;  %v9596_v7 = vpop.f32.mrf.mxu1 }
 0x11e   :  { %15021 = vst [vmem:[#allocation11_spill] sm:$0xff] %v9596_v7 }
 0x11f   :  { %v9607_v12 = vpop.f32.mrf.mxu0  ;;  %v9609_v13 = vpop.f32.mrf.mxu1 }
 0x120   :  { %15022 = vst [vmem:[#allocation12_spill] sm:$0xff] %v9609_v13  ;;  %v8816_v13 = vld [vmem:[%s14836_s0 + $0x258] sm:$0xff]  }
 0x121   :  { %v9611_v0 = vpop.f32.mrf.mxu0  ;;  %7644 = vmatmul.mubr.msk.bf16.gmra.mxu0 %vm1274_vm1, %v8772_v6  ;;  %v9614_v1 = vpop.f32.mrf.mxu1  ;;  %7868 = vmatmul.mubr.msk.bf16.gmra.mxu1 %vm1274_vm1, %v8830_v9 }
 0x122   :  { %15023 = vst [vmem:[#allocation13_spill] sm:$0xff] %v9614_v1  ;;  %7647 = vmatprep.mubr.msk.bf16.mxu0 %vm1274_vm1, %v8775_v10  ;;  %7871 = vmatprep.mubr.msk.bf16.mxu1 %vm1274_vm1, %v8833_v11  ;;  %v8792_v11 = vld [vmem:[%s14836_s0 + $0x1f8] sm:$0xff]  }
 0x123   :  { %v9619_v2 = vpop.f32.mrf.mxu0  ;;  %v9621_v3 = vpop.f32.mrf.mxu1 }
 0x124   :  { %15024 = vst [vmem:[#allocation14_spill] sm:$0xff] %v9621_v3 }
 0x125   :  { %v9623_v4 = vpop.f32.mrf.mxu0  ;;  %v9628_v14 = vpop.f32.mrf.mxu1 }
 0x126   :  { %15025 = vst [vmem:[#allocation15_spill] sm:$0xff] %v9628_v14 }
 0x127   :  { %v9636_v17 = vpop.f32.mrf.mxu0  ;;  %v9638_v18 = vpop.f32.mrf.mxu1 }
 0x128   :  { %15026 = vst [vmem:[#allocation16_spill] sm:$0xff] %v9638_v18  ;;  %v8812_v18 = vld [vmem:[%s14836_s0 + $0x248] sm:$0xff]  }
 0x129   :  { %v9640_v19 = vpop.f32.mrf.mxu0  ;;  %7648 = vmatmul.mubr.msk.bf16.gmra.mxu0 %vm1274_vm1, %v8776_v8  ;;  %v9643_v20 = vpop.f32.mrf.mxu1  ;;  %7872 = vmatmul.mubr.msk.bf16.gmra.mxu1 %vm1274_vm1, %v8834_v15  ;;  %v8795_v15 = vld [vmem:[%s14836_s0 + $0x200] sm:$0xff]  }
 0x12a   :  { %15027 = vst [vmem:[#allocation17_spill] sm:$0xff] %v9643_v20  ;;  %7651 = vmatprep.mubr.msk.bf16.mxu0 %vm1274_vm1, %v8779_v16 }
 0x12b   :  { %v9647_v21 = vpop.f32.mrf.mxu0  ;;  %v9649_v22 = vpop.f32.mrf.mxu1 }
 0x12c   :  { %15028 = vst [vmem:[#allocation18_spill] sm:$0xff] %v9649_v22 }
 0x12d   :  { %v9651_v23 = vpop.f32.mrf.mxu0  ;;  %v9656_v25 = vpop.f32.mrf.mxu1 }
 0x12e   :  { %15029 = vst [vmem:[#allocation19_spill] sm:$0xff] %v9656_v25 }
 0x12f   :  { %v9661_v27 = vpop.f32.mrf.mxu0  ;;  %v9663_v28 = vpop.f32.mrf.mxu1 }
 0x130   :  { %15030 = vst [vmem:[#allocation20_spill] sm:$0xff] %v9663_v28  ;;  %v8808_v28 = vld [vmem:[%s14836_s0 + $0x238] sm:$0xff]  }
 0x131   :  { %v9665_v29 = vpop.f32.mrf.mxu0  ;;  %7652 = vmatmul.mubr.msk.bf16.gmra.mxu0 %vm1274_vm1, %v8780_v24  ;;  %v9668_v30 = vpop.f32.mrf.mxu1 }
 0x132   :  { %15031 = vst [vmem:[#allocation21_spill] sm:$0xff] %v9668_v30  ;;  %7655 = vmatprep.mubr.msk.bf16.mxu0 %vm1274_vm1, %v8783_v26 }
 0x133   :  { %v9671_v31 = vpop.f32.mrf.mxu0  ;;  %v9673_v32 = vpop.f32.mrf.mxu1 }
 0x134   :  { %15032 = vst [vmem:[#allocation22_spill] sm:$0xff] %v9673_v32 }
 0x135   :  { %v9675_v33 = vpop.f32.mrf.mxu0  ;;  %v9680_v35 = vpop.f32.mrf.mxu1 }
 0x136   :  { %15033 = vst [vmem:[#allocation23_spill] sm:$0xff] %v9680_v35 }
 0x137   :  { %v9685_v37 = vpop.f32.mrf.mxu0  ;;  %v9687_v38 = vpop.f32.mrf.mxu1 }
 0x138   :  { %15034 = vst [vmem:[#allocation24_spill] sm:$0xff] %v9687_v38  ;;  %v8804_v38 = vld [vmem:[%s14836_s0 + $0x228] sm:$0xff]  }
 0x139   :  { %v9689_v39 = vpop.f32.mrf.mxu0  ;;  %7656 = vmatmul.mubr.msk.bf16.gmra.mxu0 %vm1274_vm1, %v8784_v34  ;;  %v9692_v40 = vpop.f32.mrf.mxu1 }
 0x13a   :  { %15035 = vst [vmem:[#allocation25_spill] sm:$0xff] %v9692_v40  ;;  %7659 = vmatprep.mubr.msk.bf16.mxu0 %vm1274_vm1, %v8787_v36 }
 0x13b   :  { %v9695_v41 = vpop.f32.mrf.mxu0  ;;  %v9697_v42 = vpop.f32.mrf.mxu1 }
 0x13c   :  { %15036 = vst [vmem:[#allocation26_spill] sm:$0xff] %v9697_v42 }
 0x13d   :  { %v9699_v43 = vpop.f32.mrf.mxu0  ;;  %v9704_v45 = vpop.f32.mrf.mxu1 }
 0x13e   :  { %15037 = vst [vmem:[#allocation27_spill] sm:$0xff] %v9704_v45 }
 0x13f   :  { %v9709_v53 = vpop.f32.mrf.mxu0  ;;  %v9711_v55 = vpop.f32.mrf.mxu1 }
 0x140   :  { %15038 = vst [vmem:[#allocation28_spill] sm:$0xff] %v9711_v55  ;;  %v8800_v55 = vld [vmem:[%s14836_s0 + $0x218] sm:$0xff]  }
 0x141   :  { %v9713_v56 = vpop.f32.mrf.mxu0  ;;  %7660 = vmatmul.mubr.msk.bf16.gmra.mxu0 %vm1274_vm1, %v8788_v44  ;;  %v9716_v57 = vpop.f32.mrf.mxu1 }
 0x142   :  { %15039 = vst [vmem:[#allocation29_spill] sm:$0xff] %v9716_v57  ;;  %7663 = vmatprep.mubr.msk.bf16.mxu0 %vm1274_vm1, %v8791_v46 }
 0x143   :  { %v9719_v6 = vpop.f32.mrf.mxu0  ;;  %v9721_v9 = vpop.f32.mrf.mxu1 }
 0x144   :  { %15040 = vst [vmem:[#allocation30_spill] sm:$0xff] %v9721_v9 }
 0x145   :  { %v9723_v10 = vpop.f32.mrf.mxu0  ;;  %v9728_v8 = vpop.f32.mrf.mxu1 }
 0x146   :  { %15041 = vst [vmem:[#allocation31_spill] sm:$0xff] %v9728_v8 }
 0x147   :  { %v9733_v16 = vpop.f32.mrf.mxu0  ;;  %v9735_v24 = vpop.f32.mrf.mxu1 }
 0x148   :  { %15042 = vst [vmem:[#allocation32_spill] sm:$0xff] %v9735_v24 }
 0x149   :  { %v9737_v26 = vpop.f32.mrf.mxu0  ;;  %7664 = vmatmul.mubr.msk.bf16.gmra.mxu0 %vm1274_vm1, %v8792_v11  ;;  %v9740_v34 = vpop.f32.mrf.mxu1  ;;  %v8799_v11 = vld [vmem:[%s14836_s0 + $0x210] sm:$0xff]  }
 0x14a   :  { %15043 = vst [vmem:[#allocation33_spill] sm:$0xff] %v9740_v34  ;;  %7667 = vmatprep.mubr.msk.bf16.mxu0 %vm1274_vm1, %v8795_v15 }
 0x14b   :  { %v9743_v36 = vpop.f32.mrf.mxu0  ;;  %v9745_v44 = vpop.f32.mrf.mxu1 }
 0x14c   :  { %15044 = vst [vmem:[#allocation34_spill] sm:$0xff] %v9745_v44 }
 0x14d   :  { %v9747_v46 = vpop.f32.mrf.mxu0  ;;  %v9752_v8 = vpop.f32.mrf.mxu1 }
 0x14e   :  { %15045 = vst [vmem:[#allocation35_spill] sm:$0xff] %v9752_v8 }
 0x14f   :  { %v9757_v24 = vpop.f32.mrf.mxu0  ;;  %v9759_v34 = vpop.f32.mrf.mxu1 }
 0x150   :  { %15046 = vst [vmem:[#allocation36_spill] sm:$0xff] %v9759_v34 }
 0x151   :  { %v9761_v15 = vpop.f32.mrf.mxu0  ;;  %7668 = vmatmul.mubr.msk.bf16.gmra.mxu0 %vm1274_vm1, %v8796_v52  ;;  %v9764_v44 = vpop.f32.mrf.mxu1  ;;  %v8803_v52 = vld [vmem:[%s14836_s0 + $0x220] sm:$0xff]  }
 0x152   :  { %15047 = vst [vmem:[#allocation37_spill] sm:$0xff] %v9764_v44  ;;  %7671 = vmatprep.mubr.msk.bf16.mxu0 %vm1274_vm1, %v8799_v11 }
 0x153   :  { %v9767_v9 = vpop.f32.mrf.mxu0  ;;  %v9769_v57 = vpop.f32.mrf.mxu1 }
 0x154   :  { %15048 = vst [vmem:[#allocation38_spill] sm:$0xff] %v9769_v57 }
 0x155   :  { %v9771_v8 = vpop.f32.mrf.mxu0  ;;  %v9776_v45 = vpop.f32.mrf.mxu1 }
 0x156   :  { %15049 = vst [vmem:[#allocation39_spill] sm:$0xff] %v9776_v45 }
 0x157   :  { %v9781_v34 = vpop.f32.mrf.mxu0  ;;  %v9783_v44 = vpop.f32.mrf.mxu1 }
 0x158   :  { %15050 = vst [vmem:[#allocation40_spill] sm:$0xff] %v9783_v44 }
 0x159   :  { %v9785_v11 = vpop.f32.mrf.mxu0  ;;  %7672 = vmatmul.mubr.msk.bf16.gmra.mxu0 %vm1274_vm1, %v8800_v55  ;;  %v9788_v57 = vpop.f32.mrf.mxu1  ;;  %v8807_v55 = vld [vmem:[%s14836_s0 + $0x230] sm:$0xff]  }
 0x15a   :  { %15051 = vst [vmem:[#allocation41_spill] sm:$0xff] %v9788_v57  ;;  %7675 = vmatprep.mubr.msk.bf16.mxu0 %vm1274_vm1, %v8803_v52 }
 0x15b   :  { %v9791_v42 = vpop.f32.mrf.mxu0  ;;  %v9793_v40 = vpop.f32.mrf.mxu1 }
 0x15c   :  { %15052 = vst [vmem:[#allocation42_spill] sm:$0xff] %v9793_v40 }
 0x15d   :  { %v9795_v45 = vpop.f32.mrf.mxu0  ;;  %v9800_v35 = vpop.f32.mrf.mxu1 }
 0x15e   :  { %15053 = vst [vmem:[#allocation43_spill] sm:$0xff] %v9800_v35 }
 0x15f   :  { %v9805_v44 = vpop.f32.mrf.mxu0  ;;  %v9807_v57 = vpop.f32.mrf.mxu1 }
 0x160   :  { %15054 = vst [vmem:[#allocation44_spill] sm:$0xff] %v9807_v57 }
 0x161   :  { %v9809_v52 = vpop.f32.mrf.mxu0  ;;  %7676 = vmatmul.mubr.msk.bf16.gmra.mxu0 %vm1274_vm1, %v8804_v38  ;;  %v9812_v40 = vpop.f32.mrf.mxu1  ;;  %v8811_v38 = vld [vmem:[%s14836_s0 + $0x240] sm:$0xff]  }
 0x162   :  { %15055 = vst [vmem:[#allocation45_spill] sm:$0xff] %v9812_v40  ;;  %7679 = vmatprep.mubr.msk.bf16.mxu0 %vm1274_vm1, %v8807_v55 }
 0x163   :  { %v9815_v32 = vpop.f32.mrf.mxu0  ;;  %v9817_v30 = vpop.f32.mrf.mxu1 }
 0x164   :  { %15056 = vst [vmem:[#allocation46_spill] sm:$0xff] %v9817_v30 }
 0x165   :  { %v9819_v35 = vpop.f32.mrf.mxu0  ;;  %v9824_v25 = vpop.f32.mrf.mxu1 }
 0x166   :  { %15057 = vst [vmem:[#allocation47_spill] sm:$0xff] %v9824_v25 }
 0x167   :  { %v9829_v57 = vpop.f32.mrf.mxu0  ;;  %v9831_v40 = vpop.f32.mrf.mxu1 }
 0x168   :  { %15058 = vst [vmem:[#allocation48_spill] sm:$0xff] %v9831_v40 }
 0x169   :  { %v9833_v55 = vpop.f32.mrf.mxu0  ;;  %7680 = vmatmul.mubr.msk.bf16.gmra.mxu0 %vm1274_vm1, %v8808_v28  ;;  %v9836_v30 = vpop.f32.mrf.mxu1  ;;  %v8815_v28 = vld [vmem:[%s14836_s0 + $0x250] sm:$0xff]  }
 0x16a   :  { %15059 = vst [vmem:[#allocation49_spill] sm:$0xff] %v9836_v30  ;;  %7683 = vmatprep.mubr.msk.bf16.mxu0 %vm1274_vm1, %v8811_v38 }
 0x16b   :  { %v9839_v22 = vpop.f32.mrf.mxu0  ;;  %v9841_v20 = vpop.f32.mrf.mxu1 }
 0x16c   :  { %15060 = vst [vmem:[#allocation50_spill] sm:$0xff] %v9841_v20 }
 0x16d   :  { %v9843_v25 = vpop.f32.mrf.mxu0  ;;  %v9848_v14 = vpop.f32.mrf.mxu1 }
 0x16e   :  { %15061 = vst [vmem:[#allocation51_spill] sm:$0xff] %v9848_v14 }
 0x16f   :  { %v9853_v40 = vpop.f32.mrf.mxu0  ;;  %v9855_v30 = vpop.f32.mrf.mxu1 }
 0x170   :  { %15062 = vst [vmem:[#allocation52_spill] sm:$0xff] %v9855_v30 }
 0x171   :  { %v9857_v38 = vpop.f32.mrf.mxu0  ;;  %7684 = vmatmul.mubr.msk.bf16.gmra.mxu0 %vm1274_vm1, %v8812_v18  ;;  %v9860_v20 = vpop.f32.mrf.mxu1  ;;  %v8819_v18 = vld [vmem:[%s14836_s0 + $0x260] sm:$0xff]  }
 0x172   :  { %15063 = vst [vmem:[#allocation53_spill] sm:$0xff] %v9860_v20  ;;  %7687 = vmatprep.mubr.msk.bf16.mxu0 %vm1274_vm1, %v8815_v28 }
 0x173   :  { %v9863_v3 = vpop.f32.mrf.mxu0  ;;  %v9865_v1 = vpop.f32.mrf.mxu1 }
 0x174   :  { %15064 = vst [vmem:[#allocation54_spill] sm:$0xff] %v9865_v1 }
 0x175   :  { %v9867_v14 = vpop.f32.mrf.mxu0  ;;  %v9872_v7 = vpop.f32.mrf.mxu1 }
 0x176   :  { %15065 = vst [vmem:[#allocation55_spill] sm:$0xff] %v9872_v7 }
 0x177   :  { %v9877_v30 = vpop.f32.mrf.mxu0  ;;  %v9879_v20 = vpop.f32.mrf.mxu1 }
 0x178   :  { %15066 = vst [vmem:[#allocation56_spill] sm:$0xff] %v9879_v20 }
 0x179   :  { %v9881_v28 = vpop.f32.mrf.mxu0  ;;  %7688 = vmatmul.mubr.msk.bf16.gmra.mxu0 %vm1274_vm1, %v8816_v13  ;;  %v9884_v1 = vpop.f32.mrf.mxu1  ;;  %v8823_v13 = vld [vmem:[%s14836_s0 + $0x270] sm:$0xff]  }
 0x17a   :  { %15067 = vst [vmem:[#allocation57_spill] sm:$0xff] %v9884_v1  ;;  %7691 = vmatprep.mubr.msk.bf16.mxu0 %vm1274_vm1, %v8819_v18 }
 0x17b   :  { %v9887_v63 = vpop.f32.mrf.mxu0  ;;  %v9889_v61 = vpop.f32.mrf.mxu1 }
 0x17c   :  { %15068 = vst [vmem:[#allocation58_spill] sm:$0xff] %v9887_v63  ;;  %15069 = vst [vmem:[#allocation59_spill] sm:$0xff] %v9889_v61 }
 0x17d   :  { %v9891_v7 = vpop.f32.mrf.mxu0  ;;  %v9896_v54 = vpop.f32.mrf.mxu1 }
 0x17e   :  { %15070 = vst [vmem:[#allocation60_spill] sm:$0xff] %v9891_v7  ;;  %15071 = vst [vmem:[#allocation61_spill] sm:$0xff] %v9896_v54  ;;  %v8824_v54 = vld [vmem:[%s14836_s0 + $0x278] sm:$0xff]  }
 0x17f   :  { %v9901_v20 = vpop.f32.mrf.mxu0  ;;  %v9903_v1 = vpop.f32.mrf.mxu1 }
 0x180   :  { %15072 = vst [vmem:[#allocation62_spill] sm:$0xff] %v9903_v1  ;;  %v8827_v1 = vld [vmem:[%s14836_s0 + $0x280] sm:$0xff]  }
 0x181   :  { %v9905_v18 = vpop.f32.mrf.mxu0  ;;  %7692 = vmatmul.mubr.msk.bf16.gmra.mxu0 %vm1274_vm1, %v8820_v59  ;;  %v9908_v61 = vpop.f32.mrf.mxu1 }
 0x182   :  { %15073 = vst [vmem:[#allocation63_spill] sm:$0xff] %v9905_v18  ;;  %15074 = vst [vmem:[#allocation64_spill] sm:$0xff] %v9908_v61  ;;  %7695 = vmatprep.mubr.msk.bf16.mxu0 %vm1274_vm1, %v8823_v13 }
 0x183   :  { %v9911_v7 = vpop.f32.mrf.mxu0  ;;  %v9918_v50 = vpop.f32.mrf.mxu1 }
 0x184   :  { %15075 = vst [vmem:[#allocation65_spill] sm:$0xff] %v9911_v7  ;;  %15077 = vst [vmem:[#allocation67_spill] sm:$0xff] %v9918_v50  ;;  %v8828_v50 = vld [vmem:[%s14836_s0 + $0x288] sm:$0xff]  }
 0x185   :  { %v9913_v63 = vpop.f32.mrf.mxu0  ;;  %v9928_v13 = vpop.f32.mrf.mxu1 }
 0x186   :  { %15076 = vst [vmem:[#allocation66_spill] sm:$0xff] %v9913_v63  ;;  %15080 = vst [vmem:[#allocation70_spill] sm:$0xff] %v9928_v13 }
 0x187   :  { %v9923_v18 = vpop.f32.mrf.mxu0  ;;  %v9938_v7 = vpop.f32.mrf.mxu1 }
 0x188   :  { %15078 = vst [vmem:[#allocation68_spill] sm:$0xff] %v9923_v18  ;;  %15083 = vst [vmem:[#allocation73_spill] sm:$0xff] %v9938_v7  ;;  %v8832_v7 = vld [vmem:[%s14836_s0 + $0x298] sm:$0xff]  }
 0x189   :  { %v9925_v59 = vpop.f32.mrf.mxu0  ;;  %7696 = vmatmul.mubr.msk.bf16.gmra.mxu0 %vm1274_vm1, %v8824_v54 }
 0x18a   :  { %15079 = vst [vmem:[#allocation69_spill] sm:$0xff] %v9925_v59  ;;  %7699 = vmatprep.mubr.msk.bf16.mxu0 %vm1274_vm1, %v8827_v1  ;;  %v8831_v59 = vld [vmem:[%s14836_s0 + $0x290] sm:$0xff]   ;;  %v9948_v1 = vpop.f32.mrf.mxu1 }
 0x18b   :  { %v9931_v61 = vpop.f32.mrf.mxu0  ;;  %15086 = vst [vmem:[#allocation76_spill] sm:$0xff] %v9948_v1 }
 0x18c   :  { %15081 = vst [vmem:[#allocation71_spill] sm:$0xff] %v9931_v61  ;;  %v9958_v61 = vpop.f32.mrf.mxu1 }
 0x18d   :  { %v9933_v63 = vpop.f32.mrf.mxu0  ;;  %15089 = vst [vmem:[#allocation79_spill] sm:$0xff] %v9958_v61  ;;  %v8836_v61 = vld [vmem:[%s14836_s0 + $0x2a8] sm:$0xff]  }
 0x18e   :  { %15082 = vst [vmem:[#allocation72_spill] sm:$0xff] %v9933_v63 }
 0x18f   :  { %v9943_v18 = vpop.f32.mrf.mxu0 }
 0x190   :  { %15084 = vst [vmem:[#allocation74_spill] sm:$0xff] %v9943_v18 }
 0x191   :  { %v9945_v54 = vpop.f32.mrf.mxu0  ;;  %7700 = vmatmul.mubr.msk.bf16.gmra.mxu0 %vm1274_vm1, %v8828_v50 }
 0x192   :  { %15085 = vst [vmem:[#allocation75_spill] sm:$0xff] %v9945_v54  ;;  %7703 = vmatprep.mubr.msk.bf16.mxu0 %vm1274_vm1, %v8831_v59  ;;  %v8835_v54 = vld [vmem:[%s14836_s0 + $0x2a0] sm:$0xff]   ;;  %v9968_v59 = vpop.f32.mrf.mxu1 }
 0x193   :  { %v9951_v13 = vpop.f32.mrf.mxu0  ;;  %15092 = vst [vmem:[#allocation82_spill] sm:$0xff] %v9968_v59 }
 0x194   :  { %15087 = vst [vmem:[#allocation77_spill] sm:$0xff] %v9951_v13  ;;  %v9978_v13 = vpop.f32.mrf.mxu1 }
 0x195   :  { %v9953_v63 = vpop.f32.mrf.mxu0  ;;  %15095 = vst [vmem:[#allocation85_spill] sm:$0xff] %v9978_v13  ;;  %v8838_v13 = vld [vmem:[%s14836_s0 + $0x2b8] sm:$0xff]  }
 0x196   :  { %15088 = vst [vmem:[#allocation78_spill] sm:$0xff] %v9953_v63 }
 0x197   :  { %v9963_v18 = vpop.f32.mrf.mxu0 }
 0x198   :  { %15090 = vst [vmem:[#allocation80_spill] sm:$0xff] %v9963_v18 }
 0x199   :  { %v9965_v50 = vpop.f32.mrf.mxu0  ;;  %7704 = vmatmul.mubr.msk.bf16.gmra.mxu0 %vm1274_vm1, %v8832_v7 }
 0x19a   :  { %15091 = vst [vmem:[#allocation81_spill] sm:$0xff] %v9965_v50  ;;  %7707 = vmatprep.mubr.msk.bf16.mxu0 %vm1274_vm1, %v8835_v54  ;;  %v8837_v50 = vld [vmem:[%s14836_s0 + $0x2b0] sm:$0xff]   ;;  %v9988_v54 = vpop.f32.mrf.mxu1 }
 0x19b   :  { %v9971_v1 = vpop.f32.mrf.mxu0  ;;  %15098 = vst [vmem:[#allocation88_spill] sm:$0xff] %v9988_v54 }
 0x19c   :  { %15093 = vst [vmem:[#allocation83_spill] sm:$0xff] %v9971_v1  ;;  %v9998_v1 = vpop.f32.mrf.mxu1 }
 0x19d   :  { %v9973_v63 = vpop.f32.mrf.mxu0  ;;  %15101 = vst [vmem:[#allocation91_spill] sm:$0xff] %v9998_v1  ;;  %v8840_v1 = vld [vmem:[%s14836_s0 + $0x2c8] sm:$0xff]  }
 0x19e   :  { %15094 = vst [vmem:[#allocation84_spill] sm:$0xff] %v9973_v63 }
 0x19f   :  { %v9983_v18 = vpop.f32.mrf.mxu0 }
 0x1a0   :  { %15096 = vst [vmem:[#allocation86_spill] sm:$0xff] %v9983_v18 }
 0x1a1   :  { %v9985_v7 = vpop.f32.mrf.mxu0  ;;  %7708 = vmatmul.mubr.msk.bf16.gmra.mxu0 %vm1274_vm1, %v8836_v61 }
 0x1a2   :  { %15097 = vst [vmem:[#allocation87_spill] sm:$0xff] %v9985_v7  ;;  %7711 = vmatprep.mubr.msk.bf16.mxu0 %vm1274_vm1, %v8837_v50  ;;  %v8839_v7 = vld [vmem:[%s14836_s0 + $0x2c0] sm:$0xff]   ;;  %v10008_v50 = vpop.f32.mrf.mxu1 }
 0x1a3   :  { %v9991_v59 = vpop.f32.mrf.mxu0  ;;  %15104 = vst [vmem:[#allocation94_spill] sm:$0xff] %v10008_v50 }
 0x1a4   :  { %15099 = vst [vmem:[#allocation89_spill] sm:$0xff] %v9991_v59  ;;  %v10018_v59 = vpop.f32.mrf.mxu1 }
 0x1a5   :  { %v9993_v63 = vpop.f32.mrf.mxu0  ;;  %15107 = vst [vmem:[#allocation97_spill] sm:$0xff] %v10018_v59  ;;  %v8842_v59 = vld [vmem:[%s14836_s0 + $0x2d8] sm:$0xff]  }
 0x1a6   :  { %15100 = vst [vmem:[#allocation90_spill] sm:$0xff] %v9993_v63 }
 0x1a7   :  { %v10003_v18 = vpop.f32.mrf.mxu0 }
 0x1a8   :  { %15102 = vst [vmem:[#allocation92_spill] sm:$0xff] %v10003_v18 }
 0x1a9   :  { %v10005_v61 = vpop.f32.mrf.mxu0  ;;  %7712 = vmatmul.mubr.msk.bf16.gmra.mxu0 %vm1274_vm1, %v8838_v13 }
 0x1aa   :  { %15103 = vst [vmem:[#allocation93_spill] sm:$0xff] %v10005_v61  ;;  %7715 = vmatprep.mubr.msk.bf16.mxu0 %vm1274_vm1, %v8839_v7  ;;  %v8841_v61 = vld [vmem:[%s14836_s0 + $0x2d0] sm:$0xff]   ;;  %v10028_v7 = vpop.f32.mrf.mxu1 }
 0x1ab   :  { %v10011_v54 = vpop.f32.mrf.mxu0  ;;  %15110 = vst [vmem:[#allocation100_spill] sm:$0xff] %v10028_v7  ;;  %v10050_v7 = vsel %vm49_vm0, %v9547_v47, -inf }
 0x1ac   :  { %15105 = vst [vmem:[#allocation95_spill] sm:$0xff] %v10011_v54  ;;  %v10038_v54 = vpop.f32.mrf.mxu1  ;;  %15116 = vst [vmem:[#allocation106_spill] sm:$0xff] %v10050_v7  ;;  %v10098_v7 = vsel %vm49_vm0, %v9579_v60, -inf }
 0x1ad   :  { %v10013_v63 = vpop.f32.mrf.mxu0  ;;  %15113 = vst [vmem:[#allocation103_spill] sm:$0xff] %v10038_v54  ;;  %v10074_v54 = vsel %vm49_vm0, %v9559_v51, -inf  ;;  %15126 = vst [vmem:[#allocation116_spill] sm:$0xff] %v10098_v7  ;;  %v10108_v51 = vsel %vm49_vm0, %v9587_v62, -inf  ;;  %v10146_v7 = vsel %vm49_vm0, %v9611_v0, -inf }
 0x1ae   :  { %15106 = vst [vmem:[#allocation96_spill] sm:$0xff] %v10013_v63  ;;  %15121 = vst [vmem:[#allocation111_spill] sm:$0xff] %v10074_v54 }
 0x1af   :  { %v10023_v18 = vpop.f32.mrf.mxu0  ;;  %15128 = vst [vmem:[#allocation118_spill] sm:$0xff] %v10108_v51  ;;  %v10134_v51 = vsel %vm49_vm0, %v9607_v12, -inf  ;;  %15136 = vst [vmem:[#allocation126_spill] sm:$0xff] %v10146_v7  ;;  %v10170_v12 = vsel %vm49_vm0, %v9623_v4, -inf  ;;  %v10194_v7 = vsel %vm49_vm0, %v9640_v19, -inf  ;;  %v10204_v4 = vsel %vm49_vm0, %v9647_v21, -inf }
 0x1b0   :  { %15108 = vst [vmem:[#allocation98_spill] sm:$0xff] %v10023_v18  ;;  %15133 = vst [vmem:[#allocation123_spill] sm:$0xff] %v10134_v51 }
 0x1b1   :  { %v10025_v13 = vpop.f32.mrf.mxu0  ;;  %7716 = vmatmul.mubr.msk.bf16.gmra.mxu0 %vm1274_vm1, %v8840_v1  ;;  %15141 = vst [vmem:[#allocation131_spill] sm:$0xff] %v10170_v12  ;;  %15146 = vst [vmem:[#allocation136_spill] sm:$0xff] %v10194_v7  ;;  %v10242_v7 = vsel %vm49_vm0, %v9665_v29, -inf  ;;  %v15277_v12 = vld [vmem:[#allocation68_spill] sm:$0xff] }
 0x1b2   :  { %15109 = vst [vmem:[#allocation99_spill] sm:$0xff] %v10025_v13  ;;  %7719 = vmatprep.mubr.msk.bf16.mxu0 %vm1274_vm1, %v8841_v61  ;;  %v8843_v13 = vld [vmem:[%s14836_s0 + $0x2e0] sm:$0xff]   ;;  %v10046_v61 = vpop.f32.mrf.mxu1  ;;  %15148 = vst [vmem:[#allocation138_spill] sm:$0xff] %v10204_v4  ;;  %v10230_v4 = vsel %vm49_vm0, %v9661_v27, -inf  ;;  %v10266_v27 = vsel %vm49_vm0, %v9675_v33, -inf  ;;  %v10300_v33 = vsel %vm49_vm0, %v9695_v41, -inf }
 0x1b3   :  { %v10031_v50 = vpop.f32.mrf.mxu0  ;;  %15115 = vst [vmem:[#allocation105_spill] sm:$0xff] %v10046_v61  ;;  %15153 = vst [vmem:[#allocation143_spill] sm:$0xff] %v10230_v4  ;;  %v15268_v4 = vld [vmem:[#allocation29_spill] sm:$0xff] }
 0x1b4   :  { %15111 = vst [vmem:[#allocation101_spill] sm:$0xff] %v10031_v50  ;;  %15156 = vst [vmem:[#allocation146_spill] sm:$0xff] %v10242_v7  ;;  %v10290_v7 = vsel %vm49_vm0, %v9689_v39, -inf }
 0x1b5   :  { %v10033_v63 = vpop.f32.mrf.mxu0  ;;  %15161 = vst [vmem:[#allocation151_spill] sm:$0xff] %v10266_v27  ;;  %15166 = vst [vmem:[#allocation156_spill] sm:$0xff] %v10290_v7  ;;  %v10338_v7 = vsel %vm49_vm0, %v9713_v56, -inf  ;;  %v15266_v27 = vld [vmem:[#allocation27_spill] sm:$0xff] }
 0x1b6   :  { %15112 = vst [vmem:[#allocation102_spill] sm:$0xff] %v10033_v63  ;;  %15168 = vst [vmem:[#allocation158_spill] sm:$0xff] %v10300_v33  ;;  %v10326_v33 = vsel %vm49_vm0, %v9709_v53, -inf  ;;  %v10362_v53 = vsel %vm49_vm0, %v9723_v10, -inf  ;;  %v10396_v10 = vsel %vm49_vm0, %v9743_v36, -inf }
 0x1b7   :  { %v10043_v18 = vpop.f32.mrf.mxu0  ;;  %15173 = vst [vmem:[#allocation163_spill] sm:$0xff] %v10326_v33  ;;  %15176 = vst [vmem:[#allocation166_spill] sm:$0xff] %v10338_v7  ;;  %v10386_v7 = vsel %vm49_vm0, %v9737_v26, -inf  ;;  %v15260_v33 = vld [vmem:[#allocation22_spill] sm:$0xff] }
 0x1b8   :  { %15114 = vst [vmem:[#allocation104_spill] sm:$0xff] %v10043_v18  ;;  %v10060_v18 = vsel %vm49_vm0, %v9555_v49, -inf  ;;  %15181 = vst [vmem:[#allocation171_spill] sm:$0xff] %v10362_v53 }
 0x1b9   :  { %v7625_v1 = vpop.f32.mrf.mxu0  ;;  %7720 = vmatmul.mubr.msk.bf16.gmra.mxu0 %vm1274_vm1, %v8842_v59  ;;  %15118 = vst [vmem:[#allocation108_spill] sm:$0xff] %v10060_v18  ;;  %v10086_v18 = vsel %vm49_vm0, %v9575_v58, -inf  ;;  %v10122_v58 = vsel %vm49_vm0, %v9591_v5, -inf  ;;  %v10156_v5 = vsel %vm49_vm0, %v9619_v2, -inf  ;;  %15185 = vst [vmem:[#allocation175_spill] sm:$0xff] %v10386_v7 }
 0x1ba   :  { %v10053_v63 = vsel %vm49_vm0, %v7625_v1, -inf  ;;  %7723 = vmatprep.mubr.msk.bf16.mxu0 %vm1274_vm1, %v8843_v13  ;;  %v8844_v1 = vld [vmem:[%s14836_s0 + $0x2e8] sm:$0xff]   ;;  %v10070_v13 = vpop.f32.mrf.mxu1  ;;  %15123 = vst [vmem:[#allocation113_spill] sm:$0xff] %v10086_v18  ;;  %15131 = vst [vmem:[#allocation121_spill] sm:$0xff] %v10122_v58 }
 0x1bb   :  { %15117 = vst [vmem:[#allocation107_spill] sm:$0xff] %v10053_v63  ;;  %v2156_v50 = vpop.f32.mrf.mxu0  ;;  %15120 = vst [vmem:[#allocation110_spill] sm:$0xff] %v10070_v13 }
 0x1bc   :  { %v10063_v59 = vsel %vm49_vm0, %v2156_v50, -inf  ;;  %v8845_v50 = vld [vmem:[%s14836_s0 + $0x2f0] sm:$0xff]   ;;  %v10094_v63 = vpop.f32.mrf.mxu1  ;;  %15138 = vst [vmem:[#allocation128_spill] sm:$0xff] %v10156_v5  ;;  %v10182_v5 = vsel %vm49_vm0, %v9636_v17, -inf  ;;  %v10218_v17 = vsel %vm49_vm0, %v9651_v23, -inf  ;;  %v10252_v23 = vsel %vm49_vm0, %v9671_v31, -inf }
 0x1bd   :  { %15119 = vst [vmem:[#allocation109_spill] sm:$0xff] %v10063_v59  ;;  %v7626_v61 = vpop.f32.mrf.mxu0  ;;  %15125 = vst [vmem:[#allocation115_spill] sm:$0xff] %v10094_v63 }
 0x1be   :  { %v10077_v49 = vsel %vm49_vm0, %v7626_v61, -inf  ;;  %15143 = vst [vmem:[#allocation133_spill] sm:$0xff] %v10182_v5  ;;  %15151 = vst [vmem:[#allocation141_spill] sm:$0xff] %v10218_v17 }
 0x1bf   :  { %15122 = vst [vmem:[#allocation112_spill] sm:$0xff] %v10077_v49  ;;  %v2159_v59 = vpop.f32.mrf.mxu0  ;;  %15158 = vst [vmem:[#allocation148_spill] sm:$0xff] %v10252_v23  ;;  %v10278_v23 = vsel %vm49_vm0, %v9685_v37, -inf  ;;  %v10314_v37 = vsel %vm49_vm0, %v9699_v43, -inf  ;;  %v10348_v43 = vsel %vm49_vm0, %v9719_v6, -inf }
 0x1c0   :  { %v10089_v13 = vsel %vm49_vm0, %v2159_v59, -inf  ;;  %15163 = vst [vmem:[#allocation153_spill] sm:$0xff] %v10278_v23  ;;  %15171 = vst [vmem:[#allocation161_spill] sm:$0xff] %v10314_v37  ;;  %v15262_v37 = vld [vmem:[#allocation24_spill] sm:$0xff] }
 0x1c1   :  { %15124 = vst [vmem:[#allocation114_spill] sm:$0xff] %v10089_v13  ;;  %v7629_v61 = vpop.f32.mrf.mxu0  ;;  %7724 = vmatmul.mubr.msk.bf16.gmra.mxu0 %vm1274_vm1, %v8844_v1  ;;  %15178 = vst [vmem:[#allocation168_spill] sm:$0xff] %v10348_v43  ;;  %v10374_v43 = vsel %vm49_vm0, %v9733_v16, -inf  ;;  %v10410_v16 = vsel %vm49_vm0, %v9747_v46, -inf  ;;  %v10444_v46 = vsel %vm49_vm0, %v9767_v9, -inf  ;;  %v15288_v13 = vld [vmem:[#allocation78_spill] sm:$0xff] }
 0x1c2   :  { %v10101_v47 = vsel %vm49_vm0, %v7629_v61, -inf  ;;  %7727 = vmatprep.mubr.msk.bf16.mxu0 %vm1274_vm1, %v8845_v50  ;;  %v8846_v61 = vld [vmem:[%s14836_s0 + $0x2f8] sm:$0xff]   ;;  %v10118_v50 = vpop.f32.mrf.mxu1  ;;  %15183 = vst [vmem:[#allocation173_spill] sm:$0xff] %v10374_v43  ;;  %15187 = vst [vmem:[#allocation177_spill] sm:$0xff] %v10396_v10  ;;  %v10422_v10 = vsel %vm49_vm0, %v9757_v24, -inf  ;;  %v10434_v43 = vsel %vm49_vm0, %v9761_v15, -inf }
 0x1c3   :  { %15127 = vst [vmem:[#allocation117_spill] sm:$0xff] %v10101_v47  ;;  %v2172_v59 = vpop.f32.mrf.mxu0  ;;  %15130 = vst [vmem:[#allocation120_spill] sm:$0xff] %v10118_v50  ;;  %v10458_v24 = vsel %vm49_vm0, %v9771_v8, -inf  ;;  %v10492_v8 = vsel %vm49_vm0, %v9791_v42, -inf }
 0x1c4   :  { %v10111_v1 = vsel %vm49_vm0, %v2172_v59, -inf  ;;  %v8847_v59 = vld [vmem:[%s14836_s0 + $0x300] sm:$0xff]   ;;  %v10142_v47 = vpop.f32.mrf.mxu1  ;;  %15189 = vst [vmem:[#allocation179_spill] sm:$0xff] %v10410_v16  ;;  %15191 = vst [vmem:[#allocation181_spill] sm:$0xff] %v10422_v10  ;;  %v10482_v10 = vsel %vm49_vm0, %v9785_v11, -inf  ;;  %v10515_v11 = vsel %vm49_vm0, %v9805_v44, -inf }
 0x1c5   :  { %15129 = vst [vmem:[#allocation119_spill] sm:$0xff] %v10111_v1  ;;  %v7630_v63 = vpop.f32.mrf.mxu0  ;;  %15135 = vst [vmem:[#allocation125_spill] sm:$0xff] %v10142_v47 }
 0x1c6   :  { %v10125_v62 = vsel %vm49_vm0, %v7630_v63, -inf  ;;  %15193 = vst [vmem:[#allocation183_spill] sm:$0xff] %v10434_v43  ;;  %15195 = vst [vmem:[#allocation185_spill] sm:$0xff] %v10444_v46  ;;  %v10470_v46 = vsel %vm49_vm0, %v9781_v34, -inf  ;;  %v10506_v34 = vsel %vm49_vm0, %v9795_v45, -inf }
 0x1c7   :  { %15132 = vst [vmem:[#allocation122_spill] sm:$0xff] %v10125_v62  ;;  %v2175_v1 = vpop.f32.mrf.mxu0  ;;  %15197 = vst [vmem:[#allocation187_spill] sm:$0xff] %v10458_v24  ;;  %v15253_v24 = vld [vmem:[#allocation17_spill] sm:$0xff] }
 0x1c8   :  { %v10137_v50 = vsel %vm49_vm0, %v2175_v1, -inf  ;;  %15199 = vst [vmem:[#allocation189_spill] sm:$0xff] %v10470_v46  ;;  %15201 = vst [vmem:[#allocation191_spill] sm:$0xff] %v10482_v10  ;;  %v15249_v46 = vld [vmem:[#allocation14_spill] sm:$0xff] }
 0x1c9   :  { %15134 = vst [vmem:[#allocation124_spill] sm:$0xff] %v10137_v50  ;;  %v7633_v63 = vpop.f32.mrf.mxu0  ;;  %7728 = vmatmul.mubr.msk.bf16.gmra.mxu0 %vm1274_vm1, %v8846_v61  ;;  %15203 = vst [vmem:[#allocation193_spill] sm:$0xff] %v10492_v8  ;;  %v15278_v50 = vld [vmem:[#allocation33_spill] sm:$0xff] }
 0x1ca   :  { %v10149_v60 = vsel %vm49_vm0, %v7633_v63, -inf  ;;  %7731 = vmatprep.mubr.msk.bf16.mxu0 %vm1274_vm1, %v8847_v59  ;;  %v8848_v63 = vld [vmem:[%s14836_s0 + $0x308] sm:$0xff]   ;;  %v10166_v59 = vpop.f32.mrf.mxu1  ;;  %15205 = vst [vmem:[#allocation195_spill] sm:$0xff] %v10506_v34  ;;  %15207 = vst [vmem:[#allocation197_spill] sm:$0xff] %v10515_v11 }
 0x1cb   :  { %15137 = vst [vmem:[#allocation127_spill] sm:$0xff] %v10149_v60  ;;  %v2188_v1 = vpop.f32.mrf.mxu0  ;;  %15140 = vst [vmem:[#allocation130_spill] sm:$0xff] %v10166_v59 }
 0x1cc   :  { %v10159_v61 = vsel %vm49_vm0, %v2188_v1, -inf  ;;  %v8849_v1 = vld [vmem:[%s14836_s0 + $0x310] sm:$0xff]   ;;  %v10190_v60 = vpop.f32.mrf.mxu1 }
 0x1cd   :  { %15139 = vst [vmem:[#allocation129_spill] sm:$0xff] %v10159_v61  ;;  %v7634_v47 = vpop.f32.mrf.mxu0  ;;  %15145 = vst [vmem:[#allocation135_spill] sm:$0xff] %v10190_v60 }
 0x1ce   :  { %v10173_v2 = vsel %vm49_vm0, %v7634_v47, -inf }
 0x1cf   :  { %15142 = vst [vmem:[#allocation132_spill] sm:$0xff] %v10173_v2  ;;  %v2191_v61 = vpop.f32.mrf.mxu0 }
 0x1d0   :  { %v10185_v59 = vsel %vm49_vm0, %v2191_v61, -inf }
 0x1d1   :  { %15144 = vst [vmem:[#allocation134_spill] sm:$0xff] %v10185_v59  ;;  %v7637_v47 = vpop.f32.mrf.mxu0  ;;  %7732 = vmatmul.mubr.msk.bf16.gmra.mxu0 %vm1274_vm1, %v8848_v63 }
 0x1d2   :  { %v10197_v0 = vsel %vm49_vm0, %v7637_v47, -inf  ;;  %7735 = vmatprep.mubr.msk.bf16.mxu0 %vm1274_vm1, %v8849_v1  ;;  %v8850_v47 = vld [vmem:[%s14836_s0 + $0x318] sm:$0xff]   ;;  %v10214_v1 = vpop.f32.mrf.mxu1 }
 0x1d3   :  { %15147 = vst [vmem:[#allocation137_spill] sm:$0xff] %v10197_v0  ;;  %v2204_v61 = vpop.f32.mrf.mxu0  ;;  %15150 = vst [vmem:[#allocation140_spill] sm:$0xff] %v10214_v1 }
 0x1d4   :  { %v10207_v63 = vsel %vm49_vm0, %v2204_v61, -inf  ;;  %v8851_v61 = vld [vmem:[%s14836_s0 + $0x320] sm:$0xff]   ;;  %v10238_v0 = vpop.f32.mrf.mxu1 }
 0x1d5   :  { %15149 = vst [vmem:[#allocation139_spill] sm:$0xff] %v10207_v63  ;;  %v7638_v60 = vpop.f32.mrf.mxu0  ;;  %15155 = vst [vmem:[#allocation145_spill] sm:$0xff] %v10238_v0 }
 0x1d6   :  { %v10221_v21 = vsel %vm49_vm0, %v7638_v60, -inf }
 0x1d7   :  { %15152 = vst [vmem:[#allocation142_spill] sm:$0xff] %v10221_v21  ;;  %v2207_v63 = vpop.f32.mrf.mxu0  ;;  %v10785_v21 = vsel %vm49_vm0, %v15268_v4, -inf }
 0x1d8   :  { %v10233_v1 = vsel %vm49_vm0, %v2207_v63, -inf }
 0x1d9   :  { %15154 = vst [vmem:[#allocation144_spill] sm:$0xff] %v10233_v1  ;;  %v7641_v60 = vpop.f32.mrf.mxu0  ;;  %7736 = vmatmul.mubr.msk.bf16.gmra.mxu0 %vm1274_vm1, %v8850_v47  ;;  %v15267_v1 = vld [vmem:[#allocation28_spill] sm:$0xff] }
 0x1da   :  { %v10245_v19 = vsel %vm49_vm0, %v7641_v60, -inf  ;;  %7739 = vmatprep.mubr.msk.bf16.mxu0 %vm1274_vm1, %v8851_v61  ;;  %v8852_v60 = vld [vmem:[%s14836_s0 + $0x328] sm:$0xff]   ;;  %v10262_v61 = vpop.f32.mrf.mxu1 }
 0x1db   :  { %15157 = vst [vmem:[#allocation147_spill] sm:$0xff] %v10245_v19  ;;  %v2220_v63 = vpop.f32.mrf.mxu0  ;;  %15160 = vst [vmem:[#allocation150_spill] sm:$0xff] %v10262_v61 }
 0x1dc   :  { %v10255_v47 = vsel %vm49_vm0, %v2220_v63, -inf  ;;  %v8853_v63 = vld [vmem:[%s14836_s0 + $0x330] sm:$0xff]   ;;  %v10286_v19 = vpop.f32.mrf.mxu1 }
 0x1dd   :  { %15159 = vst [vmem:[#allocation149_spill] sm:$0xff] %v10255_v47  ;;  %v7642_v0 = vpop.f32.mrf.mxu0  ;;  %15165 = vst [vmem:[#allocation155_spill] sm:$0xff] %v10286_v19 }
 0x1de   :  { %v10269_v31 = vsel %vm49_vm0, %v7642_v0, -inf }
 0x1df   :  { %15162 = vst [vmem:[#allocation152_spill] sm:$0xff] %v10269_v31  ;;  %v2223_v47 = vpop.f32.mrf.mxu0  ;;  %v15265_v31 = vld [vmem:[#allocation65_spill] sm:$0xff] }
 0x1e0   :  { %v10281_v61 = vsel %vm49_vm0, %v2223_v47, -inf }
 0x1e1   :  { %15164 = vst [vmem:[#allocation154_spill] sm:$0xff] %v10281_v61  ;;  %v7645_v0 = vpop.f32.mrf.mxu0  ;;  %7740 = vmatmul.mubr.msk.bf16.gmra.mxu0 %vm1274_vm1, %v8852_v60  ;;  %v10762_v61 = vsel %vm49_vm0, %v15262_v37, -inf  ;;  %v10780_v37 = vsel %vm49_vm0, %v15267_v1, -inf  ;;  %v15271_v1 = vld [vmem:[#allocation31_spill] sm:$0xff] }
 0x1e2   :  { %v10293_v29 = vsel %vm49_vm0, %v7645_v0, -inf  ;;  %7743 = vmatprep.mubr.msk.bf16.mxu0 %vm1274_vm1, %v8853_v63  ;;  %v8854_v0 = vld [vmem:[%s14836_s0 + $0x338] sm:$0xff]   ;;  %v10310_v63 = vpop.f32.mrf.mxu1  ;;  %v10797_v2 = vsel %vm49_vm0, %v15271_v1, -inf  ;;  %v3562_v1 = vsel %vm49_vm0, %v15277_v12, -inf }
 0x1e3   :  { %15167 = vst [vmem:[#allocation157_spill] sm:$0xff] %v10293_v29  ;;  %v2236_v47 = vpop.f32.mrf.mxu0  ;;  %15170 = vst [vmem:[#allocation160_spill] sm:$0xff] %v10310_v63 }
 0x1e4   :  { %v10303_v60 = vsel %vm49_vm0, %v2236_v47, -inf  ;;  %v8855_v47 = vld [vmem:[%s14836_s0 + $0x340] sm:$0xff]   ;;  %v10334_v29 = vpop.f32.mrf.mxu1 }
 0x1e5   :  { %15169 = vst [vmem:[#allocation159_spill] sm:$0xff] %v10303_v60  ;;  %v7646_v19 = vpop.f32.mrf.mxu0  ;;  %15175 = vst [vmem:[#allocation165_spill] sm:$0xff] %v10334_v29 }
 0x1e6   :  { %v10317_v41 = vsel %vm49_vm0, %v7646_v19, -inf }
 0x1e7   :  { %15172 = vst [vmem:[#allocation162_spill] sm:$0xff] %v10317_v41  ;;  %v2239_v60 = vpop.f32.mrf.mxu0  ;;  %v15261_v41 = vld [vmem:[#allocation23_spill] sm:$0xff] }
 0x1e8   :  { %v10329_v63 = vsel %vm49_vm0, %v2239_v60, -inf }
 0x1e9   :  { %15174 = vst [vmem:[#allocation164_spill] sm:$0xff] %v10329_v63  ;;  %v7649_v19 = vpop.f32.mrf.mxu0  ;;  %7744 = vmatmul.mubr.msk.bf16.gmra.mxu0 %vm1274_vm1, %v8854_v0 }
 0x1ea   :  { %v10341_v39 = vsel %vm49_vm0, %v7649_v19, -inf  ;;  %7747 = vmatprep.mubr.msk.bf16.mxu0 %vm1274_vm1, %v8855_v47  ;;  %v8856_v19 = vld [vmem:[%s14836_s0 + $0x348] sm:$0xff]   ;;  %v10358_v47 = vpop.f32.mrf.mxu1 }
 0x1eb   :  { %15177 = vst [vmem:[#allocation167_spill] sm:$0xff] %v10341_v39  ;;  %v2252_v60 = vpop.f32.mrf.mxu0  ;;  %15180 = vst [vmem:[#allocation170_spill] sm:$0xff] %v10358_v47 }
 0x1ec   :  { %v10351_v0 = vsel %vm49_vm0, %v2252_v60, -inf  ;;  %v8857_v60 = vld [vmem:[%s14836_s0 + $0x350] sm:$0xff]   ;;  %v10382_v39 = vpop.f32.mrf.mxu1 }
 0x1ed   :  { %15179 = vst [vmem:[#allocation169_spill] sm:$0xff] %v10351_v0  ;;  %v7650_v29 = vpop.f32.mrf.mxu0 }
 0x1ee   :  { %v10365_v6 = vsel %vm49_vm0, %v7650_v29, -inf }
 0x1ef   :  { %15182 = vst [vmem:[#allocation172_spill] sm:$0xff] %v10365_v6  ;;  %v2255_v0 = vpop.f32.mrf.mxu0 }
 0x1f0   :  { %v10377_v47 = vsel %vm49_vm0, %v2255_v0, -inf }
 0x1f1   :  { %15184 = vst [vmem:[#allocation174_spill] sm:$0xff] %v10377_v47  ;;  %v7653_v29 = vpop.f32.mrf.mxu0  ;;  %7748 = vmatmul.mubr.msk.bf16.gmra.mxu0 %vm1274_vm1, %v8856_v19 }
 0x1f2   :  { %v10389_v56 = vsel %vm49_vm0, %v7653_v29, -inf  ;;  %7751 = vmatprep.mubr.msk.bf16.mxu0 %vm1274_vm1, %v8857_v60  ;;  %v8858_v29 = vld [vmem:[%s14836_s0 + $0x358] sm:$0xff]   ;;  %v10406_v60 = vpop.f32.mrf.mxu1 }
 0x1f3   :  { %15186 = vst [vmem:[#allocation176_spill] sm:$0xff] %v10389_v56  ;;  %v2268_v0 = vpop.f32.mrf.mxu0  ;;  %v10802_v4 = vsel %vm49_vm0, %v10406_v60, -inf }
 0x1f4   :  { %v10399_v19 = vsel %vm49_vm0, %v2268_v0, -inf  ;;  %v8859_v0 = vld [vmem:[%s14836_s0 + $0x360] sm:$0xff]   ;;  %v10430_v7 = vpop.f32.mrf.mxu1 }
 0x1f5   :  { %15188 = vst [vmem:[#allocation178_spill] sm:$0xff] %v10399_v19  ;;  %v7654_v47 = vpop.f32.mrf.mxu0 }
 0x1f6   :  { %v10413_v36 = vsel %vm49_vm0, %v7654_v47, -inf }
 0x1f7   :  { %15190 = vst [vmem:[#allocation180_spill] sm:$0xff] %v10413_v36  ;;  %v2271_v19 = vpop.f32.mrf.mxu0  ;;  %v15254_v36 = vld [vmem:[#allocation18_spill] sm:$0xff] }
 0x1f8   :  { %v10425_v56 = vsel %vm49_vm0, %v2271_v19, -inf }
 0x1f9   :  { %15192 = vst [vmem:[#allocation182_spill] sm:$0xff] %v10425_v56  ;;  %v7657_v47 = vpop.f32.mrf.mxu0  ;;  %7752 = vmatmul.mubr.msk.bf16.gmra.mxu0 %vm1274_vm1, %v8858_v29 }
 0x1fa   :  { %v10437_v26 = vsel %vm49_vm0, %v7657_v47, -inf  ;;  %7755 = vmatprep.mubr.msk.bf16.mxu0 %vm1274_vm1, %v8859_v0  ;;  %v8860_v47 = vld [vmem:[%s14836_s0 + $0x368] sm:$0xff]   ;;  %v10454_v0 = vpop.f32.mrf.mxu1 }
 0x1fb   :  { %15194 = vst [vmem:[#allocation184_spill] sm:$0xff] %v10437_v26  ;;  %v2284_v19 = vpop.f32.mrf.mxu0  ;;  %v3567_v58 = vsel %vm49_vm0, %v10454_v0, -inf }
 0x1fc   :  { %v10447_v29 = vsel %vm49_vm0, %v2284_v19, -inf  ;;  %v8861_v19 = vld [vmem:[%s14836_s0 + $0x370] sm:$0xff]   ;;  %v10478_v43 = vpop.f32.mrf.mxu1 }
 0x1fd   :  { %15196 = vst [vmem:[#allocation186_spill] sm:$0xff] %v10447_v29  ;;  %v7658_v56 = vpop.f32.mrf.mxu0 }
 0x1fe   :  { %v10461_v9 = vsel %vm49_vm0, %v7658_v56, -inf }
 0x1ff   :  { %15198 = vst [vmem:[#allocation188_spill] sm:$0xff] %v10461_v9  ;;  %v2287_v29 = vpop.f32.mrf.mxu0 }
 0x200   :  { %v10473_v26 = vsel %vm49_vm0, %v2287_v29, -inf }
 0x201   :  { %15200 = vst [vmem:[#allocation190_spill] sm:$0xff] %v10473_v26  ;;  %v7661_v56 = vpop.f32.mrf.mxu0  ;;  %7756 = vmatmul.mubr.msk.bf16.gmra.mxu0 %vm1274_vm1, %v8860_v47 }
 0x202   :  { %v10485_v15 = vsel %vm49_vm0, %v7661_v56, -inf  ;;  %7759 = vmatprep.mubr.msk.bf16.mxu0 %vm1274_vm1, %v8861_v19  ;;  %v8862_v56 = vld [vmem:[%s14836_s0 + $0x378] sm:$0xff]   ;;  %v10502_v19 = vpop.f32.mrf.mxu1  ;;  %s8997_s0 = smov 78  }
 0x203   :  { %15202 = vst [vmem:[#allocation192_spill] sm:$0xff] %v10485_v15  ;;  %v2300_v29 = vpop.f32.mrf.mxu0 }
 0x204   :  { %v10495_v47 = vsel %vm49_vm0, %v2300_v29, -inf  ;;  %v10523_v45 = vpop.f32.mrf.mxu1 }
 0x205   :  { %15204 = vst [vmem:[#allocation194_spill] sm:$0xff] %v10495_v47  ;;  %v7662_v26 = vpop.f32.mrf.mxu0 }
 0x206   :  { %v10509_v42 = vsel %vm49_vm0, %v7662_v26, -inf  ;;  %v10527_v26 = vsel %vm49_vm0, %v9809_v52, -inf  ;;  %v10543_v52 = vpop.f32.mrf.mxu1 }
 0x207   :  { %15206 = vst [vmem:[#allocation196_spill] sm:$0xff] %v10509_v42  ;;  %v2303_v15 = vpop.f32.mrf.mxu0  ;;  %15209 = vst [vmem:[#allocation199_spill] sm:$0xff] %v10527_v26  ;;  %v10536_v42 = vsel %vm49_vm0, %v9815_v32, -inf }
 0x208   :  { %v10518_v47 = vsel %vm49_vm0, %v2303_v15, -inf  ;;  %15211 = vst [vmem:[#allocation201_spill] sm:$0xff] %v10536_v42 }
 0x209   :  { %15208 = vst [vmem:[#allocation198_spill] sm:$0xff] %v10518_v47  ;;  %v7665_v10 = vpop.f32.mrf.mxu0  ;;  %7760 = vmatmul.mubr.msk.bf16.gmra.mxu0 %vm1274_vm1, %v8862_v56  ;;  %vm4412_vm1 = vcmask 179200  }
 0x20a   :  { %v10530_v29 = vsel %vm49_vm0, %v7665_v10, -inf  ;;  %v10547_v10 = vsel %vm49_vm0, %v9819_v35, -inf  ;;  %v10563_v35 = vpop.f32.mrf.mxu1 }
 0x20b   :  { %15210 = vst [vmem:[#allocation200_spill] sm:$0xff] %v10530_v29  ;;  %v2316_v15 = vpop.f32.mrf.mxu0  ;;  %15213 = vst [vmem:[#allocation203_spill] sm:$0xff] %v10547_v10 }
 0x20c   :  { %v10539_v8 = vsel %vm49_vm0, %v2316_v15, -inf  ;;  %v10556_v15 = vsel %vm49_vm0, %v9829_v57, -inf }
 0x20d   :  { %15212 = vst [vmem:[#allocation202_spill] sm:$0xff] %v10539_v8  ;;  %v7666_v47 = vpop.f32.mrf.mxu0  ;;  %15215 = vst [vmem:[#allocation205_spill] sm:$0xff] %v10556_v15 }
 0x20e   :  { %v10550_v44 = vsel %vm49_vm0, %v7666_v47, -inf  ;;  %v10567_v47 = vsel %vm49_vm0, %v9833_v55, -inf  ;;  %v10583_v55 = vpop.f32.mrf.mxu1 }
 0x20f   :  { %15214 = vst [vmem:[#allocation204_spill] sm:$0xff] %v10550_v44  ;;  %v2319_v29 = vpop.f32.mrf.mxu0  ;;  %15217 = vst [vmem:[#allocation207_spill] sm:$0xff] %v10567_v47 }
 0x210   :  { %v10559_v56 = vsel %vm49_vm0, %v2319_v29, -inf  ;;  %v10576_v29 = vsel %vm49_vm0, %v9839_v22, -inf }
 0x211   :  { %15216 = vst [vmem:[#allocation206_spill] sm:$0xff] %v10559_v56  ;;  %v7669_v42 = vpop.f32.mrf.mxu0  ;;  %15219 = vst [vmem:[#allocation209_spill] sm:$0xff] %v10576_v29 }
 0x212   :  { %v10570_v32 = vsel %vm49_vm0, %v7669_v42, -inf  ;;  %v10587_v42 = vsel %vm49_vm0, %v9843_v25, -inf  ;;  %v10603_v25 = vpop.f32.mrf.mxu1 }
 0x213   :  { %15218 = vst [vmem:[#allocation208_spill] sm:$0xff] %v10570_v32  ;;  %v2332_v44 = vpop.f32.mrf.mxu0  ;;  %15221 = vst [vmem:[#allocation211_spill] sm:$0xff] %v10587_v42 }
 0x214   :  { %v10579_v8 = vsel %vm49_vm0, %v2332_v44, -inf  ;;  %v10596_v44 = vsel %vm49_vm0, %v9853_v40, -inf }
 0x215   :  { %15220 = vst [vmem:[#allocation210_spill] sm:$0xff] %v10579_v8  ;;  %v7670_v15 = vpop.f32.mrf.mxu0  ;;  %15223 = vst [vmem:[#allocation213_spill] sm:$0xff] %v10596_v44 }
 0x216   :  { %v10590_v57 = vsel %vm49_vm0, %v7670_v15, -inf  ;;  %v10607_v15 = vsel %vm49_vm0, %v9857_v38, -inf  ;;  %v10623_v38 = vpop.f32.mrf.mxu1 }
 0x217   :  { %15222 = vst [vmem:[#allocation212_spill] sm:$0xff] %v10590_v57  ;;  %v2335_v32 = vpop.f32.mrf.mxu0  ;;  %15225 = vst [vmem:[#allocation215_spill] sm:$0xff] %v10607_v15  ;;  %v15238_v15 = vld [vmem:[#allocation7_spill] sm:$0xff] }
 0x218   :  { %v10599_v56 = vsel %vm49_vm0, %v2335_v32, -inf  ;;  %v10616_v32 = vsel %vm49_vm0, %v9863_v3, -inf }
 0x219   :  { %15224 = vst [vmem:[#allocation214_spill] sm:$0xff] %v10599_v56  ;;  %v7673_v29 = vpop.f32.mrf.mxu0  ;;  %15227 = vst [vmem:[#allocation217_spill] sm:$0xff] %v10616_v32 }
 0x21a   :  { %v10610_v22 = vsel %vm49_vm0, %v7673_v29, -inf  ;;  %v10627_v29 = vsel %vm49_vm0, %v9867_v14, -inf  ;;  %v10643_v14 = vpop.f32.mrf.mxu1 }
 0x21b   :  { %15226 = vst [vmem:[#allocation216_spill] sm:$0xff] %v10610_v22  ;;  %v2348_v57 = vpop.f32.mrf.mxu0  ;;  %15229 = vst [vmem:[#allocation219_spill] sm:$0xff] %v10627_v29  ;;  %v15242_v29 = vld [vmem:[#allocation10_spill] sm:$0xff] }
 0x21c   :  { %v10619_v8 = vsel %vm49_vm0, %v2348_v57, -inf  ;;  %v10636_v57 = vsel %vm49_vm0, %v9877_v30, -inf  ;;  %v3572_v30 = vsel %vm49_vm0, %v9550_v48, -inf  ;;  %v10687_v10 = vpop.f32.mrf.mxu1 }
 0x21d   :  { %15228 = vst [vmem:[#allocation218_spill] sm:$0xff] %v10619_v8  ;;  %v7674_v44 = vpop.f32.mrf.mxu0  ;;  %15231 = vst [vmem:[#allocation221_spill] sm:$0xff] %v10636_v57 }
 0x21e   :  { %v10630_v40 = vsel %vm49_vm0, %v7674_v44, -inf  ;;  %v10647_v44 = vsel %vm49_vm0, %v9881_v28, -inf  ;;  %v10664_v28 = vsel %vm49_vm0, %v15238_v15, -inf  ;;  %v10706_v15 = vsel %vm49_vm0, %v15249_v46, -inf  ;;  %v10747_v53 = vpop.f32.mrf.mxu1 }
 0x21f   :  { %15230 = vst [vmem:[#allocation220_spill] sm:$0xff] %v10630_v40  ;;  %v2351_v22 = vpop.f32.mrf.mxu0  ;;  %15233 = vst [vmem:[#allocation223_spill] sm:$0xff] %v10647_v44  ;;  %v15235_v40 = vld [vmem:[#allocation6_spill] sm:$0xff]  ;;  %v10724_v46 = vsel %vm49_vm0, %v15253_v24, -inf  ;;  %v15263_v24 = vld [vmem:[#allocation25_spill] sm:$0xff] }
 0x220   :  { %v10639_v56 = vsel %vm49_vm0, %v2351_v22, -inf  ;;  %v3558_v22 = vsel %vm49_vm0, %v15235_v40, -inf  ;;  %v15241_v40 = vld [vmem:[#allocation9_spill] sm:$0xff]  ;;  %v10791_v59 = vpop.f32.mrf.mxu1 }
 0x221   :  { %15232 = vst [vmem:[#allocation222_spill] sm:$0xff] %v10639_v56  ;;  %v7677_v32 = vpop.f32.mrf.mxu0  ;;  %v15236_v56 = vld [vmem:[#allocation58_spill] sm:$0xff]  ;;  %v10675_v47 = vsel %vm49_vm0, %v15241_v40, -inf  ;;  %v15246_v40 = vld [vmem:[#allocation12_spill] sm:$0xff] }
 0x222   :  { %v10650_v3 = vsel %vm49_vm0, %v7677_v32, -inf  ;;  %v10660_v57 = vsel %vm49_vm0, %v15236_v56, -inf  ;;  %v15239_v32 = vld [vmem:[#allocation8_spill] sm:$0xff]  ;;  %v15243_v56 = vld [vmem:[#allocation11_spill] sm:$0xff]  ;;  %v10695_v11 = vsel %vm49_vm0, %v15246_v40, -inf  ;;  %v10830_v51 = vpop.f32.mrf.mxu1 }
 0x223   :  { %15234 = vst [vmem:[#allocation224_spill] sm:$0xff] %v10650_v3  ;;  %v2364_v8 = vpop.f32.mrf.mxu0  ;;  %15237 = vst [vmem:[#allocation6_spill] sm:$0xff] %v10660_v57  ;;  %v10668_v42 = vsel %vm49_vm0, %v15239_v32, -inf  ;;  %v10679_v3 = vsel %vm49_vm0, %v15242_v29, -inf  ;;  %v10683_v44 = vsel %vm49_vm0, %v15243_v56, -inf  ;;  %v15247_v29 = vld [vmem:[#allocation13_spill] sm:$0xff] }
 0x224   :  { %v10671_v48 = vsel %vm49_vm0, %v2364_v8, -inf  ;;  %v15244_v8 = vld [vmem:[#allocation60_spill] sm:$0xff]  ;;  %v10699_v34 = vsel %vm49_vm0, %v15247_v29, -inf  ;;  %15272 = vst [vmem:[#allocation11_spill] sm:$0xff] %v10797_v2 }
 0x225   :  { %15240 = vst [vmem:[#allocation58_spill] sm:$0xff] %v10671_v48  ;;  %v7678_v32 = vpop.f32.mrf.mxu0  ;;  %v10691_v26 = vsel %vm49_vm0, %v15244_v8, -inf  ;;  %v15250_v48 = vld [vmem:[#allocation15_spill] sm:$0xff]  ;;  %v15251_v8 = vld [vmem:[#allocation16_spill] sm:$0xff]  ;;  %15273 = vst [vmem:[#allocation60_spill] sm:$0xff] %v10802_v4 }
 0x226   :  { %15245 = vst [vmem:[#allocation7_spill] sm:$0xff] %v10691_v26  ;;  %v10702_v56 = vsel %vm49_vm0, %v7678_v32, -inf  ;;  %v10710_v57 = vsel %vm49_vm0, %v15250_v48, -inf  ;;  %v10714_v9 = vsel %vm49_vm0, %v15251_v8, -inf  ;;  %v10720_v32 = vsel %vm49_vm0, %v9901_v20, -inf  ;;  %v15256_v8 = vld [vmem:[#allocation19_spill] sm:$0xff] }
 0x227   :  { %15248 = vst [vmem:[#allocation8_spill] sm:$0xff] %v10702_v56  ;;  %v2367_v29 = vpop.f32.mrf.mxu0  ;;  %15252 = vst [vmem:[#allocation9_spill] sm:$0xff] %v10720_v32  ;;  %v10728_v48 = vsel %vm49_vm0, %v15254_v36, -inf  ;;  %v10735_v6 = vsel %vm49_vm0, %v15256_v8, -inf  ;;  %v15257_v40 = vld [vmem:[#allocation20_spill] sm:$0xff]  ;;  %v15258_v20 = vld [vmem:[#allocation21_spill] sm:$0xff] }
 0x228   :  { %v10731_v16 = vsel %vm49_vm0, %v2367_v29, -inf  ;;  %v10739_v56 = vsel %vm49_vm0, %v15257_v40, -inf  ;;  %v10743_v26 = vsel %vm49_vm0, %v15258_v20, -inf  ;;  %v15259_v29 = vld [vmem:[#allocation63_spill] sm:$0xff]  ;;  %v10753_v8 = vsel %vm49_vm0, %v15260_v33, -inf  ;;  %v15264_v32 = vld [vmem:[#allocation26_spill] sm:$0xff] }
 0x229   :  { %15255 = vst [vmem:[#allocation10_spill] sm:$0xff] %v10731_v16  ;;  %v7681_v36 = vpop.f32.mrf.mxu0  ;;  %v3569_v63 = vsel %vm49_vm0, %v15259_v29, -inf  ;;  %v10757_v40 = vsel %vm49_vm0, %v15261_v41, -inf  ;;  %v10766_v16 = vsel %vm49_vm0, %v15263_v24, -inf  ;;  %v10770_v29 = vsel %vm49_vm0, %v15264_v32, -inf  ;;  %v15269_v32 = vld [vmem:[#allocation30_spill] sm:$0xff] }
 0x22a   :  { %v3570_v20 = vsel %vm49_vm0, %v7681_v36, -inf  ;;  %v3555_v41 = vsel %vm49_vm0, %v15265_v31, -inf  ;;  %v10776_v36 = vsel %vm49_vm0, %v15266_v27, -inf  ;;  %v15270_v27 = vld [vmem:[#allocation66_spill] sm:$0xff]  ;;  %v15287_v4 = vld [vmem:[#allocation77_spill] sm:$0xff] }
 0x22b   :  { %v3571_v33 = vmax.f32 %v3569_v63, %v3570_v20  ;;  %v2380_v23 = vpop.f32.mrf.mxu0  ;;  %v10789_v63 = vsel %vm49_vm0, %v15269_v32, -inf  ;;  %v3576_v5 = vsel %vm49_vm0, %v15270_v27, -inf  ;;  %v15274_v32 = vld [vmem:[#allocation32_spill] sm:$0xff] }
 0x22c   :  { %v3556_v24 = vsel %vm49_vm0, %v2380_v23, -inf }
 0x22d   :  { %v3557_v20 = vmax.f32 %v3555_v41, %v3556_v24  ;;  %v7682_v31 = vpop.f32.mrf.mxu0  ;;  %v3573_v17 = vmax.f32 %v3571_v33, %v3572_v30  ;;  %v10806_v41 = vsel %vm49_vm0, %v15274_v32, -inf  ;;  %v3574_v33 = vsel %vm49_vm0, %v10382_v39, -inf }
 0x22e   :  { %v3577_v23 = vsel %vm49_vm0, %v7682_v31, -inf  ;;  %15275 = vst [vmem:[#allocation12_spill] sm:$0xff] %v10806_v41  ;;  %v10816_v31 = vsel %vm49_vm0, %v15278_v50, -inf  ;;  %v10821_v32 = vsel %vm49_vm0, %v10430_v7, -inf  ;;  %v15283_v50 = vld [vmem:[#allocation71_spill] sm:$0xff] }
 0x22f   :  { %v3578_v30 = vmax.f32 %v3576_v5, %v3577_v23  ;;  %v2383_v24 = vpop.f32.mrf.mxu0  ;;  %v10810_v27 = vmax.f32 %v3557_v20, %v3558_v22  ;;  %15279 = vst [vmem:[#allocation14_spill] sm:$0xff] %v10816_v31  ;;  %15280 = vst [vmem:[#allocation15_spill] sm:$0xff] %v10821_v32  ;;  %v15281_v5 = vld [vmem:[#allocation69_spill] sm:$0xff]  ;;  %v3575_v62 = vmax.f32 %v3573_v17, %v3574_v33  ;;  %v15285_v33 = vld [vmem:[#allocation74_spill] sm:$0xff] }
 0x230   :  { %v3563_v60 = vsel %vm49_vm0, %v2383_v24, -inf  ;;  %v3597_v23 = vsel %vm49_vm0, %v15281_v5, -inf  ;;  %v3583_v24 = vsel %vm49_vm0, %v15283_v50, -inf  ;;  %v15284_v5 = vld [vmem:[#allocation72_spill] sm:$0xff]  ;;  %v15286_v50 = vld [vmem:[#allocation75_spill] sm:$0xff] }
 0x231   :  { %15276 = vst [vmem:[#allocation13_spill] sm:$0xff] %v10810_v27  ;;  %v3564_v39 = vmax.f32 %v3562_v1, %v3563_v60  ;;  %v7685_v20 = vpop.f32.mrf.mxu0  ;;  %v10828_v12 = vmax.f32 %v3578_v30, %v10664_v28  ;;  %v3604_v1 = vsel %vm49_vm0, %v15284_v5, -inf  ;;  %v10842_v60 = vld [vmem:[%s14842_s6 + $0x1] ss:$0 sm:$0xff]  ;;  %v3625_v0 = vsel %vm49_vm0, %v15286_v50, -inf  ;;  %v15294_v31 = vld [vmem:[#allocation87_spill] sm:$0xff] }
 0x232   :  { %v3598_v7 = vsel %vm49_vm0, %v7685_v20, -inf  ;;  %v3590_v20 = vsel %vm49_vm0, %v15285_v33, -inf  ;;  %v3611_v5 = vsel %vm49_vm0, %v15287_v4, -inf  ;;  %v10862_v33 = vpop.f32.mrf.mxu1  ;;  %v3814_v4 = vadd.f32 %v10842_v60, %v3575_v62 }
 0x233   :  { %15282 = vst [vmem:[#allocation16_spill] sm:$0xff] %v10828_v12  ;;  %v3599_v28 = vmax.f32 %v3597_v23, %v3598_v7  ;;  %v2396_v22 = vpop.f32.mrf.mxu0  ;;  %v3566_v17 = vmax.f32 %v3564_v39, %v10668_v42  ;;  %v10856_v23 = vsel %vm49_vm0, %v15288_v13, -inf  ;;  %v15289_v7 = vld [vmem:[#allocation80_spill] sm:$0xff]  ;;  %v15290_v12 = vld [vmem:[#allocation81_spill] sm:$0xff] }
 0x234   :  { %v3584_v27 = vsel %vm49_vm0, %v2396_v22, -inf  ;;  %v10860_v30 = vsel %vm49_vm0, %v15289_v7, -inf  ;;  %v10866_v50 = vsel %vm49_vm0, %v15290_v12, -inf  ;;  %v15292_v12 = vld [vmem:[#allocation84_spill] sm:$0xff]  ;;  %v3898_v54 = vmax.f32 %v3814_v4, 0.0 }
 0x235   :  { %v3585_v42 = vmax.f32 %v3583_v24, %v3584_v27  ;;  %v3568_v39 = vmax.f32 %v3566_v17, %v3567_v58  ;;  %v7686_v32 = vpop.f32.mrf.mxu0  ;;  %v3601_v13 = vmax.f32 %v3599_v28, %v10675_v47  ;;  %v3588_v58 = vsel %vm49_vm0, %v10502_v19, -inf  ;;  %v15291_v24 = vld [vmem:[#allocation83_spill] sm:$0xff] }
 0x236   :  { %v3605_v22 = vsel %vm49_vm0, %v7686_v32, -inf  ;;  %v10877_v17 = vsel %vm49_vm0, %v15291_v24, -inf  ;;  %v10881_v62 = vsel %vm49_vm0, %v15292_v12, -inf  ;;  %v15293_v32 = vld [vmem:[#allocation86_spill] sm:$0xff] }
 0x237   :  { %v3813_v18 = vadd.f32 %v10842_v60, %v3568_v39  ;;  %v3606_v49 = vmax.f32 %v3604_v1, %v3605_v22  ;;  %v2399_v7 = vpop.f32.mrf.mxu0  ;;  %v3587_v27 = vmax.f32 %v3585_v42, %v10679_v3  ;;  %v10885_v47 = vsel %vm49_vm0, %v15293_v32, -inf  ;;  %v10893_v22 = vpop.f32.mrf.mxu1 }
 0x238   :  { %v3591_v1 = vsel %vm49_vm0, %v2399_v7, -inf  ;;  %v3602_v3 = vsel %vm49_vm0, %v10478_v43, -inf  ;;  %v3595_v32 = vsel %vm49_vm0, %v10543_v52, -inf  ;;  %v10900_v7 = vsel %vm49_vm0, %v15294_v31, -inf  ;;  %v15295_v43 = vld [vmem:[#allocation89_spill] sm:$0xff] }
 0x239   :  { %v3592_v28 = vmax.f32 %v3590_v20, %v3591_v1  ;;  %v7689_v42 = vpop.f32.mrf.mxu0  ;;  %v10891_v19 = vmax.f32 %v3606_v49, %v10683_v44  ;;  %v3897_v39 = vmax.f32 %v3813_v18, 0.0  ;;  %v3589_v24 = vmax.f32 %v3587_v27, %v3588_v58  ;;  %v15296_v1 = vld [vmem:[#allocation90_spill] sm:$0xff] }
 0x23a   :  { %v3626_v12 = vsel %vm49_vm0, %v7689_v42, -inf  ;;  %v10904_v20 = vsel %vm49_vm0, %v15295_v43, -inf  ;;  %v10909_v27 = vsel %vm49_vm0, %v15296_v1, -inf  ;;  %v3603_v58 = vmax.f32 %v3601_v13, %v3602_v3  ;;  %v15297_v42 = vld [vmem:[#allocation92_spill] sm:$0xff]  ;;  %v10918_v43 = vpop.f32.mrf.mxu1 }
 0x23b   :  { %v3627_v49 = vmax.f32 %v3625_v0, %v3626_v12  ;;  %v2412_v44 = vpop.f32.mrf.mxu0  ;;  %v3594_v18 = vmax.f32 %v3592_v28, %v10695_v11  ;;  %v7980_v4 = vpack.i.bf16 %v3898_v54, %v3897_v39  ;;  %v10914_v31 = vsel %vm49_vm0, %v15297_v42, -inf }
 0x23c   :  { %v3612_v52 = vsel %vm49_vm0, %v2412_v44, -inf  ;;  %v3630_v0 = vsel %vm49_vm0, %v10563_v35, -inf  ;;  %v3816_v11 = vadd.f32 %v10842_v60, %v3589_v24  ;;  %v3616_v13 = vsel %vm49_vm0, %v10583_v55, -inf }
 0x23d   :  { %v3613_v41 = vmax.f32 %v3611_v5, %v3612_v52  ;;  %v3596_v2 = vmax.f32 %v3594_v18, %v3595_v32  ;;  %v7690_v12 = vpop.f32.mrf.mxu0  ;;  %v3629_v28 = vmax.f32 %v3627_v49, %v10699_v34  ;;  %7981 = vrot.lane.b32.xlu0 %v7980_v4, %s8991_s23  ;;  %v15298_v5 = vld [vmem:[#allocation93_spill] sm:$0xff]  ;;  %v15299_v34 = vld [vmem:[#allocation95_spill] sm:$0xff]  ;;  %v3818_v44 = vadd.f32 %v10842_v60, %v3603_v58 }
 0x23e   :  { %v3633_v54 = vsel %vm49_vm0, %v7690_v12, -inf  ;;  %v10928_v3 = vsel %vm49_vm0, %v15298_v5, -inf  ;;  %v10935_v49 = vsel %vm49_vm0, %v15299_v34, -inf  ;;  %v3900_v12 = vmax.f32 %v3816_v11, 0.0 }
 0x23f   :  { %v3817_v35 = vadd.f32 %v10842_v60, %v3596_v2  ;;  %v3634_v39 = vmax.f32 %v10856_v23, %v3633_v54  ;;  %v2415_v32 = vpop.f32.mrf.mxu0  ;;  %v3615_v24 = vmax.f32 %v3613_v41, %v10706_v15  ;;  %v3631_v18 = vmax.f32 %v3629_v28, %v3630_v0  ;;  %v10941_v23 = vpop.f32.mrf.mxu1 }
 0x240   :  { %v3619_v55 = vsel %vm49_vm0, %v2415_v32, -inf  ;;  %v3623_v58 = vsel %vm49_vm0, %v10623_v38, -inf  ;;  %v3609_v0 = vsel %vm49_vm0, %v10523_v45, -inf  ;;  %v3902_v5 = vmax.f32 %v3818_v44, 0.0 }
 0x241   :  { %v3901_v1 = vmax.f32 %v3817_v35, 0.0  ;;  %v3620_v52 = vmax.f32 %v10860_v30, %v3619_v55  ;;  %v3617_v4 = vmax.f32 %v3615_v24, %v3616_v13  ;;  %v7693_v42 = vpop.f32.mrf.mxu0  ;;  %v3636_v2 = vmax.f32 %v3634_v39, %v10710_v57 }
 0x242   :  { %v3822_v15 = vadd.f32 %v10842_v60, %v3631_v18  ;;  %v3654_v41 = vsel %vm49_vm0, %v7693_v42, -inf  ;;  %v3637_v30 = vsel %vm49_vm0, %v10603_v25, -inf  ;;  %v3644_v45 = vsel %vm49_vm0, %v10687_v10, -inf }
 0x243   :  { %v3655_v28 = vmax.f32 %v10866_v50, %v3654_v41  ;;  %v2428_v54 = vpop.f32.mrf.mxu0  ;;  %v3622_v57 = vmax.f32 %v3620_v52, %v10714_v9  ;;  %v7985_v13 = vpack.i.bf16 %v3901_v1, %v3900_v12  ;;  %v3820_v39 = vadd.f32 %v10842_v60, %v3617_v4  ;;  %v10958_v50 = vpop.f32.mrf.mxu1 }
 0x244   :  { %v3640_v11 = vsel %vm49_vm0, %v2428_v54, -inf  ;;  %v3906_v35 = vmax.f32 %v3822_v15, 0.0  ;;  %v3638_v25 = vmax.f32 %v3636_v2, %v3637_v30  ;;  %v3610_v52 = vmax.f32 %v10891_v19, %v3609_v0 }
 0x245   :  { %v3641_v38 = vmax.f32 %v10877_v17, %v3640_v11  ;;  %v3624_v32 = vmax.f32 %v3622_v57, %v3623_v58  ;;  %v7694_v24 = vpop.f32.mrf.mxu0  ;;  %v3657_v34 = vmax.f32 %v3655_v28, %v10724_v46  ;;  %7986 = vrot.lane.b32.xlu0 %v7985_v13, %s8992_s24  ;;  %v3658_v17 = vsel %vm49_vm0, %v10643_v14, -inf  ;;  %v10977_v15 = vpop.f32.mrf.mxu1 }
 0x246   :  { %v3661_v9 = vsel %vm49_vm0, %v7694_v24, -inf  ;;  %v7990_v44 = vpack.i.bf16 %v3906_v35, %v3902_v5  ;;  %v3665_v4 = vsel %vm49_vm0, %v10747_v53, -inf  ;;  %v3651_v42 = vsel %vm49_vm0, %v10791_v59, -inf }
 0x247   :  { %v3821_v18 = vadd.f32 %v10842_v60, %v3624_v32  ;;  %v3662_v55 = vmax.f32 %v10881_v62, %v3661_v9  ;;  %v3643_v10 = vmax.f32 %v3641_v38, %v10728_v48  ;;  %v2431_v1 = vpop.f32.mrf.mxu0  ;;  %v3904_v19 = vmax.f32 %v3820_v39, 0.0 }
 0x248   :  { %7991 = vrot.lane.b32.xlu1 %v7990_v44, %s8992_s24  ;;  %v3647_v46 = vsel %vm49_vm0, %v2431_v1, -inf  ;;  %v3823_v41 = vadd.f32 %v10842_v60, %v3638_v25  ;;  %v3659_v58 = vmax.f32 %v3657_v34, %v3658_v17  ;;  %v3672_v11 = vsel %vm49_vm0, %v10862_v33, -inf }
 0x249   :  { %v3905_v2 = vmax.f32 %v3821_v18, 0.0  ;;  %v3645_v12 = vmax.f32 %v3643_v10, %v3644_v45  ;;  %v3648_v14 = vmax.f32 %v10885_v47, %v3647_v46  ;;  %v7697_v62 = vpop.f32.mrf.mxu0  ;;  %v3664_v48 = vmax.f32 %v3662_v55, %v10735_v6 }
 0x24a   :  { %v3682_v0 = vsel %vm49_vm0, %v7697_v62, -inf  ;;  %v3819_v47 = vadd.f32 %v10842_v60, %v3610_v52  ;;  %v3907_v32 = vmax.f32 %v3823_v41, 0.0  ;;  %v3686_v18 = vsel %vm49_vm0, %v10830_v51, -inf }
 0x24b   :  { %v3824_v53 = vadd.f32 %v10842_v60, %v3645_v12  ;;  %v3683_v28 = vmax.f32 %v10900_v7, %v3682_v0  ;;  %v3666_v59 = vmax.f32 %v3664_v48, %v3665_v4  ;;  %v2444_v30 = vpop.f32.mrf.mxu0  ;;  %v3650_v54 = vmax.f32 %v3648_v14, %v10739_v56  ;;  %v10990_v7 = vpop.f32.mrf.mxu1  ;;  %v15302_v48 = vld [vmem:[#allocation99_spill] sm:$0xff] }
 0x24c   :  { %v3668_v6 = vsel %vm49_vm0, %v2444_v30, -inf  ;;  %v7995_v57 = vpack.i.bf16 %v3905_v2, %v3904_v19  ;;  %v3826_v56 = vadd.f32 %v10842_v60, %v3659_v58  ;;  %v3903_v44 = vmax.f32 %v3819_v47, 0.0  ;;  %v15300_v2 = vld [vmem:[#allocation96_spill] sm:$0xff] }
 0x24d   :  { %v3908_v13 = vmax.f32 %v3824_v53, 0.0  ;;  %v3827_v5 = vadd.f32 %v10842_v60, %v3666_v59  ;;  %v3669_v35 = vmax.f32 %v10904_v20, %v3668_v6  ;;  %v3652_v39 = vmax.f32 %v3650_v54, %v3651_v42  ;;  %v7698_v38 = vpop.f32.mrf.mxu0  ;;  %v11008_v46 = vpop.f32.mrf.mxu1  ;;  %v15303_v53 = vld [vmem:[#allocation101_spill] sm:$0xff] }
 0x24e   :  { %v3685_v24 = vmax.f32 %v3683_v28, %v10743_v26  ;;  %7996 = vrot.lane.b32.xlu0 %v7995_v57, %s8992_s24  ;;  %v3689_v45 = vsel %vm49_vm0, %v7698_v38, -inf  ;;  %v3716_v12 = vsel %vm49_vm0, %v15300_v2, -inf  ;;  %v3737_v19 = vsel %vm49_vm0, %v15302_v48, -inf  ;;  %v15305_v38 = vld [vmem:[#allocation104_spill] sm:$0xff] }
 0x24f   :  { %v3911_v25 = vmax.f32 %v3827_v5, 0.0  ;;  %v3825_v33 = vadd.f32 %v10842_v60, %v3652_v39  ;;  %v3690_v34 = vmax.f32 %v10909_v27, %v3689_v45  ;;  %v2447_v9 = vpop.f32.mrf.mxu0  ;;  %v3671_v20 = vmax.f32 %v3669_v35, %v10753_v8  ;;  %v3148_v47 = vpop.f32.mrf.mxu1 }
 0x250   :  { %v3675_v17 = vsel %vm49_vm0, %v2447_v9, -inf  ;;  %v8000_v55 = vpack.i.bf16 %v3908_v13, %v3907_v32  ;;  %v3679_v27 = vsel %vm49_vm0, %v10918_v43, -inf  ;;  %v3910_v8 = vmax.f32 %v3826_v56, 0.0 }
 0x251   :  { %v3909_v26 = vmax.f32 %v3825_v33, 0.0  ;;  %v3676_v10 = vmax.f32 %v10914_v31, %v3675_v17  ;;  %v11004_v1 = vmax.f32 %v3690_v34, %v10757_v40  ;;  %v7701_v52 = vpop.f32.mrf.mxu0  ;;  %v3673_v4 = vmax.f32 %v3671_v20, %v3672_v11  ;;  %v15301_v31 = vld [vmem:[#allocation98_spill] sm:$0xff]  ;;  %v7874_v9 = vpop.f32.mrf.mxu1 }
 0x252   :  { %8001 = vrot.lane.b32.xlu0 %v8000_v55, %s8992_s24  ;;  %v3710_v51 = vsel %vm49_vm0, %v7701_v52, -inf  ;;  %v8005_v42 = vpack.i.bf16 %v3903_v44, %v3911_v25  ;;  %v3702_v40 = vsel %vm49_vm0, %v15301_v31, -inf  ;;  %v3687_v41 = vmax.f32 %v3685_v24, %v3686_v18 }
 0x253   :  { %v3711_v14 = vmax.f32 %v10928_v3, %v3710_v51  ;;  %v2460_v62 = vpop.f32.mrf.mxu0  ;;  %v3678_v43 = vmax.f32 %v3676_v10, %v10762_v61  ;;  %v8010_v0 = vpack.i.bf16 %v3910_v8, %v3909_v26  ;;  %v3723_v28 = vsel %vm49_vm0, %v15303_v53, -inf }
 0x254   :  { %v3696_v58 = vsel %vm49_vm0, %v2460_v62, -inf  ;;  %v3714_v54 = vsel %vm49_vm0, %v10941_v23, -inf  ;;  %v3828_v61 = vadd.f32 %v10842_v60, %v3673_v4  ;;  %v3700_v11 = vsel %vm49_vm0, %v10958_v50, -inf }
 0x255   :  { %v3697_v59 = vmax.f32 %v10935_v49, %v3696_v58  ;;  %v3680_v30 = vmax.f32 %v3678_v43, %v3679_v27  ;;  %v7702_v3 = vpop.f32.mrf.mxu0  ;;  %v3713_v6 = vmax.f32 %v3711_v14, %v10766_v16  ;;  %8011 = vrot.lane.b32.xlu1 %v8010_v0, %s8992_s24  ;;  %v15304_v49 = vld [vmem:[#allocation102_spill] sm:$0xff]  ;;  %v3730_v16 = vsel %vm49_vm0, %v15305_v38, -inf }
 0x256   :  { %8006 = vrot.lane.b32.xlu0 %v8005_v42, %s8992_s24  ;;  %v3717_v57 = vsel %vm49_vm0, %v7702_v3, -inf  ;;  %v3744_v13 = vsel %vm49_vm0, %v15304_v49, -inf  ;;  %v3830_v32 = vadd.f32 %v10842_v60, %v3687_v41  ;;  %v3912_v20 = vmax.f32 %v3828_v61, 0.0 }
 0x257   :  { %v3829_v23 = vadd.f32 %v10842_v60, %v3680_v30  ;;  %v3718_v5 = vmax.f32 %v3716_v12, %v3717_v57  ;;  %v2463_v35 = vpop.f32.mrf.mxu0  ;;  %v3699_v39 = vmax.f32 %v3697_v59, %v10770_v29  ;;  %v3715_v56 = vmax.f32 %v3713_v6, %v3714_v54  ;;  %v15306_v54 = vld [vmem:[#allocation11_spill] sm:$0xff]  ;;  %v15307_v6 = vld [vmem:[#allocation106_spill] sm:$0xff] }
 0x258   :  { %v3703_v24 = vsel %vm49_vm0, %v2463_v35, -inf  ;;  %v3707_v18 = vsel %vm49_vm0, %v10990_v7, -inf  ;;  %v3693_v17 = vsel %vm49_vm0, %v10893_v22, -inf  ;;  %v3721_v26 = vsel %vm49_vm0, %v10977_v15, -inf  ;;  %v3151_v22 = vpop.f32.mrf.mxu1  ;;  %v15308_v57 = vld [vmem:[#allocation107_spill] sm:$0xff] }
 0x259   :  { %v3913_v45 = vmax.f32 %v3829_v23, 0.0  ;;  %v3704_v25 = vmax.f32 %v3702_v40, %v3703_v24  ;;  %v3701_v50 = vmax.f32 %v3699_v39, %v3700_v11  ;;  %v7705_v33 = vpop.f32.mrf.mxu0  ;;  %v3720_v34 = vmax.f32 %v3718_v5, %v10776_v36  ;;  %v15310_v5 = vld [vmem:[#allocation12_spill] sm:$0xff]  ;;  %v15311_v39 = vld [vmem:[#allocation34_spill] sm:$0xff] }
 0x25a   :  { %v3834_v44 = vadd.f32 %v10842_v60, %v3715_v56  ;;  %v3738_v29 = vsel %vm49_vm0, %v7705_v33, -inf  ;;  %v3914_v36 = vmax.f32 %v3830_v32, 0.0  ;;  %v3728_v12 = vsel %vm49_vm0, %v3148_v47, -inf  ;;  %v15313_v33 = vld [vmem:[#allocation108_spill] sm:$0xff] }
 0x25b   :  { %v3739_v55 = vmax.f32 %v3737_v19, %v3738_v29  ;;  %v2476_v10 = vpop.f32.mrf.mxu0  ;;  %v3706_v52 = vmax.f32 %v3704_v25, %v10780_v37  ;;  %v8015_v4 = vpack.i.bf16 %v3913_v45, %v3912_v20  ;;  %v3832_v51 = vadd.f32 %v10842_v60, %v3701_v50  ;;  %v15312_v45 = vld [vmem:[#allocation14_spill] sm:$0xff] }
 0x25c   :  { %v3918_v27 = vmax.f32 %v3834_v44, 0.0  ;;  %v3724_v8 = vsel %vm49_vm0, %v2476_v10, -inf  ;;  %v3722_v31 = vmax.f32 %v3720_v34, %v3721_v26  ;;  %v3742_v62 = vsel %vm49_vm0, %v11008_v46, -inf  ;;  %v15314_v34 = vld [vmem:[#allocation109_spill] sm:$0xff]  ;;  %v15316_v26 = vld [vmem:[#allocation35_spill] sm:$0xff] }
 0x25d   :  { %v3725_v42 = vmax.f32 %v3723_v28, %v3724_v8  ;;  %v3708_v2 = vmax.f32 %v3706_v52, %v3707_v18  ;;  %v7706_v7 = vpop.f32.mrf.mxu0  ;;  %v3741_v40 = vmax.f32 %v3739_v55, %v10785_v21  ;;  %8016 = vrot.lane.b32.xlu1 %v8015_v4, %s8993_s25  ;;  %v3694_v41 = vmax.f32 %v11004_v1, %v3693_v17  ;;  %v15318_v8 = vld [vmem:[#allocation112_spill] sm:$0xff] }
 0x25e   :  { %v3745_v37 = vsel %vm49_vm0, %v7706_v7, -inf  ;;  %v8020_v15 = vpack.i.bf16 %v3918_v27, %v3914_v36  ;;  %v3749_v58 = vsel %vm49_vm0, %v7874_v9, -inf  ;;  %v3735_v0 = vsel %vm49_vm0, %v3151_v22, -inf  ;;  %v15317_v27 = vld [vmem:[#allocation111_spill] sm:$0xff] }
 0x25f   :  { %v3833_v14 = vadd.f32 %v10842_v60, %v3708_v2  ;;  %v3746_v43 = vmax.f32 %v3744_v13, %v3745_v37  ;;  %v3727_v48 = vmax.f32 %v3725_v42, %v10789_v63  ;;  %v2479_v19 = vpop.f32.mrf.mxu0  ;;  %v3916_v3 = vmax.f32 %v3832_v51, 0.0  ;;  %v15321_v37 = vld [vmem:[#allocation114_spill] sm:$0xff] }
 0x260   :  { %8021 = vrot.lane.b32.xlu0 %v8020_v15, %s8993_s25  ;;  %v3731_v21 = vsel %vm49_vm0, %v2479_v19, -inf  ;;  %v3835_v63 = vadd.f32 %v10842_v60, %v3722_v31  ;;  %v3743_v47 = vmax.f32 %v3741_v40, %v3742_v62  ;;  %v15309_v11 = vmax.f32 %v15307_v6, %v15308_v57  ;;  %v15320_v40 = vld [vmem:[#allocation113_spill] sm:$0xff]  ;;  %v15330_v57 = vld [vmem:[#allocation38_spill] sm:$0xff] }
 0x261   :  { %v3917_v53 = vmax.f32 %v3833_v14, 0.0  ;;  %v3729_v28 = vmax.f32 %v3727_v48, %v3728_v12  ;;  %v3732_v59 = vmax.f32 %v3730_v16, %v3731_v21  ;;  %v7709_v30 = vpop.f32.mrf.mxu0  ;;  %v3748_v46 = vmax.f32 %v3746_v43, %v15306_v54  ;;  %v15323_v21 = vld [vmem:[#allocation116_spill] sm:$0xff] }
 0x262   :  { %v3180_v1 = vsel %vm49_vm0, %v7709_v30, -inf  ;;  %v11078_v38 = vsel %vm49_vm0, %v15311_v39, -inf  ;;  %v3831_v16 = vadd.f32 %v10842_v60, %v3694_v41  ;;  %v15315_v9 = vmax.f32 %v15313_v33, %v15314_v34  ;;  %v15335_v34 = vld [vmem:[#allocation123_spill] sm:$0xff] }
 0x263   :  { %v3836_v61 = vadd.f32 %v10842_v60, %v3729_v28  ;;  %v11073_v49 = vmax.f32 %v15309_v11, %v3180_v1  ;;  %v3750_v13 = vmax.f32 %v3748_v46, %v3749_v58  ;;  %v2492_v23 = vpop.f32.mrf.mxu0  ;;  %v3734_v35 = vmax.f32 %v3732_v59, %v15310_v5  ;;  %v15324_v58 = vld [vmem:[#allocation117_spill] sm:$0xff] }
 0x264   :  { %v3166_v32 = vsel %vm49_vm0, %v2492_v23, -inf  ;;  %v8025_v56 = vpack.i.bf16 %v3917_v53, %v3916_v3  ;;  %v3919_v29 = vmax.f32 %v3835_v63, 0.0  ;;  %v3838_v18 = vadd.f32 %v10842_v60, %v3743_v47  ;;  %v15326_v59 = vld [vmem:[#allocation37_spill] sm:$0xff]  ;;  %v15327_v63 = vld [vmem:[#allocation118_spill] sm:$0xff]  ;;  %v15328_v47 = vld [vmem:[#allocation119_spill] sm:$0xff] }
 0x265   :  { %v3920_v24 = vmax.f32 %v3836_v61, 0.0  ;;  %v3183_v25 = vmax.f32 %v11073_v49, %v15312_v45  ;;  %v3839_v50 = vadd.f32 %v10842_v60, %v3750_v13  ;;  %v11088_v20 = vmax.f32 %v15315_v9, %v3166_v32  ;;  %v7710_v44 = vpop.f32.mrf.mxu0  ;;  %v15331_v5 = vld [vmem:[#allocation121_spill] sm:$0xff]  ;;  %v15336_v9 = vld [vmem:[#allocation124_spill] sm:$0xff]  ;;  %v15436_v23 = vld [vmem:[#allocation183_spill] sm:$0xff] }
 0x266   :  { %v3736_v17 = vmax.f32 %v3734_v35, %v3735_v0  ;;  %8026 = vrot.lane.b32.xlu1 %v8025_v56, %s8993_s25  ;;  %v3187_v55 = vsel %vm49_vm0, %v7710_v44, -inf  ;;  %v11095_v10 = vsel %vm49_vm0, %v15316_v26, -inf  ;;  %v15319_v4 = vmax.f32 %v15317_v27, %v15318_v8  ;;  %v15332_v35 = vld [vmem:[#allocation122_spill] sm:$0xff]  ;;  %v15334_v56 = vld [vmem:[#allocation39_spill] sm:$0xff] }
 0x267   :  { %v3923_v52 = vmax.f32 %v3839_v50, 0.0  ;;  %v3169_v36 = vmax.f32 %v11088_v20, %v11078_v38  ;;  %v2495_v42 = vpop.f32.mrf.mxu0  ;;  %v3915_v2 = vmax.f32 %v3831_v16, 0.0  ;;  %v8030_v22 = vpack.i.bf16 %v3920_v24, %v3919_v29  ;;  %v15339_v26 = vld [vmem:[#allocation127_spill] sm:$0xff] }
 0x268   :  { %v11102_v51 = vmax.f32 %v15319_v4, %v3187_v55  ;;  %v3837_v7 = vadd.f32 %v10842_v60, %v3736_v17  ;;  %v3173_v12 = vsel %vm49_vm0, %v2495_v42, -inf  ;;  %v15322_v15 = vmax.f32 %v15320_v40, %v15321_v37  ;;  %v15338_v55 = vld [vmem:[#allocation126_spill] sm:$0xff]  ;;  %v15341_v4 = vld [vmem:[#allocation41_spill] sm:$0xff] }
 0x269   :  { %v7713_v62 = vpop.f32.mrf.mxu0  ;;  %v3922_v43 = vmax.f32 %v3838_v18, 0.0  ;;  %v8035_v41 = vpack.i.bf16 %v3915_v2, %v3923_v52  ;;  %v15325_v0 = vmax.f32 %v15323_v21, %v15324_v58  ;;  %v11122_v30 = vsel %vm49_vm0, %v15326_v59, -inf  ;;  %v15347_v21 = vld [vmem:[#allocation132_spill] sm:$0xff]  ;;  %v15349_v59 = vld [vmem:[#allocation43_spill] sm:$0xff] }
 0x26a   :  { %v3190_v31 = vmax.f32 %v11102_v51, %v11095_v10  ;;  %v11111_v14 = vmax.f32 %v15322_v15, %v3173_v12  ;;  %v3921_v48 = vmax.f32 %v3837_v7, 0.0  ;;  %8031 = vrot.lane.b32.xlu1 %v8030_v22, %s8993_s25  ;;  %v3208_v19 = vsel %vm49_vm0, %v7713_v62, -inf  ;;  %v15342_v12 = vld [vmem:[#allocation128_spill] sm:$0xff]  ;;  %v15343_v22 = vld [vmem:[#allocation129_spill] sm:$0xff]  ;;  %v15345_v62 = vld [vmem:[#allocation42_spill] sm:$0xff] }
 0x26b   :  { %v11118_v53 = vmax.f32 %v15325_v0, %v3208_v19  ;;  %v2508_v28 = vpop.f32.mrf.mxu0  ;;  %v15329_v1 = vmax.f32 %v15327_v63, %v15328_v47  ;;  %v11134_v11 = vsel %vm49_vm0, %v15330_v57, -inf  ;;  %v15333_v39 = vmax.f32 %v15331_v5, %v15332_v35  ;;  %v15350_v47 = vld [vmem:[#allocation133_spill] sm:$0xff]  ;;  %v15353_v35 = vld [vmem:[#allocation136_spill] sm:$0xff] }
 0x26c   :  { %v3194_v54 = vsel %vm49_vm0, %v2508_v28, -inf  ;;  %v8040_v46 = vpack.i.bf16 %v3922_v43, %v3921_v48  ;;  %v11148_v24 = vsel %vm49_vm0, %v15334_v56, -inf  ;;  %v15337_v44 = vmax.f32 %v15335_v34, %v15336_v9  ;;  %v15356_v34 = vld [vmem:[#allocation45_spill] sm:$0xff] }
 0x26d   :  { %v11130_v61 = vmax.f32 %v15329_v1, %v3194_v54  ;;  %v7714_v6 = vpop.f32.mrf.mxu0  ;;  %v15340_v52 = vmax.f32 %v15338_v55, %v15339_v26  ;;  %v11166_v42 = vsel %vm49_vm0, %v15341_v4, -inf  ;;  %v15344_v40 = vmax.f32 %v15342_v12, %v15343_v22  ;;  %v15351_v1 = vld [vmem:[#allocation134_spill] sm:$0xff]  ;;  %v15358_v55 = vld [vmem:[#allocation139_spill] sm:$0xff] }
 0x26e   :  { %8036 = vrot.lane.b32.xlu1 %v8035_v41, %s8993_s25  ;;  %8041 = vrot.lane.b32.xlu0 %v8040_v46, %s8993_s25  ;;  %v3215_v13 = vsel %vm49_vm0, %v7714_v6, -inf  ;;  %v11178_v43 = vsel %vm49_vm0, %v15345_v62, -inf  ;;  %v15346_v41 = vld [vmem:[#allocation131_spill] sm:$0xff]  ;;  %v11190_v54 = vsel %vm49_vm0, %v15349_v59, -inf  ;;  %v15352_v6 = vmax.f32 %v15350_v47, %v15351_v1  ;;  %v15360_v4 = vld [vmem:[#allocation46_spill] sm:$0xff]  ;;  %v15366_v47 = vld [vmem:[#allocation144_spill] sm:$0xff] }
 0x26f   :  { %v11144_v16 = vmax.f32 %v15333_v39, %v3215_v13  ;;  %v2511_v32 = vpop.f32.mrf.mxu0  ;;  %v15348_v58 = vmax.f32 %v15346_v41, %v15347_v21  ;;  %v15354_v39 = vld [vmem:[#allocation137_spill] sm:$0xff]  ;;  %v3266_v9 = vsel %vm49_vm0, %v15356_v34, -inf  ;;  %v15364_v21 = vld [vmem:[#allocation47_spill] sm:$0xff]  ;;  %s8996_s25 = smov 18   ;;  %v15540_v49 = vmax.f32 %v11118_v53, %v11122_v30 }
 0x270   :  { %v3201_v50 = vsel %vm49_vm0, %v2511_v32, -inf  ;;  %v15355_v32 = vmax.f32 %v15353_v35, %v15354_v39  ;;  %v15370_v34 = vld [vmem:[#allocation147_spill] sm:$0xff] }
 0x271   :  { %v11156_v29 = vmax.f32 %v15337_v44, %v3201_v50  ;;  %v7717_v18 = vpop.f32.mrf.mxu0 }
 0x272   :  { %v3236_v17 = vsel %vm49_vm0, %v7717_v18, -inf }
 0x273   :  { %v11162_v27 = vmax.f32 %v15340_v52, %v3236_v17  ;;  %v2524_v8 = vpop.f32.mrf.mxu0  ;;  %v15357_v17 = vld [vmem:[#allocation138_spill] sm:$0xff] }
 0x274   :  { %v3222_v2 = vsel %vm49_vm0, %v2524_v8, -inf  ;;  %v15359_v26 = vmax.f32 %v15357_v17, %v15358_v55  ;;  %v15372_v55 = vld [vmem:[#allocation49_spill] sm:$0xff] }
 0x275   :  { %v11174_v37 = vmax.f32 %v15344_v40, %v3222_v2  ;;  %v7718_v15 = vpop.f32.mrf.mxu0  ;;  %v3252_v2 = vsel %vm49_vm0, %v15360_v4, -inf  ;;  %v15361_v40 = vld [vmem:[#allocation141_spill] sm:$0xff]  ;;  %v15542_v51 = vmax.f32 %v11162_v27, %v11166_v42 }
 0x276   :  { %v3243_v48 = vsel %vm49_vm0, %v7718_v15, -inf  ;;  %v15362_v15 = vld [vmem:[#allocation142_spill] sm:$0xff] }
 0x277   :  { %v11186_v0 = vmax.f32 %v15348_v58, %v3243_v48  ;;  %v2527_v28 = vpop.f32.mrf.mxu0  ;;  %v15363_v62 = vmax.f32 %v15361_v40, %v15362_v15  ;;  %v11220_v58 = vsel %vm49_vm0, %v15364_v21, -inf  ;;  %v15543_v53 = vmax.f32 %v11174_v37, %v11178_v43  ;;  %v5384_v27 = vld [vmem:[%s14838_s2 + $0x1c8] sm:$0xff] }
 0x278   :  { %v3229_v46 = vsel %vm49_vm0, %v2527_v28, -inf }
 0x279   :  { %v11198_v57 = vmax.f32 %v15352_v6, %v3229_v46  ;;  %v7721_v13 = vpop.f32.mrf.mxu0  ;;  %v15365_v46 = vld [vmem:[#allocation143_spill] sm:$0xff] }
 0x27a   :  { %v3264_v5 = vsel %vm49_vm0, %v7721_v13, -inf  ;;  %v15367_v1 = vmax.f32 %v15365_v46, %v15366_v47 }
 0x27b   :  { %v3265_v56 = vmax.f32 %v15355_v32, %v3264_v5  ;;  %v2540_v50 = vpop.f32.mrf.mxu0  ;;  %v15368_v5 = vld [vmem:[#allocation48_spill] sm:$0xff] }
 0x27c   :  { %v3250_v44 = vsel %vm49_vm0, %v2540_v50, -inf  ;;  %v3259_v35 = vsel %vm49_vm0, %v15368_v5, -inf  ;;  %v15369_v50 = vld [vmem:[#allocation146_spill] sm:$0xff] }
 0x27d   :  { %v3267_v18 = vmax.f32 %v3265_v56, %v3266_v9  ;;  %v3251_v52 = vmax.f32 %v15359_v26, %v3250_v44  ;;  %v7722_v8 = vpop.f32.mrf.mxu0  ;;  %v15371_v9 = vmax.f32 %v15369_v50, %v15370_v34  ;;  %v3294_v26 = vsel %vm49_vm0, %v15372_v55, -inf  ;;  %v15380_v50 = vld [vmem:[#allocation51_spill] sm:$0xff] }
 0x27e   :  { %v3271_v12 = vsel %vm49_vm0, %v7722_v8, -inf  ;;  %v3301_v34 = vsel %vm49_vm0, %v15380_v50, -inf }
 0x27f   :  { %v3253_v22 = vmax.f32 %v3251_v52, %v3252_v2  ;;  %v11216_v48 = vmax.f32 %v15363_v62, %v3271_v12  ;;  %v2543_v41 = vpop.f32.mrf.mxu0  ;;  %v15373_v2 = vld [vmem:[#allocation148_spill] sm:$0xff]  ;;  %v15374_v12 = vld [vmem:[#allocation149_spill] sm:$0xff]  ;;  %v15376_v62 = vld [vmem:[#allocation50_spill] sm:$0xff]  ;;  %v3770_v21 = vadd.f32 %v10842_v60, %v3267_v18 }
 0x280   :  { %v3257_v28 = vsel %vm49_vm0, %v2543_v41, -inf  ;;  %v15375_v40 = vmax.f32 %v15373_v2, %v15374_v12  ;;  %v3280_v41 = vsel %vm49_vm0, %v15376_v62, -inf  ;;  %v15382_v18 = vld [vmem:[#allocation154_spill] sm:$0xff]  ;;  %v15385_v62 = vld [vmem:[#allocation156_spill] sm:$0xff] }
 0x281   :  { %v3274_v59 = vmax.f32 %v11216_v48, %v11220_v58  ;;  %v3258_v6 = vmax.f32 %v15367_v1, %v3257_v28  ;;  %v7725_v13 = vpop.f32.mrf.mxu0  ;;  %v3768_v39 = vadd.f32 %v10842_v60, %v3253_v22 }
 0x282   :  { %v3292_v32 = vsel %vm49_vm0, %v7725_v13, -inf  ;;  %v15378_v13 = vld [vmem:[#allocation152_spill] sm:$0xff] }
 0x283   :  { %v3260_v56 = vmax.f32 %v3258_v6, %v3259_v35  ;;  %v3293_v44 = vmax.f32 %v15371_v9, %v3292_v32  ;;  %v2556_v17 = vpop.f32.mrf.mxu0  ;;  %v3852_v46 = vmax.f32 %v3768_v39, 0.0  ;;  %v15377_v6 = vld [vmem:[#allocation151_spill] sm:$0xff] }
 0x284   :  { %v3278_v52 = vsel %vm49_vm0, %v2556_v17, -inf  ;;  %v15379_v5 = vmax.f32 %v15377_v6, %v15378_v13  ;;  %v15381_v17 = vld [vmem:[#allocation153_spill] sm:$0xff] }
 0x285   :  { %v3769_v8 = vadd.f32 %v10842_v60, %v3260_v56  ;;  %v3295_v4 = vmax.f32 %v3293_v44, %v3294_v26  ;;  %v3279_v22 = vmax.f32 %v15375_v40, %v3278_v52  ;;  %v7726_v15 = vpop.f32.mrf.mxu0  ;;  %v15383_v55 = vmax.f32 %v15381_v17, %v15382_v18  ;;  %v15392_v17 = vld [vmem:[#allocation54_spill] sm:$0xff] }
 0x286   :  { %v3299_v28 = vsel %vm49_vm0, %v7726_v15, -inf  ;;  %v3854_v40 = vmax.f32 %v3770_v21, 0.0  ;;  %v3308_v18 = vsel %vm49_vm0, %v15392_v17, -inf }
 0x287   :  { %v3774_v47 = vadd.f32 %v10842_v60, %v3295_v4  ;;  %v3281_v1 = vmax.f32 %v3279_v22, %v3280_v41  ;;  %v3300_v35 = vmax.f32 %v15379_v5, %v3299_v28  ;;  %v2559_v32 = vpop.f32.mrf.mxu0  ;;  %v3853_v56 = vmax.f32 %v3769_v8, 0.0  ;;  %v15384_v4 = vld [vmem:[#allocation52_spill] sm:$0xff]  ;;  %v15386_v41 = vld [vmem:[#allocation157_spill] sm:$0xff] }
 0x288   :  { %v3285_v9 = vsel %vm49_vm0, %v2559_v32, -inf  ;;  %v3287_v2 = vsel %vm49_vm0, %v15384_v4, -inf  ;;  %v15387_v28 = vmax.f32 %v15385_v62, %v15386_v41  ;;  %v15388_v5 = vld [vmem:[#allocation53_spill] sm:$0xff]  ;;  %v15394_v4 = vld [vmem:[#allocation162_spill] sm:$0xff]  ;;  %v15396_v62 = vld [vmem:[#allocation55_spill] sm:$0xff] }
 0x289   :  { %v3302_v44 = vmax.f32 %v3300_v35, %v3301_v34  ;;  %v3286_v26 = vmax.f32 %v15383_v55, %v3285_v9  ;;  %v7729_v39 = vpop.f32.mrf.mxu0  ;;  %v8045_v52 = vpack.i.bf16 %v3853_v56, %v3852_v46  ;;  %v3858_v22 = vmax.f32 %v3774_v47, 0.0  ;;  %v15389_v56 = vld [vmem:[#allocation158_spill] sm:$0xff] }
 0x28a   :  { %v3320_v12 = vsel %vm49_vm0, %v7729_v39, -inf  ;;  %v3772_v8 = vadd.f32 %v10842_v60, %v3281_v1  ;;  %v3322_v46 = vsel %vm49_vm0, %v15388_v5, -inf  ;;  %v15390_v1 = vld [vmem:[#allocation159_spill] sm:$0xff]  ;;  %v3329_v41 = vsel %vm49_vm0, %v15396_v62, -inf }
 0x28b   :  { %v3288_v15 = vmax.f32 %v3286_v26, %v3287_v2  ;;  %v3321_v6 = vmax.f32 %v15387_v28, %v3320_v12  ;;  %8046 = vrot.lane.b32.xlu0 %v8045_v52, %s8994_s26  ;;  %v2572_v13 = vpop.f32.mrf.mxu0  ;;  %v8050_v32 = vpack.i.bf16 %v3858_v22, %v3854_v40  ;;  %v15391_v50 = vmax.f32 %v15389_v56, %v15390_v1  ;;  %v15393_v52 = vld [vmem:[#allocation161_spill] sm:$0xff]  ;;  %v15397_v28 = vld [vmem:[#allocation56_spill] sm:$0xff] }
 0x28c   :  { %v3306_v35 = vsel %vm49_vm0, %v2572_v13, -inf  ;;  %v3775_v55 = vadd.f32 %v10842_v60, %v3302_v44  ;;  %v15395_v2 = vmax.f32 %v15393_v52, %v15394_v4  ;;  %v3856_v22 = vmax.f32 %v3772_v8, 0.0 }
 0x28d   :  { %v3773_v21 = vadd.f32 %v10842_v60, %v3288_v15  ;;  %v3323_v47 = vmax.f32 %v3321_v6, %v3322_v46  ;;  %v3307_v34 = vmax.f32 %v15391_v50, %v3306_v35  ;;  %v7730_v9 = vpop.f32.mrf.mxu0  ;;  %v3315_v6 = vsel %vm49_vm0, %v15397_v28, -inf  ;;  %v15398_v46 = vld [vmem:[#allocation163_spill] sm:$0xff]  ;;  %v15399_v35 = vld [vmem:[#allocation164_spill] sm:$0xff] }
 0x28e   :  { %v3327_v26 = vsel %vm49_vm0, %v7730_v9, -inf  ;;  %v15400_v56 = vmax.f32 %v15398_v46, %v15399_v35  ;;  %v3771_v8 = vadd.f32 %v10842_v60, %v3274_v59  ;;  %v3859_v9 = vmax.f32 %v3775_v55, 0.0  ;;  %v15405_v55 = vld [vmem:[#allocation168_spill] sm:$0xff] }
 0x28f   :  { %v3309_v39 = vmax.f32 %v3307_v34, %v3308_v18  ;;  %v3328_v12 = vmax.f32 %v15395_v2, %v3327_v26  ;;  %8051 = vrot.lane.b32.xlu0 %v8050_v32, %s8994_s26  ;;  %v2575_v40 = vpop.f32.mrf.mxu0  ;;  %v3857_v15 = vmax.f32 %v3773_v21, 0.0  ;;  %v3778_v21 = vadd.f32 %v10842_v60, %v3323_v47  ;;  %v15401_v26 = vld [vmem:[#allocation166_spill] sm:$0xff] }
 0x290   :  { %v3313_v44 = vsel %vm49_vm0, %v2575_v40, -inf  ;;  %v15404_v40 = vld [vmem:[#allocation57_spill] sm:$0xff] }
 0x291   :  { %v3776_v13 = vadd.f32 %v10842_v60, %v3309_v39  ;;  %v3330_v5 = vmax.f32 %v3328_v12, %v3329_v41  ;;  %v3314_v1 = vmax.f32 %v15400_v56, %v3313_v44  ;;  %v7733_v50 = vpop.f32.mrf.mxu0  ;;  %v8055_v32 = vpack.i.bf16 %v3857_v15, %v3856_v22  ;;  %v15402_v39 = vld [vmem:[#allocation167_spill] sm:$0xff]  ;;  %v15406_v22 = vld [vmem:[#allocation169_spill] sm:$0xff] }
 0x292   :  { %v3348_v34 = vsel %vm49_vm0, %v7733_v50, -inf  ;;  %v15403_v52 = vmax.f32 %v15401_v26, %v15402_v39  ;;  %v3350_v48 = vsel %vm49_vm0, %v15404_v40, -inf  ;;  %v15407_v15 = vmax.f32 %v15405_v55, %v15406_v22  ;;  %v15409_v56 = vld [vmem:[#allocation171_spill] sm:$0xff]  ;;  %v15412_v39 = vld [vmem:[#allocation61_spill] sm:$0xff]  ;;  %v15416_v55 = vld [vmem:[#allocation62_spill] sm:$0xff] }
 0x293   :  { %v3779_v17 = vadd.f32 %v10842_v60, %v3330_v5  ;;  %v3316_v18 = vmax.f32 %v3314_v1, %v3315_v6  ;;  %8056 = vrot.lane.b32.xlu0 %v8055_v32, %s8994_s26  ;;  %v2588_v2 = vpop.f32.mrf.mxu0  ;;  %v3860_v12 = vmax.f32 %v3776_v13, 0.0  ;;  %v15408_v6 = vld [vmem:[#allocation59_spill] sm:$0xff]  ;;  %v3855_v13 = vmax.f32 %v3771_v8, 0.0  ;;  %v15410_v1 = vld [vmem:[#allocation172_spill] sm:$0xff] }
 0x294   :  { %v3349_v4 = vmax.f32 %v15403_v52, %v3348_v34  ;;  %v3334_v58 = vsel %vm49_vm0, %v2588_v2, -inf  ;;  %v3336_v44 = vsel %vm49_vm0, %v15408_v6, -inf  ;;  %v15411_v50 = vmax.f32 %v15409_v56, %v15410_v1  ;;  %v15414_v2 = vld [vmem:[#allocation174_spill] sm:$0xff] }
 0x295   :  { %v3777_v59 = vadd.f32 %v10842_v60, %v3316_v18  ;;  %v3335_v62 = vmax.f32 %v15407_v15, %v3334_v58  ;;  %v7734_v41 = vpop.f32.mrf.mxu0  ;;  %v8060_v28 = vpack.i.bf16 %v3860_v12, %v3859_v9  ;;  %v3863_v46 = vmax.f32 %v3779_v17, 0.0  ;;  %v15413_v17 = vld [vmem:[#allocation173_spill] sm:$0xff]  ;;  %v15422_v1 = vld [vmem:[#allocation70_spill] sm:$0xff] }
 0x296   :  { %v3351_v47 = vmax.f32 %v3349_v4, %v3350_v48  ;;  %v3355_v5 = vsel %vm49_vm0, %v7734_v41, -inf  ;;  %v3862_v26 = vmax.f32 %v3778_v21, 0.0  ;;  %v11317_v9 = vsel %vm49_vm0, %v15412_v39, -inf  ;;  %v15418_v41 = vld [vmem:[#allocation176_spill] sm:$0xff]  ;;  %v15424_v39 = vld [vmem:[#allocation178_spill] sm:$0xff] }
 0x297   :  { %v3337_v35 = vmax.f32 %v3335_v62, %v3336_v44  ;;  %v11312_v32 = vmax.f32 %v15411_v50, %v3355_v5  ;;  %8061 = vrot.lane.b32.xlu1 %v8060_v28, %s8994_s26  ;;  %v2591_v34 = vpop.f32.mrf.mxu0  ;;  %v3861_v18 = vmax.f32 %v3777_v59, 0.0  ;;  %v8065_v4 = vpack.i.bf16 %v3855_v13, %v3863_v46  ;;  %v15417_v62 = vld [vmem:[#allocation175_spill] sm:$0xff]  ;;  %v15420_v5 = vld [vmem:[#allocation64_spill] sm:$0xff] }
 0x298   :  { %v3341_v52 = vsel %vm49_vm0, %v2591_v34, -inf  ;;  %v15415_v12 = vmax.f32 %v15413_v17, %v15414_v2  ;;  %v3343_v59 = vsel %vm49_vm0, %v15416_v55, -inf  ;;  %v15419_v28 = vmax.f32 %v15417_v62, %v15418_v41  ;;  %v15421_v46 = vld [vmem:[#allocation67_spill] sm:$0xff]  ;;  %v15426_v2 = vld [vmem:[#allocation73_spill] sm:$0xff]  ;;  %v15428_v62 = vld [vmem:[#allocation180_spill] sm:$0xff] }
 0x299   :  { %v3358_v8 = vmax.f32 %v11312_v32, %v11317_v9  ;;  %v7737_v48 = vpop.f32.mrf.mxu0  ;;  %v8070_v58 = vpack.i.bf16 %v3862_v26, %v3861_v18  ;;  %v3780_v21 = vadd.f32 %v10842_v60, %v3337_v35  ;;  %8066 = vrot.lane.b32.xlu0 %v8065_v4, %s8994_s26  ;;  %v3378_v13 = vsel %vm49_vm0, %v15420_v5, -inf  ;;  %v15423_v26 = vld [vmem:[#allocation177_spill] sm:$0xff]  ;;  %v15430_v5 = vld [vmem:[#allocation76_spill] sm:$0xff] }
 0x29a   :  { %v3342_v40 = vmax.f32 %v15415_v12, %v3341_v52  ;;  %v3376_v22 = vsel %vm49_vm0, %v7737_v48, -inf  ;;  %v3364_v56 = vsel %vm49_vm0, %v15421_v46, -inf  ;;  %v3385_v50 = vsel %vm49_vm0, %v15422_v1, -inf  ;;  %v5327_v55 = vld [vmem:[%s14838_s2] sm:$0xff] }
 0x29b   :  { %v3377_v6 = vmax.f32 %v15419_v28, %v3376_v22  ;;  %8071 = vrot.lane.b32.xlu1 %v8070_v58, %s8994_s26  ;;  %v2604_v44 = vpop.f32.mrf.mxu0  ;;  %v15425_v52 = vmax.f32 %v15423_v26, %v15424_v39  ;;  %v3371_v12 = vsel %vm49_vm0, %v15426_v2, -inf  ;;  %v3864_v58 = vmax.f32 %v3780_v21, 0.0  ;;  %v15433_v26 = vld [vmem:[#allocation181_spill] sm:$0xff]  ;;  %v15434_v39 = vld [vmem:[#allocation182_spill] sm:$0xff]  ;;  %v11436_v9 = vld [vmem:[%s14842_s6 + $0x1] ss:$0 sm:$0xff] }
 0x29c   :  { %v3344_v15 = vmax.f32 %v3342_v40, %v3343_v59  ;;  %v3362_v35 = vsel %vm49_vm0, %v2604_v44, -inf  ;;  %v3782_v40 = vadd.f32 %v10842_v60, %v3351_v47  ;;  %v5328_v47 = vld [vmem:[%s14838_s2 + $0x8] sm:$0xff]  ;;  %v11361_v21 = vsel %vm49_vm0, %v15430_v5, -inf  ;;  %v5331_v32 = vld [vmem:[%s14838_s2 + $0x20] sm:$0xff] }
 0x29d   :  { %v3379_v18 = vmax.f32 %v3377_v6, %v3378_v13  ;;  %v3363_v4 = vmax.f32 %v15425_v52, %v3362_v35  ;;  %v7738_v17 = vpop.f32.mrf.mxu0  ;;  %v15431_v13 = vld [vmem:[#allocation79_spill] sm:$0xff]  ;;  %v15432_v35 = vld [vmem:[#allocation82_spill] sm:$0xff]  ;;  %v5422_v2 = vmul.f32 %v5327_v55, %v5327_v55  ;;  %v15440_v55 = vld [vmem:[#allocation88_spill] sm:$0xff]  ;;  %v11932_v45 = vadd.f32 %v11436_v9, %v15540_v49 }
 0x29e   :  { %v3781_v34 = vadd.f32 %v10842_v60, %v3344_v15  ;;  %v3383_v48 = vsel %vm49_vm0, %v7738_v17, -inf  ;;  %v15427_v15 = vld [vmem:[#allocation179_spill] sm:$0xff]  ;;  %v3392_v46 = vsel %vm49_vm0, %v15431_v13, -inf  ;;  %v11951_v30 = vadd.f32 %v11436_v9, %v15543_v53 }
 0x29f   :  { %v3786_v59 = vadd.f32 %v10842_v60, %v3379_v18  ;;  %v3365_v22 = vmax.f32 %v3363_v4, %v3364_v56  ;;  %v15429_v41 = vmax.f32 %v15427_v15, %v15428_v62  ;;  %v2607_v6 = vpop.f32.mrf.mxu0  ;;  %v3413_v56 = vsel %vm49_vm0, %v15432_v35, -inf  ;;  %v15437_v35 = vld [vmem:[#allocation184_spill] sm:$0xff] }
 0x2a0   :  { %v3865_v44 = vmax.f32 %v3781_v34, 0.0  ;;  %v3369_v1 = vsel %vm49_vm0, %v2607_v6, -inf  ;;  %v15435_v34 = vmax.f32 %v15433_v26, %v15434_v39  ;;  %v3866_v15 = vmax.f32 %v3782_v40, 0.0 }
 0x2a1   :  { %v3384_v28 = vmax.f32 %v15429_v41, %v3383_v48  ;;  %v7741_v4 = vpop.f32.mrf.mxu0  ;;  %v3870_v62 = vmax.f32 %v3786_v59, 0.0  ;;  %v5423_v41 = vmul.f32 %v5328_v47, %v5328_v47  ;;  %v3784_v5 = vadd.f32 %v10842_v60, %v3365_v22  ;;  %v15442_v47 = vld [vmem:[#allocation185_spill] sm:$0xff] }
 0x2a2   :  { %v3370_v52 = vmax.f32 %v15435_v34, %v3369_v1  ;;  %v8075_v17 = vpack.i.bf16 %v3865_v44, %v3864_v58  ;;  %v3404_v48 = vsel %vm49_vm0, %v7741_v4, -inf  ;;  %v15438_v63 = vmax.f32 %v15436_v23, %v15437_v35  ;;  %v15443_v1 = vld [vmem:[#allocation186_spill] sm:$0xff] }
 0x2a3   :  { %v3386_v18 = vmax.f32 %v3384_v28, %v3385_v50  ;;  %v2620_v50 = vpop.f32.mrf.mxu0  ;;  %v15439_v28 = vld [vmem:[#allocation85_spill] sm:$0xff]  ;;  %v11381_v40 = vsel %vm49_vm0, %v15440_v55, -inf  ;;  %v8080_v22 = vpack.i.bf16 %v3870_v62, %v3866_v15  ;;  %v15444_v26 = vmax.f32 %v15442_v47, %v15443_v1  ;;  %v15445_v62 = vld [vmem:[#allocation187_spill] sm:$0xff] }
 0x2a4   :  { %v3372_v13 = vmax.f32 %v3370_v52, %v3371_v12  ;;  %v3405_v6 = vmax.f32 %v15438_v63, %v3404_v48  ;;  %8076 = vrot.lane.b32.xlu1 %v8075_v17, %s8995_s8  ;;  %v3399_v58 = vsel %vm49_vm0, %v15439_v28, -inf  ;;  %v3390_v59 = vsel %vm49_vm0, %v2620_v50, -inf  ;;  %v15441_v12 = vld [vmem:[#allocation91_spill] sm:$0xff]  ;;  %v15450_v1 = vld [vmem:[#allocation189_spill] sm:$0xff] }
 0x2a5   :  { %v11386_v44 = vsel %vm49_vm0, %v15441_v12, -inf  ;;  %v3391_v39 = vmax.f32 %v15444_v26, %v3390_v59  ;;  %v7742_v34 = vpop.f32.mrf.mxu0  ;;  %v5329_v52 = vld [vmem:[%s14838_s2 + $0x10] sm:$0xff]  ;;  %v3787_v4 = vadd.f32 %v10842_v60, %v3386_v18  ;;  %8081 = vrot.lane.b32.xlu0 %v8080_v22, %s8995_s8  ;;  %v5517_v48 = vsel %vm5516_vm5, %v5422_v2, 0.0  ;;  %v15449_v18 = vld [vmem:[#allocation97_spill] sm:$0xff] }
 0x2a6   :  { %v3785_v23 = vadd.f32 %v10842_v60, %v3372_v13  ;;  %v3407_v63 = vmax.f32 %v3405_v6, %v11361_v21  ;;  %v3411_v17 = vsel %vm49_vm0, %v7742_v34, -inf  ;;  %v5518_v15 = vsel %vm5516_vm5, %v5423_v41, 0.0  ;;  %v15446_v13 = vld [vmem:[#allocation188_spill] sm:$0xff]  ;;  %v15448_v59 = vld [vmem:[#allocation94_spill] sm:$0xff] }
 0x2a7   :  { %v3393_v21 = vmax.f32 %v3391_v39, %v3392_v46  ;;  %v15447_v35 = vmax.f32 %v15445_v62, %v15446_v13  ;;  %v2623_v50 = vpop.f32.mrf.mxu0  ;;  %v3868_v28 = vmax.f32 %v3784_v5, 0.0  ;;  %v11406_v12 = vsel %vm49_vm0, %v15448_v59, -inf  ;;  %v15451_v26 = vld [vmem:[#allocation190_spill] sm:$0xff] }
 0x2a8   :  { %v3869_v55 = vmax.f32 %v3785_v23, 0.0  ;;  %v11410_v22 = vsel %vm49_vm0, %v15449_v18, -inf  ;;  %v3397_v2 = vsel %vm49_vm0, %v2623_v50, -inf  ;;  %v5424_v47 = vmul.f32 %v5329_v52, %v5329_v52  ;;  %v15454_v50 = vld [vmem:[#allocation192_spill] sm:$0xff] }
 0x2a9   :  { %v3412_v6 = vmax.f32 %v15447_v35, %v3411_v17  ;;  %v3788_v46 = vadd.f32 %v10842_v60, %v3393_v21  ;;  %v15452_v39 = vmax.f32 %v15450_v1, %v15451_v26  ;;  %v7745_v5 = vpop.f32.mrf.mxu0  ;;  %v5330_v17 = vld [vmem:[%s14838_s2 + $0x18] sm:$0xff]  ;;  %v3783_v62 = vadd.f32 %v10842_v60, %v3358_v8 }
 0x2aa   :  { %v8085_v23 = vpack.i.bf16 %v3869_v55, %v3868_v28  ;;  %v3432_v52 = vsel %vm49_vm0, %v7745_v5, -inf  ;;  %v3871_v13 = vmax.f32 %v3787_v4, 0.0  ;;  %v5519_v21 = vadd.f32 %v5518_v15, %v5517_v48 }
 0x2ab   :  { %v3414_v41 = vmax.f32 %v3412_v6, %v3413_v56  ;;  %v3398_v34 = vmax.f32 %v15452_v39, %v3397_v2  ;;  %v15453_v6 = vld [vmem:[#allocation191_spill] sm:$0xff]  ;;  %v2636_v55 = vpop.f32.mrf.mxu0  ;;  %v3872_v18 = vmax.f32 %v3788_v46, 0.0  ;;  %v5520_v4 = vsel %vm5516_vm5, %v5424_v47, 0.0  ;;  %v15456_v2 = vld [vmem:[#allocation193_spill] sm:$0xff]  ;;  %v15457_v46 = vld [vmem:[#allocation194_spill] sm:$0xff] }
 0x2ac   :  { %v15455_v59 = vmax.f32 %v15453_v6, %v15454_v50  ;;  %8086 = vrot.lane.b32.xlu1 %v8085_v23, %s8995_s8  ;;  %v3418_v8 = vsel %vm49_vm0, %v2636_v55, -inf  ;;  %v3867_v5 = vmax.f32 %v3783_v62, 0.0  ;;  %v15460_v6 = vld [vmem:[#allocation196_spill] sm:$0xff]  ;;  %v5332_v62 = vld [vmem:[%s14838_s2 + $0x28] sm:$0xff] }
 0x2ad   :  { %v3791_v56 = vadd.f32 %v10842_v60, %v3414_v41  ;;  %v3400_v35 = vmax.f32 %v3398_v34, %v3399_v58  ;;  %v3790_v60 = vadd.f32 %v11436_v9, %v3407_v63  ;;  %v5425_v58 = vmul.f32 %v5330_v17, %v5330_v17  ;;  %v7746_v26 = vpop.f32.mrf.mxu0  ;;  %v15459_v17 = vld [vmem:[#allocation195_spill] sm:$0xff] }
 0x2ae   :  { %v3433_v28 = vmax.f32 %v15455_v59, %v3432_v52  ;;  %v15458_v41 = vmax.f32 %v15456_v2, %v15457_v46  ;;  %v8090_v39 = vpack.i.bf16 %v3872_v18, %v3871_v13  ;;  %v3439_v34 = vsel %vm49_vm0, %v7746_v26, -inf  ;;  %v15464_v2 = vld [vmem:[#allocation105_spill] sm:$0xff] }
 0x2af   :  { %v3789_v48 = vadd.f32 %v11436_v9, %v3400_v35  ;;  %v3875_v23 = vmax.f32 %v3791_v56, 0.0  ;;  %v5426_v63 = vmul.f32 %v5331_v32, %v5331_v32  ;;  %v15461_v47 = vmax.f32 %v15459_v17, %v15460_v6  ;;  %v15462_v56 = vld [vmem:[#allocation100_spill] sm:$0xff]  ;;  %v15463_v32 = vld [vmem:[#allocation103_spill] sm:$0xff] }
 0x2b0   :  { %v3435_v15 = vmax.f32 %v3433_v28, %v11381_v40  ;;  %v3419_v1 = vmax.f32 %v15458_v41, %v3418_v8  ;;  %8091 = vrot.lane.b32.xlu1 %v8090_v39, %s8995_s8  ;;  %v2639_v40 = vpop.f32.mrf.mxu0  ;;  %v5521_v59 = vadd.f32 %v5520_v4, %v5519_v21  ;;  %v3874_v55 = vmax.f32 %v3790_v60, 0.0  ;;  %v15465_v4 = vld [vmem:[#allocation110_spill] sm:$0xff]  ;;  %v15466_v41 = vld [vmem:[#allocation197_spill] sm:$0xff]  ;;  %v15470_v17 = vld [vmem:[#allocation199_spill] sm:$0xff] }
 0x2b1   :  { %v11451_v50 = vmax.f32 %v15461_v47, %v3439_v34  ;;  %v3873_v35 = vmax.f32 %v3789_v48, 0.0  ;;  %v3425_v28 = vsel %vm49_vm0, %v2639_v40, -inf  ;;  %v8095_v13 = vpack.i.bf16 %v3867_v5, %v3875_v23  ;;  %v15469_v5 = vld [vmem:[#allocation115_spill] sm:$0xff]  ;;  %v15471_v6 = vld [vmem:[#allocation200_spill] sm:$0xff] }
 0x2b2   :  { %v3421_v52 = vmax.f32 %v3419_v1, %v11386_v44  ;;  %v5522_v44 = vsel %vm5516_vm5, %v5425_v58, 0.0  ;;  %v3462_v18 = vsel %vm49_vm0, %v15462_v56, -inf  ;;  %v3448_v8 = vsel %vm49_vm0, %v15463_v32, -inf  ;;  %v7749_v60 = vpop.f32.mrf.mxu0  ;;  %v15467_v58 = vld [vmem:[#allocation198_spill] sm:$0xff] }
 0x2b3   :  { %v11465_v48 = vsel %vm49_vm0, %v15464_v2, -inf  ;;  %v3442_v21 = vmax.f32 %v11451_v50, %v11406_v12  ;;  %v11471_v46 = vsel %vm49_vm0, %v15465_v4, -inf  ;;  %v15468_v1 = vmax.f32 %v15466_v41, %v15467_v58  ;;  %v5333_v32 = vld [vmem:[%s14838_s2 + $0x30] sm:$0xff]  ;;  %v15473_v41 = vld [vmem:[#allocation120_spill] sm:$0xff] }
 0x2b4   :  { %v3460_v39 = vsel %vm49_vm0, %v7749_v60, -inf  ;;  %v8100_v34 = vpack.i.bf16 %v3874_v55, %v3873_v35  ;;  %v11479_v23 = vsel %vm49_vm0, %v15469_v5, -inf  ;;  %v15472_v47 = vmax.f32 %v15470_v17, %v15471_v6  ;;  %8096 = vrot.lane.b32.xlu1 %v8095_v13, %s8995_s8  ;;  %v2652_v56 = vpop.f32.mrf.mxu0  ;;  %v15477_v5 = vld [vmem:[#allocation125_spill] sm:$0xff] }
 0x2b5   :  { %v3426_v26 = vmax.f32 %v15468_v1, %v3425_v28  ;;  %v5427_v2 = vmul.f32 %v5332_v62, %v5332_v62  ;;  %v5523_v28 = vadd.f32 %v5522_v44, %v5521_v59  ;;  %v3792_v60 = vadd.f32 %v11436_v9, %v3421_v52  ;;  %v15475_v62 = vld [vmem:[#allocation202_spill] sm:$0xff] }
 0x2b6   :  { %v3461_v40 = vmax.f32 %v15472_v47, %v3460_v39  ;;  %8101 = vrot.lane.b32.xlu0 %v8100_v34, %s8995_s8  ;;  %v3446_v55 = vsel %vm49_vm0, %v2652_v56, -inf  ;;  %v5524_v4 = vsel %vm5516_vm5, %v5426_v63, 0.0  ;;  %v11495_v13 = vsel %vm49_vm0, %v15473_v41, -inf  ;;  %v15474_v39 = vld [vmem:[#allocation201_spill] sm:$0xff]  ;;  %v7750_v52 = vpop.f32.mrf.mxu0  ;;  %v15478_v47 = vld [vmem:[#allocation203_spill] sm:$0xff]  ;;  %s9009_s8 = smov 100  }
 0x2b7   :  { %v3428_v35 = vmax.f32 %v3426_v26, %v11410_v22  ;;  %v3794_v58 = vadd.f32 %v11436_v9, %v3435_v15  ;;  %v15476_v59 = vmax.f32 %v15474_v39, %v15475_v62  ;;  %v11503_v22 = vsel %vm49_vm0, %v15477_v5, -inf  ;;  %v15479_v15 = vld [vmem:[#allocation204_spill] sm:$0xff]  ;;  %v15484_v5 = vld [vmem:[#allocation206_spill] sm:$0xff] }
 0x2b8   :  { %v3463_v1 = vmax.f32 %v3461_v40, %v3462_v18  ;;  %v3467_v63 = vsel %vm49_vm0, %v7750_v52, -inf  ;;  %v5428_v34 = vmul.f32 %v5333_v32, %v5333_v32  ;;  %v15480_v18 = vmax.f32 %v15478_v47, %v15479_v15  ;;  %v2655_v56 = vpop.f32.mrf.mxu0  ;;  %v15481_v32 = vld [vmem:[#allocation130_spill] sm:$0xff] }
 0x2b9   :  { %v3447_v44 = vmax.f32 %v15476_v59, %v3446_v55  ;;  %v3793_v26 = vadd.f32 %v11436_v9, %v3428_v35  ;;  %v5525_v41 = vadd.f32 %v5524_v4, %v5523_v28  ;;  %v3453_v55 = vsel %vm49_vm0, %v2655_v56, -inf  ;;  %v5334_v35 = vld [vmem:[%s14838_s2 + $0x38] sm:$0xff] }
 0x2ba   :  { %v3798_v17 = vadd.f32 %v11436_v9, %v3463_v1  ;;  %v3468_v40 = vmax.f32 %v15480_v18, %v3467_v63  ;;  %v3876_v39 = vmax.f32 %v3792_v60, 0.0  ;;  %v5526_v59 = vsel %vm5516_vm5, %v5427_v2, 0.0  ;;  %v7753_v4 = vpop.f32.mrf.mxu0  ;;  %v15483_v60 = vld [vmem:[#allocation205_spill] sm:$0xff]  ;;  %v15486_v18 = vld [vmem:[#allocation207_spill] sm:$0xff]  ;;  %v15487_v56 = vld [vmem:[#allocation208_spill] sm:$0xff] }
 0x2bb   :  { %v3449_v6 = vmax.f32 %v3447_v44, %v3448_v8  ;;  %v3877_v62 = vmax.f32 %v3793_v26, 0.0  ;;  %v11518_v1 = vsel %vm49_vm0, %v15481_v32, -inf  ;;  %v15482_v8 = vld [vmem:[#allocation135_spill] sm:$0xff]  ;;  %v3878_v52 = vmax.f32 %v3794_v58, 0.0 }
 0x2bc   :  { %v11522_v44 = vsel %vm49_vm0, %v15482_v8, -inf  ;;  %v3470_v28 = vmax.f32 %v3468_v40, %v11465_v48  ;;  %v15485_v26 = vmax.f32 %v15483_v60, %v15484_v5  ;;  %v3488_v47 = vsel %vm49_vm0, %v7753_v4, -inf  ;;  %v2668_v7 = vpop.f32.mrf.mxu0  ;;  %v5335_v8 = vld [vmem:[%s14838_s2 + $0x40] sm:$0xff] }
 0x2bd   :  { %v8105_v15 = vpack.i.bf16 %v3877_v62, %v3876_v39  ;;  %v3882_v2 = vmax.f32 %v3798_v17, 0.0  ;;  %v15488_v32 = vmax.f32 %v15486_v18, %v15487_v56  ;;  %v5429_v48 = vmul.f32 %v5334_v35, %v5334_v35  ;;  %v15489_v62 = vld [vmem:[#allocation140_spill] sm:$0xff]  ;;  %v15490_v5 = vld [vmem:[#allocation145_spill] sm:$0xff]  ;;  %v15495_v18 = vld [vmem:[#allocation211_spill] sm:$0xff] }
 0x2be   :  { %v3454_v63 = vmax.f32 %v15485_v26, %v3453_v55  ;;  %v5527_v40 = vadd.f32 %v5526_v59, %v5525_v41  ;;  %v5528_v58 = vsel %vm5516_vm5, %v5428_v34, 0.0  ;;  %v3796_v60 = vadd.f32 %v11436_v9, %v3449_v6  ;;  %v15491_v41 = vld [vmem:[#allocation209_spill] sm:$0xff]  ;;  %v15492_v6 = vld [vmem:[#allocation210_spill] sm:$0xff]  ;;  %v7754_v26 = vpop.f32.mrf.mxu0 }
 0x2bf   :  { %v3489_v19 = vmax.f32 %v15488_v32, %v3488_v47  ;;  %8106 = vrot.lane.b32.xlu0 %v8105_v15, %s8996_s25  ;;  %v3474_v17 = vsel %vm49_vm0, %v2668_v7, -inf  ;;  %v8110_v39 = vpack.i.bf16 %v3882_v2, %v3878_v52  ;;  %v11542_v4 = vsel %vm49_vm0, %v15489_v62, -inf }
 0x2c0   :  { %v3456_v55 = vmax.f32 %v3454_v63, %v11471_v46  ;;  %v11546_v35 = vsel %vm49_vm0, %v15490_v5, -inf  ;;  %v15493_v59 = vmax.f32 %v15491_v41, %v15492_v6  ;;  %v15494_v63 = vld [vmem:[#allocation150_spill] sm:$0xff]  ;;  %v3495_v52 = vsel %vm49_vm0, %v7754_v26, -inf  ;;  %v2671_v32 = vpop.f32.mrf.mxu0  ;;  %v15498_v6 = vld [vmem:[#allocation16_spill] sm:$0xff] }
 0x2c1   :  { %v3491_v34 = vmax.f32 %v3489_v19, %v11479_v23  ;;  %v11554_v47 = vsel %vm49_vm0, %v15494_v63, -inf  ;;  %8111 = vrot.lane.b32.xlu1 %v8110_v39, %s8996_s25  ;;  %v5430_v15 = vmul.f32 %v5335_v8, %v5335_v8  ;;  %v15496_v19 = vld [vmem:[#allocation212_spill] sm:$0xff]  ;;  %v5529_v62 = vadd.f32 %v5528_v58, %v5527_v40  ;;  %v15501_v58 = vld [vmem:[#allocation213_spill] sm:$0xff]  ;;  %v15502_v63 = vld [vmem:[#allocation214_spill] sm:$0xff] }
 0x2c2   :  { %v3475_v46 = vmax.f32 %v15493_v59, %v3474_v17  ;;  %v3797_v7 = vadd.f32 %v11436_v9, %v3456_v55  ;;  %v15497_v23 = vmax.f32 %v15495_v18, %v15496_v19  ;;  %v5336_v17 = vld [vmem:[%s14838_s2 + $0x48] sm:$0xff]  ;;  %v5530_v5 = vsel %vm5516_vm5, %v5429_v48, 0.0 }
 0x2c3   :  { %v3799_v55 = vadd.f32 %v11436_v9, %v3470_v28  ;;  %v3481_v39 = vsel %vm49_vm0, %v2671_v32, -inf  ;;  %v3880_v41 = vmax.f32 %v3796_v60, 0.0  ;;  %v3795_v26 = vadd.f32 %v11436_v9, %v3442_v21  ;;  %v7757_v28 = vpop.f32.mrf.mxu0  ;;  %v15504_v32 = vld [vmem:[#allocation215_spill] sm:$0xff] }
 0x2c4   :  { %v3477_v2 = vmax.f32 %v3475_v46, %v11495_v13  ;;  %v3496_v56 = vmax.f32 %v15497_v23, %v3495_v52  ;;  %v3881_v8 = vmax.f32 %v3797_v7, 0.0  ;;  %v15499_v13 = vld [vmem:[#allocation15_spill] sm:$0xff]  ;;  %v15503_v60 = vmax.f32 %v15501_v58, %v15502_v63 }
 0x2c5   :  { %v15500_v59 = vmax.f32 %v15498_v6, %v15499_v13  ;;  %v3516_v52 = vsel %vm49_vm0, %v7757_v28, -inf  ;;  %v5431_v19 = vmul.f32 %v5336_v17, %v5336_v17  ;;  %v15505_v6 = vld [vmem:[#allocation216_spill] sm:$0xff]  ;;  %v2684_v21 = vpop.f32.mrf.mxu0  ;;  %v3802_v17 = vadd.f32 %v11436_v9, %v3491_v34 }
 0x2c6   :  { %v3800_v40 = vadd.f32 %v11436_v9, %v3477_v2  ;;  %v3498_v48 = vmax.f32 %v3496_v56, %v11503_v22  ;;  %v3482_v7 = vmax.f32 %v15503_v60, %v3481_v39  ;;  %v8115_v18 = vpack.i.bf16 %v3881_v8, %v3880_v41  ;;  %v15507_v8 = vld [vmem:[#allocation217_spill] sm:$0xff] }
 0x2c7   :  { %v11573_v46 = vadd.f32 %v11436_v9, %v15500_v59  ;;  %v15506_v12 = vmax.f32 %v15504_v32, %v15505_v6  ;;  %v5531_v2 = vadd.f32 %v5530_v5, %v5529_v62  ;;  %v3502_v56 = vsel %vm49_vm0, %v2684_v21, -inf  ;;  %v7758_v63 = vpop.f32.mrf.mxu0 }
 0x2c8   :  { %v3803_v23 = vadd.f32 %v11436_v9, %v3498_v48  ;;  %v3884_v13 = vmax.f32 %v3800_v40, 0.0  ;;  %v3484_v22 = vmax.f32 %v3482_v7, %v11518_v1  ;;  %8116 = vrot.lane.b32.xlu0 %v8115_v18, %s8996_s25  ;;  %v3883_v39 = vmax.f32 %v3799_v55, 0.0  ;;  %v15508_v48 = vld [vmem:[#allocation218_spill] sm:$0xff]  ;;  %v15510_v55 = vld [vmem:[#allocation155_spill] sm:$0xff]  ;;  %v15513_v18 = vld [vmem:[#allocation220_spill] sm:$0xff] }
 0x2c9   :  { %v3517_v50 = vmax.f32 %v15506_v12, %v3516_v52  ;;  %v5532_v59 = vsel %vm5516_vm5, %v5430_v15, 0.0  ;;  %v15509_v28 = vmax.f32 %v15507_v8, %v15508_v48  ;;  %v3879_v40 = vmax.f32 %v3795_v26, 0.0  ;;  %v5337_v15 = vld [vmem:[%s14838_s2 + $0x50] sm:$0xff]  ;;  %v2687_v12 = vpop.f32.mrf.mxu0 }
 0x2ca   :  { %v3801_v62 = vadd.f32 %v11436_v9, %v3484_v22  ;;  %v3523_v1 = vsel %vm49_vm0, %v7758_v63, -inf  ;;  %v8120_v5 = vpack.i.bf16 %v3884_v13, %v3883_v39  ;;  %v3887_v60 = vmax.f32 %v3803_v23, 0.0  ;;  %v15512_v26 = vld [vmem:[#allocation219_spill] sm:$0xff] }
 0x2cb   :  { %v3519_v41 = vmax.f32 %v3517_v50, %v11522_v44  ;;  %v3503_v58 = vmax.f32 %v15509_v28, %v3502_v56  ;;  %v3546_v34 = vsel %vm49_vm0, %v15510_v55, -inf  ;;  %v15511_v44 = vld [vmem:[#allocation160_spill] sm:$0xff]  ;;  %v15514_v32 = vmax.f32 %v15512_v26, %v15513_v18  ;;  %v7761_v39 = vpop.f32.mrf.mxu0  ;;  %v15515_v28 = vld [vmem:[#allocation165_spill] sm:$0xff] }
 0x2cc   :  { %v11607_v7 = vsel %vm49_vm0, %v15511_v44, -inf  ;;  %8121 = vrot.lane.b32.xlu0 %v8120_v5, %s8996_s25  ;;  %v3509_v23 = vsel %vm49_vm0, %v2687_v12, -inf  ;;  %v8125_v50 = vpack.i.bf16 %v3879_v40, %v3887_v60  ;;  %v3885_v21 = vmax.f32 %v3801_v62, 0.0  ;;  %v5338_v13 = vld [vmem:[%s14838_s2 + $0x58] sm:$0xff]  ;;  %v15517_v40 = vld [vmem:[#allocation222_spill] sm:$0xff] }
 0x2cd   :  { %v3505_v52 = vmax.f32 %v3503_v58, %v11542_v4  ;;  %v3524_v6 = vmax.f32 %v15514_v32, %v3523_v1  ;;  %v5533_v22 = vadd.f32 %v5532_v59, %v5531_v2  ;;  %v3886_v4 = vmax.f32 %v3802_v17, 0.0  ;;  %v15516_v1 = vld [vmem:[#allocation221_spill] sm:$0xff]  ;;  %v15519_v59 = vld [vmem:[#allocation223_spill] sm:$0xff]  ;;  %v2700_v44 = vpop.f32.mrf.mxu0 }
 0x2ce   :  { %v5432_v8 = vmul.f32 %v5337_v15, %v5337_v15  ;;  %v5534_v48 = vsel %vm5516_vm5, %v5431_v19, 0.0  ;;  %v3553_v58 = vsel %vm49_vm0, %v15515_v28, -inf  ;;  %v3899_v63 = vmax.f32 %v11573_v46, 0.0  ;;  %v5339_v19 = vld [vmem:[%s14838_s2 + $0x60] sm:$0xff] }
 0x2cf   :  { %v3526_v56 = vmax.f32 %v3524_v6, %v11546_v35  ;;  %v15518_v62 = vmax.f32 %v15516_v1, %v15517_v40  ;;  %v3544_v60 = vsel %vm49_vm0, %v7761_v39, -inf  ;;  %v15520_v35 = vld [vmem:[#allocation224_spill] sm:$0xff]  ;;  %v8130_v15 = vpack.i.bf16 %v3886_v4, %v3885_v21  ;;  %v15523_v21 = vld [vmem:[#allocation58_spill] sm:$0xff]  ;;  %v7762_v4 = vpop.f32.mrf.mxu0  ;;  %v15525_v40 = vld [vmem:[#allocation7_spill] sm:$0xff] }
 0x2d0   :  { %v15521_v55 = vmax.f32 %v15519_v59, %v15520_v35  ;;  %v5433_v26 = vmul.f32 %v5338_v13, %v5338_v13  ;;  %v3804_v46 = vadd.f32 %v11436_v9, %v3505_v52  ;;  %8126 = vrot.lane.b32.xlu0 %v8125_v50, %s8996_s25  ;;  %v3530_v32 = vsel %vm49_vm0, %v2700_v44, -inf  ;;  %v15529_v44 = vld [vmem:[#allocation60_spill] sm:$0xff] }
 0x2d1   :  { %v3510_v5 = vmax.f32 %v15518_v62, %v3509_v23  ;;  %v3807_v2 = vadd.f32 %v11436_v9, %v3526_v56  ;;  %v5535_v6 = vadd.f32 %v5534_v48, %v5533_v22  ;;  %8131 = vrot.lane.b32.xlu1 %v8130_v15, %s8996_s25  ;;  %v15522_v23 = vld [vmem:[#allocation6_spill] sm:$0xff]  ;;  %v5536_v13 = vsel %vm5516_vm5, %v5432_v8, 0.0  ;;  %v15526_v62 = vld [vmem:[#allocation8_spill] sm:$0xff]  ;;  %v2703_v8 = vpop.f32.mrf.mxu0  ;;  %v15528_v15 = vld [vmem:[#allocation13_spill] sm:$0xff]  ;;  %s9004_s25 = smov 108  }
 0x2d2   :  { %v3545_v17 = vmax.f32 %v15521_v55, %v3544_v60  ;;  %v15524_v56 = vmax.f32 %v15522_v23, %v15523_v21  ;;  %v3806_v52 = vadd.f32 %v11436_v9, %v3519_v41  ;;  %v3551_v50 = vsel %vm49_vm0, %v7762_v4, -inf  ;;  %v5341_v55 = vld [vmem:[%s14838_s2 + $0x70] sm:$0xff] }
 0x2d3   :  { %v3512_v18 = vmax.f32 %v3510_v5, %v11554_v47  ;;  %v3891_v28 = vmax.f32 %v3807_v2, 0.0  ;;  %v5434_v22 = vmul.f32 %v5339_v19, %v5339_v19  ;;  %v15527_v5 = vmax.f32 %v15525_v40, %v15526_v62  ;;  %v15532_v23 = vld [vmem:[#allocation10_spill] sm:$0xff] }
 0x2d4   :  { %v3547_v12 = vmax.f32 %v3545_v17, %v3546_v34  ;;  %v3531_v39 = vmax.f32 %v15524_v56, %v3530_v32  ;;  %v5340_v34 = vld [vmem:[%s14838_s2 + $0x68] sm:$0xff]  ;;  %v3537_v41 = vsel %vm49_vm0, %v2703_v8, -inf  ;;  %v3888_v59 = vmax.f32 %v3804_v46, 0.0 }
 0x2d5   :  { %v3805_v47 = vadd.f32 %v11436_v9, %v3512_v18  ;;  %v3552_v60 = vmax.f32 %v15527_v5, %v3551_v50  ;;  %v8135_v2 = vpack.i.bf16 %v3891_v28, %v3899_v63  ;;  %v5537_v17 = vadd.f32 %v5536_v13, %v5535_v6  ;;  %v5342_v6 = vld [vmem:[%s14838_s2 + $0x78] sm:$0xff]  ;;  %v15534_v28 = vld [vmem:[#allocation170_spill] sm:$0xff] }
 0x2d6   :  { %v3810_v48 = vadd.f32 %v11436_v9, %v3547_v12  ;;  %v3533_v1 = vmax.f32 %v3531_v39, %v11607_v7  ;;  %v15530_v19 = vmax.f32 %v15528_v15, %v15529_v44  ;;  %v5435_v32 = vmul.f32 %v5340_v34, %v5340_v34  ;;  %v15531_v12 = vld [vmem:[#allocation9_spill] sm:$0xff]  ;;  %v5345_v15 = vld [vmem:[%s14838_s2 + $0x90] sm:$0xff] }
 0x2d7   :  { %v3889_v35 = vmax.f32 %v3805_v47, 0.0  ;;  %v3554_v18 = vmax.f32 %v3552_v60, %v3553_v58  ;;  %8136 = vrot.lane.b32.xlu1 %v8135_v2, %s8991_s23  ;;  %v5538_v63 = vsel %vm5516_vm5, %v5433_v26, 0.0  ;;  %v15533_v46 = vmax.f32 %v15531_v12, %v15532_v23 }
 0x2d8   :  { %v3812_v7 = vadd.f32 %v11436_v9, %v15530_v19  ;;  %v3890_v39 = vmax.f32 %v3806_v52, 0.0  ;;  %v3894_v4 = vmax.f32 %v3810_v48, 0.0  ;;  %v3539_v13 = vsel %vm49_vm0, %v15534_v28, -inf  ;;  %v5343_v52 = vld [vmem:[%s14838_s2 + $0x80] sm:$0xff] }
 0x2d9   :  { %v3538_v21 = vmax.f32 %v15533_v46, %v3537_v41  ;;  %v8140_v56 = vpack.i.bf16 %v3889_v35, %v3888_v59  ;;  %v3811_v58 = vadd.f32 %v11436_v9, %v3554_v18  ;;  %v5436_v47 = vmul.f32 %v5341_v55, %v5341_v55  ;;  %v5347_v46 = vld [vmem:[%s14838_s2 + $0xa0] sm:$0xff] }
 0x2da   :  { %v5540_v50 = vsel %vm5516_vm5, %v5434_v22, 0.0  ;;  %v3808_v26 = vadd.f32 %v11436_v9, %v3533_v1  ;;  %v8145_v40 = vpack.i.bf16 %v3894_v4, %v3890_v39  ;;  %v5539_v48 = vadd.f32 %v5538_v63, %v5537_v17  ;;  %v5344_v22 = vld [vmem:[%s14838_s2 + $0x88] sm:$0xff] }
 0x2db   :  { %v3540_v34 = vmax.f32 %v3538_v21, %v3539_v13  ;;  %v3896_v62 = vmax.f32 %v3812_v7, 0.0  ;;  %8141 = vrot.lane.b32.xlu1 %v8140_v56, %s8991_s23  ;;  %v3895_v5 = vmax.f32 %v3811_v58, 0.0  ;;  %v5437_v60 = vmul.f32 %v5342_v6, %v5342_v6  ;;  %v5348_v4 = vld [vmem:[%s14838_s2 + $0xa8] sm:$0xff]  ;;  %v5349_v58 = vld [vmem:[%s14838_s2 + $0xb0] sm:$0xff] }
 0x2dc   :  { %v5542_v8 = vsel %vm5516_vm5, %v5435_v32, 0.0  ;;  %8146 = vrot.lane.b32.xlu0 %v8145_v40, %s8991_s23  ;;  %v5541_v1 = vadd.f32 %v5540_v50, %v5539_v48  ;;  %v5438_v59 = vmul.f32 %v5343_v52, %v5343_v52  ;;  %v5544_v35 = vsel %vm5516_vm5, %v5436_v47, 0.0  ;;  %v5346_v32 = vld [vmem:[%s14838_s2 + $0x98] sm:$0xff] }
 0x2dd   :  { %v3809_v2 = vadd.f32 %v11436_v9, %v3540_v34  ;;  %v8150_v41 = vpack.i.bf16 %v3896_v62, %v3895_v5  ;;  %v3892_v55 = vmax.f32 %v3808_v26, 0.0  ;;  %v5439_v19 = vmul.f32 %v5344_v22, %v5344_v22  ;;  %v5350_v34 = vld [vmem:[%s14838_s2 + $0xb8] sm:$0xff]  ;;  %v5351_v62 = vld [vmem:[%s14838_s2 + $0xc0] sm:$0xff] }
 0x2de   :  { %v5543_v44 = vadd.f32 %v5542_v8, %v5541_v1  ;;  %v5546_v7 = vsel %vm5516_vm5, %v5437_v60, 0.0  ;;  %v5440_v12 = vmul.f32 %v5345_v15, %v5345_v15  ;;  %v5548_v23 = vsel %vm5516_vm5, %v5438_v59, 0.0  ;;  %v5353_v59 = vld [vmem:[%s14838_s2 + $0xd0] sm:$0xff]  ;;  %v5354_v15 = vld [vmem:[%s14838_s2 + $0xd8] sm:$0xff] }
 0x2df   :  { %v3893_v17 = vmax.f32 %v3809_v2, 0.0  ;;  %8151 = vrot.lane.b32.xlu1 %v8150_v41, %s8991_s23  ;;  %v5441_v56 = vmul.f32 %v5346_v32, %v5346_v32  ;;  %v5550_v39 = vsel %vm5516_vm5, %v5439_v19, 0.0  ;;  %v5442_v28 = vmul.f32 %v5347_v46, %v5347_v46  ;;  %v5352_v2 = vld [vmem:[%s14838_s2 + $0xc8] sm:$0xff]  ;;  %v5355_v32 = vld [vmem:[%s14838_s2 + $0xe0] sm:$0xff] }
 0x2e0   :  { %v5545_v63 = vadd.f32 %v5544_v35, %v5543_v44  ;;  %v5552_v13 = vsel %vm5516_vm5, %v5440_v12, 0.0  ;;  %v5443_v50 = vmul.f32 %v5348_v4, %v5348_v4  ;;  %v5444_v52 = vmul.f32 %v5349_v58, %v5349_v58  ;;  %v5356_v46 = vld [vmem:[%s14838_s2 + $0xe8] sm:$0xff] }
 0x2e1   :  { %v8155_v18 = vpack.i.bf16 %v3893_v17, %v3892_v55  ;;  %v5554_v26 = vsel %vm5516_vm5, %v5441_v56, 0.0  ;;  %v5556_v48 = vsel %vm5516_vm5, %v5442_v28, 0.0  ;;  %v5445_v60 = vmul.f32 %v5350_v34, %v5350_v34 }
 0x2e2   :  { %v5547_v21 = vadd.f32 %v5546_v7, %v5545_v63  ;;  %v5558_v8 = vsel %vm5516_vm5, %v5443_v50, 0.0  ;;  %v5446_v1 = vmul.f32 %v5351_v62, %v5351_v62  ;;  %v5560_v41 = vsel %vm5516_vm5, %v5444_v52, 0.0 }
 0x2e3   :  { %8156 = vrot.lane.b32.xlu1 %v8155_v18, %s8991_s23  ;;  %v5447_v55 = vmul.f32 %v5352_v2, %v5352_v2  ;;  %v5562_v17 = vsel %vm5516_vm5, %v5445_v60, 0.0  ;;  %v5448_v19 = vmul.f32 %v5353_v59, %v5353_v59  ;;  %v11728_v18 = vpop.permute.xlu0 %7981  ;;  %v5449_v12 = vmul.f32 %v5354_v15, %v5354_v15  ;;  %v5361_v59 = vld [vmem:[%s14838_s2 + $0x110] sm:$0xff] }
 0x2e4   :  { %v5549_v6 = vadd.f32 %v5548_v23, %v5547_v21  ;;  %v5564_v7 = vsel %vm5516_vm5, %v5446_v1, 0.0  ;;  %v5450_v56 = vmul.f32 %v5355_v32, %v5355_v32  ;;  %v5456_v32 = vmul.f32 %v5361_v59, %v5361_v59 }
 0x2e5   :  { %v5566_v23 = vsel %vm5516_vm5, %v5447_v55, 0.0  ;;  %v5570_v58 = vsel %vm5516_vm5, %v5449_v12, 0.0  ;;  %v5363_v12 = vld [vmem:[%s14838_s2 + $0x120] sm:$0xff] }
 0x2e6   :  { %v5551_v47 = vadd.f32 %v5550_v39, %v5549_v6  ;;  %v5568_v39 = vsel %vm5516_vm5, %v5448_v19, 0.0  ;;  %v5357_v6 = vld [vmem:[%s14838_s2 + $0xf0] sm:$0xff] }
 0x2e7   :  { %v11738_v4 = vpop.permute.xlu0 %7986  ;;  %v5452_v34 = vmul.f32 %v5357_v6, %v5357_v6 }
 0x2e8   :  { %v5553_v40 = vadd.f32 %v5552_v13, %v5551_v47  ;;  %v5451_v13 = vmul.f32 %v5356_v46, %v5356_v46  ;;  %v5358_v47 = vld [vmem:[%s14838_s2 + $0xf8] sm:$0xff] }
 0x2ea   :  { %v5555_v5 = vadd.f32 %v5554_v26, %v5553_v40  ;;  %v11747_v26 = vpop.permute.xlu1 %7991  ;;  %v5572_v40 = vsel %vm5516_vm5, %v5450_v56, 0.0  ;;  %v5574_v60 = vsel %vm5516_vm5, %v5451_v13, 0.0  ;;  %v5364_v56 = vld [vmem:[%s14838_s2 + $0x128] sm:$0xff]  ;;  %v5584_v13 = vsel %vm5516_vm5, %v5456_v32, 0.0 }
 0x2eb   :  { %v11750_v52 = vpop.permute.xlu0 %7996 }
 0x2ec   :  { %v5557_v22 = vadd.f32 %v5556_v48, %v5555_v5  ;;  %15535 = vst [vmem:[#allocation17_spill] sm:$0xff] %v11750_v52  ;;  %v5359_v48 = vld [vmem:[%s14838_s2 + $0x100] sm:$0xff]  ;;  %v5453_v5 = vmul.f32 %v5358_v47, %v5358_v47  ;;  %v5365_v47 = vld [vmem:[%s14838_s2 + $0x130] sm:$0xff] }
 0x2ed   :  { %v5454_v1 = vmul.f32 %v5359_v48, %v5359_v48  ;;  %v5366_v48 = vld [vmem:[%s14838_s2 + $0x138] sm:$0xff] }
 0x2ee   :  { %v5559_v35 = vadd.f32 %v5558_v8, %v5557_v22  ;;  %v5360_v8 = vld [vmem:[%s14838_s2 + $0x108] sm:$0xff]  ;;  %v11759_v22 = vpop.permute.xlu1 %8011  ;;  %v5461_v59 = vmul.f32 %v5366_v48, %v5366_v48 }
 0x2ef   :  { %v5455_v55 = vmul.f32 %v5360_v8, %v5360_v8  ;;  %v11766_v15 = vpop.permute.xlu0 %8001 }
 0x2f0   :  { %v5561_v44 = vadd.f32 %v5560_v41, %v5559_v35  ;;  %v5576_v41 = vsel %vm5516_vm5, %v5452_v34, 0.0  ;;  %v5459_v34 = vmul.f32 %v5364_v56, %v5364_v56 }
 0x2f2   :  { %v5563_v63 = vadd.f32 %v5562_v17, %v5561_v44  ;;  %v5578_v17 = vsel %vm5516_vm5, %v5453_v5, 0.0  ;;  %v5362_v44 = vld [vmem:[%s14838_s2 + $0x118] sm:$0xff]  ;;  %v5460_v5 = vmul.f32 %v5365_v47, %v5365_v47 }
 0x2f3   :  { %v5457_v46 = vmul.f32 %v5362_v44, %v5362_v44 }
 0x2f4   :  { %v5565_v21 = vadd.f32 %v5564_v7, %v5563_v63  ;;  %v11771_v7 = vpop.permute.xlu1 %8016  ;;  %v5580_v63 = vsel %vm5516_vm5, %v5454_v1, 0.0 }
 0x2f6   :  { %v5567_v28 = vadd.f32 %v5566_v23, %v5565_v21  ;;  %v5582_v21 = vsel %vm5516_vm5, %v5455_v55, 0.0  ;;  %v5368_v55 = vld [vmem:[%s14838_s2 + $0x148] sm:$0xff] }
 0x2f8   :  { %v5569_v50 = vadd.f32 %v5568_v39, %v5567_v28  ;;  %v11781_v6 = vpop.permute.xlu1 %8026  ;;  %v5458_v28 = vmul.f32 %v5363_v12, %v5363_v12 }
 0x2f9   :  { %15536 = vst [vmem:[#allocation18_spill] sm:$0xff] %v11781_v6 }
 0x2fa   :  { %v5571_v62 = vadd.f32 %v5570_v58, %v5569_v50  ;;  %v11784_v58 = vpop.permute.xlu0 %8006 }
 0x2fc   :  { %v5573_v2 = vadd.f32 %v5572_v40, %v5571_v62  ;;  %v5586_v40 = vsel %vm5516_vm5, %v5457_v46, 0.0  ;;  %v5594_v46 = vsel %vm5516_vm5, %v5461_v59, 0.0  ;;  %v5373_v59 = vld [vmem:[%s14838_s2 + $0x170] sm:$0xff] }
 0x2fe   :  { %v5575_v35 = vadd.f32 %v5574_v60, %v5573_v2  ;;  %v5588_v60 = vsel %vm5516_vm5, %v5458_v28, 0.0  ;;  %v11794_v8 = vpop.permute.xlu0 %8021  ;;  %v5367_v2 = vld [vmem:[%s14838_s2 + $0x140] sm:$0xff] }
 0x2ff   :  { %v5462_v44 = vmul.f32 %v5367_v2, %v5367_v2 }
 0x300   :  { %v5577_v19 = vadd.f32 %v5576_v41, %v5575_v35  ;;  %v11799_v41 = vpop.permute.xlu1 %8031  ;;  %v5590_v35 = vsel %vm5516_vm5, %v5459_v34, 0.0 }
 0x302   :  { %v5579_v23 = vadd.f32 %v5578_v17, %v5577_v19  ;;  %v5592_v19 = vsel %vm5516_vm5, %v5460_v5, 0.0  ;;  %v11806_v32 = vpop.permute.xlu0 %8041 }
 0x304   :  { %v5581_v39 = vadd.f32 %v5580_v63, %v5579_v23  ;;  %v5369_v63 = vld [vmem:[%s14838_s2 + $0x150] sm:$0xff]  ;;  %v5463_v23 = vmul.f32 %v5368_v55, %v5368_v55 }
 0x305   :  { %v5464_v28 = vmul.f32 %v5369_v63, %v5369_v63 }
 0x306   :  { %v5583_v50 = vadd.f32 %v5582_v21, %v5581_v39  ;;  %v5370_v21 = vld [vmem:[%s14838_s2 + $0x158] sm:$0xff]  ;;  %v11815_v39 = vpop.permute.xlu1 %8036  ;;  %v11818_v47 = vpop.permute.xlu0 %8046  ;;  %v5598_v48 = vsel %vm5516_vm5, %v5463_v23, 0.0 }
 0x308   :  { %v5585_v62 = vadd.f32 %v5584_v13, %v5583_v50  ;;  %v5596_v13 = vsel %vm5516_vm5, %v5462_v44, 0.0  ;;  %v5371_v50 = vld [vmem:[%s14838_s2 + $0x160] sm:$0xff] }
 0x309   :  { %v5466_v2 = vmul.f32 %v5371_v50, %v5371_v50 }
 0x30a   :  { %v5587_v1 = vadd.f32 %v5586_v40, %v5585_v62  ;;  %v5465_v40 = vmul.f32 %v5370_v21, %v5370_v21  ;;  %v5372_v62 = vld [vmem:[%s14838_s2 + $0x168] sm:$0xff]  ;;  %v11834_v44 = vpop.permute.xlu0 %8051 }
 0x30b   :  { %v5467_v55 = vmul.f32 %v5372_v62, %v5372_v62  ;;  %v5604_v23 = vsel %vm5516_vm5, %v5466_v2, 0.0 }
 0x30c   :  { %v5589_v17 = vadd.f32 %v5588_v60, %v5587_v1  ;;  %v11827_v60 = vpop.permute.xlu1 %8061  ;;  %v5600_v1 = vsel %vm5516_vm5, %v5464_v28, 0.0 }
 0x30e   :  { %v5591_v12 = vadd.f32 %v5590_v35, %v5589_v17  ;;  %v5602_v17 = vsel %vm5516_vm5, %v5465_v40, 0.0  ;;  %v5606_v40 = vsel %vm5516_vm5, %v5467_v55, 0.0 }
 0x310   :  { %v5593_v56 = vadd.f32 %v5592_v19, %v5591_v12  ;;  %v5374_v19 = vld [vmem:[%s14838_s2 + $0x178] sm:$0xff]  ;;  %v5468_v12 = vmul.f32 %v5373_v59, %v5373_v59  ;;  %v11846_v50 = vpop.permute.xlu1 %8071  ;;  %v5377_v59 = vld [vmem:[%s14838_s2 + $0x190] sm:$0xff] }
 0x312   :  { %v5595_v34 = vadd.f32 %v5594_v46, %v5593_v56  ;;  %v15537_v46 = vld [vmem:[#allocation40_spill] sm:$0xff]  ;;  %v5608_v2 = vsel %vm5516_vm5, %v5468_v12, 0.0 }
 0x313   :  { %v3203_v21 = vsel %vm49_vm0, %v15537_v46, -inf  ;;  %v5375_v56 = vld [vmem:[%s14838_s2 + $0x180] sm:$0xff]  ;;  %v5472_v46 = vmul.f32 %v5377_v59, %v5377_v59 }
 0x314   :  { %v5597_v5 = vadd.f32 %v5596_v13, %v5595_v34  ;;  %v3204_v13 = vmax.f32 %v11156_v29, %v3203_v21  ;;  %v5469_v34 = vmul.f32 %v5374_v19, %v5374_v19 }
 0x315   :  { %v5616_v59 = vsel %vm5516_vm5, %v5472_v46, 0.0 }
 0x316   :  { %v5599_v35 = vadd.f32 %v5598_v48, %v5597_v5  ;;  %v5376_v48 = vld [vmem:[%s14838_s2 + $0x188] sm:$0xff]  ;;  %v5470_v5 = vmul.f32 %v5375_v56, %v5375_v56  ;;  %v5610_v19 = vsel %vm5516_vm5, %v5469_v34, 0.0 }
 0x317   :  { %v5471_v55 = vmul.f32 %v5376_v48, %v5376_v48 }
 0x318   :  { %v5601_v63 = vadd.f32 %v5600_v1, %v5599_v35  ;;  %v11853_v1 = vpop.permute.xlu0 %8056  ;;  %v3761_v35 = vadd.f32 %v11436_v9, %v3204_v13  ;;  %v5612_v21 = vsel %vm5516_vm5, %v5470_v5, 0.0  ;;  %v5379_v13 = vld [vmem:[%s14838_s2 + $0x1a0] sm:$0xff] }
 0x319   :  { %v8059_v12 = vunpack.i.h.bf16 %v11853_v1  ;;  %v5614_v34 = vsel %vm5516_vm5, %v5471_v55, 0.0 }
 0x31a   :  { %v5603_v28 = vadd.f32 %v5602_v17, %v5601_v63  ;;  %v11859_v17 = vpop.permute.xlu1 %8076  ;;  %v5378_v63 = vld [vmem:[%s14838_s2 + $0x198] sm:$0xff] }
 0x31b   :  { %v5473_v48 = vmul.f32 %v5378_v63, %v5378_v63 }
 0x31c   :  { %v5605_v62 = vadd.f32 %v5604_v23, %v5603_v28  ;;  %v3845_v28 = vmax.f32 %v3761_v35, 0.0  ;;  %v11887_v46 = vpop.permute.xlu0 %8066 }
 0x31d   :  { %v5618_v63 = vsel %vm5516_vm5, %v5473_v48, 0.0  ;;  %v15538_v48 = vld [vmem:[#allocation36_spill] sm:$0xff] }
 0x31e   :  { %v5607_v29 = vadd.f32 %v5606_v40, %v5605_v62  ;;  %v11867_v40 = vpop.permute.xlu1 %8086 }
 0x31f   :  { %v8089_v62 = vunpack.i.h.bf16 %v11867_v40 }
 0x320   :  { %v5609_v23 = vadd.f32 %v5608_v2, %v5607_v29  ;;  %v4217_v2 = vsel %vm49_vm0, %v3845_v28, %v8059_v12  ;;  %v5474_v29 = vmul.f32 %v5379_v13, %v5379_v13  ;;  %v5381_v12 = vld [vmem:[%s14838_s2 + $0x1b0] sm:$0xff]  ;;  %v5382_v13 = vld [vmem:[%s14838_s2 + $0x1b8] sm:$0xff] }
 0x321   :  { %v11877_v5 = vsel %vm4224_vm6, %v4217_v2, %v8089_v62  ;;  %v5476_v28 = vmul.f32 %v5381_v12, %v5381_v12  ;;  %v11895_v62 = vpop.permute.xlu0 %8081 }
 0x322   :  { %v5611_v56 = vadd.f32 %v5610_v19, %v5609_v23  ;;  %v5380_v19 = vld [vmem:[%s14838_s2 + $0x1a8] sm:$0xff] }
 0x323   :  { %v5475_v23 = vmul.f32 %v5380_v19, %v5380_v19  ;;  %v5477_v19 = vmul.f32 %v5382_v13, %v5382_v13 }
 0x324   :  { %v5613_v33 = vadd.f32 %v5612_v21, %v5611_v56  ;;  %v5620_v21 = vsel %vm5516_vm5, %v5474_v29, 0.0  ;;  %v15539_v29 = vld [vmem:[#allocation44_spill] sm:$0xff] }
 0x326   :  { %v5615_v35 = vadd.f32 %v5614_v34, %v5613_v33  ;;  %v5622_v33 = vsel %vm5516_vm5, %v5475_v23, 0.0  ;;  %v3175_v34 = vsel %vm49_vm0, %v15538_v48, -inf  ;;  %v11909_v23 = vadd.f32 %v11436_v9, %v3183_v25 }
 0x327   :  { %v3176_v2 = vmax.f32 %v11111_v14, %v3175_v34  ;;  %v11915_v14 = vadd.f32 %v11436_v9, %v3169_v36  ;;  %v15541_v25 = vmax.f32 %v11144_v16, %v11148_v24  ;;  %v5626_v36 = vsel %vm5516_vm5, %v5477_v19, 0.0 }
 0x328   :  { %v5617_v55 = vadd.f32 %v5616_v59, %v5615_v35  ;;  %v3231_v35 = vsel %vm49_vm0, %v15539_v29, -inf  ;;  %v15544_v16 = vmax.f32 %v11186_v0, %v11190_v54  ;;  %v15545_v48 = vmax.f32 %v11130_v61, %v11134_v11  ;;  %v5385_v61 = vld [vmem:[%s14838_s2 + $0x1d0] sm:$0xff] }
 0x329   :  { %v11926_v12 = vadd.f32 %v11436_v9, %v3176_v2  ;;  %v11938_v20 = vadd.f32 %v11436_v9, %v15541_v25  ;;  %v3840_v37 = vmax.f32 %v11915_v14, 0.0  ;;  %v5480_v53 = vmul.f32 %v5385_v61, %v5385_v61 }
 0x32a   :  { %v5619_v3 = vadd.f32 %v5618_v63, %v5617_v55  ;;  %v3232_v63 = vmax.f32 %v11198_v57, %v3231_v35  ;;  %v5383_v55 = vld [vmem:[%s14838_s2 + $0x1c0] sm:$0xff]  ;;  %v11923_v57 = vadd.f32 %v11436_v9, %v3190_v31  ;;  %v11945_v31 = vadd.f32 %v11436_v9, %v15542_v51 }
 0x32b   :  { %v5478_v10 = vmul.f32 %v5383_v55, %v5383_v55  ;;  %v11957_v24 = vadd.f32 %v11436_v9, %v15544_v16  ;;  %v3841_v54 = vmax.f32 %v11926_v12, 0.0  ;;  %v11978_v34 = vadd.f32 %v11436_v9, %v15545_v48 }
 0x32c   :  { %v5621_v56 = vadd.f32 %v5620_v21, %v5619_v3  ;;  %v5624_v3 = vsel %vm5516_vm5, %v5476_v28, 0.0  ;;  %v11917_v21 = vpop.permute.xlu0 %8101  ;;  %v11962_v28 = vpop.permute.xlu1 %8091  ;;  %v3850_v35 = vmax.f32 %v11945_v31, 0.0  ;;  %v5386_v31 = vld [vmem:[%s14838_s2 + $0x1d8] sm:$0xff]  ;;  %v8049_v48 = vunpack.i.h.bf16 %v11818_v47 }
 0x32d   :  { %v5628_v29 = vsel %vm5516_vm5, %v5478_v10, 0.0  ;;  %v8048_v61 = vunpack.i.l.bf16 %v11818_v47  ;;  %v5481_v12 = vmul.f32 %v5386_v31, %v5386_v31  ;;  %v8073_v2 = vunpack.i.l.bf16 %v11846_v50  ;;  %v5387_v47 = vld [vmem:[%s14838_s2 + $0x1e0] sm:$0xff] }
 0x32e   :  { %v5623_v59 = vadd.f32 %v5622_v33, %v5621_v56  ;;  %v11960_v56 = vadd.f32 %v11436_v9, %v3232_v63  ;;  %v5632_v33 = vsel %vm5516_vm5, %v5480_v53, 0.0  ;;  %v4213_v55 = vsel %vm49_vm0, %v3841_v54, %v8049_v48  ;;  %v5388_v53 = vld [vmem:[%s14838_s2 + $0x1e8] sm:$0xff] }
 0x32f   :  { %v8104_v51 = vunpack.i.h.bf16 %v11917_v21  ;;  %v4212_v31 = vsel %vm49_vm0, %v3840_v37, %v8048_v61  ;;  %v5634_v11 = vsel %vm5516_vm5, %v5481_v12, 0.0 }
 0x330   :  { %v5625_v38 = vadd.f32 %v5624_v3, %v5623_v59  ;;  %v5479_v59 = vmul.f32 %v5384_v27, %v5384_v27  ;;  %v3849_v63 = vmax.f32 %v11960_v56, 0.0  ;;  %v8014_v56 = vunpack.i.h.bf16 %v11759_v22 }
 0x331   :  { %v11969_v43 = vpop.permute.xlu0 %8106  ;;  %v8068_v27 = vunpack.i.l.bf16 %v11887_v46 }
 0x332   :  { %v5627_v13 = vadd.f32 %v5626_v36, %v5625_v38  ;;  %v11996_v38 = vpop.permute.xlu1 %8096  ;;  %v5630_v16 = vsel %vm5516_vm5, %v5479_v59, 0.0  ;;  %v8074_v36 = vunpack.i.h.bf16 %v11846_v50  ;;  %v8064_v50 = vunpack.i.h.bf16 %v11827_v60 }
 0x333   :  { %v5482_v59 = vmul.f32 %v5387_v47, %v5387_v47  ;;  %v4221_v37 = vsel %vm49_vm0, %v3849_v63, %v8073_v2  ;;  %v8098_v61 = vunpack.i.l.bf16 %v11996_v38  ;;  %v15547_v2 = vmax.f32 %v11951_v30, 0.0 }
 0x334   :  { %v5629_v10 = vadd.f32 %v5628_v29, %v5627_v13  ;;  %v8044_v29 = vunpack.i.h.bf16 %v11806_v32  ;;  %v4222_v54 = vsel %vm49_vm0, %v3850_v35, %v8074_v36  ;;  %v5389_v35 = vld [vmem:[%s14838_s2 + $0x1f0] sm:$0xff]  ;;  %v5483_v36 = vmul.f32 %v5388_v53, %v5388_v53 }
 0x335   :  { %v4235_v42 = vsel %vm4224_vm6, %v4222_v54, %v8104_v51  ;;  %v4220_v63 = vsel %vm49_vm0, %v15547_v2, %v8064_v50  ;;  %v15548_v47 = vmax.f32 %v11957_v24, 0.0  ;;  %v15549_v54 = vunpack.i.h.bf16 %v11728_v18 }
 0x336   :  { %v12020_v49 = vpop.permute.xlu1 %8111  ;;  %v15550_v50 = vunpack.i.l.bf16 %v11728_v18  ;;  %v5484_v24 = vmul.f32 %v5389_v35, %v5389_v35  ;;  %v15551_v35 = vunpack.i.l.bf16 %v11759_v22 }
 0x33a   :  { %v11992_v14 = vpop.permute.xlu0 %8116 }
 0x33b   :  { %v8119_v25 = vunpack.i.h.bf16 %v11992_v14 }
 0x33d   :  { %v12010_v13 = vsel %vm4237_vm7, %v11877_v5, %v8119_v25  ;;  %v5631_v5 = vadd.f32 %v5630_v16, %v5629_v10  ;;  %v8038_v25 = vunpack.i.l.bf16 %v11815_v39  ;;  %v8103_v10 = vunpack.i.l.bf16 %v11917_v21 }
 0x33e   :  { %v12016_v0 = vpop.permute.xlu0 %8121  ;;  %v8053_v16 = vunpack.i.l.bf16 %v11834_v44 }
 0x33f   :  { %v5633_v21 = vadd.f32 %v5632_v33, %v5631_v5  ;;  %v4234_v6 = vsel %vm4224_vm6, %v4221_v37, %v8103_v10  ;;  %v15546_v33 = vmax.f32 %v11909_v23, 0.0  ;;  %v4223_v10 = vsel %vm49_vm0, %v15548_v47, %v8068_v27 }
 0x340   :  { %v4236_v30 = vsel %vm4224_vm6, %v4223_v10, %v8098_v61  ;;  %v5638_v37 = vsel %vm5516_vm5, %v5483_v36, 0.0  ;;  %v8108_v61 = vunpack.i.l.bf16 %v11969_v43 }
 0x341   :  { %v4214_v12 = vsel %vm49_vm0, %v15546_v33, %v8053_v16  ;;  %v5635_v23 = vadd.f32 %v5634_v11, %v5633_v21  ;;  %v5636_v16 = vsel %vm5516_vm5, %v5482_v59, 0.0  ;;  %v8078_v11 = vunpack.i.l.bf16 %v11859_v17 }
 0x342   :  { %v12037_v9 = vpop.permute.xlu0 %8126  ;;  %v8083_v59 = vunpack.i.l.bf16 %v11895_v62  ;;  %v8109_v21 = vunpack.i.h.bf16 %v11969_v43 }
 0x343   :  { %v8132_v48 = vpop.permute.xlu1 %8131  ;;  %v8128_v52 = vunpack.i.l.bf16 %v12037_v9  ;;  %v5637_v36 = vadd.f32 %v5636_v16, %v5635_v23  ;;  %v4225_v23 = vsel %vm4224_vm6, %v4212_v31, %v8078_v11  ;;  %v15553_v16 = vunpack.i.l.bf16 %v11806_v32  ;;  %v5391_v32 = vld [vmem:[%s14838_s2 + $0x200] sm:$0xff] }
 0x344   :  { %v8134_v3 = vunpack.i.h.bf16 %v8132_v48  ;;  %v8133_v19 = vunpack.i.l.bf16 %v8132_v48 }
 0x346   :  { %v4248_v5 = vsel %vm4237_vm7, %v4235_v42, %v8134_v3  ;;  %v4247_v51 = vsel %vm4237_vm7, %v4234_v6, %v8133_v19  ;;  %v8079_v19 = vunpack.i.h.bf16 %v11859_v17  ;;  %v4249_v3 = vsel %vm4237_vm7, %v4236_v30, %v8128_v52 }
 0x347   :  { %v4261_v53 = vsel %vm4250_vm8, %v4248_v5, %v15549_v54  ;;  %v4260_v42 = vsel %vm4250_vm8, %v4247_v51, %v15550_v50  ;;  %v15552_v52 = vunpack.i.l.bf16 %v11784_v58  ;;  %v8113_v17 = vunpack.i.l.bf16 %v12020_v49 }
 0x348   :  { %v4274_v27 = vsel %vm4263_vm9, %v4261_v53, %v8014_v56  ;;  %v4273_v33 = vsel %vm4263_vm9, %v4260_v42, %v15551_v35  ;;  %v4226_v22 = vsel %vm4224_vm6, %v4213_v55, %v8079_v19  ;;  %v5390_v55 = vld [vmem:[%s14838_s2 + $0x1f8] sm:$0xff]  ;;  %v4227_v30 = vsel %vm4224_vm6, %v4214_v12, %v8083_v59 }
 0x349   :  { %v12066_v48 = vpop.permute.xlu1 %8136  ;;  %v12091_v5 = vsel %vm4276_vm10, %v4274_v27, %v8044_v29  ;;  %v8094_v29 = vunpack.i.h.bf16 %v11962_v28  ;;  %v4239_v50 = vsel %vm4237_vm7, %v4226_v22, %v8109_v21  ;;  %v8124_v42 = vunpack.i.h.bf16 %v12016_v0 }
 0x34a   :  { %v8138_v6 = vunpack.i.l.bf16 %v12066_v48  ;;  %v4238_v19 = vsel %vm4237_vm7, %v4225_v23, %v8108_v61  ;;  %v5640_v27 = vsel %vm5516_vm5, %v5484_v24, 0.0  ;;  %v15557_v23 = vunpack.i.h.bf16 %v11766_v15 }
 0x34b   :  { %v4233_v61 = vsel %vm4224_vm6, %v4220_v63, %v8094_v29  ;;  %v15555_v63 = vunpack.i.l.bf16 %v11738_v4 }
 0x34c   :  { %v4262_v18 = vsel %vm4250_vm8, %v4249_v3, %v8138_v6  ;;  %v5639_v6 = vadd.f32 %v5638_v37, %v5637_v36  ;;  %v4240_v3 = vsel %vm4237_vm7, %v4227_v30, %v8113_v17  ;;  %v5485_v37 = vmul.f32 %v5390_v55, %v5390_v55 }
 0x34d   :  { %v4275_v56 = vsel %vm4263_vm9, %v4262_v18, %v15552_v52  ;;  %v8142_v2 = vpop.permute.xlu1 %8141  ;;  %v8069_v18 = vunpack.i.h.bf16 %v11887_v46  ;;  %v8099_v52 = vunpack.i.h.bf16 %v11996_v38  ;;  %v4246_v24 = vsel %vm4237_vm7, %v4233_v61, %v8124_v42 }
 0x34e   :  { %v12094_v51 = vsel %vm4276_vm10, %v4275_v56, %v8038_v25  ;;  %v8144_v47 = vunpack.i.h.bf16 %v8142_v2  ;;  %v12096_v43 = vpop.permute.xlu0 %8146  ;;  %v8143_v10 = vunpack.i.l.bf16 %v8142_v2  ;;  %v12109_v25 = vsel %vm4276_vm10, %v4273_v33, %v15553_v16 }
 0x34f   :  { %v8148_v54 = vunpack.i.l.bf16 %v12096_v43  ;;  %v12102_v53 = vpack.i.bf16 %v12094_v51, %v12091_v5  ;;  %v12134_v21 = vpack.i.bf16 %v12091_v5, %v12109_v25  ;;  %v5486_v33 = vmul.f32 %v5391_v32, %v5391_v32  ;;  %v5392_v32 = vld [vmem:[%s14838_s2 + $0x208] sm:$0xff] }
 0x350   :  { %v4252_v12 = vsel %vm4250_vm8, %v4239_v50, %v8144_v47  ;;  %v4251_v11 = vsel %vm4250_vm8, %v4238_v19, %v8143_v10  ;;  %v15554_v56 = vunpack.i.h.bf16 %v11738_v4  ;;  %v5641_v46 = vadd.f32 %v5640_v27, %v5639_v6 }
 0x351   :  { %8161 = vrot.lane.b32.xlu0 %v12102_v53, %s8991_s23  ;;  %v12119_v31 = vpop.permute.xlu1 %8151  ;;  %8166 = vrot.lane.b32.xlu1 %v12102_v53, %s8997_s0  ;;  %v4253_v59 = vsel %vm4250_vm8, %v4240_v3, %v8148_v54  ;;  %v4264_v17 = vsel %vm4263_vm9, %v4251_v11, %v15555_v63  ;;  %v15556_v47 = vunpack.i.l.bf16 %v11747_v26  ;;  %v8129_v54 = vunpack.i.h.bf16 %v12037_v9 }
 0x352   :  { %v8154_v35 = vunpack.i.h.bf16 %v12119_v31  ;;  %v4265_v2 = vsel %vm4263_vm9, %v4252_v12, %v15554_v56  ;;  %v5642_v16 = vsel %vm5516_vm5, %v5485_v37, 0.0  ;;  %v15558_v4 = vmax.f32 %v11923_v57, 0.0 }
 0x353   :  { %v4266_v38 = vsel %vm4263_vm9, %v4253_v59, %v15556_v47  ;;  %v8139_v30 = vunpack.i.h.bf16 %v12066_v48  ;;  %v15559_v50 = vunpack.i.h.bf16 %v11799_v41  ;;  %v15560_v6 = vunpack.i.h.bf16 %v11771_v7  ;;  %v5393_v59 = vld [vmem:[%s14838_s2 + $0x210] sm:$0xff] }
 0x354   :  { %v4259_v22 = vsel %vm4250_vm8, %v4246_v24, %v8154_v35  ;;  %v4215_v55 = vsel %vm49_vm0, %v15558_v4, %v8069_v18  ;;  %v15561_v48 = vunpack.i.l.bf16 %v11771_v7  ;;  %v15562_v3 = vunpack.i.l.bf16 %v11794_v8 }
 0x355   :  { %8176 = vrot.lane.b32.xlu0 %v12134_v21, %s8998_s1  ;;  %v12146_v36 = vpop.permute.xlu1 %8156  ;;  %v4272_v29 = vsel %vm4263_vm9, %v4259_v22, %v15557_v23  ;;  %v12180_v57 = vsel %vm4276_vm10, %v4265_v2, %v15560_v6  ;;  %v8054_v27 = vunpack.i.h.bf16 %v11834_v44  ;;  %v8063_v7 = vunpack.i.l.bf16 %v11827_v60 }
 0x356   :  { %v8159_v10 = vunpack.i.h.bf16 %v12146_v36  ;;  %v12168_v42 = vsel %vm4276_vm10, %v4272_v29, %v15559_v50  ;;  %v12185_v19 = vsel %vm4276_vm10, %v4264_v17, %v15561_v48  ;;  %v12190_v12 = vsel %vm4276_vm10, %v4266_v38, %v15562_v3  ;;  %v5396_v50 = vld [vmem:[%s14838_s2 + $0x228] sm:$0xff] }
 0x357   :  { %v4228_v11 = vsel %vm4224_vm6, %v4215_v55, %v8099_v52  ;;  %v5643_v37 = vadd.f32 %v5642_v16, %v5641_v46  ;;  %v5487_v61 = vmul.f32 %v5392_v32, %v5392_v32  ;;  %v5644_v35 = vsel %vm5516_vm5, %v5486_v33, 0.0  ;;  %v5394_v33 = vld [vmem:[%s14838_s2 + $0x218] sm:$0xff] }
 0x358   :  { %v12172_v9 = vsel %vm4250_vm8, %v12010_v13, %v8159_v10  ;;  %v12196_v13 = vpack.i.bf16 %v12109_v25, %v12168_v42  ;;  %v4241_v18 = vsel %vm4237_vm7, %v4228_v11, %v8129_v54  ;;  %v4353_v44 = vrot.slane %v12180_v57, 2 }
 0x359   :  { %8201 = vrot.lane.b32.xlu0 %v12134_v21, %s8999_s27  ;;  %v4254_v24 = vsel %vm4250_vm8, %v4241_v18, %v8139_v30  ;;  %v4352_v60 = vrot.slane %v12185_v19, 2  ;;  %v12212_v52 = vrot.slane %v12190_v12, 2  ;;  %v8009_v56 = vunpack.i.h.bf16 %v11784_v58 }
 0x35a   :  { %8171 = vrot.lane.b32.xlu1 %v12196_v13, %s8991_s23  ;;  %v8084_v2 = vunpack.i.h.bf16 %v11895_v62  ;;  %v5488_v46 = vmul.f32 %v5393_v59, %v5393_v59  ;;  %v8039_v63 = vunpack.i.h.bf16 %v11815_v39  ;;  %v15563_v17 = vmax.f32 %v11932_v45, 0.0  ;;  %v5395_v39 = vld [vmem:[%s14838_s2 + $0x220] sm:$0xff]  ;;  %v5398_v59 = vld [vmem:[%s14838_s2 + $0x238] sm:$0xff] }
 0x35b   :  { %v15564_v38 = vmax.f32 %v11938_v20, 0.0  ;;  %v5645_v62 = vadd.f32 %v5644_v35, %v5643_v37  ;;  %v8093_v22 = vunpack.i.l.bf16 %v11962_v28  ;;  %v4267_v10 = vsel %vm4263_vm9, %v4254_v24, %v8009_v56 }
 0x35c   :  { %v4218_v47 = vsel %vm49_vm0, %v15563_v17, %v8054_v27  ;;  %v12234_v54 = vpack.i.bf16 %v12185_v19, %v12168_v42  ;;  %v5646_v45 = vsel %vm5516_vm5, %v5487_v61, 0.0  ;;  %v8123_v20 = vunpack.i.l.bf16 %v12016_v0 }
 0x35d   :  { %8206 = vrot.lane.b32.xlu0 %v12196_v13, %s9000_s30  ;;  %v4219_v58 = vsel %vm49_vm0, %v15564_v38, %v8063_v7  ;;  %v4354_v23 = vsel %vm1780_vm4, %v4352_v60, %v4353_v44  ;;  %v4356_v28 = vsel %vm1780_vm4, %v4353_v44, %v12212_v52  ;;  %v5489_v29 = vmul.f32 %v5394_v33, %v5394_v33  ;;  %v5397_v7 = vld [vmem:[%s14838_s2 + $0x230] sm:$0xff]  ;;  %v5399_v33 = vld [vmem:[%s14838_s2 + $0x240] sm:$0xff] }
 0x35e   :  { %8181 = vrot.lane.b32.xlu1 %v12196_v13, %s8997_s0  ;;  %v4231_v16 = vsel %vm4224_vm6, %v4218_v47, %v8084_v2  ;;  %v8153_v4 = vunpack.i.l.bf16 %v12119_v31  ;;  %v5648_v55 = vsel %vm5516_vm5, %v5488_v46, 0.0  ;;  %v8114_v30 = vunpack.i.h.bf16 %v12020_v49 }
 0x35f   :  { %v12251_v0 = vsel %vm4276_vm10, %v4267_v10, %v8039_v63  ;;  %v5490_v32 = vmul.f32 %v5395_v39, %v5395_v39  ;;  %v5647_v6 = vadd.f32 %v5646_v45, %v5645_v62  ;;  %v4232_v48 = vsel %vm4224_vm6, %v4219_v58, %v8093_v22  ;;  %v5400_v22 = vld [vmem:[%s14838_s2 + $0x248] sm:$0xff] }
 0x360   :  { %v8149_v31 = vunpack.i.h.bf16 %v12096_v43  ;;  %v12262_v49 = vpack.i.bf16 %v12251_v0, %v12190_v12  ;;  %v12264_v3 = vpack.i.bf16 %v4356_v28, %v4354_v23  ;;  %v4245_v27 = vsel %vm4237_vm7, %v4232_v48, %v8123_v20  ;;  %v5401_v20 = vld [vmem:[%s14838_s2 + $0x250] sm:$0xff]  ;;  %v5402_v23 = vld [vmem:[%s14838_s2 + $0x258] sm:$0xff] }
 0x361   :  { %8231 = vrot.lane.b32.xlu0 %v12234_v54, %s9001_s12  ;;  %v5650_v11 = vsel %vm5516_vm5, %v5489_v29, 0.0  ;;  %v4258_v43 = vsel %vm4250_vm8, %v4245_v27, %v8153_v4  ;;  %v5491_v37 = vmul.f32 %v5396_v50, %v5396_v50  ;;  %v7994_v18 = vunpack.i.h.bf16 %v11747_v26 }
 0x362   :  { %8186 = vrot.lane.b32.xlu1 %v12134_v21, %s9002_s15  ;;  %v8003_v61 = vunpack.i.l.bf16 %v11766_v15  ;;  %v4244_v35 = vsel %vm4237_vm7, %v4231_v16, %v8114_v30  ;;  %v5649_v24 = vadd.f32 %v5648_v55, %v5647_v6  ;;  %v12285_v60 = vpack.i.bf16 %v12180_v57, %v12185_v19 }
 0x363   :  { %v4257_v44 = vsel %vm4250_vm8, %v4244_v35, %v8149_v31  ;;  %v5492_v56 = vmul.f32 %v5397_v7, %v5397_v7  ;;  %v5652_v2 = vsel %vm5516_vm5, %v5490_v32, 0.0  ;;  %v8058_v26 = vunpack.i.l.bf16 %v11853_v1 }
 0x364   :  { %v4271_v15 = vsel %vm4263_vm9, %v4258_v43, %v8003_v61  ;;  %v5493_v46 = vmul.f32 %v5398_v59, %v5398_v59  ;;  %v5651_v63 = vadd.f32 %v5650_v11, %v5649_v24  ;;  %v3844_v17 = vmax.f32 %v11978_v34, 0.0  ;;  %v5404_v59 = vld [vmem:[%s14838_s2 + $0x268] sm:$0xff] }
 0x365   :  { %8241 = vrot.lane.b32.xlu0 %v12262_v49, %s8997_s0  ;;  %v8033_v47 = vunpack.i.l.bf16 %v11799_v41  ;;  %v5654_v38 = vsel %vm5516_vm5, %v5491_v37, 0.0  ;;  %v8024_v1 = vunpack.i.h.bf16 %v11794_v8  ;;  %v8088_v58 = vunpack.i.l.bf16 %v11867_v40 }
 0x366   :  { %8191 = vrot.lane.b32.xlu1 %v12134_v21, %s9003_s20  ;;  %v4270_v62 = vsel %vm4263_vm9, %v4257_v44, %v7994_v18  ;;  %v5653_v10 = vadd.f32 %v5652_v2, %v5651_v63  ;;  %v8250_v41 = vpack.i.bf16 %v12251_v0, %v12180_v57  ;;  %v5494_v8 = vmul.f32 %v5399_v33, %v5399_v33  ;;  %v15565_v18 = vld [vmem:[#allocation17_spill] sm:$0xff] }
 0x367   :  { %v12305_v34 = vsel %vm4276_vm10, %v4271_v15, %v8033_v47  ;;  %v5656_v40 = vsel %vm5516_vm5, %v5492_v56, 0.0  ;;  %v4216_v39 = vsel %vm49_vm0, %v3844_v17, %v8058_v26  ;;  %v8118_v45 = vunpack.i.l.bf16 %v11992_v14  ;;  %v5405_v15 = vld [vmem:[%s14838_s2 + $0x270] sm:$0xff] }
 0x368   :  { %v5655_v28 = vadd.f32 %v5654_v38, %v5653_v10  ;;  %v5658_v29 = vsel %vm5516_vm5, %v5493_v46, 0.0  ;;  %v12322_v16 = vsel %vm4276_vm10, %v4270_v62, %v8024_v1  ;;  %v8158_v4 = vunpack.i.l.bf16 %v12146_v36  ;;  %v5403_v36 = vld [vmem:[%s14838_s2 + $0x260] sm:$0xff]  ;;  %v15567_v38 = vld [vmem:[#allocation18_spill] sm:$0xff] }
 0x369   :  { %8246 = vrot.lane.b32.xlu0 %v12285_v60, %s9004_s25  ;;  %v5495_v55 = vmul.f32 %v5400_v22, %v5400_v22  ;;  %v4229_v14 = vsel %vm4224_vm6, %v4216_v39, %v8088_v58  ;;  %v4391_v50 = vrot.slane %v12305_v34, 2  ;;  %v4393_v32 = vrot.slane %v12168_v42, 2  ;;  %v5406_v58 = vld [vmem:[%s14838_s2 + $0x278] sm:$0xff] }
 0x36a   :  { %8196 = vrot.lane.b32.xlu1 %v12134_v21, %s9005_s29  ;;  %v5657_v30 = vadd.f32 %v5656_v40, %v5655_v28  ;;  %v5496_v6 = vmul.f32 %v5401_v20, %v5401_v20  ;;  %v5497_v48 = vmul.f32 %v5402_v23, %v5402_v23  ;;  %v5660_v31 = vsel %vm5516_vm5, %v5494_v8, 0.0  ;;  %v5407_v8 = vld [vmem:[%s14838_s2 + $0x280] sm:$0xff]  ;;  %v5408_v20 = vld [vmem:[%s14838_s2 + $0x288] sm:$0xff] }
 0x36b   :  { %v4242_v27 = vsel %vm4237_vm7, %v4229_v14, %v8118_v45  ;;  %v4390_v11 = vrot.slane %v12322_v16, 2  ;;  %v5662_v37 = vsel %vm5516_vm5, %v5495_v55, 0.0  ;;  %v7998_v61 = vunpack.i.l.bf16 %v15565_v18  ;;  %v5409_v55 = vld [vmem:[%s14838_s2 + $0x290] sm:$0xff] }
 0x36c   :  { %v5659_v7 = vadd.f32 %v5658_v29, %v5657_v30  ;;  %v4255_v43 = vsel %vm4250_vm8, %v4242_v27, %v8158_v4  ;;  %v4394_v44 = vsel %vm1780_vm4, %v4391_v50, %v4393_v32  ;;  %v5498_v56 = vmul.f32 %v5403_v36, %v5403_v36 }
 0x36d   :  { %8251 = vrot.lane.b32.xlu0 %v8250_v41, %s8998_s1  ;;  %v4392_v24 = vsel %vm1780_vm4, %v4390_v11, %v4391_v50  ;;  %v5664_v2 = vsel %vm5516_vm5, %v5496_v6, 0.0  ;;  %v4268_v26 = vsel %vm4263_vm9, %v4255_v43, %v7998_v61  ;;  %v5499_v33 = vmul.f32 %v5404_v59, %v5404_v59  ;;  %v5412_v11 = vld [vmem:[%s14838_s2 + $0x2a8] sm:$0xff] }
 0x36e   :  { %8211 = vrot.lane.b32.xlu1 %v12134_v21, %s8992_s24  ;;  %v5661_v35 = vadd.f32 %v5660_v31, %v5659_v7  ;;  %v5666_v63 = vsel %vm5516_vm5, %v5497_v48, 0.0  ;;  %v8220_v17 = vpack.i.bf16 %v12185_v19, %v12094_v51  ;;  %v12359_v47 = vpack.i.bf16 %v4394_v44, %v4392_v24  ;;  %v5411_v31 = vld [vmem:[%s14838_s2 + $0x2a0] sm:$0xff]  ;;  %v5414_v44 = vld [vmem:[%s14838_s2 + $0x2b8] sm:$0xff] }
 0x36f   :  { %v8028_v1 = vunpack.i.l.bf16 %v15567_v38  ;;  %v5500_v22 = vmul.f32 %v5405_v15, %v5405_v15  ;;  %v5668_v10 = vsel %vm5516_vm5, %v5498_v56, 0.0  ;;  %v5501_v39 = vmul.f32 %v5406_v58, %v5406_v58 }
 0x370   :  { %v5663_v46 = vadd.f32 %v5662_v37, %v5661_v35  ;;  %15566 = vst [vmem:[#allocation19_spill] sm:$0xff] %v12359_v47  ;;  %v5670_v45 = vsel %vm5516_vm5, %v5499_v33, 0.0  ;;  %v5502_v29 = vmul.f32 %v5407_v8, %v5407_v8  ;;  %v5503_v30 = vmul.f32 %v5408_v20, %v5408_v20  ;;  %v5413_v37 = vld [vmem:[%s14838_s2 + $0x2b0] sm:$0xff]  ;;  %v5415_v33 = vld [vmem:[%s14838_s2 + $0x2c0] sm:$0xff] }
 0x371   :  { %8266 = vrot.lane.b32.xlu0 %v12264_v3, %s9000_s30  ;;  %v12368_v41 = vsel %vm4276_vm10, %v4268_v26, %v8028_v1  ;;  %v5672_v4 = vsel %vm5516_vm5, %v5500_v22, 0.0  ;;  %v5674_v50 = vsel %vm5516_vm5, %v5501_v39, 0.0  ;;  %v5504_v6 = vmul.f32 %v5409_v55, %v5409_v55  ;;  %v5417_v22 = vld [vmem:[%s14838_s2 + $0x2d0] sm:$0xff]  ;;  %v5418_v39 = vld [vmem:[%s14838_s2 + $0x2d8] sm:$0xff] }
 0x372   :  { %8216 = vrot.lane.b32.xlu1 %v12134_v21, %s9006_s18  ;;  %v5665_v62 = vadd.f32 %v5664_v2, %v5663_v46  ;;  %v8280_v28 = vpack.i.bf16 %v12368_v41, %v12251_v0  ;;  %v5676_v48 = vsel %vm5516_vm5, %v5502_v29, 0.0  ;;  %v5678_v7 = vsel %vm5516_vm5, %v5503_v30, 0.0 }
 0x373   :  { %v5680_v59 = vsel %vm5516_vm5, %v5504_v6, 0.0  ;;  %v5507_v35 = vmul.f32 %v5412_v11, %v5412_v11  ;;  %v12418_v2 = vpack.i.bf16 %v12305_v34, %v12322_v16  ;;  %v5508_v26 = vmul.f32 %v5413_v37, %v5413_v37 }
 0x374   :  { %v5667_v40 = vadd.f32 %v5666_v63, %v5665_v62  ;;  %v5509_v63 = vmul.f32 %v5414_v44, %v5414_v44  ;;  %v5510_v58 = vmul.f32 %v5415_v33, %v5415_v33  ;;  %v5512_v20 = vmul.f32 %v5417_v22, %v5417_v22 }
 0x375   :  { %8271 = vrot.lane.b32.xlu0 %v12264_v3, %s9005_s29  ;;  %v5688_v62 = vsel %vm5516_vm5, %v5508_v26, 0.0  ;;  %v4365_v11 = vrot.slane %v12368_v41, 2  ;;  %v8355_v26 = vpack.i.bf16 %v12190_v12, %v12180_v57  ;;  %vm4421_vm6 = vcmask 916480  }
 0x376   :  { %8221 = vrot.lane.b32.xlu1 %v8220_v17, %s8998_s1  ;;  %v5669_v23 = vadd.f32 %v5668_v10, %v5667_v40  ;;  %v5686_v17 = vsel %vm5516_vm5, %v5507_v35, 0.0  ;;  %v5690_v40 = vsel %vm5516_vm5, %v5509_v63, 0.0  ;;  %v7999_v63 = vunpack.i.h.bf16 %v15565_v18 }
 0x377   :  { %vm4424_vm7 = vcmask 113664   ;;  %vm4427_vm8 = vcmask 359424  }
 0x378   :  { %v5671_v14 = vadd.f32 %v5670_v45, %v5669_v23  ;;  %v5692_v23 = vsel %vm5516_vm5, %v5510_v58, 0.0 }
 0x379   :  { %8276 = vrot.lane.b32.xlu0 %v12264_v3, %s8999_s27 }
 0x37a   :  { %8226 = vrot.lane.b32.xlu1 %v12234_v54, %s9007_s11  ;;  %v5410_v54 = vld [vmem:[%s14838_s2 + $0x298] sm:$0xff]  ;;  %v5673_v32 = vadd.f32 %v5672_v4, %v5671_v14  ;;  %v5513_v4 = vmul.f32 %v5418_v39, %v5418_v39  ;;  %v5420_v14 = vld [vmem:[%s14838_s2 + $0x2e8] sm:$0x3f] }
 0x37b   :  { %v5505_v36 = vmul.f32 %v5410_v54, %v5410_v54  ;;  %v5696_v54 = vsel %vm5516_vm5, %v5512_v20, 0.0  ;;  %v5515_v6 = vmul.f32 %v5420_v14, %v5420_v14  ;;  %v8875_v39 = vld [vmem:[%s14838_s2 + $0xf8] sm:$0xff]  ;;  %v8876_v20 = vld [vmem:[%s14838_s2 + $0x70] sm:$0xff]  ;;  %v8879_v14 = vld [vmem:[%s14838_s2 + $0xe8] sm:$0xff] }
 0x37c   :  { %v5675_v27 = vadd.f32 %v5674_v50, %v5673_v32 }
 0x37d   :  { %8281 = vrot.lane.b32.xlu0 %v8280_v28, %s8992_s24  ;;  %v5682_v24 = vsel %vm5516_vm5, %v5505_v36, 0.0 }
 0x37e   :  { %8236 = vrot.lane.b32.xlu1 %v12262_v49, %s8991_s23  ;;  %v5677_v43 = vadd.f32 %v5676_v48, %v5675_v27  ;;  %v5506_v49 = vmul.f32 %v5411_v31, %v5411_v31  ;;  %v5698_v48 = vsel %vm5516_vm5, %v5513_v4, 0.0  ;;  %v8878_v4 = vld [vmem:[%s14838_s2 + $0xe0] sm:$0xff] }
 0x380   :  { %v5679_v61 = vadd.f32 %v5678_v7, %v5677_v43  ;;  %v5684_v15 = vsel %vm5516_vm5, %v5506_v49, 0.0  ;;  %v5703_v7 = vsel %vm5702_vm11, %v5515_v6, 0.0  ;;  %v4364_v49 = vrot.slane %v12251_v0, 2 }
 0x381   :  { %8286 = vrot.lane.b32.xlu0 %v8280_v28, %s9006_s18  ;;  %s9008_s18 = smov 46   ;;  %vm4440_vm11 = vcmask 539648  }
 0x382   :  { %8256 = vrot.lane.b32.xlu1 %v12285_v60, %s8991_s23  ;;  %v5681_v56 = vadd.f32 %v5680_v59, %v5679_v61  ;;  %v12472_v37 = vsel %vm1780_vm4, %v4364_v49, %v4365_v11 }
 0x384   :  { %v5683_v46 = vadd.f32 %v5682_v24, %v5681_v56  ;;  %v8350_v24 = vpack.i.bf16 %v12472_v37, %v12212_v52 }
 0x385   :  { %8291 = vrot.lane.b32.xlu0 %v8280_v28, %s9004_s25  ;;  %v5419_v28 = vld [vmem:[%s14838_s2 + $0x2e0] sm:$0xff] }
 0x386   :  { %8261 = vrot.lane.b32.xlu1 %v12285_v60, %s8997_s0  ;;  %v5416_v60 = vld [vmem:[%s14838_s2 + $0x2c8] sm:$0xff]  ;;  %v5685_v1 = vadd.f32 %v5684_v15, %v5683_v46  ;;  %v5514_v50 = vmul.f32 %v5419_v28, %v5419_v28  ;;  %v8877_v28 = vld [vmem:[%s14838_s2 + $0x78] sm:$0xff] }
 0x387   :  { %v5511_v8 = vmul.f32 %v5416_v60, %v5416_v60  ;;  %v8029_v60 = vunpack.i.h.bf16 %v15567_v38 }
 0x388   :  { %v5687_v10 = vadd.f32 %v5686_v17, %v5685_v1  ;;  %v5700_v27 = vsel %vm5516_vm5, %v5514_v50, 0.0  ;;  %v4269_v17 = vsel %vm4263_vm9, %v12172_v9, %v7999_v63  ;;  %v5421_v9 = vld [vmem:[%s14842_s6 + $0x2] sm:$0x1] }
 0x389   :  { %8296 = vrot.lane.b32.xlu0 %v12418_v2, %s8991_s23  ;;  %v5694_v55 = vsel %vm5516_vm5, %v5511_v8, 0.0  ;;  %v12508_v18 = vsel %vm4276_vm10, %v4269_v17, %v8029_v60  ;;  %v8874_v8 = vld [vmem:[%s14838_s2 + $0xf0] sm:$0xff]  ;;  %v8880_v50 = vld [vmem:[%s14838_s2 + $0x60] sm:$0xff] }
 0x38a   :  { %8306 = vrot.lane.b32.xlu1 %v12418_v2, %s9005_s29  ;;  %v5689_v45 = vadd.f32 %v5688_v62, %v5687_v10  ;;  %v12516_v38 = vrot.slane %v12508_v18, 2  ;;  %v15568_v62 = vld [vmem:[#allocation5_spill] sm:$0xff] }
 0x38c   :  { %v5691_v29 = vadd.f32 %v5690_v40, %v5689_v45  ;;  %v12528_v10 = vsel %vm1780_vm4, %v4365_v11, %v12516_v38 }
 0x38d   :  { %8301 = vrot.lane.b32.xlu0 %v12418_v2, %s8997_s0  ;;  %v12575_v49 = vpack.i.bf16 %v12516_v38, %v12528_v10 }
 0x38e   :  { %8311 = vrot.lane.b32.xlu1 %v12418_v2, %s8999_s27  ;;  %v5693_v30 = vadd.f32 %v5692_v23, %v5691_v29 }
 0x390   :  { %v5695_v32 = vadd.f32 %v5694_v55, %v5693_v30 }
 0x391   :  { %8316 = vrot.lane.b32.xlu0 %v12418_v2, %s9007_s11 }
 0x392   :  { %8321 = vrot.lane.b32.xlu1 %v12418_v2, %s9001_s12  ;;  %v5697_v31 = vadd.f32 %v5696_v54, %v5695_v32  ;;  %v8881_v32 = vld [vmem:[%s14838_s2 + $0x68] sm:$0xff] }
 0x394   :  { %v5699_v36 = vadd.f32 %v5698_v48, %v5697_v31 }
 0x395   :  { %8326 = vrot.lane.b32.xlu0 %v12418_v2, %s9008_s18 }
 0x396   :  { %8336 = vrot.lane.b32.xlu1 %v12418_v2, %s9004_s25  ;;  %v5701_v43 = vadd.f32 %v5700_v27, %v5699_v36  ;;  %v8882_v27 = vld [vmem:[%s14838_s2 + $0xd0] sm:$0xff] }
 0x398   :  { %v5704_v59 = vadd.f32 %v5703_v7, %v5701_v43  ;;  %v8883_v7 = vld [vmem:[%s14838_s2 + $0xd8] sm:$0xff] }
 0x399   :  { %8331 = vrot.lane.b32.xlu0 %v12418_v2, %s9009_s8 }
 0x39a   :  { %8341 = vrot.lane.b32.xlu1 %v12418_v2, %s9000_s30  ;;  %v5705_v61 = vrot.slane %v5704_v59, 4 }
 0x39c   :  { %v5706_v35 = vadd.f32 %v5705_v61, %v5704_v59 }
 0x39d   :  { %8366 = vrot.lane.b32.xlu0 %v12134_v21, %s9004_s25  ;;  %s9010_s25 = smov 98  }
 0x39e   :  { %8346 = vrot.lane.b32.xlu1 %v12418_v2, %s8998_s1  ;;  %v5707_v44 = vrot.slane %v5706_v35, 2 }
 0x3a0   :  { %v5708_v56 = vadd.f32 %v5707_v44, %v5706_v35  ;;  %v8884_v35 = vld [vmem:[%s14838_s2 + $0x50] sm:$0xff]  ;;  %v8885_v44 = vld [vmem:[%s14838_s2 + $0x58] sm:$0xff] }
 0x3a1   :  { %8376 = vrot.lane.b32.xlu0 %v12264_v3, %s9008_s18 }
 0x3a2   :  { %8351 = vrot.lane.b32.xlu1 %v8350_v24, %s9000_s30  ;;  %v5709_v15 = vrot.slane %v5708_v56, 1 }
 0x3a4   :  { %v5710_v33 = vadd.f32 %v5709_v15, %v5708_v56  ;;  %v8886_v15 = vld [vmem:[%s14838_s2 + $0xc0] sm:$0xff] }
 0x3a5   :  { %8381 = vrot.lane.b32.xlu0 %v12264_v3, %s9009_s8 }
 0x3a6   :  { %8356 = vrot.lane.b32.xlu1 %v8355_v26, %s9007_s11  ;;  %v5711_v46 = vmax.f32 %v5710_v33, 1e-12 }
 0x3a8   :  { %8865 = vrsqrt.f32 %v5711_v46  ;;  %v8887_v46 = vld [vmem:[%s14838_s2 + $0xc8] sm:$0xff] }
 0x3a9   :  { %8386 = vrot.lane.b32.xlu0 %v12264_v3, %s9010_s25 }
 0x3aa   :  { %8361 = vrot.lane.b32.xlu1 %v8355_v26, %s9001_s12  ;;  %s9013_s12 = smov 16  }
 0x3ad   :  { %8391 = vrot.lane.b32.xlu0 %v12418_v2, %s9011_s9  ;;  %v12505_v2 = vpack.i.bf16 %v12322_v16, %v12212_v52  ;;  %v8435_v52 = vpack.i.bf16 %v12508_v18, %v12368_v41 }
 0x3ae   :  { %8371 = vrot.lane.b32.xlu1 %v12102_v53, %s9000_s30 }
 0x3b1   :  { %8401 = vrot.lane.b32.xlu0 %v12264_v3, %s9012_s10 }
 0x3b2   :  { %8396 = vrot.lane.b32.xlu1 %v12264_v3, %s8991_s23 }
 0x3b5   :  { %8406 = vrot.lane.b32.xlu0 %v12264_v3, %s9013_s12  ;;  %v8866_v1 = vpop.eup %8865 }
 0x3b6   :  { %8411 = vrot.lane.b32.xlu1 %v12505_v2, %s9013_s12  ;;  %v5713_v58 = vmul.f32 %v8866_v1, %v5421_v9  ;;  %v8888_v9 = vld [vmem:[%s14838_s2 + $0x40] sm:$0xff] }
 0x3b8   :  { %v12524_v22 = vrot.slane %v5713_v58, %v15568_v62  ;;  %v8889_v58 = vld [vmem:[%s14838_s2 + $0x48] sm:$0xff] }
 0x3b9   :  { %8421 = vrot.lane.b32.xlu0 %v8350_v24, %s9008_s18 }
 0x3ba   :  { %8416 = vrot.lane.b32.xlu1 %v12264_v3, %s9014_s16  ;;  %15569 = vst [vmem:[#allocation20_spill] sm:$0xff] %v12524_v22  ;;  %v5748_v40 = vmul.f32 %v8874_v8, %v12524_v22  ;;  %v5749_v45 = vmul.f32 %v8875_v39, %v12524_v22  ;;  %v5732_v23 = vmul.f32 %v8876_v20, %v12524_v22 }
 0x3bb   :  { %v5733_v29 = vmul.f32 %v8877_v28, %v12524_v22  ;;  %v5746_v55 = vmul.f32 %v8878_v4, %v12524_v22  ;;  %v5747_v30 = vmul.f32 %v8879_v14, %v12524_v22  ;;  %v5730_v54 = vmul.f32 %v8880_v50, %v12524_v22  ;;  %v8892_v14 = vld [vmem:[%s14838_s2 + $0x30] sm:$0xff] }
 0x3bc   :  { %v5731_v6 = vmul.f32 %v8881_v32, %v12524_v22  ;;  %v5827_v48 = vpack.c.bf16 %v5749_v45, %v5748_v40  ;;  %v5744_v36 = vmul.f32 %v8882_v27, %v12524_v22  ;;  %v5745_v11 = vmul.f32 %v8883_v7, %v12524_v22  ;;  %v8890_v40 = vld [vmem:[%s14838_s2 + $0xb0] sm:$0xff]  ;;  %v8891_v45 = vld [vmem:[%s14838_s2 + $0xb8] sm:$0xff]  ;;  %v8896_v7 = vld [vmem:[%s14838_s2 + $0x20] sm:$0xff] }
 0x3bd   :  { %8436 = vrot.lane.b32.xlu0 %v8435_v52, %s8991_s23  ;;  %v5819_v31 = vpack.c.bf16 %v5733_v29, %v5732_v23  ;;  %v5826_v43 = vpack.c.bf16 %v5747_v30, %v5746_v55  ;;  %v5729_v56 = vmul.f32 %v8885_v44, %v12524_v22  ;;  %v5742_v33 = vmul.f32 %v8886_v15, %v12524_v22 }
 0x3be   :  { %8426 = vrot.lane.b32.xlu1 %v8350_v24, %s9009_s8  ;;  %7386 = vmatprep.subr.bf16.mxu1 %v5827_v48  ;;  %v5818_v61 = vpack.c.bf16 %v5731_v6, %v5730_v54  ;;  %v5728_v24 = vmul.f32 %v8884_v35, %v12524_v22  ;;  %v5825_v26 = vpack.c.bf16 %v5745_v11, %v5744_v36  ;;  %v8894_v54 = vld [vmem:[%s14838_s2 + $0xa0] sm:$0xff]  ;;  %v8895_v6 = vld [vmem:[%s14838_s2 + $0xa8] sm:$0xff] }
 0x3bf   :  { %7387 = vmatpush3.bf16.msra.mxu1 %v5819_v31  ;;  %v5743_v63 = vmul.f32 %v8887_v46, %v12524_v22  ;;  %v5726_v1 = vmul.f32 %v8888_v9, %v12524_v22  ;;  %v5740_v39 = vmul.f32 %v8890_v40, %v12524_v22  ;;  %v5741_v20 = vmul.f32 %v8891_v45, %v12524_v22  ;;  %v8901_v9 = vld [vmem:[%s14838_s2 + $0x18] sm:$0xff]  ;;  %v8903_v40 = vld [vmem:[%s14838_s2 + $0x88] sm:$0xff] }
 0x3c0   :  { %7388 = vmatprep.subr.bf16.mxu1 %v5826_v43  ;;  %v5817_v60 = vpack.c.bf16 %v5729_v56, %v5728_v24  ;;  %v8450_v28 = vpack.i.bf16 %v12094_v51, %v12516_v38  ;;  %v12626_v29 = vpack.i.bf16 %v12528_v10, %v12472_v37  ;;  %v5724_v30 = vmul.f32 %v8892_v14, %v12524_v22  ;;  %v8897_v43 = vld [vmem:[%s14838_s2 + $0x28] sm:$0xff]  ;;  %v8898_v24 = vld [vmem:[%s14838_s2 + $0x90] sm:$0xff]  ;;  %v8899_v56 = vld [vmem:[%s14838_s2 + $0x98] sm:$0xff] }
 0x3c1   :  { %8441 = vrot.lane.b32.xlu0 %v8435_v52, %s8997_s0  ;;  %v5824_v8 = vpack.c.bf16 %v5743_v63, %v5742_v33  ;;  %v5823_v50 = vpack.c.bf16 %v5741_v20, %v5740_v39  ;;  %v5738_v32 = vmul.f32 %v8894_v54, %v12524_v22  ;;  %v5739_v48 = vmul.f32 %v8895_v6, %v12524_v22  ;;  %v8900_v63 = vld [vmem:[%s14838_s2 + $0x10] sm:$0xff]  ;;  %v8904_v14 = vld [vmem:[%s14838_s2] sm:$0xff] }
 0x3c2   :  { %8431 = vrot.lane.b32.xlu1 %v8435_v52, %s8998_s1  ;;  %v5727_v52 = vmul.f32 %v8889_v58, %v12524_v22  ;;  %15570 = vst [vmem:[#allocation21_spill] sm:$0xff] %v12626_v29  ;;  %v5722_v11 = vmul.f32 %v8896_v7, %v12524_v22  ;;  %v5736_v44 = vmul.f32 %v8898_v24, %v12524_v22  ;;  %v4943_v24 = vrot.slane %v12180_v57, 4 }
 0x3c3   :  { %v12578_v59 = vpop.permute.xlu0 %8161  ;;  %7389 = vmatpush3.bf16.msra.mxu1 %v5818_v61  ;;  %v12618_v23 = vpop.permute.xlu1 %8166  ;;  %v5723_v61 = vmul.f32 %v8897_v43, %v12524_v22  ;;  %v5822_v35 = vpack.c.bf16 %v5739_v48, %v5738_v32  ;;  %v5735_v39 = vmul.f32 %v8903_v40, %v12524_v22  ;;  %v8490_v20 = vpack.i.bf16 %v12168_v42, %v12305_v34 }
 0x3c4   :  { %7390 = vmatprep.subr.bf16.mxu1 %v5825_v26  ;;  %v5816_v55 = vpack.c.bf16 %v5727_v52, %v5726_v1  ;;  %v5737_v26 = vmul.f32 %v8899_v56, %v12524_v22  ;;  %v5721_v1 = vmul.f32 %v8901_v9, %v12524_v22  ;;  %v8902_v52 = vld [vmem:[%s14838_s2 + $0x80] sm:$0xff]  ;;  %v4673_v56 = vrot.slane %v12094_v51, 2 }
 0x3c5   :  { %8461 = vrot.lane.b32.xlu0 %v12575_v49, %s9000_s30  ;;  %v5814_v46 = vpack.c.bf16 %v5723_v61, %v5722_v11  ;;  %s9022_s30 = smov 64  }
 0x3c6   :  { %8446 = vrot.lane.b32.xlu1 %v12359_v47, %s9015_s14  ;;  %v5821_v58 = vpack.c.bf16 %v5737_v26, %v5736_v44  ;;  %v4945_v44 = vrot.slane %v12190_v12, 4  ;;  %v14965_v12 = vrot.slane %v12368_v41, 4 }
 0x3c7   :  { %v12600_v17 = vpop.permute.xlu0 %8176  ;;  %7391 = vmatpush3.bf16.msra.mxu1 %v5817_v60  ;;  %v5720_v60 = vmul.f32 %v8900_v63, %v12524_v22  ;;  %v4671_v63 = vrot.slane %v12091_v5, 2 }
 0x3c8   :  { %7392 = vmatprep.subr.bf16.mxu1 %v5824_v8  ;;  %v5734_v8 = vmul.f32 %v8902_v52, %v12524_v22  ;;  %v12762_v9 = vsel %vm4941_vm12, %v4943_v24, %v4945_v44 }
 0x3c9   :  { %8466 = vrot.lane.b32.xlu0 %v12505_v2, %s9014_s16  ;;  %v8893_v2 = vld [vmem:[%s14838_s2 + $0x38] sm:$0xff]  ;;  %v12768_v52 = vsel %vm1780_vm4, %v4671_v63, %v4673_v56 }
 0x3ca   :  { %8451 = vrot.lane.b32.xlu1 %v8450_v28, %s9005_s29  ;;  %v5725_v38 = vmul.f32 %v8893_v2, %v12524_v22  ;;  %v5820_v42 = vpack.c.bf16 %v5735_v39, %v5734_v8  ;;  %15572 = vst [vmem:[#allocation22_spill] sm:$0xff] %v12768_v52 }
 0x3cb   :  { %v12629_v4 = vpop.permute.xlu0 %8201  ;;  %7393 = vmatpush3.bf16.msra.mxu1 %v5816_v55  ;;  %v5813_v55 = vpack.c.bf16 %v5721_v1, %v5720_v60 }
 0x3cc   :  { %v12647_v31 = vpop.permute.xlu1 %8171  ;;  %v5815_v36 = vpack.c.bf16 %v5725_v38, %v5724_v30  ;;  %7394 = vmatprep.subr.bf16.mxu1 %v5823_v50  ;;  %v5718_v30 = vmul.f32 %v8904_v14, %v12524_v22 }
 0x3cd   :  { %8471 = vrot.lane.b32.xlu0 %v12626_v29, %s9002_s15 }
 0x3ce   :  { %8456 = vrot.lane.b32.xlu1 %v8450_v28, %s8999_s27 }
 0x3cf   :  { %v12652_v27 = vpop.permute.xlu0 %8206  ;;  %7395 = vmatpush3.bf16.msra.mxu1 %v5815_v36 }
 0x3d0   :  { %v12670_v15 = vpop.permute.xlu1 %8181  ;;  %7396 = vmatprep.subr.bf16.mxu1 %v5822_v35 }
 0x3d1   :  { %8476 = vrot.lane.b32.xlu0 %v12626_v29, %s9003_s20  ;;  %s9023_s20 = smov 112  }
 0x3d2   :  { %8486 = vrot.lane.b32.xlu1 %v12196_v13, %s9009_s8 }
 0x3d3   :  { %v12676_v33 = vpop.permute.xlu0 %8231  ;;  %7397 = vmatpush3.bf16.msra.mxu1 %v5814_v46  ;;  %v4670_v46 = vrot.slane %v12109_v25, 2 }
 0x3d4   :  { %v12694_v45 = vpop.permute.xlu1 %8186  ;;  %7398 = vmatprep.subr.bf16.mxu1 %v5821_v58 }
 0x3d5   :  { %8481 = vrot.lane.b32.xlu0 %v12196_v13, %s9008_s18  ;;  %v8905_v13 = vld [vmem:[%s14838_s2 + $0x8] sm:$0xff] }
 0x3d6   :  { %8496 = vrot.lane.b32.xlu1 %v12626_v29, %s9005_s29  ;;  %v5719_v2 = vmul.f32 %v8905_v13, %v12524_v22  ;;  %s9016_s29 = smov 74   ;;  %v8173_v13 = vunpack.i.l.bf16 %v12647_v31 }
 0x3d7   :  { %v12702_v28 = vpop.permute.xlu0 %8241  ;;  %7399 = vmatpush3.bf16.msra.mxu1 %v5813_v55 }
 0x3d8   :  { %v12712_v38 = vpop.permute.xlu1 %8191  ;;  %v5812_v54 = vpack.c.bf16 %v5719_v2, %v5718_v30  ;;  %7400 = vmatprep.subr.bf16.mxu1 %v5820_v42  ;;  %v12777_v30 = vsel %vm1780_vm4, %v4670_v46, %v4671_v63  ;;  %v8906_v46 = vld [vmem:[%s14838_s2 + $0x1f0] sm:$0xff] }
 0x3d9   :  { %8491 = vrot.lane.b32.xlu0 %v8490_v20, %s9013_s12  ;;  %15573 = vst [vmem:[#allocation23_spill] sm:$0xff] %v12777_v30  ;;  %v12786_v42 = vpack.i.bf16 %v12768_v52, %v12777_v30  ;;  %v14974_v14 = vunpack.i.h.bf16 %v12712_v38  ;;  %s8968_s12 = scalar_lea.vmem %s6857_s13, 32 }
 0x3da   :  { %8501 = vrot.lane.b32.xlu1 %v12626_v29, %s8999_s27  ;;  %s9017_s27 = smov 68   ;;  %p8969_p0 = scmp.ne.s32.totalorder %s6857_s13, %s8968_s12 }
 0x3db   :  { %v12717_v50 = vpop.permute.xlu0 %8246  ;;  %7401 = vmatpush3.bf16.msra.mxu1 %v5812_v54  ;;  %15574 = vst [vmem:[#allocation24_spill] sm:$0xff] %v12786_v42  ;;  %v14973_v42 = vunpack.i.l.bf16 %v12712_v38  ;;  %p8974_p2 = scmp.lt.s32.totalorder %s8968_s12, %s8968_s12 }
 0x3dc   :  { %v12719_v32 = vpop.permute.xlu1 %8196 }
 0x3dd   :  { %8506 = vrot.lane.b32.xlu0 %v12626_v29, %s9016_s29  ;;  %p8975_p3 = por %p8974_p2, %p8973_p1 }
 0x3de   :  { %8516 = vrot.lane.b32.xlu1 %v12575_v49, %s9009_s8 }
 0x3df   :  { %v12725_v6 = vpop.permute.xlu0 %8251  ;;  %p8976_p4 = pnand %p8975_p3, %p8969_p0 }
 0x3e0   :  { %v12727_v48 = vpop.permute.xlu1 %8211  ;;  %v8254_v63 = vunpack.i.h.bf16 %v12725_v6 }
 0x3e1   :  { %8511 = vrot.lane.b32.xlu0 %v12575_v49, %s9008_s18  ;;  %v4942_v49 = vrot.slane %v12185_v19, 4 }
 0x3e3   :  { %v12731_v36 = vpop.permute.xlu0 %8266 }
 0x3e4   :  { %15571 = vst [vmem:[#allocation63_spill] sm:$0xff] %v12731_v36  ;;  %v12733_v7 = vpop.permute.xlu1 %8216 }
 0x3e5   :  { %8531 = vrot.lane.b32.xlu0 %v8490_v20, %s9014_s16  ;;  %v5118_v20 = vrot.slane %v12251_v0, 4 }
 0x3e7   :  { %v12736_v11 = vpop.permute.xlu0 %8271  ;;  %v12791_v54 = vsel %vm4941_vm12, %v5118_v20, %v14965_v12 }
 0x3e8   :  { %v12738_v43 = vpop.permute.xlu1 %8221 }
 0x3e9   :  { %8541 = vrot.lane.b32.xlu0 %v12626_v29, %s9010_s25 }
 0x3eb   :  { %v12742_v61 = vpop.permute.xlu0 %8276 }
 0x3ec   :  { %v12744_v35 = vpop.permute.xlu1 %8226 }
 0x3ed   :  { %8551 = vrot.lane.b32.xlu0 %v12134_v21, %s9011_s9  ;;  %v12759_v21 = vsel %vm4941_vm12, %v4942_v49, %v4943_v24  ;;  %v8229_v1 = vunpack.i.h.bf16 %v12744_v35  ;;  %v5780_v24 = vmul.f32 %v8906_v46, %v12524_v22  ;;  %v8213_v46 = vunpack.i.l.bf16 %v12727_v48 }
 0x3ef   :  { %v8282_v26 = vpop.permute.xlu0 %8281 }
 0x3f0   :  { %v12754_v60 = vpop.permute.xlu1 %8236  ;;  %v8284_v8 = vunpack.i.h.bf16 %v8282_v26  ;;  %v8283_v40 = vunpack.i.l.bf16 %v8282_v26 }
 0x3f1   :  { %8561 = vrot.lane.b32.xlu0 %v12626_v29, %s9012_s10  ;;  %v8239_v58 = vunpack.i.h.bf16 %v12754_v60 }
 0x3f3   :  { %v8287_v39 = vpop.permute.xlu0 %8286  ;;  %v12772_v55 = vsel %vm4263_vm9, %v8229_v1, %v8239_v58  ;;  %v4402_v1 = vsel %vm4263_vm9, %v12180_v57, %v8284_v8  ;;  %v4401_v58 = vsel %vm4263_vm9, %v12185_v19, %v8283_v40  ;;  %v12814_v57 = vsel %vm4263_vm9, %v12094_v51, %v8173_v13 }
 0x3f4   :  { %v12780_v2 = vpop.permute.xlu1 %8256  ;;  %v8289_v49 = vunpack.i.h.bf16 %v8287_v39  ;;  %v8288_v56 = vunpack.i.l.bf16 %v8287_v39  ;;  %v8253_v19 = vunpack.i.l.bf16 %v12725_v6  ;;  %v8224_v8 = vunpack.i.h.bf16 %v12738_v43  ;;  %v8907_v6 = vld [vmem:[%s14838_s2 + $0x1f8] sm:$0xff] }
 0x3f5   :  { %8571 = vrot.lane.b32.xlu0 %v12264_v3, %s9017_s27  ;;  %v8258_v26 = vunpack.i.l.bf16 %v12780_v2  ;;  %v8214_v51 = vunpack.i.h.bf16 %v12727_v48  ;;  %v5781_v13 = vmul.f32 %v8907_v6, %v12524_v22  ;;  %v8249_v6 = vunpack.i.h.bf16 %v12717_v50 }
 0x3f6   :  { %v4405_v44 = vsel %vm4403_vm13, %v4402_v1, %v8253_v19  ;;  %v14975_v1 = vunpack.i.l.bf16 %v12719_v32 }
 0x3f7   :  { %v12804_v20 = vpop.permute.xlu0 %8291  ;;  %v4681_v12 = vsel %vm4263_vm9, %v12251_v0, %v8258_v26  ;;  %v8189_v26 = vunpack.i.h.bf16 %v12694_v45  ;;  %v4408_v30 = vsel %vm4406_vm14, %v4405_v44, %v8289_v49  ;;  %v5843_v52 = vpack.c.bf16 %v5781_v13, %v5780_v24 }
 0x3f8   :  { %15575 = vst [vmem:[#allocation25_spill] sm:$0xff] %v12804_v20  ;;  %v12818_v40 = vpop.permute.xlu1 %8261  ;;  %v12821_v0 = vsel %vm4403_vm13, %v4681_v12, %v8254_v63  ;;  %v8188_v12 = vunpack.i.l.bf16 %v12694_v45  ;;  %v4404_v63 = vsel %vm4403_vm13, %v4401_v58, %v8224_v8  ;;  %v8248_v45 = vunpack.i.l.bf16 %v12717_v50 }
 0x3f9   :  { %8576 = vrot.lane.b32.xlu0 %v12359_v47, %s9010_s25  ;;  %v4407_v62 = vsel %vm4406_vm14, %v4404_v63, %v8288_v56  ;;  %v12848_v56 = vsel %vm4263_vm9, %v12305_v34, %v8214_v51  ;;  %7426 = vmatprep.subr.bf16.mxu1 %v5843_v52  ;;  %v12852_v44 = vsel %vm4263_vm9, %v12322_v16, %v8213_v46  ;;  %v8909_v16 = vld [vmem:[%s14838_s2 + $0x178] sm:$0xff]  ;;  %v8223_v46 = vunpack.i.l.bf16 %v12738_v43  ;;  %v8910_v43 = vld [vmem:[%s14838_s2 + $0x1e0] sm:$0xff] }
 0x3fa   :  { %v4410_v58 = vsel %vm4409_vm15, %v4407_v62, %v8248_v45  ;;  %v4411_v19 = vsel %vm4409_vm15, %v4408_v30, %v8249_v6  ;;  %v5765_v62 = vmul.f32 %v8909_v16, %v12524_v22  ;;  %v5778_v51 = vmul.f32 %v8910_v43, %v12524_v22 }
 0x3fb   :  { %v8297_v39 = vpop.permute.xlu0 %8296 }
 0x3fc   :  { %v8307_v29 = vpop.permute.xlu1 %8306  ;;  %v8298_v63 = vunpack.i.l.bf16 %v8297_v39 }
 0x3fd   :  { %8586 = vrot.lane.b32.xlu0 %v12359_v47, %s8991_s23  ;;  %v8309_v49 = vunpack.i.h.bf16 %v8307_v29  ;;  %v8308_v24 = vunpack.i.l.bf16 %v8307_v29  ;;  %v8908_v29 = vld [vmem:[%s14838_s2 + $0x170] sm:$0xff] }
 0x3fe   :  { %v5764_v52 = vmul.f32 %v8908_v29, %v12524_v22 }
 0x3ff   :  { %v12857_v8 = vpop.permute.xlu0 %8301  ;;  %v4414_v13 = vsel %vm4412_vm1, %v8249_v6, %v8309_v49  ;;  %v4413_v34 = vsel %vm4412_vm1, %v8248_v45, %v8308_v24  ;;  %v15576_v45 = vpack.i.bf16 %v12762_v9, %v12759_v21  ;;  %v5303_v49 = vpack.c.bf16 %v4411_v19, %v4410_v58  ;;  %v8911_v21 = vld [vmem:[%s14838_s2 + $0x1e8] sm:$0xff] }
 0x400   :  { %v8312_v6 = vpop.permute.xlu1 %8311  ;;  %v8299_v24 = vunpack.i.h.bf16 %v8297_v39  ;;  %v4416_v48 = vsel %vm4415_vm2, %v4413_v34, %v8188_v12  ;;  %v4417_v16 = vsel %vm4415_vm2, %v4414_v13, %v8189_v26  ;;  %v5779_v9 = vmul.f32 %v8911_v21, %v12524_v22  ;;  %v8915_v21 = vld [vmem:[%s14838_s2 + $0x1d8] sm:$0xff] }
 0x401   :  { %8596 = vrot.lane.b32.xlu0 %v15576_v45, %s9015_s14  ;;  %v8314_v29 = vunpack.i.h.bf16 %v8312_v6  ;;  %v8313_v50 = vunpack.i.l.bf16 %v8312_v6  ;;  %v14972_v39 = vunpack.i.l.bf16 %v12804_v20  ;;  %v5835_v58 = vpack.c.bf16 %v5765_v62, %v5764_v52  ;;  %v8913_v62 = vld [vmem:[%s14838_s2 + $0x168] sm:$0xff] }
 0x402   :  { %v4516_v19 = vsel %vm4263_vm9, %v12109_v25, %v8298_v63  ;;  %v8303_v13 = vunpack.i.l.bf16 %v12857_v8  ;;  %v8912_v25 = vld [vmem:[%s14838_s2 + $0x160] sm:$0xff]  ;;  %v5763_v63 = vmul.f32 %v8913_v62, %v12524_v22  ;;  %v5842_v43 = vpack.c.bf16 %v5779_v9, %v5778_v51 }
 0x403   :  { %v12878_v30 = vpop.permute.xlu0 %8316  ;;  %v4419_v12 = vsel %vm4418_vm3, %v4416_v48, %v8313_v50  ;;  %v4420_v26 = vsel %vm4418_vm3, %v4417_v16, %v8314_v29  ;;  %v4517_v48 = vsel %vm4263_vm9, %v12091_v5, %v8299_v24  ;;  %v5762_v52 = vmul.f32 %v8912_v25, %v12524_v22  ;;  %v8914_v5 = vld [vmem:[%s14838_s2 + $0x1d0] sm:$0xff] }
 0x404   :  { %v12894_v34 = vpop.permute.xlu1 %8321  ;;  %v4422_v6 = vsel %vm4421_vm6, %v4419_v12, %v14973_v42  ;;  %v4423_v45 = vsel %vm4421_vm6, %v4420_v26, %v14974_v14  ;;  %v8304_v29 = vunpack.i.h.bf16 %v12857_v8  ;;  %v5776_v24 = vmul.f32 %v8914_v5, %v12524_v22 }
 0x405   :  { %v5304_v50 = vpack.c.bf16 %v4423_v45, %v4422_v6  ;;  %v5777_v12 = vmul.f32 %v8915_v21, %v12524_v22  ;;  %v14971_v6 = vunpack.i.h.bf16 %v12804_v20  ;;  %v15577_v8 = vunpack.i.l.bf16 %v12600_v17 }
 0x406   :  { %v12931_v45 = vsel %vm4403_vm13, %v12814_v57, %v8223_v46  ;;  %v4689_v25 = vsel %vm4412_vm1, %v14972_v39, %v14975_v1  ;;  %v5834_v57 = vpack.c.bf16 %v5763_v63, %v5762_v52  ;;  %v8916_v46 = vld [vmem:[%s14838_s2 + $0x150] sm:$0xff]  ;;  %v8919_v63 = vld [vmem:[%s14838_s2 + $0x1c8] sm:$0xff] }
 0x407   :  { %v12913_v16 = vpop.permute.xlu0 %8326  ;;  %v4519_v51 = vsel %vm4403_vm13, %v4516_v19, %v15577_v8  ;;  %5908 = vmatprep.mubr.bf16.mxu1 %v5304_v50  ;;  %v15578_v50 = vunpack.i.h.bf16 %v12600_v17  ;;  %v5760_v8 = vmul.f32 %v8916_v46, %v12524_v22  ;;  %v8922_v1 = vld [vmem:[%s14838_s2 + $0x1b0] sm:$0xff] }
 0x408   :  { %v8328_v9 = vunpack.i.l.bf16 %v12913_v16  ;;  %v12939_v62 = vsel %vm4406_vm14, %v4519_v51, %v8303_v13  ;;  %v12941_v5 = vpop.permute.xlu1 %8336  ;;  %v8329_v19 = vunpack.i.h.bf16 %v12913_v16  ;;  %5909 = vmatmul.mubr.bf16.vlgmr.msra.gmra.mxu1 %v5303_v49  ;;  %v8917_v13 = vld [vmem:[%s14838_s2 + $0x158] sm:$0xff]  ;;  %v5775_v16 = vmul.f32 %v8919_v63, %v12524_v22  ;;  %v8920_v63 = vld [vmem:[%s14838_s2 + $0x140] sm:$0xff] }
 0x409   :  { %v4520_v21 = vsel %vm4403_vm13, %v4517_v48, %v15578_v50  ;;  %7427 = vmatpush3.bf16.msra.mxu1 %v5835_v58  ;;  %v5761_v51 = vmul.f32 %v8917_v13, %v12524_v22  ;;  %v5841_v48 = vpack.c.bf16 %v5777_v12, %v5776_v24  ;;  %v8918_v58 = vld [vmem:[%s14838_s2 + $0x1c0] sm:$0xff]  ;;  %v15579_v50 = vunpack.i.h.bf16 %v12719_v32 }
 0x40a   :  { %v12956_v49 = vsel %vm4406_vm14, %v4520_v21, %v8304_v29  ;;  %7428 = vmatprep.subr.bf16.mxu1 %v5842_v43  ;;  %v5774_v52 = vmul.f32 %v8918_v58, %v12524_v22  ;;  %v15580_v43 = vunpack.i.l.bf16 %v12731_v36  ;;  %v4691_v12 = vsel %vm4415_vm2, %v4689_v25, %v8328_v9 }
 0x40b   :  { %v8332_v17 = vpop.permute.xlu0 %8331  ;;  %v4690_v29 = vsel %vm4412_vm1, %v14971_v6, %v15579_v50  ;;  %v5758_v50 = vmul.f32 %v8920_v63, %v12524_v22  ;;  %v15583_v6 = vunpack.i.h.bf16 %v12731_v36  ;;  %v5833_v42 = vpack.c.bf16 %v5761_v51, %v5760_v8 }
 0x40c   :  { %v12975_v24 = vsel %vm4409_vm15, %v12939_v62, %v15580_v43  ;;  %v12978_v21 = vunpack.i.l.bf16 %v8332_v17  ;;  %v4692_v46 = vsel %vm4415_vm2, %v4690_v29, %v8329_v19  ;;  %v12981_v13 = vpop.permute.xlu1 %8341  ;;  %v12983_v58 = vunpack.i.h.bf16 %v8332_v17  ;;  %v8921_v43 = vld [vmem:[%s14838_s2 + $0x148] sm:$0xff]  ;;  %v8923_v17 = vld [vmem:[%s14838_s2 + $0x1b8] sm:$0xff] }
 0x40d   :  { %v5759_v25 = vmul.f32 %v8921_v43, %v12524_v22  ;;  %v12997_v29 = vsel %vm4409_vm15, %v12956_v49, %v15583_v6  ;;  %v14980_v39 = vunpack.i.l.bf16 %v12981_v13  ;;  %7429 = vmatpush3.bf16.msra.mxu1 %v5834_v57  ;;  %v15584_v63 = vunpack.i.l.bf16 %v12629_v4 }
 0x40e   :  { %15581 = vst [vmem:[#allocation26_spill] sm:$0xff] %v12978_v21  ;;  %15582 = vst [vmem:[#allocation65_spill] sm:$0xff] %v12983_v58  ;;  %7430 = vmatprep.subr.bf16.mxu1 %v5841_v48  ;;  %v5840_v43 = vpack.c.bf16 %v5775_v16, %v5774_v52  ;;  %v5772_v6 = vmul.f32 %v8922_v1, %v12524_v22  ;;  %v5773_v57 = vmul.f32 %v8923_v17, %v12524_v22 }
 0x40f   :  { %v13001_v14 = vpop.permute.xlu0 %8366  ;;  %v4693_v26 = vsel %vm4418_vm3, %v4691_v12, %v15584_v63  ;;  %v15585_v8 = vunpack.i.l.bf16 %v12719_v32  ;;  %v15586_v48 = vunpack.i.h.bf16 %v12719_v32  ;;  %v15587_v52 = vunpack.i.h.bf16 %v12981_v13 }
 0x410   :  { %v15588_v1 = vunpack.i.h.bf16 %v12629_v4  ;;  %v4695_v63 = vsel %vm4421_vm6, %v4693_v26, %v12978_v21  ;;  %v8347_v47 = vpop.permute.xlu1 %8346  ;;  %v5832_v32 = vpack.c.bf16 %v5759_v25, %v5758_v50  ;;  %v14986_v26 = vunpack.i.h.bf16 %v12941_v5 }
 0x411   :  { %v5019_v51 = vsel %vm4412_vm1, %v14980_v39, %v15585_v8  ;;  %v5020_v16 = vsel %vm4412_vm1, %v15587_v52, %v15586_v48  ;;  %v15589_v39 = vunpack.i.l.bf16 %v12629_v4  ;;  %v8348_v20 = vunpack.i.l.bf16 %v8347_v47  ;;  %7431 = vmatpush3.bf16.msra.mxu1 %v5833_v42 }
 0x412   :  { %v4694_v12 = vsel %vm4418_vm3, %v4692_v46, %v15588_v1  ;;  %v5022_v17 = vsel %vm4415_vm2, %v5019_v51, %v8328_v9  ;;  %v5023_v36 = vsel %vm4415_vm2, %v5020_v16, %v8329_v19  ;;  %v15590_v52 = vmov %v15588_v1  ;;  %7432 = vmatprep.subr.bf16.mxu1 %v5840_v43 }
 0x413   :  { %v4696_v8 = vsel %vm4421_vm6, %v4694_v12, %v12983_v58  ;;  %v5025_v48 = vsel %vm4418_vm3, %v5022_v17, %v15589_v39  ;;  %v5026_v46 = vsel %vm4418_vm3, %v5023_v36, %v15590_v52  ;;  %v8349_v1 = vunpack.i.h.bf16 %v8347_v47  ;;  %v13046_v50 = vpop.permute.xlu0 %8376 }
 0x414   :  { %v5028_v9 = vsel %vm4421_vm6, %v5025_v48, %v12978_v21  ;;  %v13044_v19 = vsel %vm4421_vm6, %v5026_v46, %v12983_v58  ;;  %v5839_v39 = vpack.c.bf16 %v5773_v57, %v5772_v6  ;;  %v4955_v47 = vsel %vm4403_vm13, %v12852_v44, %v8348_v20  ;;  %v13060_v57 = vpop.permute.xlu1 %8351 }
 0x415   :  { %15591 = vst [vmem:[#allocation27_spill] sm:$0xff] %v13044_v19  ;;  %v5040_v25 = vrot.slane %v5028_v9, 4  ;;  %v14983_v4 = vrot.slane %v13044_v19, 4  ;;  %v4956_v36 = vsel %vm4403_vm13, %v12848_v56, %v8349_v1  ;;  %v14985_v42 = vunpack.i.l.bf16 %v12941_v5  ;;  %7433 = vmatpush3.bf16.msra.mxu1 %v5832_v32 }
 0x416   :  { %v15592_v51 = vunpack.i.l.bf16 %v12733_v7  ;;  %v15593_v12 = vunpack.i.h.bf16 %v12733_v7  ;;  %v5310_v6 = vpack.c.bf16 %v4696_v8, %v4695_v63  ;;  %v4546_v17 = vrot.slane %v12975_v24, 2  ;;  %7434 = vmatprep.subr.bf16.mxu1 %v5839_v39 }
 0x417   :  { %v4547_v20 = vrot.slane %v12997_v29, 2  ;;  %v14984_v44 = vunpack.i.l.bf16 %v13060_v57  ;;  %v15594_v56 = vrot.slane %v12508_v18, 4  ;;  %v15595_v48 = vrot.slane %v12368_v41, 4  ;;  %v13076_v8 = vpop.permute.xlu0 %8381 }
 0x418   :  { %v4957_v16 = vsel %vm4406_vm14, %v4955_v47, %v15592_v51  ;;  %v4958_v43 = vsel %vm4406_vm14, %v4956_v36, %v15593_v12  ;;  %5916 = vmatprep.mubr.bf16.mxu1 %v5310_v6  ;;  %v15596_v7 = vunpack.i.l.bf16 %v12670_v15  ;;  %v13091_v32 = vsel %vm4941_vm12, %v5040_v25, %v14983_v4  ;;  %v13096_v1 = vpop.permute.xlu1 %8356  ;;  %v8924_v12 = vld [vmem:[%s14838_s2 + $0x130] sm:$0xff]  ;;  %v8925_v6 = vld [vmem:[%s14838_s2 + $0x138] sm:$0xff]  ;;  %v8929_v47 = vld [vmem:[%s14838_s2 + $0x128] sm:$0xff] }
 0x419   :  { %v13070_v52 = vsel %vm4941_vm12, %v15595_v48, %v15594_v56  ;;  %v13081_v24 = vsel %vm4409_vm15, %v4957_v16, %v14985_v42  ;;  %v13086_v29 = vsel %vm4409_vm15, %v4958_v43, %v14986_v26  ;;  %15597 = vst [vmem:[#allocation28_spill] sm:$0xff] %v13091_v32  ;;  %v4548_v25 = vsel %vm1780_vm4, %v4546_v17, %v4547_v20  ;;  %v8926_v17 = vld [vmem:[%s14838_s2 + $0x1a0] sm:$0xff]  ;;  %v8930_v42 = vld [vmem:[%s14838_s2 + $0x190] sm:$0xff] }
 0x41a   :  { %v4524_v63 = vsel %vm4406_vm14, %v12931_v45, %v15596_v7  ;;  %v5756_v43 = vmul.f32 %v8924_v12, %v12524_v22  ;;  %v5757_v56 = vmul.f32 %v8925_v6, %v12524_v22  ;;  %v5770_v48 = vmul.f32 %v8926_v17, %v12524_v22  ;;  %v8927_v6 = vld [vmem:[%s14838_s2 + $0x1a8] sm:$0xff]  ;;  %v8928_v17 = vld [vmem:[%s14838_s2 + $0x120] sm:$0xff] }
 0x41b   :  { %v4527_v45 = vsel %vm4409_vm15, %v4524_v63, %v14984_v44  ;;  %v13105_v16 = vpop.permute.xlu0 %8386  ;;  %v5771_v4 = vmul.f32 %v8927_v6, %v12524_v22  ;;  %v5754_v9 = vmul.f32 %v8928_v17, %v12524_v22  ;;  %v8234_v6 = vunpack.i.h.bf16 %v12676_v33 }
 0x41c   :  { %v4555_v46 = vrot.slane %v4527_v45, 2  ;;  %v5831_v12 = vpack.c.bf16 %v5757_v56, %v5756_v43  ;;  %v8931_v43 = vld [vmem:[%s14838_s2 + $0x198] sm:$0xff] }
 0x41d   :  { %v5838_v17 = vpack.c.bf16 %v5771_v4, %v5770_v48  ;;  %v5769_v26 = vmul.f32 %v8931_v43, %v12524_v22  ;;  %v8233_v48 = vunpack.i.l.bf16 %v12676_v33 }
 0x41e   :  { %v4556_v39 = vsel %vm1780_vm4, %v4547_v20, %v4555_v46  ;;  %v13123_v46 = vpop.permute.xlu1 %8361  ;;  %7435 = vmatpush3.bf16.msra.mxu1 %v5831_v12 }
 0x41f   :  { %v8520_v45 = vpack.i.bf16 %v4556_v39, %v4548_v25  ;;  %v5755_v25 = vmul.f32 %v8929_v47, %v12524_v22  ;;  %v8392_v44 = vpop.permute.xlu0 %8391  ;;  %v5768_v47 = vmul.f32 %v8930_v42, %v12524_v22  ;;  %7436 = vmatprep.subr.bf16.mxu1 %v5838_v17  ;;  %v15598_v39 = vunpack.i.h.bf16 %v12712_v38 }
 0x420   :  { %v8394_v56 = vunpack.i.h.bf16 %v8392_v44  ;;  %v8393_v20 = vunpack.i.l.bf16 %v8392_v44  ;;  %v8934_v44 = vld [vmem:[%s14838_s2 + $0x180] sm:$0xff]  ;;  %v15599_v17 = vunpack.i.l.bf16 %v12712_v38  ;;  %v8937_v38 = vld [vmem:[%s14838_s2 + $0x108] sm:$0xff] }
 0x421   :  { %8521 = vrot.lane.b32.xlu1 %v8520_v45, %s9018_s19  ;;  %v5830_v7 = vpack.c.bf16 %v5755_v25, %v5754_v9  ;;  %v8932_v45 = vld [vmem:[%s14838_s2 + $0x110] sm:$0xff]  ;;  %v8933_v9 = vld [vmem:[%s14838_s2 + $0x118] sm:$0xff]  ;;  %v5837_v25 = vpack.c.bf16 %v5769_v26, %v5768_v47  ;;  %v5766_v43 = vmul.f32 %v8934_v44, %v12524_v22 }
 0x422   :  { %v5752_v4 = vmul.f32 %v8932_v45, %v12524_v22  ;;  %v5753_v42 = vmul.f32 %v8933_v9, %v12524_v22  ;;  %v13159_v12 = vpop.permute.xlu1 %8371  ;;  %v8935_v45 = vld [vmem:[%s14838_s2 + $0x188] sm:$0xff]  ;;  %v8228_v9 = vunpack.i.l.bf16 %v12744_v35  ;;  %v4426_v26 = vsel %vm4424_vm7, %v15598_v39, %v8394_v56  ;;  %v8936_v35 = vld [vmem:[%s14838_s2 + $0x100] sm:$0xff] }
 0x423   :  { %v5767_v51 = vmul.f32 %v8935_v45, %v12524_v22  ;;  %v4425_v47 = vsel %vm4424_vm7, %v15599_v17, %v8393_v20  ;;  %v8402_v63 = vpop.permute.xlu0 %8401  ;;  %7437 = vmatpush3.bf16.msra.mxu1 %v5830_v7  ;;  %v5750_v33 = vmul.f32 %v8936_v35, %v12524_v22  ;;  %v5751_v20 = vmul.f32 %v8937_v38, %v12524_v22 }
 0x424   :  { %v5829_v45 = vpack.c.bf16 %v5753_v42, %v5752_v4  ;;  %v8244_v39 = vunpack.i.h.bf16 %v12702_v28  ;;  %v8404_v56 = vunpack.i.h.bf16 %v8402_v63  ;;  %v8403_v17 = vunpack.i.l.bf16 %v8402_v63  ;;  %7438 = vmatprep.subr.bf16.mxu1 %v5837_v25 }
 0x425   :  { %8526 = vrot.lane.b32.xlu1 %v12102_v53, %s9008_s18  ;;  %v5836_v44 = vpack.c.bf16 %v5767_v51, %v5766_v43  ;;  %v8274_v4 = vunpack.i.h.bf16 %v12736_v11  ;;  %v5237_v42 = vsel %vm4403_vm13, %v12772_v55, %v8234_v6  ;;  %v8318_v35 = vunpack.i.l.bf16 %v12878_v30 }
 0x426   :  { %v8397_v36 = vpop.permute.xlu1 %8396  ;;  %v13195_v32 = vsel %vm4427_vm8, %v4425_v47, %v8403_v17  ;;  %v13198_v38 = vsel %vm4427_vm8, %v4426_v26, %v8404_v56  ;;  %v15600_v51 = vunpack.i.h.bf16 %v12578_v59  ;;  %v15601_v55 = vunpack.i.l.bf16 %v13105_v16 }
 0x427   :  { %v8399_v22 = vunpack.i.h.bf16 %v8397_v36  ;;  %v8398_v63 = vunpack.i.l.bf16 %v8397_v36  ;;  %v15602_v43 = vunpack.i.h.bf16 %v13105_v16  ;;  %v13213_v47 = vpop.permute.xlu0 %8406  ;;  %7439 = vmatpush3.bf16.msra.mxu1 %v5829_v45  ;;  %v5828_v36 = vpack.c.bf16 %v5751_v20, %v5750_v33 }
 0x428   :  { %v4794_v25 = vsel %vm4263_vm9, %v8228_v9, %v15600_v51  ;;  %v4436_v6 = vsel %vm49_vm0, %v15601_v55, %v12472_v37  ;;  %v8319_v56 = vunpack.i.h.bf16 %v12878_v30  ;;  %7440 = vmatprep.subr.bf16.mxu1 %v5836_v44  ;;  %v8273_v37 = vunpack.i.l.bf16 %v12736_v11 }
 0x429   :  { %8536 = vrot.lane.b32.xlu1 %v12102_v53, %s9009_s8  ;;  %v4437_v26 = vsel %vm49_vm0, %v15602_v43, %v12528_v10  ;;  %v5240_v53 = vsel %vm4406_vm14, %v5237_v42, %v8244_v39  ;;  %v13221_v17 = vsel %vm4276_vm10, %v4436_v6, %v8398_v63  ;;  %v8323_v10 = vunpack.i.l.bf16 %v12894_v34 }
 0x42a   :  { %v13218_v9 = vsel %vm4276_vm10, %v4437_v26, %v8399_v22  ;;  %v13226_v55 = vpop.permute.xlu1 %8411  ;;  %v8238_v33 = vunpack.i.l.bf16 %v12754_v60  ;;  %v8263_v45 = vunpack.i.l.bf16 %v12818_v40  ;;  %v15603_v30 = vunpack.i.h.bf16 %v12647_v31 }
 0x42b   :  { %v8414_v20 = vunpack.i.h.bf16 %v13226_v55  ;;  %v4797_v44 = vsel %vm4403_vm13, %v4794_v25, %v8233_v48  ;;  %v15604_v39 = vunpack.i.h.bf16 %v12652_v27  ;;  %v8259_v60 = vunpack.i.h.bf16 %v12780_v2  ;;  %v13244_v6 = vpop.permute.xlu0 %8421  ;;  %7441 = vmatpush3.bf16.msra.mxu1 %v5828_v36 }
 0x42c   :  { %v4792_v22 = vsel %vm4263_vm9, %v8318_v35, %v15603_v30  ;;  %v8324_v63 = vunpack.i.h.bf16 %v12894_v34  ;;  %v15605_v31 = vunpack.i.l.bf16 %v12578_v59  ;;  %v14992_v43 = vunpack.i.h.bf16 %v13001_v14 }
 0x42d   :  { %8546 = vrot.lane.b32.xlu1 %v12264_v3, %s9007_s11  ;;  %v13240_v42 = vsel %vm4409_vm15, %v5240_v53, %v15604_v39  ;;  %v14991_v48 = vunpack.i.l.bf16 %v13001_v14  ;;  %v15606_v25 = vmov %v15604_v39  ;;  %v14989_v53 = vmov 0  }
 0x42e   :  { %v4793_v35 = vsel %vm4263_vm9, %v8319_v56, %v15605_v31  ;;  %v13254_v26 = vsel %vm4412_vm1, %v15606_v25, %v8414_v20  ;;  %6006 = vmatprep.subr.bf16.mxu1 %v14989_v53  ;;  %v4795_v2 = vsel %vm4403_vm13, %v4792_v22, %v8323_v10  ;;  %v8354_v34 = vunpack.i.h.bf16 %v13060_v57  ;;  %v13265_v56 = vpop.permute.xlu1 %8416  ;;  %v15607_v10 = vld [vmem:[#allocation21_spill] sm:$0xff] }
 0x42f   :  { %v13260_v59 = vunpack.i.h.bf16 %v13076_v8  ;;  %v13263_v36 = vunpack.i.l.bf16 %v13076_v8  ;;  %v5013_v20 = vsel %vm4263_vm9, %v12508_v18, %v8238_v33  ;;  %v4685_v39 = vsel %vm4406_vm14, %v12821_v0, %v8263_v45  ;;  %v8437_v33 = vpop.permute.xlu0 %8436 }
 0x430   :  { %v15608_v22 = vunpack.i.h.bf16 %v12618_v23  ;;  %v4682_v8 = vsel %vm4263_vm9, %v12368_v41, %v8259_v60  ;;  %v4796_v25 = vsel %vm4403_vm13, %v4793_v35, %v8324_v63  ;;  %v15609_v53 = vunpack.i.l.bf16 %v12981_v13  ;;  %v15611_v35 = vld [vmem:[#allocation25_spill] sm:$0xff] }
 0x431   :  { %8556 = vrot.lane.b32.xlu1 %v15607_v10, %s8991_s23  ;;  %v8264_v45 = vunpack.i.h.bf16 %v12818_v40  ;;  %v13299_v41 = vsel %vm4409_vm15, %v12956_v49, %v14992_v43  ;;  %v15610_v60 = vunpack.i.h.bf16 %v12670_v15  ;;  %v15613_v15 = vunpack.i.h.bf16 %v12941_v5 }
 0x432   :  { %v13277_v31 = vsel %vm4406_vm14, %v4797_v44, %v15608_v22  ;;  %v13285_v18 = vsel %vm4409_vm15, %v4685_v39, %v15609_v53  ;;  %v13293_v44 = vsel %vm4409_vm15, %v12939_v62, %v14991_v48  ;;  %v15612_v53 = vunpack.i.l.bf16 %v15611_v35  ;;  %v13314_v0 = vpop.permute.xlu1 %8426 }
 0x433   :  { %v4798_v63 = vsel %vm4406_vm14, %v4795_v2, %v15610_v60  ;;  %v14998_v62 = vrot.slane %v13260_v59, 2  ;;  %v4552_v48 = vrot.slane %v13263_v36, 2  ;;  %v13321_v49 = vsel %vm4412_vm1, %v15613_v15, %v8274_v4 }
 0x434   :  { %v13307_v40 = vsel %vm4409_vm15, %v4685_v39, %v15612_v53  ;;  %v13310_v22 = vsel %vm4409_vm15, %v4798_v63, %v8354_v34  ;;  %v15614_v2 = vunpack.i.l.bf16 %v12941_v5  ;;  %v15615_v63 = vld [vmem:[#allocation24_spill] sm:$0xff]  ;;  %v15616_v53 = vunpack.i.l.bf16 %v12618_v23 }
 0x435   :  { %8566 = vrot.lane.b32.xlu1 %v15615_v63, %s9015_s14  ;;  %v8408_v5 = vunpack.i.l.bf16 %v13213_v47  ;;  %v8438_v15 = vunpack.i.l.bf16 %v8437_v33  ;;  %v4822_v30 = vrot.slane %v13310_v22, 2  ;;  %v8359_v51 = vunpack.i.h.bf16 %v13096_v1 }
 0x436   :  { %v13326_v39 = vsel %vm4412_vm1, %v15614_v2, %v8273_v37  ;;  %v4799_v43 = vsel %vm4406_vm14, %v4796_v25, %v15616_v53  ;;  %v8442_v37 = vpop.permute.xlu0 %8441  ;;  %v8439_v60 = vunpack.i.h.bf16 %v8437_v33  ;;  %v8358_v23 = vunpack.i.l.bf16 %v13096_v1  ;;  %v8432_v11 = vpop.permute.xlu1 %8431 }
 0x437   :  { %v8364_v25 = vunpack.i.h.bf16 %v13123_v46  ;;  %v8363_v53 = vunpack.i.l.bf16 %v13123_v46  ;;  %v13347_v4 = vsel %vm1780_vm4, %v4552_v48, %v14998_v62  ;;  %v8434_v22 = vunpack.i.h.bf16 %v8432_v11 }
 0x438   :  { %15617 = vst [vmem:[#allocation29_spill] sm:$0xff] %v13347_v4  ;;  %v8433_v19 = vunpack.i.l.bf16 %v8432_v11  ;;  %v4804_v33 = vsel %vm4412_vm1, %v8354_v34, %v8408_v5  ;;  %v8424_v46 = vunpack.i.h.bf16 %v13244_v6  ;;  %v5235_v21 = vsel %vm4263_vm9, %v8358_v23, %v8438_v15 }
 0x439   :  { %8581 = vrot.lane.b32.xlu1 %v12264_v3, %s9011_s9  ;;  %v5236_v48 = vsel %vm4263_vm9, %v8359_v51, %v8439_v60  ;;  %v8444_v62 = vunpack.i.h.bf16 %v8442_v37  ;;  %v5014_v7 = vsel %vm4403_vm13, %v5013_v20, %v8434_v22  ;;  %v8443_v2 = vunpack.i.l.bf16 %v8442_v37 }
 0x43a   :  { %v13357_v58 = vpop.permute.xlu0 %8461  ;;  %v4684_v11 = vsel %vm4403_vm13, %v4682_v8, %v8433_v19  ;;  %v15618_v3 = vunpack.i.l.bf16 %v12702_v28  ;;  %v8447_v4 = vpop.permute.xlu1 %8446  ;;  %v15619_v15 = vunpack.i.l.bf16 %v12652_v27  ;;  %v15620_v51 = vunpack.i.h.bf16 %v12981_v13  ;;  %v15621_v28 = vld [vmem:[#allocation19_spill] sm:$0xff] }
 0x43b   :  { %v4686_v34 = vsel %vm4406_vm14, %v4684_v11, %v8264_v45  ;;  %v14999_v5 = vunpack.i.h.bf16 %v13357_v58  ;;  %v8463_v19 = vunpack.i.l.bf16 %v13357_v58  ;;  %v8449_v8 = vunpack.i.h.bf16 %v8447_v4 }
 0x43c   :  { %v5015_v1 = vsel %vm4406_vm14, %v5014_v7, %v15618_v3  ;;  %v5017_v20 = vsel %vm4409_vm15, %v4686_v34, %v15620_v51  ;;  %v8428_v7 = vunpack.i.l.bf16 %v13314_v0  ;;  %v5238_v13 = vsel %vm4403_vm13, %v5235_v21, %v8363_v53 }
 0x43d   :  { %v5018_v23 = vsel %vm4409_vm15, %v5015_v1, %v15619_v15  ;;  %8591 = vrot.lane.b32.xlu1 %v15621_v28, %s9012_s10  ;;  %v5038_v60 = vrot.slane %v5017_v20, 4  ;;  %v4803_v37 = vsel %vm4409_vm15, %v13277_v31, %v14999_v5  ;;  %v5239_v1 = vsel %vm4403_vm13, %v5236_v48, %v8364_v25 }
 0x43e   :  { %v5046_v45 = vrot.slane %v5018_v23, 4  ;;  %v13381_v22 = vpop.permute.xlu0 %8466  ;;  %v4802_v11 = vsel %vm4409_vm15, %v4799_v43, %v8463_v19  ;;  %v8448_v3 = vunpack.i.l.bf16 %v8447_v4  ;;  %v5242_v15 = vsel %vm4406_vm14, %v5239_v1, %v8444_v62  ;;  %v13393_v31 = vpop.permute.xlu1 %8451 }
 0x43f   :  { %v4831_v23 = vrot.slane %v4803_v37, 2  ;;  %v4823_v51 = vrot.slane %v4802_v11, 2  ;;  %v13391_v20 = vsel %vm4440_vm11, %v13218_v9, %v8449_v8  ;;  %v5241_v5 = vsel %vm4406_vm14, %v5238_v13, %v8443_v2 }
 0x440   :  { %v13398_v21 = vsel %vm4440_vm11, %v13221_v17, %v8448_v3  ;;  %v8453_v25 = vunpack.i.l.bf16 %v13393_v31  ;;  %v15622_v43 = vunpack.i.h.bf16 %v15611_v35  ;;  %v15623_v4 = vrot.slane %v13285_v18, 4 }
 0x441   :  { %8601 = vrot.lane.b32.xlu1 %v15615_v63, %s9016_s29  ;;  %v5047_v2 = vsel %vm4941_vm12, %v5038_v60, %v5046_v45  ;;  %v4824_v17 = vsel %vm1780_vm4, %v4822_v30, %v4823_v51  ;;  %v4807_v8 = vsel %vm4415_vm2, %v4804_v33, %v8424_v46  ;;  %v8418_v35 = vunpack.i.l.bf16 %v13265_v56 }
 0x442   :  { %v4688_v62 = vsel %vm4409_vm15, %v4686_v34, %v15622_v43  ;;  %v5039_v53 = vsel %vm4941_vm12, %v15623_v4, %v5038_v60  ;;  %v8472_v48 = vpop.permute.xlu0 %8471  ;;  %v8429_v13 = vunpack.i.h.bf16 %v13314_v0  ;;  %v13417_v1 = vpop.permute.xlu1 %8456  ;;  %v4832_v45 = vsel %vm1780_vm4, %v4823_v51, %v4831_v23 }
 0x443   :  { %v5309_v9 = vpack.c.bf16 %v4688_v62, %v13307_v40  ;;  %v8605_v37 = vpack.i.bf16 %v5047_v2, %v5039_v53  ;;  %v8474_v34 = vunpack.i.h.bf16 %v8472_v48  ;;  %v4559_v40 = vrot.slane %v8428_v7, 2 }
 0x444   :  { %v8473_v18 = vunpack.i.l.bf16 %v8472_v48  ;;  %v15624_v60 = vunpack.i.l.bf16 %v13159_v12  ;;  %v15625_v33 = vunpack.i.h.bf16 %v13159_v12  ;;  %v8610_v3 = vpack.i.bf16 %v4832_v45, %v4824_v17 }
 0x445   :  { %5917 = vmatmul.mubr.bf16.gmra.mxu1 %v5309_v9  ;;  %8606 = vrot.lane.b32.xlu0 %v8605_v37, %s9018_s19  ;;  %v4964_v11 = vsel %vm4415_vm2, %v13321_v49, %v8474_v34  ;;  %v15626_v43 = vunpack.i.l.bf16 %v13060_v57  ;;  %v8458_v51 = vunpack.i.l.bf16 %v13417_v1  ;;  %v15627_v9 = vunpack.i.h.bf16 %v12742_v61 }
 0x446   :  { %v5244_v30 = vsel %vm4409_vm15, %v5241_v5, %v15624_v60  ;;  %v5245_v46 = vsel %vm4409_vm15, %v5242_v15, %v15625_v33  ;;  %v4963_v23 = vsel %vm4415_vm2, %v13326_v39, %v8473_v18  ;;  %v13435_v5 = vpop.permute.xlu0 %8476  ;;  %v8423_v4 = vunpack.i.l.bf16 %v13244_v6  ;;  %8611 = vrot.lane.b32.xlu1 %v8610_v3, %s9018_s19  ;;  %v13449_v37 = vpop.permute.xlu1 %8486 }
 0x447   :  { %v4530_v62 = vsel %vm4412_vm1, %v15626_v43, %v8453_v25  ;;  %v4966_v15 = vsel %vm4418_vm3, %v4964_v11, %v15627_v9  ;;  %v8479_v49 = vunpack.i.h.bf16 %v13435_v5  ;;  %v8478_v57 = vunpack.i.l.bf16 %v13435_v5 }
 0x448   :  { %v15628_v25 = vunpack.i.l.bf16 %v12742_v61  ;;  %v8413_v53 = vunpack.i.l.bf16 %v13226_v55  ;;  %v4810_v2 = vsel %vm4418_vm3, %v4807_v8, %v8418_v35  ;;  %v5265_v48 = vrot.slane %v5244_v30, 4 }
 0x449   :  { %v5273_v17 = vrot.slane %v5245_v46, 4  ;;  %v8419_v6 = vunpack.i.h.bf16 %v13265_v56  ;;  %v13455_v34 = vsel %vm4421_vm6, %v4810_v2, %v8429_v13  ;;  %v4533_v18 = vsel %vm4415_vm2, %v4530_v62, %v8423_v4  ;;  %8621 = vrot.lane.b32.xlu0 %v15621_v28, %s9007_s11 }
 0x44a   :  { %v4965_v39 = vsel %vm4418_vm3, %v4963_v23, %v15628_v25  ;;  %v15629_v55 = vrot.slane %v13260_v59, 2  ;;  %v8454_v35 = vunpack.i.h.bf16 %v13393_v31  ;;  %v4536_v45 = vsel %vm4418_vm3, %v4533_v18, %v8458_v51  ;;  %v8482_v60 = vpop.permute.xlu0 %8481  ;;  %8616 = vrot.lane.b32.xlu1 %v15615_v63, %s9010_s25  ;;  %v8497_v43 = vpop.permute.xlu1 %8496 }
 0x44b   :  { %v4967_v61 = vsel %vm4421_vm6, %v4965_v39, %v8478_v57  ;;  %v4968_v30 = vsel %vm4421_vm6, %v4966_v15, %v8479_v49  ;;  %v15630_v33 = vunpack.i.h.bf16 %v13357_v58  ;;  %v8469_v11 = vunpack.i.h.bf16 %v13381_v22 }
 0x44c   :  { %v13466_v8 = vsel %vm1780_vm4, %v15629_v55, %v4559_v40  ;;  %v8468_v3 = vunpack.i.l.bf16 %v13381_v22  ;;  %v8484_v31 = vunpack.i.h.bf16 %v8482_v60  ;;  %v8483_v40 = vunpack.i.l.bf16 %v8482_v60 }
 0x44d   :  { %v13476_v46 = vsel %vm4412_vm1, %v15630_v33, %v8413_v53  ;;  %v5316_v62 = vpack.c.bf16 %v4968_v30, %v4967_v61  ;;  %v15631_v23 = vrot.slane %v13240_v42, 4  ;;  %v5274_v9 = vsel %vm4941_vm12, %v5265_v48, %v5273_v17  ;;  %8631 = vrot.lane.b32.xlu0 %v15615_v63, %s8991_s23  ;;  %v15633_v61 = vld [vmem:[#allocation63_spill] sm:$0xff] }
 0x44e   :  { %vm4430_vm9 = vcmask 605184   ;;  %v13489_v15 = vsel %vm4421_vm6, %v4536_v45, %v8428_v7  ;;  %v8489_v4 = vunpack.i.h.bf16 %v13449_v37  ;;  %v5249_v25 = vsel %vm4415_vm2, %v13254_v26, %v8484_v31  ;;  %v8492_v17 = vpop.permute.xlu0 %8491  ;;  %8626 = vrot.lane.b32.xlu1 %v15607_v10, %s9011_s9 }
 0x44f   :  { %v5266_v51 = vsel %vm4941_vm12, %v15631_v23, %v5265_v48  ;;  %v8499_v39 = vunpack.i.h.bf16 %v8497_v43  ;;  %vm4433_vm13 = vcmask 850944   ;;  %v15632_v42 = vunpack.i.l.bf16 %v12652_v27  ;;  %5924 = vmatprep.mubr.bf16.mxu1 %v5316_v62  ;;  %v8502_v62 = vpop.permute.xlu1 %8501 }
 0x450   :  { %v8459_v2 = vunpack.i.h.bf16 %v13417_v1  ;;  %v5252_v48 = vsel %vm4418_vm3, %v5249_v25, %v8469_v11  ;;  %v8498_v7 = vunpack.i.l.bf16 %v8497_v43  ;;  %v15634_v26 = vunpack.i.h.bf16 %v15633_v61 }
 0x451   :  { %v5021_v53 = vsel %vm4412_vm1, %v15632_v42, %v8454_v35  ;;  %v13504_v18 = vsel %vm4421_vm6, %v5252_v48, %v8489_v4  ;;  %v15635_v27 = vunpack.i.h.bf16 %v13001_v14  ;;  %v8650_v1 = vpack.i.bf16 %v5274_v9, %v5266_v51 }
 0x452   :  { %v4529_v55 = vsel %vm4412_vm1, %v15634_v26, %v8499_v39  ;;  %v4557_v45 = vrot.slane %v13489_v15, 2  ;;  %v5024_v60 = vsel %vm4415_vm2, %v5021_v53, %v8483_v40  ;;  %v15636_v30 = vunpack.i.l.bf16 %v15633_v61  ;;  %8636 = vrot.lane.b32.xlu1 %v15615_v63, %s9012_s10 }
 0x453   :  { %v5132_v35 = vsel %vm4412_vm1, %v15635_v27, %v8499_v39  ;;  %v15637_v11 = vunpack.i.l.bf16 %v13001_v14  ;;  %v15638_v43 = vpack.c.bf16 %v13086_v29, %v13081_v24  ;;  %v15639_v10 = vpack.i.bf16 %v13070_v52, %v12791_v54  ;;  %v8507_v52 = vpop.permute.xlu0 %8506 }
 0x454   :  { %v4528_v33 = vsel %vm4412_vm1, %v15636_v30, %v8498_v7  ;;  %v8494_v23 = vunpack.i.h.bf16 %v8492_v17  ;;  %v8493_v40 = vunpack.i.l.bf16 %v8492_v17  ;;  %v8504_v51 = vunpack.i.h.bf16 %v8502_v62 }
 0x455   :  { %v5131_v31 = vsel %vm4412_vm1, %v15637_v11, %v8498_v7  ;;  %5925 = vmatmul.mubr.bf16.gmra.mxu1 %v15638_v43  ;;  %8641 = vrot.lane.b32.xlu0 %v15639_v10, %s9015_s14  ;;  %v8503_v9 = vunpack.i.l.bf16 %v8502_v62  ;;  %v15640_v15 = vunpack.i.l.bf16 %v13046_v50  ;;  %v15641_v25 = vunpack.i.h.bf16 %v13046_v50 }
 0x456   :  { %v15644_v53 = vunpack.i.l.bf16 %v13159_v12  ;;  %v15645_v7 = vunpack.i.h.bf16 %v13159_v12  ;;  %v5027_v30 = vsel %vm4418_vm3, %v5024_v60, %v8459_v2  ;;  %v8509_v11 = vunpack.i.h.bf16 %v8507_v52  ;;  %8646 = vrot.lane.b32.xlu1 %v15621_v28, %s9017_s27  ;;  %s9020_s27 = smov 32  }
 0x457   :  { %v4531_v14 = vsel %vm4415_vm2, %v4528_v33, %v15640_v15  ;;  %v4532_v39 = vsel %vm4415_vm2, %v4529_v55, %v15641_v25  ;;  %v15642_v24 = vmov %v15640_v15  ;;  %v15643_v42 = vmov %v15641_v25 }
 0x458   :  { %v5133_v29 = vsel %vm4415_vm2, %v5131_v31, %v15642_v24  ;;  %v5134_v54 = vsel %vm4415_vm2, %v5132_v35, %v15643_v42  ;;  %v13544_v48 = vsel %vm4412_vm1, %v15644_v53, %v8493_v40  ;;  %v13549_v17 = vsel %vm4412_vm1, %v15645_v7, %v8494_v23  ;;  %v8517_v35 = vpop.permute.xlu1 %8516  ;;  %v8512_v23 = vpop.permute.xlu0 %8511 }
 0x459   :  { %v4534_v61 = vsel %vm4418_vm3, %v4531_v14, %v8503_v9  ;;  %v4535_v26 = vsel %vm4418_vm3, %v4532_v39, %v8504_v51  ;;  %v5135_v27 = vsel %vm4418_vm3, %v5133_v29, %v8503_v9  ;;  %v5136_v12 = vsel %vm4418_vm3, %v5134_v54, %v8504_v51  ;;  %8651 = vrot.lane.b32.xlu0 %v8650_v1, %s9018_s19 }
 0x45a   :  { %v4537_v50 = vsel %vm4421_vm6, %v4534_v61, %v13263_v36  ;;  %v4538_v55 = vsel %vm4421_vm6, %v4535_v26, %v13260_v59  ;;  %v8508_v31 = vunpack.i.l.bf16 %v8507_v52  ;;  %v8519_v63 = vunpack.i.h.bf16 %v8517_v35 }
 0x45b   :  { %v4550_v33 = vrot.slane %v4538_v55, 2  ;;  %v4549_v43 = vrot.slane %v4537_v50, 2  ;;  %v5137_v62 = vsel %vm4421_vm6, %v5135_v27, %v13263_v36  ;;  %v5138_v10 = vsel %vm4421_vm6, %v5136_v12, %v13260_v59  ;;  %v15651_v55 = vld [vmem:[#allocation65_spill] sm:$0xff]  ;;  %v15652_v27 = vld [vmem:[#allocation26_spill] sm:$0xff] }
 0x45c   :  { %v4432_v40 = vsel %vm4430_vm9, %v13198_v38, %v8509_v11  ;;  %v4431_v2 = vsel %vm4430_vm9, %v13195_v32, %v8508_v31  ;;  %v5322_v1 = vpack.c.bf16 %v5138_v10, %v5137_v62  ;;  %v8514_v60 = vunpack.i.h.bf16 %v8512_v23 }
 0x45d   :  { %v8488_v51 = vunpack.i.l.bf16 %v13449_v37  ;;  %v15646_v9 = vunpack.i.h.bf16 %v13105_v16  ;;  %v15647_v14 = vunpack.i.l.bf16 %v13105_v16  ;;  %v8518_v38 = vunpack.i.l.bf16 %v8517_v35 }
 0x45e   :  { %5932 = vmatprep.mubr.bf16.mxu1 %v5322_v1  ;;  %v8513_v28 = vunpack.i.l.bf16 %v8512_v23  ;;  %v4809_v39 = vsel %vm4415_vm2, %v13476_v46, %v8514_v60  ;;  %v4558_v24 = vsel %vm1780_vm4, %v4550_v33, %v4557_v45  ;;  %v15648_v29 = vunpack.i.h.bf16 %v13213_v47  ;;  %v15655_v23 = vld [vmem:[#allocation28_spill] sm:$0xff] }
 0x45f   :  { %v13577_v15 = vsel %vm4433_vm13, %v4432_v40, %v15646_v9  ;;  %v13582_v25 = vsel %vm4433_vm13, %v4431_v2, %v15647_v14  ;;  %v5030_v42 = vsel %vm4421_vm6, %v5027_v30, %v8488_v51  ;;  %v4812_v54 = vsel %vm4418_vm3, %v4809_v39, %v8468_v3  ;;  %v15650_v3 = vld [vmem:[#allocation29_spill] sm:$0xff]  ;;  %v8532_v2 = vpop.permute.xlu0 %8531  ;;  %v15656_v9 = vld [vmem:[#allocation20_spill] sm:$0xff] }
 0x460   :  { %v5305_v32 = vpack.c.bf16 %v13577_v15, %v13582_v25  ;;  %v4805_v16 = vsel %vm4412_vm1, %v8463_v19, %v15648_v29  ;;  %v15649_v52 = vpack.c.bf16 %v13299_v41, %v13293_v44  ;;  %v8660_v46 = vpack.i.bf16 %v13466_v8, %v4558_v24  ;;  %v8944_v15 = vld [vmem:[%s14838_s2 + $0x240] sm:$0xff] }
 0x461   :  { %v4835_v53 = vrot.slane %v8519_v63, 2  ;;  %v4808_v45 = vsel %vm4415_vm2, %v4805_v16, %v8513_v28  ;;  %v4815_v47 = vsel %vm4421_vm6, %v4812_v54, %v8519_v63  ;;  %v4551_v58 = vsel %vm1780_vm4, %v4549_v43, %v4550_v33 }
 0x462   :  { %5933 = vmatmul.mubr.bf16.gmra.mxu1 %v15649_v52  ;;  %v4829_v19 = vrot.slane %v8518_v38, 2  ;;  %v4811_v22 = vsel %vm4418_vm3, %v4808_v45, %v8419_v6  ;;  %v4833_v7 = vrot.slane %v4815_v47, 2  ;;  %8661 = vrot.lane.b32.xlu0 %v8660_v46, %s9018_s19  ;;  %v8655_v44 = vpack.i.bf16 %v15650_v3, %v4551_v58  ;;  %v8941_v47 = vld [vmem:[%s14838_s2 + $0x268] sm:$0xff] }
 0x463   :  { %v4814_v41 = vsel %vm4421_vm6, %v4811_v22, %v8518_v38  ;;  %v4828_v8 = vrot.slane %v8429_v13, 2  ;;  %v4825_v61 = vrot.slane %v13455_v34, 2  ;;  %v5048_v26 = vrot.slane %v5030_v42, 4  ;;  %v15653_v34 = vld [vmem:[#allocation27_spill] sm:$0xff]  ;;  %v13631_v1 = vpop.permute.xlu0 %8541 }
 0x464   :  { %v4826_v50 = vrot.slane %v4814_v41, 2  ;;  %8656 = vrot.lane.b32.xlu1 %v8655_v44, %s9018_s19  ;;  %v5044_v56 = vrot.slane %v15651_v55, 4  ;;  %v5043_v6 = vrot.slane %v15652_v27, 4  ;;  %v5050_v12 = vrot.slane %v8488_v51, 4  ;;  %v8938_v51 = vld [vmem:[%s14838_s2 + $0x270] sm:$0xff]  ;;  %v8939_v38 = vld [vmem:[%s14838_s2 + $0x278] sm:$0xff] }
 0x465   :  { %v4830_v35 = vsel %vm1780_vm4, %v4828_v8, %v4829_v19  ;;  %v4836_v30 = vsel %vm1780_vm4, %v4829_v19, %v4835_v53  ;;  %v15654_v31 = vrot.slane %v15653_v34, 4  ;;  %v5796_v14 = vmul.f32 %v8938_v51, %v15656_v9  ;;  %v8940_v53 = vld [vmem:[%s14838_s2 + $0x260] sm:$0xff] }
 0x466   :  { %v4834_v33 = vsel %vm1780_vm4, %v4826_v50, %v4833_v7  ;;  %v4827_v0 = vsel %vm1780_vm4, %v4825_v61, %v4826_v50  ;;  %v5051_v63 = vsel %vm4941_vm12, %v5044_v56, %v5050_v12  ;;  %v5045_v62 = vsel %vm4941_vm12, %v5043_v6, %v5044_v56  ;;  %v8943_v7 = vld [vmem:[%s14838_s2 + $0x258] sm:$0xff] }
 0x467   :  { %v8670_v13 = vpack.i.bf16 %v4836_v30, %v4834_v33  ;;  %v8665_v11 = vpack.i.bf16 %v4830_v35, %v4827_v0  ;;  %v5049_v43 = vsel %vm4941_vm12, %v15654_v31, %v5048_v26  ;;  %v8675_v40 = vpack.i.bf16 %v5045_v62, %v15655_v23  ;;  %v13643_v39 = vpop.permute.xlu0 %8551 }
 0x468   :  { %v8680_v10 = vpack.i.bf16 %v5051_v63, %v5049_v43  ;;  %vm4573_vm4 = vcmask 785408   ;;  %v5797_v28 = vmul.f32 %v8939_v38, %v15656_v9  ;;  %v5794_v45 = vmul.f32 %v8940_v53, %v15656_v9  ;;  %v8945_v43 = vld [vmem:[%s14838_s2 + $0x248] sm:$0xff] }
 0x469   :  { %8671 = vrot.lane.b32.xlu0 %v8670_v13, %s9018_s19  ;;  %8666 = vrot.lane.b32.xlu1 %v8665_v11, %s9018_s19  ;;  %v5793_v3 = vmul.f32 %v8943_v7, %v15656_v9  ;;  %v8534_v61 = vunpack.i.h.bf16 %v8532_v2  ;;  %v8533_v26 = vunpack.i.l.bf16 %v8532_v2  ;;  %v15657_v35 = vmov 0  }
 0x46a   :  { %v5851_v46 = vpack.c.bf16 %v5797_v28, %v5796_v14  ;;  %v5790_v25 = vmul.f32 %v8944_v15, %v15656_v9  ;;  %v5267_v34 = vrot.slane %v13504_v18, 4  ;;  %v5791_v63 = vmul.f32 %v8945_v43, %v15656_v9  ;;  %v8946_v28 = vld [vmem:[%s14838_s2 + $0x230] sm:$0xff] }
 0x46b   :  { %v13671_v44 = vpop.permute.xlu0 %8561  ;;  %vm5872_vm14 = vcmask 1046528   ;;  %vm6385_vm1 = vcmask 130048  }
 0x46c   :  { %v5848_v38 = vpack.c.bf16 %v5791_v63, %v5790_v25  ;;  %v8564_v25 = vunpack.i.h.bf16 %v13671_v44 }
 0x46d   :  { %8681 = vrot.lane.b32.xlu0 %v8680_v10, %s9018_s19  ;;  %8676 = vrot.lane.b32.xlu1 %v8675_v40, %s9018_s19 }
 0x46f   :  { %v13698_v62 = vpop.permute.xlu0 %8571 }
 0x493   :  { %v13633_v60 = vpop.permute.xlu1 %8521 }
 0x494   :  { %v8524_v24 = vunpack.i.h.bf16 %v13633_v60  ;;  %v8523_v29 = vunpack.i.l.bf16 %v13633_v60 }
 0x496   :  { %v4584_v16 = vsel %vm4573_vm4, %v13398_v21, %v8523_v29  ;;  %v4585_v42 = vsel %vm4573_vm4, %v13391_v20, %v8524_v24  ;;  %v5795_v21 = vmul.f32 %v8941_v47, %v15656_v9  ;;  %v8942_v20 = vld [vmem:[%s14838_s2 + $0x250] sm:$0xff] }
 0x497   :  { %v8527_v54 = vpop.permute.xlu1 %8526  ;;  %v5306_v52 = vpack.c.bf16 %v4585_v42, %v4584_v16  ;;  %v5792_v22 = vmul.f32 %v8942_v20, %v15656_v9  ;;  %v5788_v16 = vmul.f32 %v8946_v28, %v15656_v9  ;;  %v8947_v42 = vld [vmem:[%s14838_s2 + $0x238] sm:$0xff] }
 0x498   :  { %v8529_v58 = vunpack.i.h.bf16 %v8527_v54  ;;  %v8528_v19 = vunpack.i.l.bf16 %v8527_v54  ;;  %v5850_v56 = vpack.c.bf16 %v5795_v21, %v5794_v45  ;;  %v5789_v54 = vmul.f32 %v8947_v42, %v15656_v9  ;;  %v8949_v45 = vld [vmem:[%s14838_s2 + $0x228] sm:$0xff] }
 0x499   :  { %5973 = vmatprep.mubr.bf16.mxu1 %v5306_v52  ;;  %v5849_v30 = vpack.c.bf16 %v5793_v3, %v5792_v22  ;;  %v13718_v52 = vpop.permute.xlu0 %8576  ;;  %v5787_v47 = vmul.f32 %v8949_v45, %v15656_v9  ;;  %v8951_v22 = vld [vmem:[%s14838_s2 + $0x2e8] sm:$0x3f] }
 0x49a   :  { %v5251_v41 = vsel %vm4415_vm2, %v13549_v17, %v8529_v58  ;;  %v5250_v8 = vsel %vm4415_vm2, %v13544_v48, %v8528_v19  ;;  %5974 = vmatmul.mubr.bf16.vlgmr.msra.gmra.mxu1 %v5305_v32  ;;  %v5270_v17 = vrot.slane %v8489_v4, 4  ;;  %v5847_v58 = vpack.c.bf16 %v5789_v54, %v5788_v16  ;;  %v8950_v19 = vld [vmem:[%s14838_s2 + $0x2e0] sm:$0xff] }
 0x49b   :  { %v8537_v50 = vpop.permute.xlu1 %8536  ;;  %6007 = vmatpush1.bf16.msra.mxu1 %v5851_v46  ;;  %v5253_v33 = vsel %vm4418_vm3, %v5250_v8, %v8533_v26  ;;  %v5254_v48 = vsel %vm4418_vm3, %v5251_v41, %v8534_v61  ;;  %v8948_v46 = vld [vmem:[%s14838_s2 + $0x220] sm:$0xff]  ;;  %v5810_v20 = vmul.f32 %v8950_v19, %v15656_v9  ;;  %v5811_v7 = vmul.f32 %v8951_v22, %v15656_v9  ;;  %v8952_v8 = vld [vmem:[%s14838_s2 + $0x210] sm:$0xff]  ;;  %v8953_v26 = vld [vmem:[%s14838_s2 + $0x218] sm:$0xff] }
 0x49c   :  { %v8539_v6 = vunpack.i.h.bf16 %v8537_v50  ;;  %v8538_v12 = vunpack.i.l.bf16 %v8537_v50  ;;  %6008 = vmatprep.subr.bf16.mxu1 %v15657_v35  ;;  %v5786_v53 = vmul.f32 %v8948_v46, %v15656_v9  ;;  %v5784_v61 = vmul.f32 %v8952_v8, %v15656_v9 }
 0x49d   :  { %v5785_v50 = vmul.f32 %v8953_v26, %v15656_v9  ;;  %v5858_v15 = vpack.c.bf16 %v5811_v7, %v5810_v20  ;;  %v8579_v16 = vunpack.i.h.bf16 %v13718_v52  ;;  %v8578_v42 = vunpack.i.l.bf16 %v13718_v52 }
 0x49e   :  { %v5277_v32 = vrot.slane %v8539_v6, 4  ;;  %v5256_v0 = vsel %vm4421_vm6, %v5253_v33, %v8538_v12  ;;  %v5257_v13 = vsel %vm4421_vm6, %v5254_v48, %v8539_v6  ;;  %v5271_v11 = vrot.slane %v8538_v12, 4  ;;  %v8955_v12 = vld [vmem:[%s14838_s2 + $0x208] sm:$0xff]  ;;  %v8587_v48 = vpop.permute.xlu0 %8586 }
 0x49f   :  { %v5268_v37 = vrot.slane %v5256_v0, 4  ;;  %v5275_v4 = vrot.slane %v5257_v13, 4  ;;  %v13692_v31 = vpop.permute.xlu1 %8546  ;;  %6009 = vmatpush1.bf16.msra.mxu1 %v5850_v56  ;;  %v5846_v3 = vpack.c.bf16 %v5787_v47, %v5786_v53  ;;  %v8954_v56 = vld [vmem:[%s14838_s2 + $0x200] sm:$0xff]  ;;  %v8553_v33 = vunpack.i.l.bf16 %v13643_v39  ;;  %v8956_v0 = vld [vmem:[%s14838_s2 + $0x2d0] sm:$0xff] }
 0x4a0   :  { %v5272_v10 = vsel %vm4941_vm12, %v5270_v17, %v5271_v11  ;;  %v5278_v23 = vsel %vm4941_vm12, %v5271_v11, %v5277_v32  ;;  %6010 = vmatprep.subr.bf16.mxu1 %v15657_v35  ;;  %v5782_v6 = vmul.f32 %v8954_v56, %v15656_v9  ;;  %v8554_v17 = vunpack.i.h.bf16 %v13643_v39  ;;  %v8957_v39 = vld [vmem:[%s14838_s2 + $0x2d8] sm:$0xff] }
 0x4a1   :  { %v5276_v18 = vsel %vm4941_vm12, %v5268_v37, %v5275_v4  ;;  %v5269_v40 = vsel %vm4941_vm12, %v5267_v34, %v5268_v37  ;;  %v8563_v32 = vunpack.i.l.bf16 %v13671_v44  ;;  %v13766_v13 = vmul.f32 %v8956_v0, %v15656_v9  ;;  %v15659_v56 = vld [vmem:[#allocation23_spill] sm:$0xff] }
 0x4a2   :  { %v8690_v2 = vpack.i.bf16 %v5278_v23, %v5276_v18  ;;  %v8685_v51 = vpack.i.bf16 %v5272_v10, %v5269_v40  ;;  %v13772_v11 = vmul.f32 %v8957_v39, %v15656_v9  ;;  %v8574_v34 = vunpack.i.h.bf16 %v13698_v62  ;;  %v8958_v18 = vld [vmem:[%s14838_s2 + $0x2c0] sm:$0xff]  ;;  %v8597_v54 = vpop.permute.xlu0 %8596 }
 0x4a3   :  { %v13705_v14 = vpop.permute.xlu1 %8556  ;;  %6011 = vmatpush1.bf16.msra.mxu1 %v5849_v30  ;;  %v5783_v30 = vmul.f32 %v8955_v12, %v15656_v9  ;;  %v8573_v37 = vunpack.i.l.bf16 %v13698_v62  ;;  %v5845_v44 = vpack.c.bf16 %v5785_v50, %v5784_v61  ;;  %v4698_v63 = vsel %vm4424_vm7, %v15651_v55, %v8554_v17 }
 0x4a4   :  { %8691 = vrot.lane.b32.xlu0 %v8690_v2, %s9018_s19  ;;  %8686 = vrot.lane.b32.xlu1 %v8685_v51, %s9018_s19  ;;  %v4697_v10 = vsel %vm4424_vm7, %v15652_v27, %v8553_v33  ;;  %v5874_v23 = vsel %vm5872_vm14, %v5858_v15, 0  ;;  %v13788_v62 = vmul.f32 %v8958_v18, %v15656_v9  ;;  %v4700_v2 = vsel %vm4427_vm8, %v4698_v63, %v8564_v25  ;;  %v8959_v27 = vld [vmem:[%s14838_s2 + $0x2c8] sm:$0xff] }
 0x4a5   :  { %6012 = vmatprep.subr.bf16.mxu1 %v15657_v35  ;;  %v5844_v43 = vpack.c.bf16 %v5783_v30, %v5782_v6  ;;  %v4699_v40 = vsel %vm4427_vm8, %v4697_v10, %v8563_v32  ;;  %v5857_v55 = vpack.c.bf16 %v13772_v11, %v13766_v13  ;;  %v13798_v51 = vmul.f32 %v8959_v27, %v15656_v9  ;;  %v8962_v13 = vld [vmem:[%s14838_s2 + $0x2a0] sm:$0xff] }
 0x4a6   :  { %v4702_v28 = vsel %vm4430_vm9, %v4700_v2, %v8574_v34  ;;  %v8589_v46 = vunpack.i.h.bf16 %v8587_v48  ;;  %v8588_v53 = vunpack.i.l.bf16 %v8587_v48  ;;  %v8549_v45 = vunpack.i.h.bf16 %v13692_v31 }
 0x4a7   :  { %v13728_v21 = vpop.permute.xlu1 %8566  ;;  %6013 = vmatpush1.bf16.msra.mxu1 %v5848_v38  ;;  %v4701_v38 = vsel %vm4430_vm9, %v4699_v40, %v8573_v37  ;;  %v8548_v47 = vunpack.i.l.bf16 %v13692_v31  ;;  %v8544_v19 = vunpack.i.h.bf16 %v13631_v1  ;;  %v8543_v20 = vunpack.i.l.bf16 %v13631_v1  ;;  %v15658_v31 = vld [vmem:[#allocation22_spill] sm:$0xff] }
 0x4a8   :  { %6014 = vmatprep.subr.bf16.mxu1 %v15657_v35  ;;  %v8559_v22 = vunpack.i.h.bf16 %v13705_v14  ;;  %v8558_v7 = vunpack.i.l.bf16 %v13705_v14  ;;  %v8598_v8 = vunpack.i.l.bf16 %v8597_v54  ;;  %v8569_v61 = vunpack.i.h.bf16 %v13728_v21 }
 0x4a9   :  { %v8568_v26 = vunpack.i.l.bf16 %v13728_v21  ;;  %v4978_v50 = vsel %vm49_vm0, %v8579_v16, %v15658_v31  ;;  %v4977_v1 = vsel %vm49_vm0, %v8578_v42, %v15659_v56  ;;  %v4703_v14 = vsel %vm4433_vm13, %v4701_v38, %v8543_v20 }
 0x4aa   :  { %v4704_v6 = vsel %vm4433_vm13, %v4702_v28, %v8544_v19  ;;  %v4979_v12 = vsel %vm4276_vm10, %v4977_v1, %v8588_v53  ;;  %v4980_v30 = vsel %vm4276_vm10, %v4978_v50, %v8589_v46  ;;  %v4706_v21 = vsel %vm49_vm0, %v8544_v19, %v8549_v45  ;;  %v8960_v45 = vld [vmem:[%s14838_s2 + $0x2b0] sm:$0xff] }
 0x4ab   :  { %v13739_v41 = vpop.permute.xlu1 %8581  ;;  %6015 = vmatpush1.bf16.msra.mxu1 %v5847_v58  ;;  %v4705_v17 = vsel %vm49_vm0, %v8543_v20, %v8548_v47  ;;  %v4708_v15 = vsel %vm4276_vm10, %v4706_v21, %v8559_v22  ;;  %v4981_v0 = vsel %vm4440_vm11, %v4979_v12, %v8598_v8  ;;  %v5804_v47 = vmul.f32 %v8960_v45, %v15656_v9 }
 0x4ac   :  { %6016 = vmatprep.subr.bf16.mxu1 %v15657_v35  ;;  %v4707_v48 = vsel %vm4276_vm10, %v4705_v17, %v8558_v7  ;;  %v4710_v37 = vsel %vm4440_vm11, %v4708_v15, %v8569_v61  ;;  %v8583_v63 = vunpack.i.l.bf16 %v13739_v41  ;;  %v5311_v7 = vpack.c.bf16 %v4704_v6, %v4703_v14 }
 0x4ad   :  { %v4709_v34 = vsel %vm4440_vm11, %v4707_v48, %v8568_v26  ;;  %v5802_v11 = vmul.f32 %v8962_v13, %v15656_v9  ;;  %vm6560_vm2 = vcmask 687104   ;;  %vm9025_vm3 = vmmov 0  }
 0x4ae   :  { %v4969_v22 = vsel %vm4424_vm7, %v8478_v57, %v8583_v63 }
 0x4af   :  { %v13776_v4 = vpop.permute.xlu1 %8591  ;;  %6017 = vmatpush1.bf16.msra.mxu1 %v5846_v3  ;;  %v8599_v3 = vunpack.i.h.bf16 %v8597_v54 }
 0x4b0   :  { %6018 = vmatprep.subr.bf16.mxu1 %v15657_v35  ;;  %v8594_v40 = vunpack.i.h.bf16 %v13776_v4  ;;  %v8593_v2 = vunpack.i.l.bf16 %v13776_v4 }
 0x4b1   :  { %v4982_v39 = vsel %vm4440_vm11, %v4980_v30, %v8599_v3  ;;  %v5856_v3 = vpack.c.bf16 %v13798_v51, %v13788_v62 }
 0x4b2   :  { %v4971_v8 = vsel %vm4427_vm8, %v4969_v22, %v8593_v2 }
 0x4b3   :  { %v13806_v58 = vpop.permute.xlu1 %8601  ;;  %6019 = vmatpush1.bf16.msra.mxu1 %v5845_v44 }
 0x4b4   :  { %6020 = vmatprep.subr.bf16.mxu1 %v15657_v35  ;;  %v8604_v27 = vunpack.i.h.bf16 %v13806_v58  ;;  %v8603_v38 = vunpack.i.l.bf16 %v13806_v58  ;;  %v8961_v58 = vld [vmem:[%s14838_s2 + $0x2b8] sm:$0xff] }
 0x4b5   :  { %v5805_v19 = vmul.f32 %v8961_v58, %v15656_v9 }
 0x4b7   :  { %v13829_v33 = vpop.permute.xlu0 %8606  ;;  %6021 = vmatpush1.bf16.msra.mxu1 %v5844_v43  ;;  %v8584_v43 = vunpack.i.h.bf16 %v13739_v41  ;;  %v5855_v30 = vpack.c.bf16 %v5805_v19, %v5804_v47 }
 0x4b8   :  { %v8609_v25 = vunpack.i.h.bf16 %v13829_v33  ;;  %v8608_v32 = vunpack.i.l.bf16 %v13829_v33  ;;  %6024 = vmatprep.subr.bf16.mxu1 %v15657_v35  ;;  %v13840_v44 = vpop.permute.xlu1 %8611 }
 0x4b9   :  { %v8614_v10 = vunpack.i.h.bf16 %v13840_v44  ;;  %v8613_v18 = vunpack.i.l.bf16 %v13840_v44  ;;  %v4970_v20 = vsel %vm4424_vm7, %v8479_v49, %v8584_v43  ;;  %v4973_v49 = vsel %vm4430_vm9, %v4971_v8, %v8603_v38  ;;  %v8964_v43 = vld [vmem:[%s14838_s2 + $0x290] sm:$0xff] }
 0x4ba   :  { %v5074_v4 = vsel %vm4573_vm4, %v4981_v0, %v8608_v32  ;;  %v5075_v46 = vsel %vm4573_vm4, %v4982_v39, %v8609_v25  ;;  %v4972_v61 = vsel %vm4427_vm8, %v4970_v20, %v8594_v40  ;;  %v4975_v6 = vsel %vm4433_vm13, %v4973_v49, %v8578_v42  ;;  %v8965_v40 = vld [vmem:[%s14838_s2 + $0x298] sm:$0xff] }
 0x4bb   :  { %v8622_v28 = vpop.permute.xlu0 %8621  ;;  %6025 = vmatpush2.bf16.msra.mxu1 %v5874_v23  ;;  %v4859_v54 = vsel %vm4573_vm4, %v4709_v34, %v8613_v18  ;;  %v4860_v41 = vsel %vm4573_vm4, %v4710_v37, %v8614_v10  ;;  %v5318_v31 = vpack.c.bf16 %v5075_v46, %v5074_v4  ;;  %v4974_v5 = vsel %vm4430_vm9, %v4972_v61, %v8604_v27  ;;  %v8967_v4 = vld [vmem:[%s14838_s2 + $0x288] sm:$0xff] }
 0x4bc   :  { %6026 = vmatprep.subr.bf16.mxu1 %v15657_v35  ;;  %v13863_v53 = vpop.permute.xlu1 %8616  ;;  %v5312_v23 = vpack.c.bf16 %v4860_v41, %v4859_v54  ;;  %v8624_v51 = vunpack.i.h.bf16 %v8622_v28  ;;  %v8623_v56 = vunpack.i.l.bf16 %v8622_v28  ;;  %v4976_v12 = vsel %vm4433_vm13, %v4974_v5, %v8579_v16  ;;  %v8966_v54 = vld [vmem:[%s14838_s2 + $0x280] sm:$0xff] }
 0x4bd   :  { %v8619_v57 = vunpack.i.h.bf16 %v13863_v53  ;;  %v8618_v50 = vunpack.i.l.bf16 %v13863_v53  ;;  %v5317_v37 = vpack.c.bf16 %v4976_v12, %v4975_v6  ;;  %v5800_v63 = vmul.f32 %v8964_v43, %v15656_v9 }
 0x4be   :  { %5981 = vmatprep.mubr.bf16.mxu1 %v5312_v23  ;;  %v5801_v2 = vmul.f32 %v8965_v40, %v15656_v9  ;;  %v5798_v41 = vmul.f32 %v8966_v54, %v15656_v9  ;;  %v5799_v46 = vmul.f32 %v8967_v4, %v15656_v9 }
 0x4bf   :  { %v8632_v26 = vpop.permute.xlu0 %8631  ;;  %6027 = vmatpush2.bf16.msra.mxu1 %v5857_v55  ;;  %v8963_v55 = vld [vmem:[%s14838_s2 + $0x2a8] sm:$0xff]  ;;  %v5148_v21 = vsel %vm49_vm0, %v8619_v57, %v8624_v51  ;;  %v5147_v17 = vsel %vm49_vm0, %v8618_v50, %v8623_v56  ;;  %vm5859_vm0 = vcmask 900096   ;;  %s9021_s2 = smov 80  }
 0x4c0   :  { %5982 = vmatmul.mubr.bf16.gmra.mxu1 %v5311_v7  ;;  %6028 = vmatprep.subr.bf16.mxu1 %v15657_v35  ;;  %v8627_v62 = vpop.permute.xlu1 %8626  ;;  %v5803_v1 = vmul.f32 %v8963_v55, %v15656_v9  ;;  %v8634_v48 = vunpack.i.h.bf16 %v8632_v26  ;;  %v8633_v15 = vunpack.i.l.bf16 %v8632_v26  ;;  %v5853_v49 = vpack.c.bf16 %v5801_v2, %v5800_v63 }
 0x4c1   :  { %5989 = vmatprep.mubr.bf16.mxu1 %v5318_v31  ;;  %v8629_v0 = vunpack.i.h.bf16 %v8627_v62  ;;  %v8628_v39 = vunpack.i.l.bf16 %v8627_v62 }
 0x4c2   :  { %v5854_v16 = vpack.c.bf16 %v5803_v1, %v5802_v11  ;;  %v5149_v23 = vsel %vm4276_vm10, %v5147_v17, %v8633_v15  ;;  %v5150_v45 = vsel %vm4276_vm10, %v5148_v21, %v8634_v48  ;;  %vm6112_vm10 = vcmask 261120  }
 0x4c3   :  { %6029 = vmatpush2.bf16.msra.mxu1 %v5856_v3  ;;  %v5140_v19 = vsel %vm4424_vm7, %v13260_v59, %v8629_v0  ;;  %v5139_v20 = vsel %vm4424_vm7, %v13263_v36, %v8628_v39  ;;  %vm6740_vm7 = vcmask 76800  }
 0x4c4   :  { %6030 = vmatprep.subr.bf16.mxu1 %v15657_v35  ;;  %v8637_v52 = vpop.permute.xlu1 %8636 }
 0x4c5   :  { %v8639_v27 = vunpack.i.h.bf16 %v8637_v52  ;;  %v8638_v38 = vunpack.i.l.bf16 %v8637_v52 }
 0x4c7   :  { %v8642_v14 = vpop.permute.xlu0 %8641  ;;  %6031 = vmatpush2.bf16.msra.mxu1 %v5855_v30  ;;  %v5141_v59 = vsel %vm4427_vm8, %v5139_v20, %v8638_v38  ;;  %v5142_v31 = vsel %vm4427_vm8, %v5140_v19, %v8639_v27  ;;  %v5852_v30 = vpack.c.bf16 %v5799_v46, %v5798_v41 }
 0x4c8   :  { %v8644_v42 = vunpack.i.h.bf16 %v8642_v14  ;;  %v8643_v34 = vunpack.i.l.bf16 %v8642_v14  ;;  %5990 = vmatmul.mubr.bf16.gmra.mxu1 %v5317_v37  ;;  %6032 = vmatprep.subr.bf16.mxu1 %v15657_v35  ;;  %v8647_v7 = vpop.permute.xlu1 %8646  ;;  %v7402_v51 = vpop.f32.mrf.mxu1 }
 0x4c9   :  { %v8649_v3 = vunpack.i.h.bf16 %v8647_v7  ;;  %v8648_v8 = vunpack.i.l.bf16 %v8647_v7 }
 0x4ca   :  { %v5151_v22 = vsel %vm4440_vm11, %v5149_v23, %v8643_v34  ;;  %v5152_v9 = vsel %vm4440_vm11, %v5150_v45, %v8644_v42  ;;  %v7403_v55 = vpop.f32.mrf.mxu1 }
 0x4cb   :  { %v13920_v28 = vpop.permute.xlu0 %8651  ;;  %6033 = vmatpush2.bf16.msra.mxu1 %v5854_v16  ;;  %v5143_v5 = vsel %vm4430_vm9, %v5141_v59, %v8648_v8  ;;  %v5144_v62 = vsel %vm4430_vm9, %v5142_v31, %v8649_v3  ;;  %v13958_v12 = vadd.f32 %v7403_v55, %v7402_v51 }
 0x4cc   :  { %v8654_v47 = vunpack.i.h.bf16 %v13920_v28  ;;  %v8653_v58 = vunpack.i.l.bf16 %v13920_v28  ;;  %6034 = vmatprep.subr.bf16.mxu1 %v15657_v35  ;;  %v5145_v56 = vsel %vm4433_vm13, %v5143_v5, %v8618_v50  ;;  %v5146_v13 = vsel %vm4433_vm13, %v5144_v62, %v8619_v57  ;;  %v7405_v17 = vpop.f32.mrf.mxu1 }
 0x4cd   :  { %v5323_v1 = vpack.c.bf16 %v5146_v13, %v5145_v56 }
 0x4ce   :  { %v5301_v61 = vsel %vm4573_vm4, %v5151_v22, %v8653_v58  ;;  %v5302_v26 = vsel %vm4573_vm4, %v5152_v9, %v8654_v47  ;;  %v7406_v15 = vpop.f32.mrf.mxu1 }
 0x4cf   :  { %v5324_v36 = vpack.c.bf16 %v5302_v26, %v5301_v61  ;;  %6035 = vmatpush2.bf16.msra.mxu1 %v5853_v49  ;;  %v13969_v42 = vadd.f32 %v7406_v15, %v7405_v17 }
 0x4d0   :  { %6036 = vmatprep.subr.bf16.mxu1 %v15657_v35 }
 0x4d1   :  { %5997 = vmatprep.mubr.bf16.mxu1 %v5324_v36 }
 0x4d2   :  { %5998 = vmatmul.mubr.bf16.gmra.mxu1 %v5323_v1 }
 0x4d3   :  { %6037 = vmatpush2.bf16.msra.mxu1 %v5852_v30 }
 0x4d4   :  { %v8662_v11 = vpop.permute.xlu0 %8661 }
 0x4d5   :  { %v8664_v14 = vunpack.i.h.bf16 %v8662_v11  ;;  %v8663_v6 = vunpack.i.l.bf16 %v8662_v11 }
 0x4d6   :  { %v8657_v21 = vpop.permute.xlu1 %8656 }
 0x4d7   :  { %v4576_v53 = vsel %vm4573_vm4, %v8524_v24, %v8663_v6  ;;  %v4577_v57 = vsel %vm4573_vm4, %v8663_v6, %v8664_v14  ;;  %v8659_v50 = vunpack.i.h.bf16 %v8657_v21  ;;  %v8658_v48 = vunpack.i.l.bf16 %v8657_v21 }
 0x4d9   :  { %v4574_v0 = vsel %vm4573_vm4, %v8523_v29, %v8658_v48  ;;  %v4575_v39 = vsel %vm4573_vm4, %v8658_v48, %v8659_v50 }
 0x4da   :  { %v5307_v35 = vpack.c.bf16 %v4576_v53, %v4574_v0  ;;  %v5308_v34 = vpack.c.bf16 %v4577_v57, %v4575_v39 }
 0x4db   :  { %v8672_v52 = vpop.permute.xlu0 %8671  ;;  %v8667_v37 = vpop.permute.xlu1 %8666 }
 0x4dc   :  { %7201 = vmatprep.mubr.msk.bf16.mxu1 %vm5859_vm0, %v5308_v34  ;;  %v8674_v24 = vunpack.i.h.bf16 %v8672_v52  ;;  %v8673_v16 = vunpack.i.l.bf16 %v8672_v52  ;;  %v8669_v43 = vunpack.i.h.bf16 %v8667_v37  ;;  %v8668_v63 = vunpack.i.l.bf16 %v8667_v37  ;;  %v14020_v52 = vld [vmem:[%s14839_s3] sm:$0xff]  ;;  %v14025_v37 = vld [vmem:[%s14839_s3 + $0x8] sm:$0xff] }
 0x4dd   :  { %6039 = vmatmul.mubr.bf16.vlgmr.msra.gmra.mxu1 %v5307_v35 }
 0x4de   :  { %v4852_v60 = vsel %vm4573_vm4, %v8673_v16, %v8674_v24  ;;  %v4850_v29 = vsel %vm4573_vm4, %v8668_v63, %v8669_v43  ;;  %v4851_v46 = vsel %vm4573_vm4, %v8614_v10, %v8673_v16  ;;  %v4849_v23 = vsel %vm4573_vm4, %v8613_v18, %v8668_v63 }
 0x4df   :  { %v5314_v40 = vpack.c.bf16 %v4852_v60, %v4850_v29  ;;  %v8682_v2 = vpop.permute.xlu0 %8681  ;;  %v8677_v27 = vpop.permute.xlu1 %8676  ;;  %v5313_v22 = vpack.c.bf16 %v4851_v46, %v4849_v23  ;;  %v6168_v24 = vmul.f32 %v14020_v52, %v14020_v52  ;;  %v14043_v60 = vld [vmem:[%s14839_s3 + $0x18] sm:$0xff] }
 0x4e0   :  { %v8684_v38 = vunpack.i.h.bf16 %v8682_v2  ;;  %v8683_v54 = vunpack.i.l.bf16 %v8682_v2  ;;  %v8679_v41 = vunpack.i.h.bf16 %v8677_v27  ;;  %v8678_v4 = vunpack.i.l.bf16 %v8677_v27  ;;  %v14051_v27 = vld [vmem:[%s14839_s3 + $0x20] sm:$0xff] }
 0x4e1   :  { %7202 = vmatprep.mubr.msk.bf16.mxu1 %vm5859_vm0, %v5314_v40  ;;  %v6218_v43 = vsel %vm4409_vm15, %v6168_v24, 0.0  ;;  %v6171_v40 = vmul.f32 %v14043_v60, %v14043_v60 }
 0x4e2   :  { %v5067_v45 = vsel %vm4573_vm4, %v8683_v54, %v8684_v38  ;;  %v5065_v19 = vsel %vm4573_vm4, %v8678_v4, %v8679_v41  ;;  %v5066_v9 = vsel %vm4573_vm4, %v8609_v25, %v8683_v54  ;;  %v5064_v44 = vsel %vm4573_vm4, %v8608_v32, %v8678_v4  ;;  %v14059_v4 = vld [vmem:[%s14839_s3 + $0x28] sm:$0xff] }
 0x4e3   :  { %v5320_v20 = vpack.c.bf16 %v5067_v45, %v5065_v19  ;;  %v5319_v10 = vpack.c.bf16 %v5066_v9, %v5064_v44  ;;  %v6172_v54 = vmul.f32 %v14051_v27, %v14051_v27  ;;  %v6223_v41 = vsel %vm4409_vm15, %v6171_v40, 0.0  ;;  %v14067_v19 = vld [vmem:[%s14839_s3 + $0x30] sm:$0xff]  ;;  %v14075_v44 = vld [vmem:[%s14839_s3 + $0x38] sm:$0xff] }
 0x4e4   :  { %v6173_v23 = vmul.f32 %v14059_v4, %v14059_v4 }
 0x4e5   :  { %6047 = vmatmul.mubr.bf16.gmra.mxu1 %v5313_v22  ;;  %v6225_v45 = vsel %vm4409_vm15, %v6172_v54, 0.0  ;;  %v6174_v22 = vmul.f32 %v14067_v19, %v14067_v19 }
 0x4e6   :  { %7203 = vmatprep.mubr.msk.bf16.mxu1 %vm5859_vm0, %v5320_v20  ;;  %v6227_v9 = vsel %vm4409_vm15, %v6173_v23, 0.0 }
 0x4ed   :  { %6055 = vmatmul.mubr.bf16.gmra.mxu1 %v5319_v10 }
 0x505   :  { %v7408_v18 = vpop.f32.mrf.mxu1 }
 0x507   :  { %v7409_v7 = vpop.f32.mrf.mxu1 }
 0x508   :  { %v13990_v3 = vadd.f32 %v7409_v7, %v7408_v18  ;;  %v14080_v18 = vld [vmem:[%s14839_s3 + $0x40] sm:$0xff]  ;;  %v14085_v7 = vld [vmem:[%s14839_s3 + $0x48] sm:$0xff] }
 0x509   :  { %v7411_v8 = vpop.f32.mrf.mxu1 }
 0x50b   :  { %v7412_v61 = vpop.f32.mrf.mxu1 }
 0x50c   :  { %v13992_v26 = vadd.f32 %v7412_v61, %v7411_v8  ;;  %v6175_v8 = vmul.f32 %v14075_v44, %v14075_v44  ;;  %v6229_v61 = vsel %vm4409_vm15, %v6174_v22, 0.0 }
 0x515   :  { %v7414_v59 = vpop.f32.mrf.mxu1 }
 0x516   :  { %v8692_v5 = vpop.permute.xlu0 %8691  ;;  %v8687_v51 = vpop.permute.xlu1 %8686 }
 0x517   :  { %v7415_v31 = vpop.f32.mrf.mxu1  ;;  %v8694_v32 = vunpack.i.h.bf16 %v8692_v5  ;;  %v8693_v62 = vunpack.i.l.bf16 %v8692_v5  ;;  %v8689_v56 = vunpack.i.h.bf16 %v8687_v51  ;;  %v8688_v13 = vunpack.i.l.bf16 %v8687_v51 }
 0x518   :  { %v13994_v36 = vadd.f32 %v7415_v31, %v7414_v59  ;;  %v14093_v59 = vld [vmem:[%s14839_s3 + $0x50] sm:$0xff]  ;;  %v6176_v31 = vmul.f32 %v14080_v18, %v14080_v18  ;;  %v6231_v5 = vsel %vm4409_vm15, %v6175_v8, 0.0 }
 0x519   :  { %v7417_v49 = vpop.f32.mrf.mxu1  ;;  %v5293_v11 = vsel %vm4573_vm4, %v8654_v47, %v8693_v62  ;;  %v5294_v55 = vsel %vm4573_vm4, %v8693_v62, %v8694_v32  ;;  %v5291_v1 = vsel %vm4573_vm4, %v8653_v58, %v8688_v13  ;;  %v5292_v14 = vsel %vm4573_vm4, %v8688_v13, %v8689_v56  ;;  %v14103_v32 = vld [vmem:[%s14839_s3 + $0x58] sm:$0xff]  ;;  %v14111_v13 = vld [vmem:[%s14839_s3 + $0x60] sm:$0xff] }
 0x51a   :  { %v5325_v30 = vpack.c.bf16 %v5293_v11, %v5291_v1  ;;  %v5326_v21 = vpack.c.bf16 %v5294_v55, %v5292_v14  ;;  %v6178_v51 = vmul.f32 %v14093_v59, %v14093_v59  ;;  %v6233_v56 = vsel %vm4409_vm15, %v6176_v31, 0.0  ;;  %v14119_v14 = vld [vmem:[%s14839_s3 + $0x68] sm:$0xff] }
 0x51b   :  { %v7418_v25 = vpop.f32.mrf.mxu1  ;;  %v6179_v55 = vmul.f32 %v14103_v32, %v14103_v32 }
 0x51c   :  { %v13996_v33 = vadd.f32 %v7418_v25, %v7417_v49  ;;  %7204 = vmatprep.mubr.msk.bf16.mxu1 %vm5859_vm0, %v5326_v21  ;;  %v6177_v25 = vmul.f32 %v14085_v7, %v14085_v7  ;;  %v6180_v21 = vmul.f32 %v14111_v13, %v14111_v13 }
 0x51d   :  { %6063 = vmatmul.mubr.bf16.gmra.mxu1 %v5325_v30  ;;  %v14124_v30 = vld [vmem:[%s14839_s3 + $0x70] sm:$0xff] }
 0x51e   :  { %v6235_v1 = vsel %vm4409_vm15, %v6177_v25, 0.0  ;;  %v6241_v24 = vsel %vm4409_vm15, %v6180_v21, 0.0 }
 0x522   :  { %v7420_v6 = vpop.f32.mrf.mxu1 }
 0x524   :  { %v7421_v17 = vpop.f32.mrf.mxu1 }
 0x525   :  { %v14006_v53 = vadd.f32 %v7421_v17, %v7420_v6  ;;  %v6237_v17 = vsel %vm4409_vm15, %v6178_v51, 0.0 }
 0x526   :  { %v7423_v57 = vpop.f32.mrf.mxu1 }
 0x528   :  { %v7424_v50 = vpop.f32.mrf.mxu1 }
 0x529   :  { %v14009_v47 = vadd.f32 %v7424_v50, %v7423_v57  ;;  %v14132_v57 = vld [vmem:[%s14839_s3 + $0x78] sm:$0xff] }
 0x55a   :  { %v7442_v48 = vpop.f32.mrf.mxu1 }
 0x55c   :  { %v7443_v15 = vpop.f32.mrf.mxu1 }
 0x55d   :  { %v7444_v28 = vadd.f32 %v7443_v15, %v7442_v48  ;;  %v6181_v48 = vmul.f32 %v14119_v14, %v14119_v14  ;;  %v6239_v15 = vsel %vm4409_vm15, %v6179_v55, 0.0 }
 0x55e   :  { %v7445_v0 = vpop.f32.mrf.mxu1 }
 0x55f   :  { %v14012_v58 = vadd.f32 %v7444_v28, %v13958_v12  ;;  %v6169_v12 = vmul.f32 %v14025_v37, %v14025_v37  ;;  %v14140_v28 = vld [vmem:[%s14839_s3 + $0x80] sm:$0xff] }
 0x560   :  { %v7446_v39 = vpop.f32.mrf.mxu1 }
 0x561   :  { %v7447_v35 = vadd.f32 %v7446_v39, %v7445_v0  ;;  %v6219_v63 = vsel %vm4409_vm15, %v6169_v12, 0.0  ;;  %v6182_v0 = vmul.f32 %v14124_v30, %v14124_v30  ;;  %v14150_v12 = vld [vmem:[%s14839_s3 + $0x88] sm:$0xff] }
 0x562   :  { %v6220_v29 = vadd.f32 %v6219_v63, %v6218_v43  ;;  %v6184_v43 = vmul.f32 %v14140_v28, %v14140_v28  ;;  %v6243_v63 = vsel %vm4409_vm15, %v6181_v48, 0.0  ;;  %v6185_v54 = vmul.f32 %v14150_v12, %v14150_v12  ;;  %v14205_v48 = vld [vmem:[%s14839_s3 + $0xb8] sm:$0xff] }
 0x563   :  { %v14015_v34 = vadd.f32 %v7447_v35, %v13969_v42  ;;  %v14034_v42 = vld [vmem:[%s14839_s3 + $0x10] sm:$0xff]  ;;  %v6183_v35 = vmul.f32 %v14132_v57, %v14132_v57 }
 0x564   :  { %v6170_v16 = vmul.f32 %v14034_v42, %v14034_v42  ;;  %v6249_v22 = vsel %vm4409_vm15, %v6184_v43, 0.0 }
 0x566   :  { %v6221_v2 = vsel %vm4409_vm15, %v6170_v16, 0.0 }
 0x567   :  { %v6222_v38 = vadd.f32 %v6221_v2, %v6220_v29  ;;  %v14158_v29 = vld [vmem:[%s14839_s3 + $0x90] sm:$0xff]  ;;  %v6245_v2 = vsel %vm4409_vm15, %v6182_v0, 0.0 }
 0x569   :  { %v6224_v46 = vadd.f32 %v6223_v41, %v6222_v38  ;;  %v6247_v41 = vsel %vm4409_vm15, %v6183_v35, 0.0 }
 0x56b   :  { %v6226_v20 = vadd.f32 %v6225_v45, %v6224_v46  ;;  %v14167_v46 = vld [vmem:[%s14839_s3 + $0x98] sm:$0xff] }
 0x56c   :  { %v6187_v31 = vmul.f32 %v14167_v46, %v14167_v46 }
 0x56d   :  { %v6228_v10 = vadd.f32 %v6227_v9, %v6226_v20  ;;  %v6186_v20 = vmul.f32 %v14158_v29, %v14158_v29 }
 0x56f   :  { %v6230_v49 = vadd.f32 %v6229_v61, %v6228_v10  ;;  %v14175_v10 = vld [vmem:[%s14839_s3 + $0xa0] sm:$0xff] }
 0x571   :  { %v6232_v62 = vadd.f32 %v6231_v5, %v6230_v49  ;;  %v6251_v49 = vsel %vm4409_vm15, %v6185_v54, 0.0  ;;  %v14186_v5 = vld [vmem:[%s14839_s3 + $0xa8] sm:$0xff] }
 0x572   :  { %v6189_v21 = vmul.f32 %v14186_v5, %v14186_v5 }
 0x573   :  { %v6234_v11 = vadd.f32 %v6233_v56, %v6232_v62  ;;  %v6188_v56 = vmul.f32 %v14175_v10, %v14175_v10 }
 0x575   :  { %v6236_v6 = vadd.f32 %v6235_v1, %v6234_v11  ;;  %v6253_v11 = vsel %vm4409_vm15, %v6186_v20, 0.0  ;;  %v14194_v1 = vld [vmem:[%s14839_s3 + $0xb0] sm:$0xff]  ;;  %v6257_v35 = vsel %vm4409_vm15, %v6188_v56, 0.0 }
 0x577   :  { %v6238_v50 = vadd.f32 %v6237_v17, %v6236_v6  ;;  %v6255_v17 = vsel %vm4409_vm15, %v6187_v31, 0.0 }
 0x579   :  { %v6240_v39 = vadd.f32 %v6239_v15, %v6238_v50 }
 0x57b   :  { %v6242_v16 = vadd.f32 %v6241_v24, %v6240_v39  ;;  %v6190_v39 = vmul.f32 %v14194_v1, %v14194_v1 }
 0x57d   :  { %v6244_v40 = vadd.f32 %v6243_v63, %v6242_v16  ;;  %v14213_v16 = vld [vmem:[%s14839_s3 + $0xc0] sm:$0xff]  ;;  %v6191_v63 = vmul.f32 %v14205_v48, %v14205_v48 }
 0x57f   :  { %v6246_v23 = vadd.f32 %v6245_v2, %v6244_v40  ;;  %v6259_v40 = vsel %vm4409_vm15, %v6189_v21, 0.0 }
 0x580   :  { %v7448_v38 = vpop.f32.mrf.mxu1 }
 0x581   :  { %v6248_v8 = vadd.f32 %v6247_v41, %v6246_v23  ;;  %v6192_v23 = vmul.f32 %v14213_v16, %v14213_v16 }
 0x582   :  { %v7449_v45 = vpop.f32.mrf.mxu1 }
 0x583   :  { %v7450_v9 = vadd.f32 %v7449_v45, %v7448_v38  ;;  %v6250_v62 = vadd.f32 %v6249_v22, %v6248_v8  ;;  %v14224_v38 = vld [vmem:[%s14839_s3 + $0xc8] sm:$0xff]  ;;  %v6261_v45 = vsel %vm4409_vm15, %v6190_v39, 0.0  ;;  %v14232_v22 = vld [vmem:[%s14839_s3 + $0xd0] sm:$0xff] }
 0x584   :  { %v7451_v61 = vpop.f32.mrf.mxu1  ;;  %v6193_v8 = vmul.f32 %v14224_v38, %v14224_v38  ;;  %v6194_v56 = vmul.f32 %v14232_v22, %v14232_v22 }
 0x585   :  { %v14181_v25 = vadd.f32 %v7450_v9, %v13990_v3  ;;  %v6252_v3 = vadd.f32 %v6251_v49, %v6250_v62  ;;  %v14243_v49 = vld [vmem:[%s14839_s3 + $0xd8] sm:$0xff] }
 0x586   :  { %v7452_v51 = vpop.f32.mrf.mxu1  ;;  %v6195_v21 = vmul.f32 %v14243_v49, %v14243_v49 }
 0x587   :  { %v7453_v55 = vadd.f32 %v7452_v51, %v7451_v61  ;;  %v6254_v15 = vadd.f32 %v6253_v11, %v6252_v3  ;;  %v6263_v61 = vsel %vm4409_vm15, %v6191_v63, 0.0  ;;  %v6265_v11 = vsel %vm4409_vm15, %v6192_v23, 0.0  ;;  %v14251_v3 = vld [vmem:[%s14839_s3 + $0xe0] sm:$0xff]  ;;  %v14270_v63 = vld [vmem:[%s14839_s3 + $0xf0] sm:$0xff] }
 0x588   :  { %v7454_v6 = vpop.f32.mrf.mxu1 }
 0x589   :  { %v14200_v50 = vadd.f32 %v7453_v55, %v13992_v26  ;;  %v6256_v26 = vadd.f32 %v6255_v17, %v6254_v15  ;;  %v6267_v17 = vsel %vm4409_vm15, %v6193_v8, 0.0  ;;  %v6198_v8 = vmul.f32 %v14270_v63, %v14270_v63 }
 0x58a   :  { %v7455_v0 = vpop.f32.mrf.mxu1 }
 0x58b   :  { %v7456_v24 = vadd.f32 %v7455_v0, %v7454_v6  ;;  %v6258_v54 = vadd.f32 %v6257_v35, %v6256_v26  ;;  %v14262_v0 = vld [vmem:[%s14839_s3 + $0xe8] sm:$0xff]  ;;  %v6269_v26 = vsel %vm4409_vm15, %v6194_v56, 0.0 }
 0x58c   :  { %v7457_v43 = vpop.f32.mrf.mxu1 }
 0x58d   :  { %v14219_v2 = vadd.f32 %v7456_v24, %v13994_v36  ;;  %v6260_v36 = vadd.f32 %v6259_v40, %v6258_v54  ;;  %v6196_v24 = vmul.f32 %v14251_v3, %v14251_v3  ;;  %v6197_v54 = vmul.f32 %v14262_v0, %v14262_v0 }
 0x58e   :  { %v7458_v41 = vpop.f32.mrf.mxu1 }
 0x58f   :  { %v7459_v20 = vadd.f32 %v7458_v41, %v7457_v43  ;;  %v6262_v62 = vadd.f32 %v6261_v45, %v6260_v36  ;;  %v6271_v41 = vsel %vm4409_vm15, %v6195_v21, 0.0  ;;  %v6275_v56 = vsel %vm4409_vm15, %v6197_v54, 0.0 }
 0x591   :  { %v14238_v31 = vadd.f32 %v7459_v20, %v13996_v33  ;;  %v6264_v33 = vadd.f32 %v6263_v61, %v6262_v62  ;;  %v14282_v20 = vld [vmem:[%s14839_s3 + $0xf8] sm:$0xff]  ;;  %v6273_v61 = vsel %vm4409_vm15, %v6196_v24, 0.0  ;;  %v14290_v62 = vld [vmem:[%s14839_s3 + $0x100] sm:$0xff] }
 0x592   :  { %v7460_v9 = vpop.f32.mrf.mxu1  ;;  %15660 = vst [vmem:[#allocation30_spill] sm:$0xff] %v14290_v62  ;;  %v6200_v21 = vmul.f32 %v14290_v62, %v14290_v62 }
 0x593   :  { %v6266_v39 = vadd.f32 %v6265_v11, %v6264_v33 }
 0x594   :  { %v7461_v51 = vpop.f32.mrf.mxu1 }
 0x595   :  { %v7462_v55 = vadd.f32 %v7461_v51, %v7460_v9  ;;  %v6199_v51 = vmul.f32 %v14282_v20, %v14282_v20 }
 0x596   :  { %v7463_v6 = vpop.f32.mrf.mxu1 }
 0x597   :  { %v14257_v15 = vadd.f32 %v7462_v55, %v14006_v53  ;;  %v6268_v53 = vadd.f32 %v6267_v17, %v6266_v39  ;;  %v14299_v55 = vld [vmem:[%s14839_s3 + $0x108] sm:$0xff]  ;;  %v6277_v17 = vsel %vm4409_vm15, %v6198_v8, 0.0  ;;  %v14307_v39 = vld [vmem:[%s14839_s3 + $0x110] sm:$0xff] }
 0x598   :  { %v7464_v35 = vpop.f32.mrf.mxu1  ;;  %15661 = vst [vmem:[#allocation66_spill] sm:$0xff] %v14299_v55  ;;  %15662 = vst [vmem:[#allocation31_spill] sm:$0xff] %v14307_v39  ;;  %v6202_v54 = vmul.f32 %v14307_v39, %v14307_v39 }
 0x599   :  { %v7465_v43 = vadd.f32 %v7464_v35, %v7463_v6  ;;  %v6270_v36 = vadd.f32 %v6269_v26, %v6268_v53  ;;  %v6279_v26 = vsel %vm4409_vm15, %v6199_v51, 0.0  ;;  %v14336_v51 = vld [vmem:[%s14839_s3 + $0x128] sm:$0xff] }
 0x59a   :  { %15665 = vst [vmem:[#allocation33_spill] sm:$0xff] %v14336_v51 }
 0x59b   :  { %v14277_v45 = vadd.f32 %v7465_v43, %v14009_v47  ;;  %v14317_v43 = vld [vmem:[%s14839_s3 + $0x118] sm:$0xff] }
 0x59c   :  { %15663 = vst [vmem:[#allocation32_spill] sm:$0xff] %v14317_v43 }
 0x59d   :  { %v6040_v40 = vpop.f32.mrf.mxu1 }
 0x59e   :  { %v6041_v23 = vadd.f32 %v6040_v40, %v14012_v58  ;;  %v6272_v58 = vadd.f32 %v6271_v41, %v6270_v36  ;;  %v6281_v41 = vsel %vm4409_vm15, %v6200_v21, 0.0  ;;  %v14325_v36 = vld [vmem:[%s14839_s3 + $0x120] sm:$0xff]  ;;  %v6285_v21 = vsel %vm4409_vm15, %v6202_v54, 0.0 }
 0x59f   :  { %v6042_v9 = vpop.f32.mrf.mxu1  ;;  %15664 = vst [vmem:[#allocation68_spill] sm:$0xff] %v14325_v36 }
 0x5a0   :  { %v6274_v33 = vadd.f32 %v6273_v61, %v6272_v58  ;;  %v6203_v61 = vmul.f32 %v14317_v43, %v14317_v43 }
 0x5a1   :  { %v6043_v47 = vpop.f32.mrf.mxu1 }
 0x5a2   :  { %v6044_v11 = vadd.f32 %v6043_v47, %v14015_v34  ;;  %v6276_v35 = vadd.f32 %v6275_v56, %v6274_v33  ;;  %v6201_v34 = vmul.f32 %v14299_v55, %v14299_v55 }
 0x5a3   :  { %v6045_v6 = vpop.f32.mrf.mxu1 }
 0x5a4   :  { %v6278_v53 = vadd.f32 %v6277_v17, %v6276_v35  ;;  %v6283_v58 = vsel %vm4409_vm15, %v6201_v34, 0.0  ;;  %v6204_v6 = vmul.f32 %v14325_v36, %v14325_v36  ;;  %v14344_v17 = vld [vmem:[%s14839_s3 + $0x130] sm:$0xff]  ;;  %v6205_v34 = vmul.f32 %v14336_v51, %v14336_v51 }
 0x5a5   :  { %v14309_v24 = vpop.f32.mrf.mxu1  ;;  %15666 = vst [vmem:[#allocation69_spill] sm:$0xff] %v14344_v17 }
 0x5a6   :  { %v6280_v9 = vadd.f32 %v6279_v26, %v6278_v53  ;;  %v6287_v26 = vsel %vm4409_vm15, %v6203_v61, 0.0 }
 0x5a7   :  { %v6050_v40 = vpop.f32.mrf.mxu1 }
 0x5a8   :  { %v6282_v56 = vadd.f32 %v6281_v41, %v6280_v9  ;;  %v14353_v40 = vld [vmem:[%s14839_s3 + $0x138] sm:$0xff]  ;;  %v6206_v9 = vmul.f32 %v14344_v17, %v14344_v17 }
 0x5a9   :  { %v6051_v8 = vpop.f32.mrf.mxu1  ;;  %15667 = vst [vmem:[#allocation71_spill] sm:$0xff] %v14353_v40 }
 0x5aa   :  { %v14331_v47 = vadd.f32 %v6051_v8, %v14200_v50  ;;  %v6284_v35 = vadd.f32 %v6283_v58, %v6282_v56  ;;  %v6289_v8 = vsel %vm4409_vm15, %v6204_v6, 0.0  ;;  %v14359_v58 = vsel %vm5516_vm5, %v6041_v23, -inf }
 0x5ab   :  { %v6053_v33 = vpop.f32.mrf.mxu1  ;;  %v6291_v6 = vsel %vm4409_vm15, %v6205_v34, 0.0 }
 0x5ac   :  { %v6286_v54 = vadd.f32 %v6285_v21, %v6284_v35  ;;  %v6207_v35 = vmul.f32 %v14353_v40, %v14353_v40  ;;  %v14384_v33 = vsel %vm5516_vm5, %v6044_v11, -inf  ;;  %v14402_v11 = vld [vmem:[%s14839_s3 + $0x158] sm:$0xff] }
 0x5ad   :  { %v6056_v50 = vpop.f32.mrf.mxu1  ;;  %15671 = vst [vmem:[#allocation77_spill] sm:$0xff] %v14402_v11 }
 0x5ae   :  { %v6057_v53 = vadd.f32 %v6056_v50, %v14219_v2  ;;  %v14367_v2 = vld [vmem:[%s14839_s3 + $0x140] sm:$0xff]  ;;  %v6288_v61 = vadd.f32 %v6287_v26, %v6286_v54  ;;  %v14378_v50 = vld [vmem:[%s14839_s3 + $0x148] sm:$0xff]  ;;  %v6293_v54 = vsel %vm4409_vm15, %v6206_v9, 0.0  ;;  %v6295_v9 = vsel %vm4409_vm15, %v6207_v35, 0.0 }
 0x5af   :  { %v6058_v41 = vpop.f32.mrf.mxu1  ;;  %15668 = vst [vmem:[#allocation72_spill] sm:$0xff] %v14367_v2  ;;  %15669 = vst [vmem:[#allocation74_spill] sm:$0xff] %v14378_v50  ;;  %v6208_v26 = vmul.f32 %v14367_v2, %v14367_v2  ;;  %v6211_v35 = vmul.f32 %v14402_v11, %v14402_v11 }
 0x5b0   :  { %v14362_v56 = vsel %vm5516_vm5, %v6057_v53, -inf  ;;  %v6290_v53 = vadd.f32 %v6289_v8, %v6288_v61  ;;  %v6209_v61 = vmul.f32 %v14378_v50, %v14378_v50 }
 0x5b1   :  { %v6059_v21 = vpop.f32.mrf.mxu1  ;;  %v6303_v39 = vsel %vm4409_vm15, %v6211_v35, 0.0 }
 0x5b2   :  { %v6060_v23 = vadd.f32 %v6059_v21, %v14238_v31  ;;  %v14392_v31 = vld [vmem:[%s14839_s3 + $0x150] sm:$0xff]  ;;  %v6292_v34 = vadd.f32 %v6291_v6, %v6290_v53  ;;  %v14410_v6 = vld [vmem:[%s14839_s3 + $0x160] sm:$0xff]  ;;  %v6299_v8 = vsel %vm4409_vm15, %v6209_v61, 0.0 }
 0x5b3   :  { %v6061_v41 = vpop.f32.mrf.mxu1  ;;  %15670 = vst [vmem:[#allocation75_spill] sm:$0xff] %v14392_v31  ;;  %15672 = vst [vmem:[#allocation78_spill] sm:$0xff] %v14410_v6 }
 0x5b4   :  { %v14387_v62 = vsel %vm5516_vm5, %v6060_v23, -inf  ;;  %v6294_v21 = vadd.f32 %v6293_v54, %v6292_v34  ;;  %v6210_v23 = vmul.f32 %v14392_v31, %v14392_v31  ;;  %v6297_v41 = vsel %vm4409_vm15, %v6208_v26, 0.0  ;;  %v14418_v54 = vld [vmem:[%s14839_s3 + $0x168] sm:$0xff] }
 0x5b5   :  { %15673 = vst [vmem:[#allocation80_spill] sm:$0xff] %v14418_v54  ;;  %v6212_v26 = vmul.f32 %v14410_v6, %v14410_v6  ;;  %v6213_v61 = vmul.f32 %v14418_v54, %v14418_v54 }
 0x5b6   :  { %v6296_v53 = vadd.f32 %v6295_v9, %v6294_v21  ;;  %v6301_v55 = vsel %vm4409_vm15, %v6210_v23, 0.0  ;;  %v14426_v9 = vld [vmem:[%s14839_s3 + $0x170] sm:$0xff] }
 0x5b7   :  { %v6214_v23 = vmul.f32 %v14426_v9, %v14426_v9  ;;  %v6305_v43 = vsel %vm4409_vm15, %v6212_v26, 0.0  ;;  %v6307_v36 = vsel %vm4409_vm15, %v6213_v61, 0.0 }
 0x5b8   :  { %v6298_v34 = vadd.f32 %v6297_v41, %v6296_v53  ;;  %v14434_v41 = vld [vmem:[%s14839_s3 + $0x178] sm:$0xff] }
 0x5b9   :  { %v6215_v35 = vmul.f32 %v14434_v41, %v14434_v41  ;;  %v6309_v51 = vsel %vm4409_vm15, %v6214_v23, 0.0 }
 0x5ba   :  { %v6300_v21 = vadd.f32 %v6299_v8, %v6298_v34  ;;  %v14442_v8 = vld [vmem:[%s14839_s3 + $0x180] sm:$0xff] }
 0x5bb   :  { %15674 = vst [vmem:[#allocation81_spill] sm:$0xff] %v14442_v8  ;;  %v6216_v26 = vmul.f32 %v14442_v8, %v14442_v8 }
 0x5bc   :  { %v6302_v53 = vadd.f32 %v6301_v55, %v6300_v21  ;;  %v14450_v55 = vld [vmem:[%s14839_s3 + $0x188] sm:$0xff] }
 0x5bd   :  { %v6313_v61 = vsel %vm4409_vm15, %v6216_v26, 0.0  ;;  %v6079_v26 = vsel %vm5516_vm5, %v14331_v47, -inf }
 0x5be   :  { %v6304_v34 = vadd.f32 %v6303_v39, %v6302_v53  ;;  %v6217_v39 = vmul.f32 %v14450_v55, %v14450_v55  ;;  %v6311_v53 = vsel %vm4409_vm15, %v6215_v35, 0.0 }
 0x5c0   :  { %v6306_v21 = vadd.f32 %v6305_v43, %v6304_v34  ;;  %v6315_v50 = vsel %vm4409_vm15, %v6217_v39, 0.0 }
 0x5c2   :  { %v6308_v17 = vadd.f32 %v6307_v36, %v6306_v21  ;;  %v6049_v21 = vadd.f32 %v14309_v24, %v14181_v25 }
 0x5c4   :  { %v6310_v40 = vadd.f32 %v6309_v51, %v6308_v17 }
 0x5c6   :  { %v6312_v2 = vadd.f32 %v6311_v53, %v6310_v40  ;;  %v6072_v40 = vsel %vm5516_vm5, %v6049_v21, -inf }
 0x5c8   :  { %v6314_v31 = vadd.f32 %v6313_v61, %v6312_v2 }
 0x5ca   :  { %v6316_v11 = vadd.f32 %v6315_v50, %v6314_v31 }
 0x5cc   :  { %v6317_v43 = vrot.slane %v6316_v11, 4 }
 0x5ce   :  { %v6318_v34 = vadd.f32 %v6317_v43, %v6316_v11  ;;  %v6167_v11 = vld [vmem:[%s14842_s6 + $0x4] sm:$0x1] }
 0x5d0   :  { %v6319_v6 = vrot.slane %v6318_v34, 2 }
 0x5d2   :  { %v6320_v8 = vadd.f32 %v6319_v6, %v6318_v34  ;;  %v7205_v6 = vld [vmem:[%s14842_s6 + $0x3] ss:$0 sm:$0xff] }
 0x5d3   :  { %v15676_v34 = vld [vmem:[#allocation5_spill] sm:$0xff] }
 0x5d4   :  { %v6321_v54 = vrot.slane %v6320_v8, 1 }
 0x5d6   :  { %v6322_v23 = vadd.f32 %v6321_v54, %v6320_v8 }
 0x5d8   :  { %v6323_v36 = vmax.f32 %v6322_v23, 1e-12 }
 0x5da   :  { %8867 = vrsqrt.f32 %v6323_v36 }
 0x5dd   :  { %v6064_v35 = vpop.f32.mrf.mxu1 }
 0x5de   :  { %v6065_v51 = vadd.f32 %v6064_v35, %v14257_v15  ;;  %v15675_v15 = vmax.f32 %v14359_v58, %v14362_v56 }
 0x5df   :  { %v6066_v17 = vpop.f32.mrf.mxu1 }
 0x5e0   :  { %v6075_v2 = vsel %vm5516_vm5, %v6065_v51, -inf }
 0x5e1   :  { %v6076_v50 = vmax.f32 %v6072_v40, %v6075_v2  ;;  %v6067_v31 = vpop.f32.mrf.mxu1 }
 0x5e2   :  { %v6068_v25 = vadd.f32 %v6067_v31, %v14277_v45  ;;  %v15677_v45 = vmax.f32 %v14384_v33, %v14387_v62 }
 0x5e3   :  { %v6077_v54 = vmax.f32 %v15675_v15, %v6076_v50  ;;  %v6069_v8 = vpop.f32.mrf.mxu1 }
 0x5e4   :  { %v6082_v39 = vsel %vm5516_vm5, %v6068_v25, -inf  ;;  %v15680_v8 = vld [vmem:[#allocation77_spill] sm:$0xff] }
 0x5e5   :  { %v6090_v61 = vadd.f32 %v7205_v6, %v6077_v54  ;;  %v6083_v43 = vmax.f32 %v6079_v26, %v6082_v39 }
 0x5e7   :  { %v8868_v24 = vpop.eup %8867  ;;  %v14481_v36 = vmax.f32 %v6090_v61, 0.0  ;;  %v6084_v21 = vmax.f32 %v15677_v45, %v6083_v43  ;;  %v15683_v43 = vld [vmem:[#allocation72_spill] sm:$0xff]  ;;  %v15684_v45 = vld [vmem:[#allocation71_spill] sm:$0xff] }
 0x5e8   :  { %v6325_v53 = vmul.f32 %v8868_v24, %v6167_v11  ;;  %v15678_v24 = vld [vmem:[#allocation80_spill] sm:$0xff] }
 0x5e9   :  { %v6091_v56 = vadd.f32 %v7205_v6, %v6084_v21  ;;  %v6099_v35 = vrot.slane %v14481_v36, 4  ;;  %v6095_v51 = vrot.slane %v14481_v36, 2  ;;  %v6103_v62 = vrot.slane %v14481_v36, 6 }
 0x5ea   :  { %v14479_v23 = vrot.slane %v6325_v53, %v15676_v34  ;;  %v15682_v53 = vld [vmem:[#allocation74_spill] sm:$0xff] }
 0x5eb   :  { %6100 = vrot.lane.b32.xlu0 %v6099_v35, %s9020_s27  ;;  %6096 = vrot.lane.b32.xlu1 %v6095_v51, %s9021_s2  ;;  %v15687_v51 = vld [vmem:[#allocation68_spill] sm:$0xff] }
 0x5ec   :  { %v6361_v58 = vmul.f32 %v14479_v23, %v14282_v20  ;;  %v6345_v47 = vmul.f32 %v14479_v23, %v14132_v57  ;;  %v6360_v17 = vmul.f32 %v14479_v23, %v14270_v63  ;;  %v6344_v40 = vmul.f32 %v14479_v23, %v14124_v30 }
 0x5ed   :  { %v6359_v57 = vmul.f32 %v14479_v23, %v14262_v0  ;;  %v6093_v20 = vmax.f32 %v6091_v56, 0.0  ;;  %v6343_v33 = vmul.f32 %v14479_v23, %v14119_v14  ;;  %v6358_v63 = vmul.f32 %v14479_v23, %v14251_v3  ;;  %v15686_v56 = vld [vmem:[#allocation33_spill] sm:$0xff] }
 0x5ee   :  { %7466 = vmatprep.subr.mxu1 %v6361_v58  ;;  %v6342_v30 = vmul.f32 %v14479_v23, %v14111_v13  ;;  %v6357_v0 = vmul.f32 %v14479_v23, %v14243_v49  ;;  %v6341_v2 = vmul.f32 %v14479_v23, %v14103_v32  ;;  %v6356_v14 = vmul.f32 %v14479_v23, %v14232_v22  ;;  %v15685_v58 = vld [vmem:[#allocation69_spill] sm:$0xff] }
 0x5ef   :  { %7467 = vmatpush3.msra.mxu1 %v6345_v47  ;;  %6108 = vrot.lane.b32.xlu0 %v6093_v20, %s9022_s30  ;;  %v6340_v3 = vmul.f32 %v14479_v23, %v14093_v59  ;;  %v6355_v13 = vmul.f32 %v14479_v23, %v14224_v38  ;;  %v6339_v49 = vmul.f32 %v14479_v23, %v14085_v7  ;;  %v15689_v20 = vld [vmem:[#allocation31_spill] sm:$0xff] }
 0x5f0   :  { %7468 = vmatprep.subr.mxu1 %v6360_v17  ;;  %6104 = vrot.lane.b32.xlu1 %v6103_v62, %s9023_s20  ;;  %v6354_v32 = vmul.f32 %v14479_v23, %v14213_v16  ;;  %v6338_v22 = vmul.f32 %v14479_v23, %v14080_v18  ;;  %v6353_v59 = vmul.f32 %v14479_v23, %v14205_v48 }
 0x5f1   :  { %7469 = vmatpush3.msra.mxu1 %v6344_v40  ;;  %v6337_v38 = vmul.f32 %v14479_v23, %v14075_v44  ;;  %v6352_v7 = vmul.f32 %v14479_v23, %v14194_v1  ;;  %v6336_v16 = vmul.f32 %v14479_v23, %v14067_v19  ;;  %v6351_v18 = vmul.f32 %v14479_v23, %v14186_v5  ;;  %v15688_v40 = vld [vmem:[#allocation32_spill] sm:$0xff] }
 0x5f2   :  { %7470 = vmatprep.subr.mxu1 %v6359_v57  ;;  %v6335_v48 = vmul.f32 %v14479_v23, %v14059_v4  ;;  %v6350_v44 = vmul.f32 %v14479_v23, %v14175_v10  ;;  %v6334_v1 = vmul.f32 %v14479_v23, %v14051_v27  ;;  %v6349_v19 = vmul.f32 %v14479_v23, %v14167_v46 }
 0x5f3   :  { %7471 = vmatpush3.msra.mxu1 %v6343_v33  ;;  %v6333_v5 = vmul.f32 %v14479_v23, %v14043_v60  ;;  %v6348_v4 = vmul.f32 %v14479_v23, %v14158_v29  ;;  %v6332_v10 = vmul.f32 %v14479_v23, %v14034_v42  ;;  %v6347_v27 = vmul.f32 %v14479_v23, %v14150_v12  ;;  %v15690_v33 = vld [vmem:[#allocation66_spill] sm:$0xff] }
 0x5f4   :  { %7472 = vmatprep.subr.mxu1 %v6358_v63  ;;  %v6331_v46 = vmul.f32 %v14479_v23, %v14025_v37  ;;  %v6346_v60 = vmul.f32 %v14479_v23, %v14140_v28  ;;  %v6330_v29 = vmul.f32 %v14479_v23, %v14020_v52  ;;  %v9024_v42 = vmov 0.0  }
 0x5f5   :  { %7473 = vmatpush3.msra.mxu1 %v6342_v30  ;;  %v6377_v11 = vmul.f32 %v14479_v23, %v14434_v41  ;;  %v6376_v6 = vmul.f32 %v14479_v23, %v14426_v9  ;;  %v6375_v15 = vmul.f32 %v14479_v23, %v15678_v24  ;;  %v15679_v41 = vld [vmem:[#allocation78_spill] sm:$0xff]  ;;  %v6373_v26 = vmul.f32 %v14479_v23, %v15680_v8  ;;  %v15681_v9 = vld [vmem:[#allocation75_spill] sm:$0xff] }
 0x5f6   :  { %7474 = vmatprep.subr.mxu1 %v6357_v0  ;;  %v6374_v54 = vmul.f32 %v14479_v23, %v15679_v41  ;;  %v6372_v39 = vmul.f32 %v14479_v23, %v15681_v9  ;;  %v6371_v61 = vmul.f32 %v14479_v23, %v15682_v53  ;;  %v6369_v21 = vmul.f32 %v14479_v23, %v15684_v45  ;;  %v15691_v30 = vld [vmem:[#allocation30_spill] sm:$0xff]  ;;  %v6540_v53 = vld [vmem:[%s14840_s4 + $0x58] sm:$0xff] }
 0x5f7   :  { %7475 = vmatpush3.msra.mxu1 %v6341_v2  ;;  %v6368_v47 = vmul.f32 %v14479_v23, %v15685_v58  ;;  %v6367_v35 = vmul.f32 %v14479_v23, %v15686_v56  ;;  %v6366_v17 = vmul.f32 %v14479_v23, %v15687_v51  ;;  %v6365_v57 = vmul.f32 %v14479_v23, %v15688_v40  ;;  %v6538_v41 = vld [vmem:[%s14840_s4 + $0x48] sm:$0xff]  ;;  %v6539_v9 = vld [vmem:[%s14840_s4 + $0x50] sm:$0xff] }
 0x5f8   :  { %7476 = vmatprep.subr.mxu1 %v6356_v14  ;;  %v6364_v62 = vmul.f32 %v14479_v23, %v15689_v20  ;;  %v6363_v63 = vmul.f32 %v14479_v23, %v15690_v33  ;;  %v6362_v0 = vmul.f32 %v14479_v23, %v15691_v30  ;;  %v6379_v2 = vmul.f32 %v14479_v23, %v14450_v55  ;;  %v15692_v14 = vld [vmem:[#allocation81_spill] sm:$0xff] }
 0x5f9   :  { %7477 = vmatpush3.msra.mxu1 %v6340_v3  ;;  %v6378_v3 = vmul.f32 %v14479_v23, %v15692_v14  ;;  %v14614_v55 = vld [vmem:[%s14840_s4] sm:$0xff]  ;;  %v6554_v8 = vmul.f32 %v6538_v41, %v6538_v41  ;;  %v6556_v58 = vmul.f32 %v6540_v53, %v6540_v53 }
 0x5fa   :  { %7478 = vmatprep.subr.mxu1 %v6355_v13 }
 0x5fb   :  { %7479 = vmatpush3.msra.mxu1 %v6339_v49  ;;  %v6545_v49 = vmul.f32 %v14614_v55, %v14614_v55  ;;  %v6578_v45 = vsel %vm6560_vm2, %v6554_v8, 0.0  ;;  %v6582_v40 = vsel %vm6560_vm2, %v6556_v58, 0.0 }
 0x5fc   :  { %7480 = vmatprep.subr.mxu1 %v6354_v32 }
 0x5fd   :  { %7481 = vmatpush3.msra.mxu1 %v6338_v22  ;;  %v14628_v22 = vld [vmem:[%s14840_s4 + $0x10] sm:$0xff] }
 0x5fe   :  { %7482 = vmatprep.subr.mxu1 %v6353_v59  ;;  %v6547_v59 = vmul.f32 %v14628_v22, %v14628_v22 }
 0x5ff   :  { %7483 = vmatpush3.msra.mxu1 %v6337_v38  ;;  %v6561_v38 = vsel %vm6560_vm2, %v6545_v49, 0.0 }
 0x600   :  { %7484 = vmatprep.subr.mxu1 %v6352_v7 }
 0x601   :  { %7485 = vmatpush3.msra.mxu1 %v6336_v16  ;;  %v14637_v16 = vld [vmem:[%s14840_s4 + $0x18] sm:$0xff] }
 0x602   :  { %7486 = vmatprep.subr.mxu1 %v6351_v18 }
 0x603   :  { %7487 = vmatpush3.msra.mxu1 %v6335_v48  ;;  %v6548_v48 = vmul.f32 %v14637_v16, %v14637_v16 }
 0x604   :  { %7488 = vmatprep.subr.mxu1 %v6350_v44  ;;  %v6564_v44 = vsel %vm6560_vm2, %v6547_v59, 0.0 }
 0x605   :  { %7489 = vmatpush3.msra.mxu1 %v6334_v1  ;;  %v14645_v1 = vld [vmem:[%s14840_s4 + $0x20] sm:$0xff] }
 0x606   :  { %7490 = vmatprep.subr.mxu1 %v6349_v19 }
 0x607   :  { %7491 = vmatpush3.msra.mxu1 %v6333_v5  ;;  %v6549_v5 = vmul.f32 %v14645_v1, %v14645_v1 }
 0x608   :  { %7492 = vmatprep.subr.mxu1 %v6348_v4  ;;  %v6566_v4 = vsel %vm6560_vm2, %v6548_v48, 0.0 }
 0x609   :  { %7493 = vmatpush3.msra.mxu1 %v6332_v10  ;;  %v14653_v10 = vld [vmem:[%s14840_s4 + $0x28] sm:$0xff] }
 0x60a   :  { %7494 = vmatprep.subr.mxu1 %v6347_v27 }
 0x60b   :  { %7495 = vmatpush3.msra.mxu1 %v6331_v46  ;;  %v6550_v46 = vmul.f32 %v14653_v10, %v14653_v10 }
 0x60c   :  { %7496 = vmatprep.subr.mxu1 %v6346_v60  ;;  %v6568_v60 = vsel %vm6560_vm2, %v6549_v5, 0.0 }
 0x60d   :  { %7497 = vmatpush3.msra.mxu1 %v6330_v29  ;;  %v14661_v29 = vld [vmem:[%s14840_s4 + $0x30] sm:$0xff] }
 0x60e   :  { %6458 = vmatprep.subr.mxu1 %v9024_v42 }
 0x65d   :  { %v6097_v12 = vpop.permute.xlu1 %6096  ;;  %v6101_v50 = vpop.permute.xlu0 %6100 }
 0x65e   :  { %v6113_v31 = vsel %vm6112_vm10, %v6097_v12, %v6101_v50  ;;  %v6111_v52 = vsel %vm5516_vm5, %v14481_v36, %v6097_v12  ;;  %v6370_v36 = vmul.f32 %v14479_v23, %v15683_v43  ;;  %vm6115_vm5 = vcmask 523264   ;;  %v14619_v23 = vld [vmem:[%s14840_s4 + $0x8] sm:$0xff] }
 0x65f   :  { %v6546_v32 = vmul.f32 %v14619_v23, %v14619_v23  ;;  %v6551_v50 = vmul.f32 %v14661_v29, %v14661_v29  ;;  %v6542_v43 = vld [vmem:[%s14840_s4 + $0x68] sm:$0xff] }
 0x661   :  { %v6109_v25 = vpop.permute.xlu0 %6108  ;;  %v6562_v7 = vsel %vm6560_vm2, %v6546_v32, 0.0 }
 0x662   :  { %v6105_v37 = vpop.permute.xlu1 %6104  ;;  %v6563_v18 = vadd.f32 %v6562_v7, %v6561_v38  ;;  %v6544_v7 = vld [vmem:[%s14842_s6 + $0x6] sm:$0x1] }
 0x663   :  { %v6114_v28 = vsel %vm4421_vm6, %v6113_v31, %v6105_v37  ;;  %v6116_v13 = vsel %vm6115_vm5, %v6105_v37, %v6109_v25  ;;  %v6570_v31 = vsel %vm6560_vm2, %v6550_v46, 0.0  ;;  %v14669_v37 = vld [vmem:[%s14840_s4 + $0x38] sm:$0xff]  ;;  %vm6720_vm6 = vcmask 80896  }
 0x664   :  { %6452 = vmatprep.mubr.f32.mxu1 %v6114_v28  ;;  %v6565_v19 = vadd.f32 %v6564_v44, %v6563_v18  ;;  %v6552_v28 = vmul.f32 %v14669_v37, %v14669_v37 }
 0x665   :  { %6453 = vmatmul.mubr.f32.vlgmr.msra.gmra.mxu1 %v6111_v52  ;;  %v6572_v52 = vsel %vm6560_vm2, %v6551_v50, 0.0 }
 0x666   :  { %6459 = vmatpush1.msra.mxu1 %v6377_v11  ;;  %7207 = vmatprep.mubr.msk.f32.mxu1 %vm6385_vm1, %v6109_v25  ;;  %v6567_v27 = vadd.f32 %v6566_v4, %v6565_v19 }
 0x667   :  { %6460 = vmatprep.subr.mxu1 %v9024_v42 }
 0x668   :  { %6461 = vmatpush1.msra.mxu1 %v6376_v6  ;;  %v6569_v12 = vadd.f32 %v6568_v60, %v6567_v27  ;;  %v6537_v6 = vld [vmem:[%s14840_s4 + $0x40] sm:$0xff] }
 0x669   :  { %6462 = vmatprep.subr.mxu1 %v9024_v42  ;;  %v6553_v24 = vmul.f32 %v6537_v6, %v6537_v6 }
 0x66a   :  { %6463 = vmatpush1.msra.mxu1 %v6375_v15  ;;  %v6571_v11 = vadd.f32 %v6570_v31, %v6569_v12  ;;  %v6574_v15 = vsel %vm6560_vm2, %v6552_v28, 0.0  ;;  %v14722_v28 = vld [vmem:[%s14841_s5] sm:$0xff] }
 0x66b   :  { %6464 = vmatprep.subr.mxu1 %v9024_v42 }
 0x66c   :  { %6465 = vmatpush1.msra.mxu1 %v6374_v54  ;;  %v6573_v25 = vadd.f32 %v6572_v52, %v6571_v11  ;;  %v14727_v52 = vld [vmem:[%s14841_s5 + $0x8] sm:$0xff] }
 0x66d   :  { %6466 = vmatprep.subr.mxu1 %v9024_v42 }
 0x66e   :  { %6467 = vmatpush1.msra.mxu1 %v6373_v26  ;;  %v6575_v54 = vadd.f32 %v6574_v15, %v6573_v25  ;;  %v6576_v26 = vsel %vm6560_vm2, %v6553_v24, 0.0  ;;  %v14740_v25 = vld [vmem:[%s14841_s5 + $0x10] sm:$0xff] }
 0x66f   :  { %6468 = vmatprep.subr.mxu1 %v9024_v42  ;;  %v6711_v24 = vmul.f32 %v14740_v25, %v14740_v25 }
 0x670   :  { %6469 = vmatpush1.msra.mxu1 %v6372_v39  ;;  %v6577_v39 = vadd.f32 %v6576_v26, %v6575_v54  ;;  %v14753_v54 = vld [vmem:[%s14841_s5 + $0x18] sm:$0xff] }
 0x671   :  { %6470 = vmatprep.subr.mxu1 %v9024_v42  ;;  %v6712_v26 = vmul.f32 %v14753_v54, %v14753_v54 }
 0x672   :  { %6471 = vmatpush1.msra.mxu1 %v6371_v61  ;;  %v6541_v61 = vld [vmem:[%s14840_s4 + $0x60] sm:$0xff]  ;;  %v6579_v56 = vadd.f32 %v6578_v45, %v6577_v39 }
 0x673   :  { %6472 = vmatprep.subr.mxu1 %v9024_v42 }
 0x674   :  { %6473 = vmatpush1.msra.mxu1 %v6370_v36  ;;  %v6555_v36 = vmul.f32 %v6539_v9, %v6539_v9 }
 0x675   :  { %6474 = vmatprep.subr.mxu1 %v9024_v42 }
 0x676   :  { %6475 = vmatpush1.msra.mxu1 %v6369_v21  ;;  %v6543_v21 = vld [vmem:[%s14840_s4 + $0x70] sm:$0xff]  ;;  %v6580_v51 = vsel %vm6560_vm2, %v6555_v36, 0.0 }
 0x677   :  { %6476 = vmatprep.subr.mxu1 %v9024_v42 }
 0x678   :  { %6477 = vmatpush1.msra.mxu1 %v6368_v47  ;;  %v6557_v47 = vmul.f32 %v6541_v61, %v6541_v61 }
 0x679   :  { %6478 = vmatprep.subr.mxu1 %v9024_v42 }
 0x67a   :  { %6479 = vmatpush1.msra.mxu1 %v6367_v35  ;;  %v6558_v35 = vmul.f32 %v6542_v43, %v6542_v43  ;;  %v6584_v20 = vsel %vm6560_vm2, %v6557_v47, 0.0 }
 0x67b   :  { %6480 = vmatprep.subr.mxu1 %v9024_v42 }
 0x67c   :  { %6481 = vmatpush1.msra.mxu1 %v6366_v17  ;;  %v6581_v17 = vadd.f32 %v6580_v51, %v6579_v56  ;;  %v6586_v33 = vsel %vm6560_vm2, %v6558_v35, 0.0  ;;  %v6704_v35 = vld [vmem:[%s14841_s5 + $0x38] sm:$0xff] }
 0x67d   :  { %6482 = vmatprep.subr.mxu1 %v9024_v42 }
 0x67e   :  { %6483 = vmatpush1.msra.mxu1 %v6365_v57  ;;  %v6559_v57 = vmul.f32 %v6543_v21, %v6543_v21 }
 0x67f   :  { %6484 = vmatprep.subr.mxu1 %v9024_v42 }
 0x680   :  { %6485 = vmatpush1.msra.mxu1 %v6364_v62  ;;  %v6583_v62 = vadd.f32 %v6582_v40, %v6581_v17  ;;  %v6588_v30 = vsel %vm6560_vm2, %v6559_v57, 0.0  ;;  %v6716_v17 = vmul.f32 %v6704_v35, %v6704_v35  ;;  %v6705_v57 = vld [vmem:[%s14841_s5 + $0x40] sm:$0xff] }
 0x681   :  { %6486 = vmatprep.subr.mxu1 %v9024_v42 }
 0x682   :  { %6487 = vmatpush1.msra.mxu1 %v6363_v63  ;;  %v6585_v63 = vadd.f32 %v6584_v20, %v6583_v62  ;;  %v6717_v62 = vmul.f32 %v6705_v57, %v6705_v57 }
 0x683   :  { %6488 = vmatprep.subr.mxu1 %v9024_v42 }
 0x684   :  { %6489 = vmatpush1.msra.mxu1 %v6362_v0  ;;  %v6587_v0 = vadd.f32 %v6586_v33, %v6585_v63  ;;  %v6734_v33 = vsel %vm6720_vm6, %v6716_v17, 0.0  ;;  %v6706_v63 = vld [vmem:[%s14841_s5 + $0x48] sm:$0xff] }
 0x685   :  { %6518 = vmatprep.subr.mxu1 %v9024_v42 }
 0x686   :  { %6519 = vmatpush2.msra.mxu1 %v6379_v2  ;;  %v6589_v2 = vadd.f32 %v6588_v30, %v6587_v0  ;;  %v6718_v0 = vmul.f32 %v6706_v63, %v6706_v63 }
 0x687   :  { %6520 = vmatprep.subr.mxu1 %v9024_v42 }
 0x688   :  { %6521 = vmatpush2.msra.mxu1 %v6378_v3  ;;  %v6590_v14 = vrot.slane %v6589_v2, 4 }
 0x689   :  { %6523 = vmatmul.mubr.f32.vlgmr.msra.gmra.mxu1 %v6116_v13  ;;  %7875 = vmatprep.subr.mxu1 %v9024_v42 }
 0x68a   :  { %v6591_v3 = vadd.f32 %v6590_v14, %v6589_v2  ;;  %7905 = vmatprep.mubr.msk.f32.mxu1 %vm9025_vm3, %v9024_v42  ;;  %v6736_v2 = vsel %vm6720_vm6, %v6717_v62, 0.0  ;;  %v6707_v14 = vld [vmem:[%s14841_s5 + $0x50] sm:$0xf] }
 0x68c   :  { %v6592_v13 = vrot.slane %v6591_v3, 2 }
 0x68e   :  { %v6593_v49 = vadd.f32 %v6592_v13, %v6591_v3  ;;  %v6719_v13 = vmul.f32 %v6707_v14, %v6707_v14 }
 0x690   :  { %v6594_v32 = vrot.slane %v6593_v49, 1 }
 0x692   :  { %v6595_v59 = vadd.f32 %v6594_v32, %v6593_v49  ;;  %v6738_v49 = vsel %vm6720_vm6, %v6718_v0, 0.0 }
 0x694   :  { %v6596_v38 = vmax.f32 %v6595_v59, 1e-12  ;;  %v6741_v59 = vsel %vm6740_vm7, %v6719_v13, 0.0 }
 0x696   :  { %8869 = vrsqrt.f32 %v6596_v38 }
 0x6a3   :  { %v8870_v18 = vpop.eup %8869 }
 0x6a4   :  { %v6598_v48 = vmul.f32 %v8870_v18, %v6544_v7 }
 0x6a6   :  { %v6602_v44 = vrot.slane %v6598_v48, %v15676_v34 }
 0x6a8   :  { %v6617_v19 = vmul.f32 %v6602_v44, %v6543_v21  ;;  %v6616_v5 = vmul.f32 %v6602_v44, %v6542_v43  ;;  %v6615_v4 = vmul.f32 %v6602_v44, %v6541_v61  ;;  %v6614_v27 = vmul.f32 %v6602_v44, %v6540_v53  ;;  %v14774_v61 = vld [vmem:[%s14841_s5 + $0x28] sm:$0xff]  ;;  %v6703_v21 = vld [vmem:[%s14841_s5 + $0x30] sm:$0xff] }
 0x6a9   :  { %v6613_v46 = vmul.f32 %v6602_v44, %v6539_v9  ;;  %v6612_v60 = vmul.f32 %v6602_v44, %v6538_v41  ;;  %v6611_v12 = vmul.f32 %v6602_v44, %v6537_v6  ;;  %v6610_v50 = vmul.f32 %v6602_v44, %v14669_v37 }
 0x6aa   :  { %7876 = vmatpush3.msra.mxu1 %v6617_v19  ;;  %v6609_v31 = vmul.f32 %v6602_v44, %v14661_v29  ;;  %v6608_v11 = vmul.f32 %v6602_v44, %v14653_v10  ;;  %v6607_v29 = vmul.f32 %v6602_v44, %v14645_v1  ;;  %v6709_v10 = vmul.f32 %v14722_v28, %v14722_v28 }
 0x6ab   :  { %7877 = vmatprep.subr.mxu1 %v9024_v42  ;;  %v6710_v37 = vmul.f32 %v14727_v52, %v14727_v52  ;;  %v6606_v6 = vmul.f32 %v6602_v44, %v14637_v16  ;;  %v6605_v1 = vmul.f32 %v6602_v44, %v14628_v22  ;;  %v6604_v41 = vmul.f32 %v6602_v44, %v14619_v23  ;;  %v14764_v23 = vld [vmem:[%s14841_s5 + $0x20] sm:$0xff] }
 0x6ac   :  { %7878 = vmatpush3.msra.mxu1 %v6616_v5  ;;  %v6721_v15 = vsel %vm6720_vm6, %v6709_v10, 0.0  ;;  %v6603_v22 = vmul.f32 %v6602_v44, %v14614_v55  ;;  %v6724_v9 = vsel %vm6720_vm6, %v6711_v24, 0.0  ;;  %v6713_v55 = vmul.f32 %v14764_v23, %v14764_v23 }
 0x6ad   :  { %7879 = vmatprep.subr.mxu1 %v9024_v42  ;;  %v6722_v16 = vsel %vm6720_vm6, %v6710_v37, 0.0  ;;  %v6726_v53 = vsel %vm6720_vm6, %v6712_v26, 0.0  ;;  %v6714_v36 = vmul.f32 %v14774_v61, %v14774_v61  ;;  %v6715_v47 = vmul.f32 %v6703_v21, %v6703_v21 }
 0x6ae   :  { %7880 = vmatpush3.msra.mxu1 %v6615_v4  ;;  %v6723_v8 = vadd.f32 %v6722_v16, %v6721_v15  ;;  %v6728_v45 = vsel %vm6720_vm6, %v6713_v55, 0.0 }
 0x6af   :  { %7881 = vmatprep.subr.mxu1 %v9024_v42  ;;  %v6730_v56 = vsel %vm6720_vm6, %v6714_v36, 0.0  ;;  %v6732_v40 = vsel %vm6720_vm6, %v6715_v47, 0.0 }
 0x6b0   :  { %7882 = vmatpush3.msra.mxu1 %v6614_v27  ;;  %v6725_v39 = vadd.f32 %v6724_v9, %v6723_v8 }
 0x6b1   :  { %7883 = vmatprep.subr.mxu1 %v9024_v42 }
 0x6b2   :  { %7884 = vmatpush3.msra.mxu1 %v6613_v46  ;;  %v6727_v43 = vadd.f32 %v6726_v53, %v6725_v39 }
 0x6b3   :  { %7885 = vmatprep.subr.mxu1 %v9024_v42 }
 0x6b4   :  { %7886 = vmatpush3.msra.mxu1 %v6612_v60  ;;  %v6729_v58 = vadd.f32 %v6728_v45, %v6727_v43  ;;  %v6708_v60 = vld [vmem:[%s14842_s6 + $0x8] sm:$0x1] }
 0x6b5   :  { %7887 = vmatprep.subr.mxu1 %v9024_v42 }
 0x6b6   :  { %7888 = vmatpush3.msra.mxu1 %v6611_v12  ;;  %v6731_v51 = vadd.f32 %v6730_v56, %v6729_v58 }
 0x6b7   :  { %7889 = vmatprep.subr.mxu1 %v9024_v42 }
 0x6b8   :  { %7890 = vmatpush3.msra.mxu1 %v6610_v50  ;;  %v6733_v20 = vadd.f32 %v6732_v40, %v6731_v51 }
 0x6b9   :  { %7891 = vmatprep.subr.mxu1 %v9024_v42 }
 0x6ba   :  { %7892 = vmatpush3.msra.mxu1 %v6609_v31  ;;  %v6735_v30 = vadd.f32 %v6734_v33, %v6733_v20 }
 0x6bb   :  { %7893 = vmatprep.subr.mxu1 %v9024_v42 }
 0x6bc   :  { %7894 = vmatpush3.msra.mxu1 %v6608_v11  ;;  %v6737_v3 = vadd.f32 %v6736_v2, %v6735_v30  ;;  %v7206_v11 = vld [vmem:[%s14842_s6 + $0x5] ss:$0 sm:$0xff] }
 0x6bd   :  { %7895 = vmatprep.subr.mxu1 %v9024_v42 }
 0x6be   :  { %7896 = vmatpush3.msra.mxu1 %v6607_v29  ;;  %v6739_v32 = vadd.f32 %v6738_v49, %v6737_v3 }
 0x6bf   :  { %7897 = vmatprep.subr.mxu1 %v9024_v42 }
 0x6c0   :  { %7898 = vmatpush3.msra.mxu1 %v6606_v6  ;;  %v6742_v38 = vadd.f32 %v6741_v59, %v6739_v32 }
 0x6c1   :  { %7899 = vmatprep.subr.mxu1 %v9024_v42 }
 0x6c2   :  { %7900 = vmatpush3.msra.mxu1 %v6605_v1  ;;  %v6743_v7 = vrot.slane %v6742_v38, 4 }
 0x6c3   :  { %7901 = vmatprep.subr.mxu1 %v9024_v42 }
 0x6c4   :  { %7902 = vmatpush3.msra.mxu1 %v6604_v41  ;;  %v6744_v18 = vadd.f32 %v6743_v7, %v6742_v38 }
 0x6c5   :  { %7903 = vmatprep.subr.mxu1 %v9024_v42 }
 0x6c6   :  { %7904 = vmatpush3.msra.mxu1 %v6603_v22  ;;  %v6745_v48 = vrot.slane %v6744_v18, 2 }
 0x6c7   :  { %7908 = vmatprep.subr.mxu1 %v9024_v42 }
 0x6c8   :  { %v6746_v44 = vadd.f32 %v6745_v48, %v6744_v18 }
 0x6ca   :  { %v6747_v19 = vrot.slane %v6746_v44, 1 }
 0x6cc   :  { %v6748_v5 = vadd.f32 %v6747_v19, %v6746_v44 }
 0x6ce   :  { %v6749_v4 = vmax.f32 %v6748_v5, 1e-12 }
 0x6d0   :  { %8871 = vrsqrt.f32 %v6749_v4 }
 0x6dd   :  { %v8872_v46 = vpop.eup %8871 }
 0x6de   :  { %v6751_v50 = vmul.f32 %v8872_v46, %v6708_v60 }
 0x6e0   :  { %v6755_v29 = vrot.slane %v6751_v50, %v15676_v34 }
 0x6e2   :  { %v6766_v24 = vmul.f32 %v6755_v29, %v6707_v14  ;;  %v6765_v16 = vmul.f32 %v6755_v29, %v6706_v63  ;;  %v6764_v41 = vmul.f32 %v6755_v29, %v6705_v57  ;;  %v6763_v22 = vmul.f32 %v6755_v29, %v6704_v35 }
 0x6e3   :  { %v6762_v34 = vmul.f32 %v6755_v29, %v6703_v21  ;;  %v6761_v8 = vmul.f32 %v6755_v29, %v14774_v61  ;;  %v6760_v26 = vmul.f32 %v6755_v29, %v14764_v23  ;;  %v6759_v9 = vmul.f32 %v6755_v29, %v14753_v54  ;;  %v7208_v54 = vld [vmem:[%s14842_s6 + $0x7] ss:$0 sm:$0xff] }
 0x6e4   :  { %v6758_v39 = vmul.f32 %v6755_v29, %v14740_v25  ;;  %v6757_v55 = vmul.f32 %v6755_v29, %v14727_v52  ;;  %v6756_v23 = vmul.f32 %v6755_v29, %v14722_v28  ;;  %v7210_v28 = vld [vmem:[%s14842_s6 + $0x9] ss:$0 sm:$0xff] }
 0x725   :  { %v7498_v27 = vpop.f32.mrf.mxu1 }
 0x727   :  { %v7499_v12 = vpop.f32.mrf.mxu1 }
 0x728   :  { %v7500_v31 = vadd.f32 %v7499_v12, %v7498_v27 }
 0x72a   :  { %v6455_v10 = vadd.f32 %v7500_v31, %v7206_v11 }
 0x749   :  { %v6524_v37 = vpop.f32.mrf.mxu1 }
 0x74a   :  { %v6525_v6 = vadd.f32 %v6524_v37, %v6455_v10 }
 0x74b   :  { %v6526_v1 = vpop.f32.mrf.mxu1 }
 0x74c   :  { %v6528_v15 = vmax.f32 %v6525_v6, 0.0 }
 0x74e   :  { %7906 = vmatmul.mubr.msk.f32.vlgmr.msra.gmra.mxu1 %vm4409_vm15, %v6528_v15 }
 0x74f   :  { %7909 = vmatpush3.msk.msra.mxu1 %vm4941_vm12, %v6766_v24  ;;  %7930 = vmatprep.mubr.msk.f32.mxu1 %vm9025_vm3, %v9024_v42  ;;  %vm6848_vm12 = vcmask 74752  }
 0x750   :  { %7910 = vmatprep.subr.mxu1 %v9024_v42 }
 0x751   :  { %7911 = vmatpush3.msra.mxu1 %v6765_v16 }
 0x752   :  { %7912 = vmatprep.subr.mxu1 %v9024_v42 }
 0x753   :  { %7913 = vmatpush3.msra.mxu1 %v6764_v41 }
 0x754   :  { %7914 = vmatprep.subr.mxu1 %v9024_v42 }
 0x755   :  { %7915 = vmatpush3.msra.mxu1 %v6763_v22 }
 0x756   :  { %7916 = vmatprep.subr.mxu1 %v9024_v42 }
 0x757   :  { %7917 = vmatpush3.msra.mxu1 %v6762_v34 }
 0x758   :  { %7918 = vmatprep.subr.mxu1 %v9024_v42 }
 0x759   :  { %7919 = vmatpush3.msra.mxu1 %v6761_v8 }
 0x75a   :  { %7920 = vmatprep.subr.mxu1 %v9024_v42 }
 0x75b   :  { %7921 = vmatpush3.msra.mxu1 %v6760_v26 }
 0x75c   :  { %7922 = vmatprep.subr.mxu1 %v9024_v42 }
 0x75d   :  { %7923 = vmatpush3.msra.mxu1 %v6759_v9 }
 0x75e   :  { %7924 = vmatprep.subr.mxu1 %v9024_v42 }
 0x75f   :  { %7925 = vmatpush3.msra.mxu1 %v6758_v39 }
 0x760   :  { %7926 = vmatprep.subr.mxu1 %v9024_v42 }
 0x761   :  { %7927 = vmatpush3.msra.mxu1 %v6757_v55 }
 0x762   :  { %7928 = vmatprep.subr.mxu1 %v9024_v42 }
 0x763   :  { %7929 = vmatpush3.msra.mxu1 %v6756_v23 }
 0x80e   :  { %v6692_v53 = vpop.f32.mrf.mxu1 }
 0x80f   :  { %v6693_v61 = vadd.f32 %v7208_v54, %v6692_v53 }
 0x810   :  { %v7907_v43 = vpop.f32.mrf.mxu1 }
 0x811   :  { %v6696_v36 = vmax.f32 %v6693_v61, 0.0 }
 0x813   :  { %7931 = vmatmul.mubr.msk.f32.vlgmr.msra.gmra.mxu1 %vm6560_vm2, %v6696_v36 }
 0x8d3   :  { %v6844_v52 = vpop.f32.mrf.mxu1 }
 0x8d4   :  { %v6845_v42 = vadd.f32 %v7210_v28, %v6844_v52 }
 0x8d5   :  { %v7932_v25 = vpop.f32.mrf.mxu1 }
 0x8d6   :  { %6849 = vst.msk [vmem:[#allocation2] sm:$0x3] %vm6848_vm12, %v6845_v42 }
 0x8d7   :  { %8979 = shalt.err (!%p8976_p4)
}
 0x8d8   :  { %6859 = dma.vmem_to_hbm [thread:$0]  %s6857_s13, 32, %s14843_s7, [#allocation3]  }
 0x8d9   :  { %8988 = dma.done.wait [#allocation3], 32  }
 0x8da   :  { %8989 = vsyncadd [#allocation3], 4294967264 }
 0x8db   :  { %6863 = vsyncpa [#allocation3], 1 }

</bundles_post_ra>
